<compile_context>
chip_gen: v5e
topology: v5e:2x2
jax: 0.10.0
libtpu: 0.0.40
codegen_flags: <defaults>
</compile_context>

<pallas_src>
import math
import numpy as np
import jax
import jax.numpy as jnp
from jax.experimental import pallas as pl
from jax.experimental.pallas import tpu as pltpu

# ---------------- configuration (small synthetic sizes) ----------------
EMB = 32            # emb_dim
HW = 4              # hw (pre-shuffle spatial)
CUR = 64            # cur_stg
C4 = CUR // 4       # channels after pixel shuffle = 16
H = W = 2 * HW      # spatial after pixel shuffle = 8
N_TOK = H * W       # 64 tokens per batch
M_PRM = EMB // 2    # performer features (kernel_ratio = 0.5)
CA_RATIO = 4        # CBAM channel-attention reduction (4 for small C)
CR = C4 // CA_RATIO
LN_EPS = 1e-5
BN_EPS = 1e-5
PERF_EPS = 1e-8
MXU_DTYPE = jnp.bfloat16   # MXU operand dtype (f32 accumulate)

# --- rows of the packed (18,128) small-vector constant slab ---
ROW_SC1, ROW_SH1 = 0, 1          # cbr1 folded BN scale/shift          (16)
ROW_SC23, ROW_SH23 = 2, 3        # merged cbr2|cbr3 scale/shift        (32)
ROW_SC4, ROW_SH4 = 4, 5          # cbr4                                (16)
ROW_SC5, ROW_SH5 = 6, 7          # cbr5                                (16)
ROW_CF_B1, ROW_CF_B2 = 8, 9      # concatFuse biases                   (32)
ROW_LN1G, ROW_LN1B = 10, 11      # LayerNorm 1                         (32)
ROW_BKQV = 12                    # fused kqv bias                      (96)
ROW_BPROJ = 13                   # proj bias                           (32)
ROW_LN2G, ROW_LN2B = 14, 15      # LayerNorm 2                         (32)
ROW_BM1, ROW_BM2 = 16, 17        # mlp biases                          (32)
N_VEC_ROWS = 18


def _dot(a, b):
    """MXU matmul: bf16 operands, f32 accumulation."""
    return jnp.dot(a.astype(MXU_DTYPE), b.astype(MXU_DTYPE),
                   preferred_element_type=jnp.float32)


# ------------- host-side constants for the roll-based 3x3 convs -------------
def _build_3x3_shift_mask(h, w):
    """Roll shifts (jnp.roll semantics) + validity masks for each 3x3 tap."""
    n = h * w
    shifts = []
    mask = np.zeros((n, 9), np.float32)
    for kh in range(3):
        for kw in range(3):
            tap = kh * 3 + kw
            d = (kh - 1) * w + (kw - 1)      # out[p] needs in[p + d]
            shifts.append((-d) % n)          # roll(x, s)[p] = x[(p - s) % n]
            for i in range(h):
                for j in range(w):
                    if 0 <= i + kh - 1 < h and 0 <= j + kw - 1 < w:
                        mask[i * w + j, tap] = 1.0
    return shifts, mask


def _sa7x7_tap_mats(h, w):
    """P[tap, p_out, q_in] = 1 iff input q feeds output p under 7x7 tap (pad=3)."""
    n = h * w
    p = np.zeros((49, n, n), np.float32)
    for kh in range(7):
        for kw in range(7):
            for i in range(h):
                for j in range(w):
                    ii, jj = i + kh - 3, j + kw - 3
                    if 0 <= ii < h and 0 <= jj < w:
                        p[kh * 7 + kw, i * w + j, ii * w + jj] = 1.0
    return p


_ROLL_SHIFTS, _MASK3_NP = _build_3x3_shift_mask(H, W)
_SA_P_NP = _sa7x7_tap_mats(H, W)      # (49, 64, 64)


# =====================================================================
# The fused FEM kernel.  grid=(B,); every in-kernel array is per-batch
# with rows = N_TOK tokens (row-major h*W + w order).
# =====================================================================
def _fem_kernel(t_ref, c_ref, a_ref, sa_mm_ref, sa_mx_ref, ca_w1_ref, ca_w2_ref,
                mask3_ref, w1a_ref, w1b_ref, w23t_ref, w23c_ref, w23x_ref,
                w4_ref, w5_ref, cf_w1a_ref, cf_w1b_ref, cf_w2_ref,
                wkqv_ref, wprm_ref, wproj_ref, wm1_ref, wm2_ref, vecs_ref,
                o_ref):
    N = N_TOK
    C = C4
    E = EMB
    m = M_PRM

    t = t_ref[...]                      # (N, C) f32
    c = c_ref[...]                      # (N, C) f32
    a = a_ref[...]                      # (N, E) f32
    mask3 = mask3_ref[...]              # (N, 9) f32
    vecs = vecs_ref[...]                # (18, 128) f32

    def vrow(r, width):                 # one packed constant row -> (1, width)
        return vecs[r:r + 1, 0:width]

    # ---- SpatialAttention(t): 7x7 conv over [mean,max] maps folded into two
    #      per-batch (N,N) bf16 operators -> 2 small MXU matmuls ----
    mean_t = jnp.mean(t, axis=-1, keepdims=True)                 # (N, 1)
    max_t = jnp.max(t, axis=-1, keepdims=True)                   # (N, 1)
    sa_col = jax.nn.sigmoid(_dot(sa_mm_ref[...], mean_t)
                            + _dot(sa_mx_ref[...], max_t))       # (N, 1)

    # ---- ChannelAttention(c): CBAM shared MLP on avg/max pooled (bias-free) ----
    avg_c = jnp.mean(c, axis=0, keepdims=True)                   # (1, C)
    mxp_c = jnp.max(c, axis=0, keepdims=True)                    # (1, C)
    w1 = ca_w1_ref[...]
    w2 = ca_w2_ref[...]
    hid = (_dot(jnp.maximum(_dot(avg_c, w1), 0.0), w2)
           + _dot(jnp.maximum(_dot(mxp_c, w1), 0.0), w2))
    ca_gate = jax.nn.sigmoid(hid)                                # (1, C)

    t_x = t * ca_gate                                            # t * CA(c)
    c_x = c * sa_col                                             # c * SA(t)

    # ---- 3x3 conv (pad=1) + folded BN + ReLU:
    #      Z = x @ W_all (tap-fused, one wide MXU matmul per source), then
    #      9 XLU rolls + 0/1 boundary masks on the VPU. ----
    def conv_taps(z, cout):
        acc = None
        for tap in range(9):
            zs = z[:, tap * cout:(tap + 1) * cout]
            s = _ROLL_SHIFTS[tap]
            if s:  # non-center tap: roll tokens, zero the invalid border rows
                zs = mask3[:, tap:tap + 1] * pltpu.roll(zs, s, axis=0)
            acc = zs if acc is None else acc + zs
        return acc

    def bn_relu(y, r_scale, r_shift, cout):
        return jnp.maximum(y * vrow(r_scale, cout) + vrow(r_shift, cout), 0.0)

    # cbr1(cat[t_x, c_x])
    z1 = _dot(t_x, w1a_ref[...]) + _dot(c_x, w1b_ref[...])       # (N, 144)
    x = bn_relu(conv_taps(z1, C), ROW_SC1, ROW_SH1, C)           # (N, 16)

    # cbr2(cat[t, x]) and cbr3(cat[c, x]) merged: output = [tx | cx]
    z23 = (_dot(t, w23t_ref[...]) + _dot(c, w23c_ref[...])
           + _dot(x, w23x_ref[...]))                             # (N, 288)
    txcx = bn_relu(conv_taps(z23, 2 * C), ROW_SC23, ROW_SH23, 2 * C)  # (N, 32)

    # cbr4(cat[tx, cx])
    z4 = _dot(txcx, w4_ref[...])                                 # (N, 144)
    x2 = bn_relu(conv_taps(z4, C), ROW_SC4, ROW_SH4, C)

    # cbr5(x) -> tokens already in unfold (row-major) order
    z5 = _dot(x2, w5_ref[...])
    fe = bn_relu(conv_taps(z5, C), ROW_SC5, ROW_SH5, C)          # (N, 16)

    # ---- concatFuse: Linear(E + C -> E) + GELU + Linear(E -> E)
    #      (the channel cat folded into two partial matmuls) ----
    h = _dot(a, cf_w1a_ref[...]) + _dot(fe, cf_w1b_ref[...]) + vrow(ROW_CF_B1, E)
    # TODO(synk): torch nn.GELU is exact erf; tanh approximation used here.
    h = jax.nn.gelu(h, approximate=True)
    tok = _dot(h, cf_w2_ref[...]) + vrow(ROW_CF_B2, E)           # (N, E)

    def layer_norm(v, rg, rb):
        mu = jnp.mean(v, axis=-1, keepdims=True)
        d = v - mu
        var = jnp.mean(d * d, axis=-1, keepdims=True)
        return d * jax.lax.rsqrt(var + LN_EPS) * vrow(rg, E) + vrow(rb, E)

    # ---- Token_performer (dropout = identity in eval mode) ----
    xn = layer_norm(tok, ROW_LN1G, ROW_LN1B)
    kqv = _dot(xn, wkqv_ref[...]) + vrow(ROW_BKQV, 3 * E)        # (N, 3E)
    k = kqv[:, 0:E]
    q = kqv[:, E:2 * E]
    v = kqv[:, 2 * E:3 * E]

    inv_sqrt_m = 1.0 / math.sqrt(m)

    def prm_exp(z):
        zd = jnp.sum(z * z, axis=-1, keepdims=True) * 0.5
        return jnp.exp(_dot(z, wprm_ref[...]) - zd) * inv_sqrt_m  # (N, m)

    kp = prm_exp(k)
    qp = prm_exp(q)
    ks = jnp.sum(kp, axis=0, keepdims=True)                      # (1, m)
    D = jnp.sum(qp * ks, axis=-1, keepdims=True)                 # (N, 1)
    kptv = jax.lax.dot_general(                                  # kp^T @ v -> (m, E)
        kp.astype(MXU_DTYPE), v.astype(MXU_DTYPE),
        (((0,), (0,)), ((), ())), preferred_element_type=jnp.float32)
    y = _dot(qp, kptv) * pl.reciprocal(D + PERF_EPS, approx=True)  # (N, E)
    tok = tok + _dot(y, wproj_ref[...]) + vrow(ROW_BPROJ, E)       # residual 1

    xn2 = layer_norm(tok, ROW_LN2G, ROW_LN2B)
    hh = jax.nn.gelu(_dot(xn2, wm1_ref[...]) + vrow(ROW_BM1, E),
                     approximate=True)
    o_ref[...] = tok + _dot(hh, wm2_ref[...]) + vrow(ROW_BM2, E)   # residual 2


# =====================================================================
# FEM forward: layout glue + weight folding/packing, then one pallas_call
# with the batch on a parallel grid axis.
# =====================================================================
def fem_forward(a, b, c, p):
    """a:(B,(2hw)^2,emb)  b:(B,hw^2,cur_stg)  c:(B,cur/4,2hw,2hw) [NCHW]."""
    B = b.shape[0]
    BN = B * N_TOK

    # --- layout glue (pure reshapes/transposes; fused by XLA under jit) ---
    # PixelShuffle(2) of b.transpose(1,2).reshape(B,cur,hw,hw), then NHWC tokens.
    t_tok = b.reshape(B, HW, HW, C4, 2, 2)
    t_tok = jnp.transpose(t_tok, (0, 1, 4, 2, 5, 3)).reshape(BN, C4)
    c_tok = jnp.transpose(c, (0, 2, 3, 1)).reshape(BN, C4)
    a_tok = a.reshape(BN, EMB)

    # --- fold the 7x7 spatial-attention conv (ch0=mean, ch1=max) into two
    #     per-batch (N,N) bf16 operators (exact: the conv is linear) ---
    p49 = jnp.asarray(_SA_P_NP)
    sa_mm = jnp.einsum('t,tpq->pq', p['sa_w'][0].reshape(-1), p49).astype(MXU_DTYPE)
    sa_mx = jnp.einsum('t,tpq->pq', p['sa_w'][1].reshape(-1), p49).astype(MXU_DTYPE)

    mask3 = jnp.asarray(_MASK3_NP)                                # (N, 9) f32

    def pack_conv(w):   # torch (Co,Ci,3,3) -> (Ci, 9*Co), tap-major columns
        co, ci = w.shape[0], w.shape[1]
        return jnp.transpose(w, (1, 2, 3, 0)).reshape(ci, 9 * co)

    def merge_halves(wa, wb):   # two (Ci,9*C4) -> (Ci,9*2*C4), per-tap [wa|wb]
        ci = wa.shape[0]
        return jnp.concatenate(
            [wa.reshape(ci, 9, C4), wb.reshape(ci, 9, C4)], axis=-1
        ).reshape(ci, 9 * 2 * C4)

    w1 = pack_conv(p['cbr1_w'])                    # rows: [t_x | c_x]
    w1a = w1[:C4].astype(MXU_DTYPE)
    w1b = w1[C4:].astype(MXU_DTYPE)
    w2 = pack_conv(p['cbr2_w'])                    # rows: [t | x]
    w3 = pack_conv(p['cbr3_w'])                    # rows: [c | x]
    zeros_h = jnp.zeros((C4, 9 * C4), jnp.float32)
    w23t = merge_halves(w2[:C4], zeros_h).astype(MXU_DTYPE)
    w23c = merge_halves(zeros_h, w3[:C4]).astype(MXU_DTYPE)
    w23x = merge_halves(w2[C4:], w3[C4:]).astype(MXU_DTYPE)
    w4 = pack_conv(p['cbr4_w']).astype(MXU_DTYPE)  # rows: [tx | cx]
    w5 = pack_conv(p['cbr5_w']).astype(MXU_DTYPE)

    # --- pack all tiny bias/scale/LN vectors into one lane-dense (18,128) slab ---
    def vrow(v):
        v = v.reshape(-1).astype(jnp.float32)
        return jnp.pad(v, (0, 128 - v.shape[0]))

    vecs = jnp.stack([
        vrow(p['cbr1_scale']), vrow(p['cbr1_shift']),
        vrow(jnp.concatenate([p['cbr2_scale'], p['cbr3_scale']])),
        vrow(jnp.concatenate([p['cbr2_shift'], p['cbr3_shift']])),
        vrow(p['cbr4_scale']), vrow(p['cbr4_shift']),
        vrow(p['cbr5_scale']), vrow(p['cbr5_shift']),
        vrow(p['cf_b1']), vrow(p['cf_b2']),
        vrow(p['ln1_g']), vrow(p['ln1_b']),
        vrow(p['bkqv']),
        vrow(p['bproj']),
        vrow(p['ln2_g']), vrow(p['ln2_b']),
        vrow(p['bm1']), vrow(p['bm2']),
    ])                                             # (18, 128)

    bf = lambda xx: xx.astype(MXU_DTYPE)
    weights = [sa_mm, sa_mx, bf(p['ca_w1']), bf(p['ca_w2']), mask3,
               w1a, w1b, w23t, w23c, w23x, w4, w5,
               bf(p['cf_w1a']), bf(p['cf_w1b']), bf(p['cf_w2']),
               bf(p['wkqv']), bf(p['wprm_t']), bf(p['wproj']),
               bf(p['wm1']), bf(p['wm2']), vecs]

    act_specs = [
        pl.BlockSpec((N_TOK, C4), lambda bi: (bi, 0)),
        pl.BlockSpec((N_TOK, C4), lambda bi: (bi, 0)),
        pl.BlockSpec((N_TOK, EMB), lambda bi: (bi, 0)),
    ]
    # weights: full-array blocks with a constant index map (fetched once,
    # VMEM-resident across grid steps)
    const_specs = [pl.BlockSpec(w.shape, lambda bi, _nd=w.ndim: (0,) * _nd)
                   for w in weights]

    out = pl.pallas_call(
        _fem_kernel,
        grid=(B,),
        in_specs=act_specs + const_specs,
        out_specs=pl.BlockSpec((N_TOK, EMB), lambda bi: (bi, 0)),
        out_shape=jax.ShapeDtypeStruct((BN, EMB), jnp.float32),
        compiler_params=pltpu.CompilerParams(
            dimension_semantics=("parallel",)),
    )(t_tok, c_tok, a_tok, *weights)
    return out.reshape(B, N_TOK, EMB)


# =====================================================================
# deterministic synthetic parameters
# =====================================================================
def init_params(key):
    keys = iter(jax.random.split(key, 24))

    def nrm(shape, std=0.05):
        return jax.random.normal(next(keys), shape, jnp.float32) * std

    p = {}
    # fuse_enhance: CBAM spatial attention (Conv2d(2,1,7,pad=3,bias=False))
    p['sa_w'] = nrm((2, 7, 7), 0.1)
    # CBAM channel attention shared MLP (bias-free)
    p['ca_w1'] = nrm((C4, CR), 0.1)
    p['ca_w2'] = nrm((CR, C4), 0.1)
    bn_scale = jnp.full((C4,), 1.0 / math.sqrt(1.0 + BN_EPS), jnp.float32)
    bn_shift = jnp.zeros((C4,), jnp.float32)
    for name, cin in (('cbr1', 2 * C4), ('cbr2', 2 * C4), ('cbr3', 2 * C4),
                      ('cbr4', 2 * C4), ('cbr5', C4)):
        p[name + '_w'] = nrm((C4, cin, 3, 3), 0.05)   # torch layout (Co,Ci,kh,kw)
        p[name + '_scale'] = bn_scale                 # folded BN (eval mode)
        p[name + '_shift'] = bn_shift
    # concatFuse (Linear on cat[a, fe]: rows [a | fe] of W^T)
    p['cf_w1a'] = nrm((EMB, EMB))
    p['cf_w1b'] = nrm((C4, EMB))
    p['cf_b1'] = jnp.zeros((EMB,), jnp.float32)
    p['cf_w2'] = nrm((EMB, EMB))
    p['cf_b2'] = jnp.zeros((EMB,), jnp.float32)
    # Token_performer
    p['ln1_g'] = jnp.ones((EMB,), jnp.float32)
    p['ln1_b'] = jnp.zeros((EMB,), jnp.float32)
    p['wkqv'] = nrm((EMB, 3 * EMB))                   # fused kqv, cols [k|q|v]
    p['bkqv'] = jnp.zeros((3 * EMB,), jnp.float32)
    w_orth = jax.nn.initializers.orthogonal()(next(keys), (M_PRM, EMB),
                                              jnp.float32) * math.sqrt(M_PRM)
    p['wprm_t'] = jnp.transpose(w_orth)               # (EMB, M_PRM), frozen
    p['wproj'] = nrm((EMB, EMB))
    p['bproj'] = jnp.zeros((EMB,), jnp.float32)
    p['ln2_g'] = jnp.ones((EMB,), jnp.float32)
    p['ln2_b'] = jnp.zeros((EMB,), jnp.float32)
    p['wm1'] = nrm((EMB, EMB))
    p['bm1'] = jnp.zeros((EMB,), jnp.float32)
    p['wm2'] = nrm((EMB, EMB))
    p['bm2'] = jnp.zeros((EMB,), jnp.float32)
    return p


if __name__ == "__main__":
    key = jax.random.PRNGKey(0)
    k1, k2, k3, kp_ = jax.random.split(key, 4)
    B = 2
    a = jax.random.normal(k1, (B, N_TOK, EMB), jnp.float32)    # (B, (2hw)^2, emb)
    b = jax.random.normal(k2, (B, HW * HW, CUR), jnp.float32)  # (B, hw^2, cur_stg)
    c = jax.random.normal(k3, (B, C4, H, W), jnp.float32)      # NCHW like PyTorch
    params = init_params(kp_)

    out = jax.jit(fem_forward)(a, b, c, params)
    out = jax.block_until_ready(out)
    assert out.shape == (B, N_TOK, EMB) and out.dtype == jnp.float32
    assert bool(jnp.all(jnp.isfinite(out)))
    print("KERNEL_OK")
</pallas_src>

<mosaic_0001>
module attributes {stable_mosaic.version = 11 : i64} {
  func.func @_fem_kernel(%arg0: i32, %arg1: memref<64x16xf32, #tpu.memory_space<vmem>>, %arg2: memref<64x16xf32, #tpu.memory_space<vmem>>, %arg3: memref<64x32xf32, #tpu.memory_space<vmem>>, %arg4: memref<64x64xbf16, #tpu.memory_space<vmem>>, %arg5: memref<64x64xbf16, #tpu.memory_space<vmem>>, %arg6: memref<16x4xbf16, #tpu.memory_space<vmem>>, %arg7: memref<4x16xbf16, #tpu.memory_space<vmem>>, %arg8: memref<64x9xf32, #tpu.memory_space<vmem>>, %arg9: memref<16x144xbf16, #tpu.memory_space<vmem>>, %arg10: memref<16x144xbf16, #tpu.memory_space<vmem>>, %arg11: memref<16x288xbf16, #tpu.memory_space<vmem>>, %arg12: memref<16x288xbf16, #tpu.memory_space<vmem>>, %arg13: memref<16x288xbf16, #tpu.memory_space<vmem>>, %arg14: memref<32x144xbf16, #tpu.memory_space<vmem>>, %arg15: memref<16x144xbf16, #tpu.memory_space<vmem>>, %arg16: memref<32x32xbf16, #tpu.memory_space<vmem>>, %arg17: memref<16x32xbf16, #tpu.memory_space<vmem>>, %arg18: memref<32x32xbf16, #tpu.memory_space<vmem>>, %arg19: memref<32x96xbf16, #tpu.memory_space<vmem>>, %arg20: memref<32x16xbf16, #tpu.memory_space<vmem>>, %arg21: memref<32x32xbf16, #tpu.memory_space<vmem>>, %arg22: memref<32x32xbf16, #tpu.memory_space<vmem>>, %arg23: memref<32x32xbf16, #tpu.memory_space<vmem>>, %arg24: memref<18x128xf32, #tpu.memory_space<vmem>>, %arg25: memref<64x32xf32, #tpu.memory_space<vmem>>) attributes {dimension_semantics = [#tpu.dimension_semantics<parallel>], iteration_bounds = array<i64: 2>, scalar_prefetch = 0 : i64, scratch_operands = 0 : i64, tpu.core_type = #tpu.core_type<tc>, window_params = [{transform_indices = @transform_0, window_bounds = array<i64: 64, 16>}, {transform_indices = @transform_1, window_bounds = array<i64: 64, 16>}, {transform_indices = @transform_2, window_bounds = array<i64: 64, 32>}, {pipeline_mode = #tpu.pipeline_mode<synchronous>, transform_indices = @transform_3, window_bounds = array<i64: 64, 64>}, {pipeline_mode = #tpu.pipeline_mode<synchronous>, transform_indices = @transform_4, window_bounds = array<i64: 64, 64>}, {pipeline_mode = #tpu.pipeline_mode<synchronous>, transform_indices = @transform_5, window_bounds = array<i64: 16, 4>}, {pipeline_mode = #tpu.pipeline_mode<synchronous>, transform_indices = @transform_6, window_bounds = array<i64: 4, 16>}, {pipeline_mode = #tpu.pipeline_mode<synchronous>, transform_indices = @transform_7, window_bounds = array<i64: 64, 9>}, {pipeline_mode = #tpu.pipeline_mode<synchronous>, transform_indices = @transform_8, window_bounds = array<i64: 16, 144>}, {pipeline_mode = #tpu.pipeline_mode<synchronous>, transform_indices = @transform_9, window_bounds = array<i64: 16, 144>}, {pipeline_mode = #tpu.pipeline_mode<synchronous>, transform_indices = @transform_10, window_bounds = array<i64: 16, 288>}, {pipeline_mode = #tpu.pipeline_mode<synchronous>, transform_indices = @transform_11, window_bounds = array<i64: 16, 288>}, {pipeline_mode = #tpu.pipeline_mode<synchronous>, transform_indices = @transform_12, window_bounds = array<i64: 16, 288>}, {pipeline_mode = #tpu.pipeline_mode<synchronous>, transform_indices = @transform_13, window_bounds = array<i64: 32, 144>}, {pipeline_mode = #tpu.pipeline_mode<synchronous>, transform_indices = @transform_14, window_bounds = array<i64: 16, 144>}, {pipeline_mode = #tpu.pipeline_mode<synchronous>, transform_indices = @transform_15, window_bounds = array<i64: 32, 32>}, {pipeline_mode = #tpu.pipeline_mode<synchronous>, transform_indices = @transform_16, window_bounds = array<i64: 16, 32>}, {pipeline_mode = #tpu.pipeline_mode<synchronous>, transform_indices = @transform_17, window_bounds = array<i64: 32, 32>}, {pipeline_mode = #tpu.pipeline_mode<synchronous>, transform_indices = @transform_18, window_bounds = array<i64: 32, 96>}, {pipeline_mode = #tpu.pipeline_mode<synchronous>, transform_indices = @transform_19, window_bounds = array<i64: 32, 16>}, {pipeline_mode = #tpu.pipeline_mode<synchronous>, transform_indices = @transform_20, window_bounds = array<i64: 32, 32>}, {pipeline_mode = #tpu.pipeline_mode<synchronous>, transform_indices = @transform_21, window_bounds = array<i64: 32, 32>}, {pipeline_mode = #tpu.pipeline_mode<synchronous>, transform_indices = @transform_22, window_bounds = array<i64: 32, 32>}, {pipeline_mode = #tpu.pipeline_mode<synchronous>, transform_indices = @transform_23, window_bounds = array<i64: 18, 128>}, {transform_indices = @transform_24, window_bounds = array<i64: 64, 32>}]} {
    %c0 = arith.constant 0 : index
    %c0_0 = arith.constant 0 : index
    %0 = vector.load %arg1[%c0, %c0_0] : memref<64x16xf32, #tpu.memory_space<vmem>>, vector<64x16xf32>
    %c0_1 = arith.constant 0 : index
    %c0_2 = arith.constant 0 : index
    %1 = vector.load %arg2[%c0_1, %c0_2] : memref<64x16xf32, #tpu.memory_space<vmem>>, vector<64x16xf32>
    %c0_3 = arith.constant 0 : index
    %c0_4 = arith.constant 0 : index
    %2 = vector.load %arg3[%c0_3, %c0_4] : memref<64x32xf32, #tpu.memory_space<vmem>>, vector<64x32xf32>
    %c0_5 = arith.constant 0 : index
    %c0_6 = arith.constant 0 : index
    %3 = vector.load %arg8[%c0_5, %c0_6] : memref<64x9xf32, #tpu.memory_space<vmem>>, vector<64x9xf32>
    %c0_7 = arith.constant 0 : index
    %c0_8 = arith.constant 0 : index
    %4 = vector.load %arg24[%c0_7, %c0_8] : memref<18x128xf32, #tpu.memory_space<vmem>>, vector<18x128xf32>
    %cst = arith.constant dense<0.000000e+00> : vector<64xf32>
    %5 = vector.multi_reduction <add>, %0, %cst [1] : vector<64x16xf32> to vector<64xf32>
    %6 = vector.shape_cast %5 : vector<64xf32> to vector<64x1xf32>
    %cst_9 = arith.constant 1.600000e+01 : f32
    %7 = vector.broadcast %cst_9 : f32 to vector<64x1xf32>
    %8 = arith.divf %6, %7 : vector<64x1xf32>
    %cst_10 = arith.constant dense<0xFF800000> : vector<64xf32>
    %9 = vector.multi_reduction <maximumf>, %0, %cst_10 [1] : vector<64x16xf32> to vector<64xf32>
    %10 = vector.shape_cast %9 : vector<64xf32> to vector<64x1xf32>
    %c0_11 = arith.constant 0 : index
    %c0_12 = arith.constant 0 : index
    %11 = vector.load %arg4[%c0_11, %c0_12] : memref<64x64xbf16, #tpu.memory_space<vmem>>, vector<64x64xbf16>
    %12 = arith.truncf %8 : vector<64x1xf32> to vector<64x1xbf16>
    %cst_13 = arith.constant dense<0.000000e+00> : vector<64x1xf32>
    %13 = tpu.matmul %11, %12, %cst_13 {dimension_numbers = #tpu.dot_dimension_numbers<[1], [0], [0], [1], [0, 0, 1, 1], [], []>} : vector<64x64xbf16>, vector<64x1xbf16>, vector<64x1xf32> -> vector<64x1xf32>
    %c0_14 = arith.constant 0 : index
    %c0_15 = arith.constant 0 : index
    %14 = vector.load %arg5[%c0_14, %c0_15] : memref<64x64xbf16, #tpu.memory_space<vmem>>, vector<64x64xbf16>
    %15 = arith.truncf %10 : vector<64x1xf32> to vector<64x1xbf16>
    %cst_16 = arith.constant dense<0.000000e+00> : vector<64x1xf32>
    %16 = tpu.matmul %14, %15, %cst_16 {dimension_numbers = #tpu.dot_dimension_numbers<[1], [0], [0], [1], [0, 0, 1, 1], [], []>} : vector<64x64xbf16>, vector<64x1xbf16>, vector<64x1xf32> -> vector<64x1xf32>
    %17 = arith.addf %13, %16 : vector<64x1xf32>
    %18 = arith.negf %17 : vector<64x1xf32>
    %19 = math.exp %18 : vector<64x1xf32>
    %cst_17 = arith.constant 1.000000e+00 : f32
    %20 = vector.broadcast %cst_17 : f32 to vector<64x1xf32>
    %21 = arith.addf %20, %19 : vector<64x1xf32>
    %22 = arith.divf %20, %21 : vector<64x1xf32>
    %cst_18 = arith.constant dense<0.000000e+00> : vector<16xf32>
    %23 = vector.multi_reduction <add>, %1, %cst_18 [0] : vector<64x16xf32> to vector<16xf32>
    %24 = vector.shape_cast %23 : vector<16xf32> to vector<1x16xf32>
    %cst_19 = arith.constant 6.400000e+01 : f32
    %25 = vector.broadcast %cst_19 : f32 to vector<1x16xf32>
    %26 = arith.divf %24, %25 : vector<1x16xf32>
    %cst_20 = arith.constant dense<0xFF800000> : vector<16xf32>
    %27 = vector.multi_reduction <maximumf>, %1, %cst_20 [0] : vector<64x16xf32> to vector<16xf32>
    %28 = vector.shape_cast %27 : vector<16xf32> to vector<1x16xf32>
    %c0_21 = arith.constant 0 : index
    %c0_22 = arith.constant 0 : index
    %29 = vector.load %arg6[%c0_21, %c0_22] : memref<16x4xbf16, #tpu.memory_space<vmem>>, vector<16x4xbf16>
    %c0_23 = arith.constant 0 : index
    %c0_24 = arith.constant 0 : index
    %30 = vector.load %arg7[%c0_23, %c0_24] : memref<4x16xbf16, #tpu.memory_space<vmem>>, vector<4x16xbf16>
    %31 = arith.truncf %26 : vector<1x16xf32> to vector<1x16xbf16>
    %cst_25 = arith.constant dense<0.000000e+00> : vector<1x4xf32>
    %32 = tpu.matmul %31, %29, %cst_25 {dimension_numbers = #tpu.dot_dimension_numbers<[1], [0], [0], [1], [0, 0, 1, 1], [], []>} : vector<1x16xbf16>, vector<16x4xbf16>, vector<1x4xf32> -> vector<1x4xf32>
    %cst_26 = arith.constant 0.000000e+00 : f32
    %33 = vector.broadcast %cst_26 : f32 to vector<1x4xf32>
    %34 = arith.maximumf %32, %33 : vector<1x4xf32>
    %35 = arith.truncf %34 : vector<1x4xf32> to vector<1x4xbf16>
    %cst_27 = arith.constant dense<0.000000e+00> : vector<1x16xf32>
    %36 = tpu.matmul %35, %30, %cst_27 {dimension_numbers = #tpu.dot_dimension_numbers<[1], [0], [0], [1], [0, 0, 1, 1], [], []>} : vector<1x4xbf16>, vector<4x16xbf16>, vector<1x16xf32> -> vector<1x16xf32>
    %37 = arith.truncf %28 : vector<1x16xf32> to vector<1x16xbf16>
    %cst_28 = arith.constant dense<0.000000e+00> : vector<1x4xf32>
    %38 = tpu.matmul %37, %29, %cst_28 {dimension_numbers = #tpu.dot_dimension_numbers<[1], [0], [0], [1], [0, 0, 1, 1], [], []>} : vector<1x16xbf16>, vector<16x4xbf16>, vector<1x4xf32> -> vector<1x4xf32>
    %cst_29 = arith.constant 0.000000e+00 : f32
    %39 = vector.broadcast %cst_29 : f32 to vector<1x4xf32>
    %40 = arith.maximumf %38, %39 : vector<1x4xf32>
    %41 = arith.truncf %40 : vector<1x4xf32> to vector<1x4xbf16>
    %cst_30 = arith.constant dense<0.000000e+00> : vector<1x16xf32>
    %42 = tpu.matmul %41, %30, %cst_30 {dimension_numbers = #tpu.dot_dimension_numbers<[1], [0], [0], [1], [0, 0, 1, 1], [], []>} : vector<1x4xbf16>, vector<4x16xbf16>, vector<1x16xf32> -> vector<1x16xf32>
    %43 = arith.addf %36, %42 : vector<1x16xf32>
    %44 = arith.negf %43 : vector<1x16xf32>
    %45 = math.exp %44 : vector<1x16xf32>
    %cst_31 = arith.constant 1.000000e+00 : f32
    %46 = vector.broadcast %cst_31 : f32 to vector<1x16xf32>
    %47 = arith.addf %46, %45 : vector<1x16xf32>
    %48 = arith.divf %46, %47 : vector<1x16xf32>
    %49 = vector.broadcast %48 : vector<1x16xf32> to vector<64x16xf32>
    %50 = arith.mulf %0, %49 : vector<64x16xf32>
    %51 = vector.broadcast %22 : vector<64x1xf32> to vector<64x16xf32>
    %52 = arith.mulf %1, %51 : vector<64x16xf32>
    %c0_32 = arith.constant 0 : index
    %c0_33 = arith.constant 0 : index
    %53 = vector.load %arg9[%c0_32, %c0_33] : memref<16x144xbf16, #tpu.memory_space<vmem>>, vector<16x144xbf16>
    %54 = arith.truncf %50 : vector<64x16xf32> to vector<64x16xbf16>
    %cst_34 = arith.constant dense<0.000000e+00> : vector<64x144xf32>
    %55 = tpu.matmul %54, %53, %cst_34 {dimension_numbers = #tpu.dot_dimension_numbers<[1], [0], [0], [1], [0, 0, 1, 1], [], []>} : vector<64x16xbf16>, vector<16x144xbf16>, vector<64x144xf32> -> vector<64x144xf32>
    %c0_35 = arith.constant 0 : index
    %c0_36 = arith.constant 0 : index
    %56 = vector.load %arg10[%c0_35, %c0_36] : memref<16x144xbf16, #tpu.memory_space<vmem>>, vector<16x144xbf16>
    %57 = arith.truncf %52 : vector<64x16xf32> to vector<64x16xbf16>
    %cst_37 = arith.constant dense<0.000000e+00> : vector<64x144xf32>
    %58 = tpu.matmul %57, %56, %cst_37 {dimension_numbers = #tpu.dot_dimension_numbers<[1], [0], [0], [1], [0, 0, 1, 1], [], []>} : vector<64x16xbf16>, vector<16x144xbf16>, vector<64x144xf32> -> vector<64x144xf32>
    %59 = arith.addf %55, %58 : vector<64x144xf32>
    %60 = vector.extract_strided_slice %59 {offsets = [0, 0], sizes = [64, 16], strides = [1, 1]} : vector<64x144xf32> to vector<64x16xf32>
    %61 = vector.extract_strided_slice %3 {offsets = [0, 0], sizes = [64, 1], strides = [1, 1]} : vector<64x9xf32> to vector<64x1xf32>
    %c9_i32 = arith.constant 9 : i32
    %62 = tpu.dynamic_rotate %60 by %c9_i32 dim 0 : vector<64x16xf32>, i32 -> vector<64x16xf32>
    %63 = vector.broadcast %61 : vector<64x1xf32> to vector<64x16xf32>
    %64 = arith.mulf %63, %62 : vector<64x16xf32>
    %65 = vector.extract_strided_slice %59 {offsets = [0, 16], sizes = [64, 16], strides = [1, 1]} : vector<64x144xf32> to vector<64x16xf32>
    %66 = vector.extract_strided_slice %3 {offsets = [0, 1], sizes = [64, 1], strides = [1, 1]} : vector<64x9xf32> to vector<64x1xf32>
    %c8_i32 = arith.constant 8 : i32
    %67 = tpu.dynamic_rotate %65 by %c8_i32 dim 0 : vector<64x16xf32>, i32 -> vector<64x16xf32>
    %68 = vector.broadcast %66 : vector<64x1xf32> to vector<64x16xf32>
    %69 = arith.mulf %68, %67 : vector<64x16xf32>
    %70 = arith.addf %64, %69 : vector<64x16xf32>
    %71 = vector.extract_strided_slice %59 {offsets = [0, 32], sizes = [64, 16], strides = [1, 1]} : vector<64x144xf32> to vector<64x16xf32>
    %72 = vector.extract_strided_slice %3 {offsets = [0, 2], sizes = [64, 1], strides = [1, 1]} : vector<64x9xf32> to vector<64x1xf32>
    %c7_i32 = arith.constant 7 : i32
    %73 = tpu.dynamic_rotate %71 by %c7_i32 dim 0 : vector<64x16xf32>, i32 -> vector<64x16xf32>
    %74 = vector.broadcast %72 : vector<64x1xf32> to vector<64x16xf32>
    %75 = arith.mulf %74, %73 : vector<64x16xf32>
    %76 = arith.addf %70, %75 : vector<64x16xf32>
    %77 = vector.extract_strided_slice %59 {offsets = [0, 48], sizes = [64, 16], strides = [1, 1]} : vector<64x144xf32> to vector<64x16xf32>
    %78 = vector.extract_strided_slice %3 {offsets = [0, 3], sizes = [64, 1], strides = [1, 1]} : vector<64x9xf32> to vector<64x1xf32>
    %c1_i32 = arith.constant 1 : i32
    %79 = tpu.dynamic_rotate %77 by %c1_i32 dim 0 : vector<64x16xf32>, i32 -> vector<64x16xf32>
    %80 = vector.broadcast %78 : vector<64x1xf32> to vector<64x16xf32>
    %81 = arith.mulf %80, %79 : vector<64x16xf32>
    %82 = arith.addf %76, %81 : vector<64x16xf32>
    %83 = vector.extract_strided_slice %59 {offsets = [0, 64], sizes = [64, 16], strides = [1, 1]} : vector<64x144xf32> to vector<64x16xf32>
    %84 = arith.addf %82, %83 : vector<64x16xf32>
    %85 = vector.extract_strided_slice %59 {offsets = [0, 80], sizes = [64, 16], strides = [1, 1]} : vector<64x144xf32> to vector<64x16xf32>
    %86 = vector.extract_strided_slice %3 {offsets = [0, 5], sizes = [64, 1], strides = [1, 1]} : vector<64x9xf32> to vector<64x1xf32>
    %c63_i32 = arith.constant 63 : i32
    %87 = tpu.dynamic_rotate %85 by %c63_i32 dim 0 : vector<64x16xf32>, i32 -> vector<64x16xf32>
    %88 = vector.broadcast %86 : vector<64x1xf32> to vector<64x16xf32>
    %89 = arith.mulf %88, %87 : vector<64x16xf32>
    %90 = arith.addf %84, %89 : vector<64x16xf32>
    %91 = vector.extract_strided_slice %59 {offsets = [0, 96], sizes = [64, 16], strides = [1, 1]} : vector<64x144xf32> to vector<64x16xf32>
    %92 = vector.extract_strided_slice %3 {offsets = [0, 6], sizes = [64, 1], strides = [1, 1]} : vector<64x9xf32> to vector<64x1xf32>
    %c57_i32 = arith.constant 57 : i32
    %93 = tpu.dynamic_rotate %91 by %c57_i32 dim 0 : vector<64x16xf32>, i32 -> vector<64x16xf32>
    %94 = vector.broadcast %92 : vector<64x1xf32> to vector<64x16xf32>
    %95 = arith.mulf %94, %93 : vector<64x16xf32>
    %96 = arith.addf %90, %95 : vector<64x16xf32>
    %97 = vector.extract_strided_slice %59 {offsets = [0, 112], sizes = [64, 16], strides = [1, 1]} : vector<64x144xf32> to vector<64x16xf32>
    %98 = vector.extract_strided_slice %3 {offsets = [0, 7], sizes = [64, 1], strides = [1, 1]} : vector<64x9xf32> to vector<64x1xf32>
    %c56_i32 = arith.constant 56 : i32
    %99 = tpu.dynamic_rotate %97 by %c56_i32 dim 0 : vector<64x16xf32>, i32 -> vector<64x16xf32>
    %100 = vector.broadcast %98 : vector<64x1xf32> to vector<64x16xf32>
    %101 = arith.mulf %100, %99 : vector<64x16xf32>
    %102 = arith.addf %96, %101 : vector<64x16xf32>
    %103 = vector.extract_strided_slice %59 {offsets = [0, 128], sizes = [64, 16], strides = [1, 1]} : vector<64x144xf32> to vector<64x16xf32>
    %104 = vector.extract_strided_slice %3 {offsets = [0, 8], sizes = [64, 1], strides = [1, 1]} : vector<64x9xf32> to vector<64x1xf32>
    %c55_i32 = arith.constant 55 : i32
    %105 = tpu.dynamic_rotate %103 by %c55_i32 dim 0 : vector<64x16xf32>, i32 -> vector<64x16xf32>
    %106 = vector.broadcast %104 : vector<64x1xf32> to vector<64x16xf32>
    %107 = arith.mulf %106, %105 : vector<64x16xf32>
    %108 = arith.addf %102, %107 : vector<64x16xf32>
    %109 = vector.extract_strided_slice %4 {offsets = [0, 0], sizes = [1, 16], strides = [1, 1]} : vector<18x128xf32> to vector<1x16xf32>
    %110 = vector.broadcast %109 : vector<1x16xf32> to vector<64x16xf32>
    %111 = arith.mulf %108, %110 : vector<64x16xf32>
    %112 = vector.extract_strided_slice %4 {offsets = [1, 0], sizes = [1, 16], strides = [1, 1]} : vector<18x128xf32> to vector<1x16xf32>
    %113 = vector.broadcast %112 : vector<1x16xf32> to vector<64x16xf32>
    %114 = arith.addf %111, %113 : vector<64x16xf32>
    %cst_38 = arith.constant 0.000000e+00 : f32
    %115 = vector.broadcast %cst_38 : f32 to vector<64x16xf32>
    %116 = arith.maximumf %114, %115 : vector<64x16xf32>
    %c0_39 = arith.constant 0 : index
    %c0_40 = arith.constant 0 : index
    %117 = vector.load %arg11[%c0_39, %c0_40] : memref<16x288xbf16, #tpu.memory_space<vmem>>, vector<16x288xbf16>
    %118 = arith.truncf %0 : vector<64x16xf32> to vector<64x16xbf16>
    %cst_41 = arith.constant dense<0.000000e+00> : vector<64x288xf32>
    %119 = tpu.matmul %118, %117, %cst_41 {dimension_numbers = #tpu.dot_dimension_numbers<[1], [0], [0], [1], [0, 0, 1, 1], [], []>} : vector<64x16xbf16>, vector<16x288xbf16>, vector<64x288xf32> -> vector<64x288xf32>
    %c0_42 = arith.constant 0 : index
    %c0_43 = arith.constant 0 : index
    %120 = vector.load %arg12[%c0_42, %c0_43] : memref<16x288xbf16, #tpu.memory_space<vmem>>, vector<16x288xbf16>
    %121 = arith.truncf %1 : vector<64x16xf32> to vector<64x16xbf16>
    %cst_44 = arith.constant dense<0.000000e+00> : vector<64x288xf32>
    %122 = tpu.matmul %121, %120, %cst_44 {dimension_numbers = #tpu.dot_dimension_numbers<[1], [0], [0], [1], [0, 0, 1, 1], [], []>} : vector<64x16xbf16>, vector<16x288xbf16>, vector<64x288xf32> -> vector<64x288xf32>
    %123 = arith.addf %119, %122 : vector<64x288xf32>
    %c0_45 = arith.constant 0 : index
    %c0_46 = arith.constant 0 : index
    %124 = vector.load %arg13[%c0_45, %c0_46] : memref<16x288xbf16, #tpu.memory_space<vmem>>, vector<16x288xbf16>
    %125 = arith.truncf %116 : vector<64x16xf32> to vector<64x16xbf16>
    %cst_47 = arith.constant dense<0.000000e+00> : vector<64x288xf32>
    %126 = tpu.matmul %125, %124, %cst_47 {dimension_numbers = #tpu.dot_dimension_numbers<[1], [0], [0], [1], [0, 0, 1, 1], [], []>} : vector<64x16xbf16>, vector<16x288xbf16>, vector<64x288xf32> -> vector<64x288xf32>
    %127 = arith.addf %123, %126 : vector<64x288xf32>
    %128 = vector.extract_strided_slice %127 {offsets = [0, 0], sizes = [64, 32], strides = [1, 1]} : vector<64x288xf32> to vector<64x32xf32>
    %129 = vector.extract_strided_slice %3 {offsets = [0, 0], sizes = [64, 1], strides = [1, 1]} : vector<64x9xf32> to vector<64x1xf32>
    %c9_i32_48 = arith.constant 9 : i32
    %130 = tpu.dynamic_rotate %128 by %c9_i32_48 dim 0 : vector<64x32xf32>, i32 -> vector<64x32xf32>
    %131 = vector.broadcast %129 : vector<64x1xf32> to vector<64x32xf32>
    %132 = arith.mulf %131, %130 : vector<64x32xf32>
    %133 = vector.extract_strided_slice %127 {offsets = [0, 32], sizes = [64, 32], strides = [1, 1]} : vector<64x288xf32> to vector<64x32xf32>
    %134 = vector.extract_strided_slice %3 {offsets = [0, 1], sizes = [64, 1], strides = [1, 1]} : vector<64x9xf32> to vector<64x1xf32>
    %c8_i32_49 = arith.constant 8 : i32
    %135 = tpu.dynamic_rotate %133 by %c8_i32_49 dim 0 : vector<64x32xf32>, i32 -> vector<64x32xf32>
    %136 = vector.broadcast %134 : vector<64x1xf32> to vector<64x32xf32>
    %137 = arith.mulf %136, %135 : vector<64x32xf32>
    %138 = arith.addf %132, %137 : vector<64x32xf32>
    %139 = vector.extract_strided_slice %127 {offsets = [0, 64], sizes = [64, 32], strides = [1, 1]} : vector<64x288xf32> to vector<64x32xf32>
    %140 = vector.extract_strided_slice %3 {offsets = [0, 2], sizes = [64, 1], strides = [1, 1]} : vector<64x9xf32> to vector<64x1xf32>
    %c7_i32_50 = arith.constant 7 : i32
    %141 = tpu.dynamic_rotate %139 by %c7_i32_50 dim 0 : vector<64x32xf32>, i32 -> vector<64x32xf32>
    %142 = vector.broadcast %140 : vector<64x1xf32> to vector<64x32xf32>
    %143 = arith.mulf %142, %141 : vector<64x32xf32>
    %144 = arith.addf %138, %143 : vector<64x32xf32>
    %145 = vector.extract_strided_slice %127 {offsets = [0, 96], sizes = [64, 32], strides = [1, 1]} : vector<64x288xf32> to vector<64x32xf32>
    %146 = vector.extract_strided_slice %3 {offsets = [0, 3], sizes = [64, 1], strides = [1, 1]} : vector<64x9xf32> to vector<64x1xf32>
    %c1_i32_51 = arith.constant 1 : i32
    %147 = tpu.dynamic_rotate %145 by %c1_i32_51 dim 0 : vector<64x32xf32>, i32 -> vector<64x32xf32>
    %148 = vector.broadcast %146 : vector<64x1xf32> to vector<64x32xf32>
    %149 = arith.mulf %148, %147 : vector<64x32xf32>
    %150 = arith.addf %144, %149 : vector<64x32xf32>
    %151 = vector.extract_strided_slice %127 {offsets = [0, 128], sizes = [64, 32], strides = [1, 1]} : vector<64x288xf32> to vector<64x32xf32>
    %152 = arith.addf %150, %151 : vector<64x32xf32>
    %153 = vector.extract_strided_slice %127 {offsets = [0, 160], sizes = [64, 32], strides = [1, 1]} : vector<64x288xf32> to vector<64x32xf32>
    %154 = vector.extract_strided_slice %3 {offsets = [0, 5], sizes = [64, 1], strides = [1, 1]} : vector<64x9xf32> to vector<64x1xf32>
    %c63_i32_52 = arith.constant 63 : i32
    %155 = tpu.dynamic_rotate %153 by %c63_i32_52 dim 0 : vector<64x32xf32>, i32 -> vector<64x32xf32>
    %156 = vector.broadcast %154 : vector<64x1xf32> to vector<64x32xf32>
    %157 = arith.mulf %156, %155 : vector<64x32xf32>
    %158 = arith.addf %152, %157 : vector<64x32xf32>
    %159 = vector.extract_strided_slice %127 {offsets = [0, 192], sizes = [64, 32], strides = [1, 1]} : vector<64x288xf32> to vector<64x32xf32>
    %160 = vector.extract_strided_slice %3 {offsets = [0, 6], sizes = [64, 1], strides = [1, 1]} : vector<64x9xf32> to vector<64x1xf32>
    %c57_i32_53 = arith.constant 57 : i32
    %161 = tpu.dynamic_rotate %159 by %c57_i32_53 dim 0 : vector<64x32xf32>, i32 -> vector<64x32xf32>
    %162 = vector.broadcast %160 : vector<64x1xf32> to vector<64x32xf32>
    %163 = arith.mulf %162, %161 : vector<64x32xf32>
    %164 = arith.addf %158, %163 : vector<64x32xf32>
    %165 = vector.extract_strided_slice %127 {offsets = [0, 224], sizes = [64, 32], strides = [1, 1]} : vector<64x288xf32> to vector<64x32xf32>
    %166 = vector.extract_strided_slice %3 {offsets = [0, 7], sizes = [64, 1], strides = [1, 1]} : vector<64x9xf32> to vector<64x1xf32>
    %c56_i32_54 = arith.constant 56 : i32
    %167 = tpu.dynamic_rotate %165 by %c56_i32_54 dim 0 : vector<64x32xf32>, i32 -> vector<64x32xf32>
    %168 = vector.broadcast %166 : vector<64x1xf32> to vector<64x32xf32>
    %169 = arith.mulf %168, %167 : vector<64x32xf32>
    %170 = arith.addf %164, %169 : vector<64x32xf32>
    %171 = vector.extract_strided_slice %127 {offsets = [0, 256], sizes = [64, 32], strides = [1, 1]} : vector<64x288xf32> to vector<64x32xf32>
    %172 = vector.extract_strided_slice %3 {offsets = [0, 8], sizes = [64, 1], strides = [1, 1]} : vector<64x9xf32> to vector<64x1xf32>
    %c55_i32_55 = arith.constant 55 : i32
    %173 = tpu.dynamic_rotate %171 by %c55_i32_55 dim 0 : vector<64x32xf32>, i32 -> vector<64x32xf32>
    %174 = vector.broadcast %172 : vector<64x1xf32> to vector<64x32xf32>
    %175 = arith.mulf %174, %173 : vector<64x32xf32>
    %176 = arith.addf %170, %175 : vector<64x32xf32>
    %177 = vector.extract_strided_slice %4 {offsets = [2, 0], sizes = [1, 32], strides = [1, 1]} : vector<18x128xf32> to vector<1x32xf32>
    %178 = vector.broadcast %177 : vector<1x32xf32> to vector<64x32xf32>
    %179 = arith.mulf %176, %178 : vector<64x32xf32>
    %180 = vector.extract_strided_slice %4 {offsets = [3, 0], sizes = [1, 32], strides = [1, 1]} : vector<18x128xf32> to vector<1x32xf32>
    %181 = vector.broadcast %180 : vector<1x32xf32> to vector<64x32xf32>
    %182 = arith.addf %179, %181 : vector<64x32xf32>
    %cst_56 = arith.constant 0.000000e+00 : f32
    %183 = vector.broadcast %cst_56 : f32 to vector<64x32xf32>
    %184 = arith.maximumf %182, %183 : vector<64x32xf32>
    %c0_57 = arith.constant 0 : index
    %c0_58 = arith.constant 0 : index
    %185 = vector.load %arg14[%c0_57, %c0_58] : memref<32x144xbf16, #tpu.memory_space<vmem>>, vector<32x144xbf16>
    %186 = arith.truncf %184 : vector<64x32xf32> to vector<64x32xbf16>
    %cst_59 = arith.constant dense<0.000000e+00> : vector<64x144xf32>
    %187 = tpu.matmul %186, %185, %cst_59 {dimension_numbers = #tpu.dot_dimension_numbers<[1], [0], [0], [1], [0, 0, 1, 1], [], []>} : vector<64x32xbf16>, vector<32x144xbf16>, vector<64x144xf32> -> vector<64x144xf32>
    %188 = vector.extract_strided_slice %187 {offsets = [0, 0], sizes = [64, 16], strides = [1, 1]} : vector<64x144xf32> to vector<64x16xf32>
    %189 = vector.extract_strided_slice %3 {offsets = [0, 0], sizes = [64, 1], strides = [1, 1]} : vector<64x9xf32> to vector<64x1xf32>
    %c9_i32_60 = arith.constant 9 : i32
    %190 = tpu.dynamic_rotate %188 by %c9_i32_60 dim 0 : vector<64x16xf32>, i32 -> vector<64x16xf32>
    %191 = vector.broadcast %189 : vector<64x1xf32> to vector<64x16xf32>
    %192 = arith.mulf %191, %190 : vector<64x16xf32>
    %193 = vector.extract_strided_slice %187 {offsets = [0, 16], sizes = [64, 16], strides = [1, 1]} : vector<64x144xf32> to vector<64x16xf32>
    %194 = vector.extract_strided_slice %3 {offsets = [0, 1], sizes = [64, 1], strides = [1, 1]} : vector<64x9xf32> to vector<64x1xf32>
    %c8_i32_61 = arith.constant 8 : i32
    %195 = tpu.dynamic_rotate %193 by %c8_i32_61 dim 0 : vector<64x16xf32>, i32 -> vector<64x16xf32>
    %196 = vector.broadcast %194 : vector<64x1xf32> to vector<64x16xf32>
    %197 = arith.mulf %196, %195 : vector<64x16xf32>
    %198 = arith.addf %192, %197 : vector<64x16xf32>
    %199 = vector.extract_strided_slice %187 {offsets = [0, 32], sizes = [64, 16], strides = [1, 1]} : vector<64x144xf32> to vector<64x16xf32>
    %200 = vector.extract_strided_slice %3 {offsets = [0, 2], sizes = [64, 1], strides = [1, 1]} : vector<64x9xf32> to vector<64x1xf32>
    %c7_i32_62 = arith.constant 7 : i32
    %201 = tpu.dynamic_rotate %199 by %c7_i32_62 dim 0 : vector<64x16xf32>, i32 -> vector<64x16xf32>
    %202 = vector.broadcast %200 : vector<64x1xf32> to vector<64x16xf32>
    %203 = arith.mulf %202, %201 : vector<64x16xf32>
    %204 = arith.addf %198, %203 : vector<64x16xf32>
    %205 = vector.extract_strided_slice %187 {offsets = [0, 48], sizes = [64, 16], strides = [1, 1]} : vector<64x144xf32> to vector<64x16xf32>
    %206 = vector.extract_strided_slice %3 {offsets = [0, 3], sizes = [64, 1], strides = [1, 1]} : vector<64x9xf32> to vector<64x1xf32>
    %c1_i32_63 = arith.constant 1 : i32
    %207 = tpu.dynamic_rotate %205 by %c1_i32_63 dim 0 : vector<64x16xf32>, i32 -> vector<64x16xf32>
    %208 = vector.broadcast %206 : vector<64x1xf32> to vector<64x16xf32>
    %209 = arith.mulf %208, %207 : vector<64x16xf32>
    %210 = arith.addf %204, %209 : vector<64x16xf32>
    %211 = vector.extract_strided_slice %187 {offsets = [0, 64], sizes = [64, 16], strides = [1, 1]} : vector<64x144xf32> to vector<64x16xf32>
    %212 = arith.addf %210, %211 : vector<64x16xf32>
    %213 = vector.extract_strided_slice %187 {offsets = [0, 80], sizes = [64, 16], strides = [1, 1]} : vector<64x144xf32> to vector<64x16xf32>
    %214 = vector.extract_strided_slice %3 {offsets = [0, 5], sizes = [64, 1], strides = [1, 1]} : vector<64x9xf32> to vector<64x1xf32>
    %c63_i32_64 = arith.constant 63 : i32
    %215 = tpu.dynamic_rotate %213 by %c63_i32_64 dim 0 : vector<64x16xf32>, i32 -> vector<64x16xf32>
    %216 = vector.broadcast %214 : vector<64x1xf32> to vector<64x16xf32>
    %217 = arith.mulf %216, %215 : vector<64x16xf32>
    %218 = arith.addf %212, %217 : vector<64x16xf32>
    %219 = vector.extract_strided_slice %187 {offsets = [0, 96], sizes = [64, 16], strides = [1, 1]} : vector<64x144xf32> to vector<64x16xf32>
    %220 = vector.extract_strided_slice %3 {offsets = [0, 6], sizes = [64, 1], strides = [1, 1]} : vector<64x9xf32> to vector<64x1xf32>
    %c57_i32_65 = arith.constant 57 : i32
    %221 = tpu.dynamic_rotate %219 by %c57_i32_65 dim 0 : vector<64x16xf32>, i32 -> vector<64x16xf32>
    %222 = vector.broadcast %220 : vector<64x1xf32> to vector<64x16xf32>
    %223 = arith.mulf %222, %221 : vector<64x16xf32>
    %224 = arith.addf %218, %223 : vector<64x16xf32>
    %225 = vector.extract_strided_slice %187 {offsets = [0, 112], sizes = [64, 16], strides = [1, 1]} : vector<64x144xf32> to vector<64x16xf32>
    %226 = vector.extract_strided_slice %3 {offsets = [0, 7], sizes = [64, 1], strides = [1, 1]} : vector<64x9xf32> to vector<64x1xf32>
    %c56_i32_66 = arith.constant 56 : i32
    %227 = tpu.dynamic_rotate %225 by %c56_i32_66 dim 0 : vector<64x16xf32>, i32 -> vector<64x16xf32>
    %228 = vector.broadcast %226 : vector<64x1xf32> to vector<64x16xf32>
    %229 = arith.mulf %228, %227 : vector<64x16xf32>
    %230 = arith.addf %224, %229 : vector<64x16xf32>
    %231 = vector.extract_strided_slice %187 {offsets = [0, 128], sizes = [64, 16], strides = [1, 1]} : vector<64x144xf32> to vector<64x16xf32>
    %232 = vector.extract_strided_slice %3 {offsets = [0, 8], sizes = [64, 1], strides = [1, 1]} : vector<64x9xf32> to vector<64x1xf32>
    %c55_i32_67 = arith.constant 55 : i32
    %233 = tpu.dynamic_rotate %231 by %c55_i32_67 dim 0 : vector<64x16xf32>, i32 -> vector<64x16xf32>
    %234 = vector.broadcast %232 : vector<64x1xf32> to vector<64x16xf32>
    %235 = arith.mulf %234, %233 : vector<64x16xf32>
    %236 = arith.addf %230, %235 : vector<64x16xf32>
    %237 = vector.extract_strided_slice %4 {offsets = [4, 0], sizes = [1, 16], strides = [1, 1]} : vector<18x128xf32> to vector<1x16xf32>
    %238 = vector.broadcast %237 : vector<1x16xf32> to vector<64x16xf32>
    %239 = arith.mulf %236, %238 : vector<64x16xf32>
    %240 = vector.extract_strided_slice %4 {offsets = [5, 0], sizes = [1, 16], strides = [1, 1]} : vector<18x128xf32> to vector<1x16xf32>
    %241 = vector.broadcast %240 : vector<1x16xf32> to vector<64x16xf32>
    %242 = arith.addf %239, %241 : vector<64x16xf32>
    %cst_68 = arith.constant 0.000000e+00 : f32
    %243 = vector.broadcast %cst_68 : f32 to vector<64x16xf32>
    %244 = arith.maximumf %242, %243 : vector<64x16xf32>
    %c0_69 = arith.constant 0 : index
    %c0_70 = arith.constant 0 : index
    %245 = vector.load %arg15[%c0_69, %c0_70] : memref<16x144xbf16, #tpu.memory_space<vmem>>, vector<16x144xbf16>
    %246 = arith.truncf %244 : vector<64x16xf32> to vector<64x16xbf16>
    %cst_71 = arith.constant dense<0.000000e+00> : vector<64x144xf32>
    %247 = tpu.matmul %246, %245, %cst_71 {dimension_numbers = #tpu.dot_dimension_numbers<[1], [0], [0], [1], [0, 0, 1, 1], [], []>} : vector<64x16xbf16>, vector<16x144xbf16>, vector<64x144xf32> -> vector<64x144xf32>
    %248 = vector.extract_strided_slice %247 {offsets = [0, 0], sizes = [64, 16], strides = [1, 1]} : vector<64x144xf32> to vector<64x16xf32>
    %249 = vector.extract_strided_slice %3 {offsets = [0, 0], sizes = [64, 1], strides = [1, 1]} : vector<64x9xf32> to vector<64x1xf32>
    %c9_i32_72 = arith.constant 9 : i32
    %250 = tpu.dynamic_rotate %248 by %c9_i32_72 dim 0 : vector<64x16xf32>, i32 -> vector<64x16xf32>
    %251 = vector.broadcast %249 : vector<64x1xf32> to vector<64x16xf32>
    %252 = arith.mulf %251, %250 : vector<64x16xf32>
    %253 = vector.extract_strided_slice %247 {offsets = [0, 16], sizes = [64, 16], strides = [1, 1]} : vector<64x144xf32> to vector<64x16xf32>
    %254 = vector.extract_strided_slice %3 {offsets = [0, 1], sizes = [64, 1], strides = [1, 1]} : vector<64x9xf32> to vector<64x1xf32>
    %c8_i32_73 = arith.constant 8 : i32
    %255 = tpu.dynamic_rotate %253 by %c8_i32_73 dim 0 : vector<64x16xf32>, i32 -> vector<64x16xf32>
    %256 = vector.broadcast %254 : vector<64x1xf32> to vector<64x16xf32>
    %257 = arith.mulf %256, %255 : vector<64x16xf32>
    %258 = arith.addf %252, %257 : vector<64x16xf32>
    %259 = vector.extract_strided_slice %247 {offsets = [0, 32], sizes = [64, 16], strides = [1, 1]} : vector<64x144xf32> to vector<64x16xf32>
    %260 = vector.extract_strided_slice %3 {offsets = [0, 2], sizes = [64, 1], strides = [1, 1]} : vector<64x9xf32> to vector<64x1xf32>
    %c7_i32_74 = arith.constant 7 : i32
    %261 = tpu.dynamic_rotate %259 by %c7_i32_74 dim 0 : vector<64x16xf32>, i32 -> vector<64x16xf32>
    %262 = vector.broadcast %260 : vector<64x1xf32> to vector<64x16xf32>
    %263 = arith.mulf %262, %261 : vector<64x16xf32>
    %264 = arith.addf %258, %263 : vector<64x16xf32>
    %265 = vector.extract_strided_slice %247 {offsets = [0, 48], sizes = [64, 16], strides = [1, 1]} : vector<64x144xf32> to vector<64x16xf32>
    %266 = vector.extract_strided_slice %3 {offsets = [0, 3], sizes = [64, 1], strides = [1, 1]} : vector<64x9xf32> to vector<64x1xf32>
    %c1_i32_75 = arith.constant 1 : i32
    %267 = tpu.dynamic_rotate %265 by %c1_i32_75 dim 0 : vector<64x16xf32>, i32 -> vector<64x16xf32>
    %268 = vector.broadcast %266 : vector<64x1xf32> to vector<64x16xf32>
    %269 = arith.mulf %268, %267 : vector<64x16xf32>
    %270 = arith.addf %264, %269 : vector<64x16xf32>
    %271 = vector.extract_strided_slice %247 {offsets = [0, 64], sizes = [64, 16], strides = [1, 1]} : vector<64x144xf32> to vector<64x16xf32>
    %272 = arith.addf %270, %271 : vector<64x16xf32>
    %273 = vector.extract_strided_slice %247 {offsets = [0, 80], sizes = [64, 16], strides = [1, 1]} : vector<64x144xf32> to vector<64x16xf32>
    %274 = vector.extract_strided_slice %3 {offsets = [0, 5], sizes = [64, 1], strides = [1, 1]} : vector<64x9xf32> to vector<64x1xf32>
    %c63_i32_76 = arith.constant 63 : i32
    %275 = tpu.dynamic_rotate %273 by %c63_i32_76 dim 0 : vector<64x16xf32>, i32 -> vector<64x16xf32>
    %276 = vector.broadcast %274 : vector<64x1xf32> to vector<64x16xf32>
    %277 = arith.mulf %276, %275 : vector<64x16xf32>
    %278 = arith.addf %272, %277 : vector<64x16xf32>
    %279 = vector.extract_strided_slice %247 {offsets = [0, 96], sizes = [64, 16], strides = [1, 1]} : vector<64x144xf32> to vector<64x16xf32>
    %280 = vector.extract_strided_slice %3 {offsets = [0, 6], sizes = [64, 1], strides = [1, 1]} : vector<64x9xf32> to vector<64x1xf32>
    %c57_i32_77 = arith.constant 57 : i32
    %281 = tpu.dynamic_rotate %279 by %c57_i32_77 dim 0 : vector<64x16xf32>, i32 -> vector<64x16xf32>
    %282 = vector.broadcast %280 : vector<64x1xf32> to vector<64x16xf32>
    %283 = arith.mulf %282, %281 : vector<64x16xf32>
    %284 = arith.addf %278, %283 : vector<64x16xf32>
    %285 = vector.extract_strided_slice %247 {offsets = [0, 112], sizes = [64, 16], strides = [1, 1]} : vector<64x144xf32> to vector<64x16xf32>
    %286 = vector.extract_strided_slice %3 {offsets = [0, 7], sizes = [64, 1], strides = [1, 1]} : vector<64x9xf32> to vector<64x1xf32>
    %c56_i32_78 = arith.constant 56 : i32
    %287 = tpu.dynamic_rotate %285 by %c56_i32_78 dim 0 : vector<64x16xf32>, i32 -> vector<64x16xf32>
    %288 = vector.broadcast %286 : vector<64x1xf32> to vector<64x16xf32>
    %289 = arith.mulf %288, %287 : vector<64x16xf32>
    %290 = arith.addf %284, %289 : vector<64x16xf32>
    %291 = vector.extract_strided_slice %247 {offsets = [0, 128], sizes = [64, 16], strides = [1, 1]} : vector<64x144xf32> to vector<64x16xf32>
    %292 = vector.extract_strided_slice %3 {offsets = [0, 8], sizes = [64, 1], strides = [1, 1]} : vector<64x9xf32> to vector<64x1xf32>
    %c55_i32_79 = arith.constant 55 : i32
    %293 = tpu.dynamic_rotate %291 by %c55_i32_79 dim 0 : vector<64x16xf32>, i32 -> vector<64x16xf32>
    %294 = vector.broadcast %292 : vector<64x1xf32> to vector<64x16xf32>
    %295 = arith.mulf %294, %293 : vector<64x16xf32>
    %296 = arith.addf %290, %295 : vector<64x16xf32>
    %297 = vector.extract_strided_slice %4 {offsets = [6, 0], sizes = [1, 16], strides = [1, 1]} : vector<18x128xf32> to vector<1x16xf32>
    %298 = vector.broadcast %297 : vector<1x16xf32> to vector<64x16xf32>
    %299 = arith.mulf %296, %298 : vector<64x16xf32>
    %300 = vector.extract_strided_slice %4 {offsets = [7, 0], sizes = [1, 16], strides = [1, 1]} : vector<18x128xf32> to vector<1x16xf32>
    %301 = vector.broadcast %300 : vector<1x16xf32> to vector<64x16xf32>
    %302 = arith.addf %299, %301 : vector<64x16xf32>
    %cst_80 = arith.constant 0.000000e+00 : f32
    %303 = vector.broadcast %cst_80 : f32 to vector<64x16xf32>
    %304 = arith.maximumf %302, %303 : vector<64x16xf32>
    %c0_81 = arith.constant 0 : index
    %c0_82 = arith.constant 0 : index
    %305 = vector.load %arg16[%c0_81, %c0_82] : memref<32x32xbf16, #tpu.memory_space<vmem>>, vector<32x32xbf16>
    %306 = arith.truncf %2 : vector<64x32xf32> to vector<64x32xbf16>
    %cst_83 = arith.constant dense<0.000000e+00> : vector<64x32xf32>
    %307 = tpu.matmul %306, %305, %cst_83 {dimension_numbers = #tpu.dot_dimension_numbers<[1], [0], [0], [1], [0, 0, 1, 1], [], []>} : vector<64x32xbf16>, vector<32x32xbf16>, vector<64x32xf32> -> vector<64x32xf32>
    %c0_84 = arith.constant 0 : index
    %c0_85 = arith.constant 0 : index
    %308 = vector.load %arg17[%c0_84, %c0_85] : memref<16x32xbf16, #tpu.memory_space<vmem>>, vector<16x32xbf16>
    %309 = arith.truncf %304 : vector<64x16xf32> to vector<64x16xbf16>
    %cst_86 = arith.constant dense<0.000000e+00> : vector<64x32xf32>
    %310 = tpu.matmul %309, %308, %cst_86 {dimension_numbers = #tpu.dot_dimension_numbers<[1], [0], [0], [1], [0, 0, 1, 1], [], []>} : vector<64x16xbf16>, vector<16x32xbf16>, vector<64x32xf32> -> vector<64x32xf32>
    %311 = arith.addf %307, %310 : vector<64x32xf32>
    %312 = vector.extract_strided_slice %4 {offsets = [8, 0], sizes = [1, 32], strides = [1, 1]} : vector<18x128xf32> to vector<1x32xf32>
    %313 = vector.broadcast %312 : vector<1x32xf32> to vector<64x32xf32>
    %314 = arith.addf %311, %313 : vector<64x32xf32>
    %315 = arith.mulf %314, %314 : vector<64x32xf32>
    %316 = arith.mulf %314, %315 : vector<64x32xf32>
    %cst_87 = arith.constant 4.471500e-02 : f32
    %317 = vector.broadcast %cst_87 : f32 to vector<64x32xf32>
    %318 = arith.mulf %317, %316 : vector<64x32xf32>
    %319 = arith.addf %314, %318 : vector<64x32xf32>
    %cst_88 = arith.constant 0.797884583 : f32
    %320 = vector.broadcast %cst_88 : f32 to vector<64x32xf32>
    %321 = arith.mulf %320, %319 : vector<64x32xf32>
    %322 = math.tanh %321 : vector<64x32xf32>
    %cst_89 = arith.constant 1.000000e+00 : f32
    %323 = vector.broadcast %cst_89 : f32 to vector<64x32xf32>
    %324 = arith.addf %323, %322 : vector<64x32xf32>
    %cst_90 = arith.constant 5.000000e-01 : f32
    %325 = vector.broadcast %cst_90 : f32 to vector<64x32xf32>
    %326 = arith.mulf %325, %324 : vector<64x32xf32>
    %327 = arith.mulf %314, %326 : vector<64x32xf32>
    %c0_91 = arith.constant 0 : index
    %c0_92 = arith.constant 0 : index
    %328 = vector.load %arg18[%c0_91, %c0_92] : memref<32x32xbf16, #tpu.memory_space<vmem>>, vector<32x32xbf16>
    %329 = arith.truncf %327 : vector<64x32xf32> to vector<64x32xbf16>
    %cst_93 = arith.constant dense<0.000000e+00> : vector<64x32xf32>
    %330 = tpu.matmul %329, %328, %cst_93 {dimension_numbers = #tpu.dot_dimension_numbers<[1], [0], [0], [1], [0, 0, 1, 1], [], []>} : vector<64x32xbf16>, vector<32x32xbf16>, vector<64x32xf32> -> vector<64x32xf32>
    %331 = vector.extract_strided_slice %4 {offsets = [9, 0], sizes = [1, 32], strides = [1, 1]} : vector<18x128xf32> to vector<1x32xf32>
    %332 = vector.broadcast %331 : vector<1x32xf32> to vector<64x32xf32>
    %333 = arith.addf %330, %332 : vector<64x32xf32>
    %cst_94 = arith.constant dense<0.000000e+00> : vector<64xf32>
    %334 = vector.multi_reduction <add>, %333, %cst_94 [1] : vector<64x32xf32> to vector<64xf32>
    %335 = vector.shape_cast %334 : vector<64xf32> to vector<64x1xf32>
    %cst_95 = arith.constant 3.200000e+01 : f32
    %336 = vector.broadcast %cst_95 : f32 to vector<64x1xf32>
    %337 = arith.divf %335, %336 : vector<64x1xf32>
    %338 = vector.broadcast %337 : vector<64x1xf32> to vector<64x32xf32>
    %339 = arith.subf %333, %338 : vector<64x32xf32>
    %340 = arith.mulf %339, %339 : vector<64x32xf32>
    %cst_96 = arith.constant dense<0.000000e+00> : vector<64xf32>
    %341 = vector.multi_reduction <add>, %340, %cst_96 [1] : vector<64x32xf32> to vector<64xf32>
    %342 = vector.shape_cast %341 : vector<64xf32> to vector<64x1xf32>
    %cst_97 = arith.constant 3.200000e+01 : f32
    %343 = vector.broadcast %cst_97 : f32 to vector<64x1xf32>
    %344 = arith.divf %342, %343 : vector<64x1xf32>
    %cst_98 = arith.constant 9.99999974E-6 : f32
    %345 = vector.broadcast %cst_98 : f32 to vector<64x1xf32>
    %346 = arith.addf %344, %345 : vector<64x1xf32>
    %347 = math.rsqrt %346 : vector<64x1xf32>
    %348 = vector.broadcast %347 : vector<64x1xf32> to vector<64x32xf32>
    %349 = arith.mulf %339, %348 : vector<64x32xf32>
    %350 = vector.extract_strided_slice %4 {offsets = [10, 0], sizes = [1, 32], strides = [1, 1]} : vector<18x128xf32> to vector<1x32xf32>
    %351 = vector.broadcast %350 : vector<1x32xf32> to vector<64x32xf32>
    %352 = arith.mulf %349, %351 : vector<64x32xf32>
    %353 = vector.extract_strided_slice %4 {offsets = [11, 0], sizes = [1, 32], strides = [1, 1]} : vector<18x128xf32> to vector<1x32xf32>
    %354 = vector.broadcast %353 : vector<1x32xf32> to vector<64x32xf32>
    %355 = arith.addf %352, %354 : vector<64x32xf32>
    %c0_99 = arith.constant 0 : index
    %c0_100 = arith.constant 0 : index
    %356 = vector.load %arg19[%c0_99, %c0_100] : memref<32x96xbf16, #tpu.memory_space<vmem>>, vector<32x96xbf16>
    %357 = arith.truncf %355 : vector<64x32xf32> to vector<64x32xbf16>
    %cst_101 = arith.constant dense<0.000000e+00> : vector<64x96xf32>
    %358 = tpu.matmul %357, %356, %cst_101 {dimension_numbers = #tpu.dot_dimension_numbers<[1], [0], [0], [1], [0, 0, 1, 1], [], []>} : vector<64x32xbf16>, vector<32x96xbf16>, vector<64x96xf32> -> vector<64x96xf32>
    %359 = vector.extract_strided_slice %4 {offsets = [12, 0], sizes = [1, 96], strides = [1, 1]} : vector<18x128xf32> to vector<1x96xf32>
    %360 = vector.broadcast %359 : vector<1x96xf32> to vector<64x96xf32>
    %361 = arith.addf %358, %360 : vector<64x96xf32>
    %362 = vector.extract_strided_slice %361 {offsets = [0, 0], sizes = [64, 32], strides = [1, 1]} : vector<64x96xf32> to vector<64x32xf32>
    %363 = vector.extract_strided_slice %361 {offsets = [0, 32], sizes = [64, 32], strides = [1, 1]} : vector<64x96xf32> to vector<64x32xf32>
    %364 = vector.extract_strided_slice %361 {offsets = [0, 64], sizes = [64, 32], strides = [1, 1]} : vector<64x96xf32> to vector<64x32xf32>
    %365 = arith.mulf %362, %362 : vector<64x32xf32>
    %cst_102 = arith.constant dense<0.000000e+00> : vector<64xf32>
    %366 = vector.multi_reduction <add>, %365, %cst_102 [1] : vector<64x32xf32> to vector<64xf32>
    %367 = vector.shape_cast %366 : vector<64xf32> to vector<64x1xf32>
    %cst_103 = arith.constant 5.000000e-01 : f32
    %368 = vector.broadcast %cst_103 : f32 to vector<64x1xf32>
    %369 = arith.mulf %367, %368 : vector<64x1xf32>
    %c0_104 = arith.constant 0 : index
    %c0_105 = arith.constant 0 : index
    %370 = vector.load %arg20[%c0_104, %c0_105] : memref<32x16xbf16, #tpu.memory_space<vmem>>, vector<32x16xbf16>
    %371 = arith.truncf %362 : vector<64x32xf32> to vector<64x32xbf16>
    %cst_106 = arith.constant dense<0.000000e+00> : vector<64x16xf32>
    %372 = tpu.matmul %371, %370, %cst_106 {dimension_numbers = #tpu.dot_dimension_numbers<[1], [0], [0], [1], [0, 0, 1, 1], [], []>} : vector<64x32xbf16>, vector<32x16xbf16>, vector<64x16xf32> -> vector<64x16xf32>
    %373 = vector.broadcast %369 : vector<64x1xf32> to vector<64x16xf32>
    %374 = arith.subf %372, %373 : vector<64x16xf32>
    %375 = math.exp %374 : vector<64x16xf32>
    %cst_107 = arith.constant 2.500000e-01 : f32
    %376 = vector.broadcast %cst_107 : f32 to vector<64x16xf32>
    %377 = arith.mulf %375, %376 : vector<64x16xf32>
    %378 = arith.mulf %363, %363 : vector<64x32xf32>
    %cst_108 = arith.constant dense<0.000000e+00> : vector<64xf32>
    %379 = vector.multi_reduction <add>, %378, %cst_108 [1] : vector<64x32xf32> to vector<64xf32>
    %380 = vector.shape_cast %379 : vector<64xf32> to vector<64x1xf32>
    %cst_109 = arith.constant 5.000000e-01 : f32
    %381 = vector.broadcast %cst_109 : f32 to vector<64x1xf32>
    %382 = arith.mulf %380, %381 : vector<64x1xf32>
    %c0_110 = arith.constant 0 : index
    %c0_111 = arith.constant 0 : index
    %383 = vector.load %arg20[%c0_110, %c0_111] : memref<32x16xbf16, #tpu.memory_space<vmem>>, vector<32x16xbf16>
    %384 = arith.truncf %363 : vector<64x32xf32> to vector<64x32xbf16>
    %cst_112 = arith.constant dense<0.000000e+00> : vector<64x16xf32>
    %385 = tpu.matmul %384, %383, %cst_112 {dimension_numbers = #tpu.dot_dimension_numbers<[1], [0], [0], [1], [0, 0, 1, 1], [], []>} : vector<64x32xbf16>, vector<32x16xbf16>, vector<64x16xf32> -> vector<64x16xf32>
    %386 = vector.broadcast %382 : vector<64x1xf32> to vector<64x16xf32>
    %387 = arith.subf %385, %386 : vector<64x16xf32>
    %388 = math.exp %387 : vector<64x16xf32>
    %cst_113 = arith.constant 2.500000e-01 : f32
    %389 = vector.broadcast %cst_113 : f32 to vector<64x16xf32>
    %390 = arith.mulf %388, %389 : vector<64x16xf32>
    %cst_114 = arith.constant dense<0.000000e+00> : vector<16xf32>
    %391 = vector.multi_reduction <add>, %377, %cst_114 [0] : vector<64x16xf32> to vector<16xf32>
    %392 = vector.shape_cast %391 : vector<16xf32> to vector<1x16xf32>
    %393 = vector.broadcast %392 : vector<1x16xf32> to vector<64x16xf32>
    %394 = arith.mulf %390, %393 : vector<64x16xf32>
    %cst_115 = arith.constant dense<0.000000e+00> : vector<64xf32>
    %395 = vector.multi_reduction <add>, %394, %cst_115 [1] : vector<64x16xf32> to vector<64xf32>
    %396 = vector.shape_cast %395 : vector<64xf32> to vector<64x1xf32>
    %397 = arith.truncf %377 : vector<64x16xf32> to vector<64x16xbf16>
    %398 = arith.truncf %364 : vector<64x32xf32> to vector<64x32xbf16>
    %cst_116 = arith.constant dense<0.000000e+00> : vector<16x32xf32>
    %399 = tpu.matmul %397, %398, %cst_116 {dimension_numbers = #tpu.dot_dimension_numbers<[0], [0], [1], [1], [0, 1, 1, 1], [], []>} : vector<64x16xbf16>, vector<64x32xbf16>, vector<16x32xf32> -> vector<16x32xf32>
    %400 = arith.truncf %390 : vector<64x16xf32> to vector<64x16xbf16>
    %401 = arith.truncf %399 : vector<16x32xf32> to vector<16x32xbf16>
    %cst_117 = arith.constant dense<0.000000e+00> : vector<64x32xf32>
    %402 = tpu.matmul %400, %401, %cst_117 {dimension_numbers = #tpu.dot_dimension_numbers<[1], [0], [0], [1], [0, 0, 1, 1], [], []>} : vector<64x16xbf16>, vector<16x32xbf16>, vector<64x32xf32> -> vector<64x32xf32>
    %cst_118 = arith.constant 9.99999993E-9 : f32
    %403 = vector.broadcast %cst_118 : f32 to vector<64x1xf32>
    %404 = arith.addf %396, %403 : vector<64x1xf32>
    %405 = tpu.reciprocal %404 {approx = true} : vector<64x1xf32> -> vector<64x1xf32>
    %406 = vector.broadcast %405 : vector<64x1xf32> to vector<64x32xf32>
    %407 = arith.mulf %402, %406 : vector<64x32xf32>
    %c0_119 = arith.constant 0 : index
    %c0_120 = arith.constant 0 : index
    %408 = vector.load %arg21[%c0_119, %c0_120] : memref<32x32xbf16, #tpu.memory_space<vmem>>, vector<32x32xbf16>
    %409 = arith.truncf %407 : vector<64x32xf32> to vector<64x32xbf16>
    %cst_121 = arith.constant dense<0.000000e+00> : vector<64x32xf32>
    %410 = tpu.matmul %409, %408, %cst_121 {dimension_numbers = #tpu.dot_dimension_numbers<[1], [0], [0], [1], [0, 0, 1, 1], [], []>} : vector<64x32xbf16>, vector<32x32xbf16>, vector<64x32xf32> -> vector<64x32xf32>
    %411 = arith.addf %333, %410 : vector<64x32xf32>
    %412 = vector.extract_strided_slice %4 {offsets = [13, 0], sizes = [1, 32], strides = [1, 1]} : vector<18x128xf32> to vector<1x32xf32>
    %413 = vector.broadcast %412 : vector<1x32xf32> to vector<64x32xf32>
    %414 = arith.addf %411, %413 : vector<64x32xf32>
    %cst_122 = arith.constant dense<0.000000e+00> : vector<64xf32>
    %415 = vector.multi_reduction <add>, %414, %cst_122 [1] : vector<64x32xf32> to vector<64xf32>
    %416 = vector.shape_cast %415 : vector<64xf32> to vector<64x1xf32>
    %cst_123 = arith.constant 3.200000e+01 : f32
    %417 = vector.broadcast %cst_123 : f32 to vector<64x1xf32>
    %418 = arith.divf %416, %417 : vector<64x1xf32>
    %419 = vector.broadcast %418 : vector<64x1xf32> to vector<64x32xf32>
    %420 = arith.subf %414, %419 : vector<64x32xf32>
    %421 = arith.mulf %420, %420 : vector<64x32xf32>
    %cst_124 = arith.constant dense<0.000000e+00> : vector<64xf32>
    %422 = vector.multi_reduction <add>, %421, %cst_124 [1] : vector<64x32xf32> to vector<64xf32>
    %423 = vector.shape_cast %422 : vector<64xf32> to vector<64x1xf32>
    %cst_125 = arith.constant 3.200000e+01 : f32
    %424 = vector.broadcast %cst_125 : f32 to vector<64x1xf32>
    %425 = arith.divf %423, %424 : vector<64x1xf32>
    %cst_126 = arith.constant 9.99999974E-6 : f32
    %426 = vector.broadcast %cst_126 : f32 to vector<64x1xf32>
    %427 = arith.addf %425, %426 : vector<64x1xf32>
    %428 = math.rsqrt %427 : vector<64x1xf32>
    %429 = vector.broadcast %428 : vector<64x1xf32> to vector<64x32xf32>
    %430 = arith.mulf %420, %429 : vector<64x32xf32>
    %431 = vector.extract_strided_slice %4 {offsets = [14, 0], sizes = [1, 32], strides = [1, 1]} : vector<18x128xf32> to vector<1x32xf32>
    %432 = vector.broadcast %431 : vector<1x32xf32> to vector<64x32xf32>
    %433 = arith.mulf %430, %432 : vector<64x32xf32>
    %434 = vector.extract_strided_slice %4 {offsets = [15, 0], sizes = [1, 32], strides = [1, 1]} : vector<18x128xf32> to vector<1x32xf32>
    %435 = vector.broadcast %434 : vector<1x32xf32> to vector<64x32xf32>
    %436 = arith.addf %433, %435 : vector<64x32xf32>
    %c0_127 = arith.constant 0 : index
    %c0_128 = arith.constant 0 : index
    %437 = vector.load %arg22[%c0_127, %c0_128] : memref<32x32xbf16, #tpu.memory_space<vmem>>, vector<32x32xbf16>
    %438 = arith.truncf %436 : vector<64x32xf32> to vector<64x32xbf16>
    %cst_129 = arith.constant dense<0.000000e+00> : vector<64x32xf32>
    %439 = tpu.matmul %438, %437, %cst_129 {dimension_numbers = #tpu.dot_dimension_numbers<[1], [0], [0], [1], [0, 0, 1, 1], [], []>} : vector<64x32xbf16>, vector<32x32xbf16>, vector<64x32xf32> -> vector<64x32xf32>
    %440 = vector.extract_strided_slice %4 {offsets = [16, 0], sizes = [1, 32], strides = [1, 1]} : vector<18x128xf32> to vector<1x32xf32>
    %441 = vector.broadcast %440 : vector<1x32xf32> to vector<64x32xf32>
    %442 = arith.addf %439, %441 : vector<64x32xf32>
    %443 = arith.mulf %442, %442 : vector<64x32xf32>
    %444 = arith.mulf %442, %443 : vector<64x32xf32>
    %cst_130 = arith.constant 4.471500e-02 : f32
    %445 = vector.broadcast %cst_130 : f32 to vector<64x32xf32>
    %446 = arith.mulf %445, %444 : vector<64x32xf32>
    %447 = arith.addf %442, %446 : vector<64x32xf32>
    %cst_131 = arith.constant 0.797884583 : f32
    %448 = vector.broadcast %cst_131 : f32 to vector<64x32xf32>
    %449 = arith.mulf %448, %447 : vector<64x32xf32>
    %450 = math.tanh %449 : vector<64x32xf32>
    %cst_132 = arith.constant 1.000000e+00 : f32
    %451 = vector.broadcast %cst_132 : f32 to vector<64x32xf32>
    %452 = arith.addf %451, %450 : vector<64x32xf32>
    %cst_133 = arith.constant 5.000000e-01 : f32
    %453 = vector.broadcast %cst_133 : f32 to vector<64x32xf32>
    %454 = arith.mulf %453, %452 : vector<64x32xf32>
    %455 = arith.mulf %442, %454 : vector<64x32xf32>
    %c0_134 = arith.constant 0 : index
    %c0_135 = arith.constant 0 : index
    %456 = vector.load %arg23[%c0_134, %c0_135] : memref<32x32xbf16, #tpu.memory_space<vmem>>, vector<32x32xbf16>
    %457 = arith.truncf %455 : vector<64x32xf32> to vector<64x32xbf16>
    %cst_136 = arith.constant dense<0.000000e+00> : vector<64x32xf32>
    %458 = tpu.matmul %457, %456, %cst_136 {dimension_numbers = #tpu.dot_dimension_numbers<[1], [0], [0], [1], [0, 0, 1, 1], [], []>} : vector<64x32xbf16>, vector<32x32xbf16>, vector<64x32xf32> -> vector<64x32xf32>
    %459 = arith.addf %414, %458 : vector<64x32xf32>
    %460 = vector.extract_strided_slice %4 {offsets = [17, 0], sizes = [1, 32], strides = [1, 1]} : vector<18x128xf32> to vector<1x32xf32>
    %461 = vector.broadcast %460 : vector<1x32xf32> to vector<64x32xf32>
    %462 = arith.addf %459, %461 : vector<64x32xf32>
    %c0_137 = arith.constant 0 : index
    %c0_138 = arith.constant 0 : index
    %463 = vector.load %arg25[%c0_137, %c0_138] : memref<64x32xf32, #tpu.memory_space<vmem>>, vector<64x32xf32>
    tpu.vector_store %arg25[%c0_137, %c0_138], %462 {strides = array<i32>} : memref<64x32xf32, #tpu.memory_space<vmem>>, vector<64x32xf32>,
    return
  }
  func.func @transform_0(%arg0: i32) -> (i32, i32) {
    %c0_i32 = arith.constant 0 : i32
    %c0_i32_0 = arith.constant 0 : i32
    return %arg0, %c0_i32 : i32, i32
  }
  func.func @transform_1(%arg0: i32) -> (i32, i32) {
    %c0_i32 = arith.constant 0 : i32
    %c0_i32_0 = arith.constant 0 : i32
    return %arg0, %c0_i32 : i32, i32
  }
  func.func @transform_2(%arg0: i32) -> (i32, i32) {
    %c0_i32 = arith.constant 0 : i32
    %c0_i32_0 = arith.constant 0 : i32
    return %arg0, %c0_i32 : i32, i32
  }
  func.func @transform_3(%arg0: i32) -> (i32, i32) {
    %c0_i32 = arith.constant 0 : i32
    %c0_i32_0 = arith.constant 0 : i32
    %c0_i32_1 = arith.constant 0 : i32
    return %c0_i32, %c0_i32_0 : i32, i32
  }
  func.func @transform_4(%arg0: i32) -> (i32, i32) {
    %c0_i32 = arith.constant 0 : i32
    %c0_i32_0 = arith.constant 0 : i32
    %c0_i32_1 = arith.constant 0 : i32
    return %c0_i32, %c0_i32_0 : i32, i32
  }
  func.func @transform_5(%arg0: i32) -> (i32, i32) {
    %c0_i32 = arith.constant 0 : i32
    %c0_i32_0 = arith.constant 0 : i32
    %c0_i32_1 = arith.constant 0 : i32
    return %c0_i32, %c0_i32_0 : i32, i32
  }
  func.func @transform_6(%arg0: i32) -> (i32, i32) {
    %c0_i32 = arith.constant 0 : i32
    %c0_i32_0 = arith.constant 0 : i32
    %c0_i32_1 = arith.constant 0 : i32
    return %c0_i32, %c0_i32_0 : i32, i32
  }
  func.func @transform_7(%arg0: i32) -> (i32, i32) {
    %c0_i32 = arith.constant 0 : i32
    %c0_i32_0 = arith.constant 0 : i32
    %c0_i32_1 = arith.constant 0 : i32
    return %c0_i32, %c0_i32_0 : i32, i32
  }
  func.func @transform_8(%arg0: i32) -> (i32, i32) {
    %c0_i32 = arith.constant 0 : i32
    %c0_i32_0 = arith.constant 0 : i32
    %c0_i32_1 = arith.constant 0 : i32
    return %c0_i32, %c0_i32_0 : i32, i32
  }
  func.func @transform_9(%arg0: i32) -> (i32, i32) {
    %c0_i32 = arith.constant 0 : i32
    %c0_i32_0 = arith.constant 0 : i32
    %c0_i32_1 = arith.constant 0 : i32
    return %c0_i32, %c0_i32_0 : i32, i32
  }
  func.func @transform_10(%arg0: i32) -> (i32, i32) {
    %c0_i32 = arith.constant 0 : i32
    %c0_i32_0 = arith.constant 0 : i32
    %c0_i32_1 = arith.constant 0 : i32
    return %c0_i32, %c0_i32_0 : i32, i32
  }
  func.func @transform_11(%arg0: i32) -> (i32, i32) {
    %c0_i32 = arith.constant 0 : i32
    %c0_i32_0 = arith.constant 0 : i32
    %c0_i32_1 = arith.constant 0 : i32
    return %c0_i32, %c0_i32_0 : i32, i32
  }
  func.func @transform_12(%arg0: i32) -> (i32, i32) {
    %c0_i32 = arith.constant 0 : i32
    %c0_i32_0 = arith.constant 0 : i32
    %c0_i32_1 = arith.constant 0 : i32
    return %c0_i32, %c0_i32_0 : i32, i32
  }
  func.func @transform_13(%arg0: i32) -> (i32, i32) {
    %c0_i32 = arith.constant 0 : i32
    %c0_i32_0 = arith.constant 0 : i32
    %c0_i32_1 = arith.constant 0 : i32
    return %c0_i32, %c0_i32_0 : i32, i32
  }
  func.func @transform_14(%arg0: i32) -> (i32, i32) {
    %c0_i32 = arith.constant 0 : i32
    %c0_i32_0 = arith.constant 0 : i32
    %c0_i32_1 = arith.constant 0 : i32
    return %c0_i32, %c0_i32_0 : i32, i32
  }
  func.func @transform_15(%arg0: i32) -> (i32, i32) {
    %c0_i32 = arith.constant 0 : i32
    %c0_i32_0 = arith.constant 0 : i32
    %c0_i32_1 = arith.constant 0 : i32
    return %c0_i32, %c0_i32_0 : i32, i32
  }
  func.func @transform_16(%arg0: i32) -> (i32, i32) {
    %c0_i32 = arith.constant 0 : i32
    %c0_i32_0 = arith.constant 0 : i32
    %c0_i32_1 = arith.constant 0 : i32
    return %c0_i32, %c0_i32_0 : i32, i32
  }
  func.func @transform_17(%arg0: i32) -> (i32, i32) {
    %c0_i32 = arith.constant 0 : i32
    %c0_i32_0 = arith.constant 0 : i32
    %c0_i32_1 = arith.constant 0 : i32
    return %c0_i32, %c0_i32_0 : i32, i32
  }
  func.func @transform_18(%arg0: i32) -> (i32, i32) {
    %c0_i32 = arith.constant 0 : i32
    %c0_i32_0 = arith.constant 0 : i32
    %c0_i32_1 = arith.constant 0 : i32
    return %c0_i32, %c0_i32_0 : i32, i32
  }
  func.func @transform_19(%arg0: i32) -> (i32, i32) {
    %c0_i32 = arith.constant 0 : i32
    %c0_i32_0 = arith.constant 0 : i32
    %c0_i32_1 = arith.constant 0 : i32
    return %c0_i32, %c0_i32_0 : i32, i32
  }
  func.func @transform_20(%arg0: i32) -> (i32, i32) {
    %c0_i32 = arith.constant 0 : i32
    %c0_i32_0 = arith.constant 0 : i32
    %c0_i32_1 = arith.constant 0 : i32
    return %c0_i32, %c0_i32_0 : i32, i32
  }
  func.func @transform_21(%arg0: i32) -> (i32, i32) {
    %c0_i32 = arith.constant 0 : i32
    %c0_i32_0 = arith.constant 0 : i32
    %c0_i32_1 = arith.constant 0 : i32
    return %c0_i32, %c0_i32_0 : i32, i32
  }
  func.func @transform_22(%arg0: i32) -> (i32, i32) {
    %c0_i32 = arith.constant 0 : i32
    %c0_i32_0 = arith.constant 0 : i32
    %c0_i32_1 = arith.constant 0 : i32
    return %c0_i32, %c0_i32_0 : i32, i32
  }
  func.func @transform_23(%arg0: i32) -> (i32, i32) {
    %c0_i32 = arith.constant 0 : i32
    %c0_i32_0 = arith.constant 0 : i32
    %c0_i32_1 = arith.constant 0 : i32
    return %c0_i32, %c0_i32_0 : i32, i32
  }
  func.func @transform_24(%arg0: i32) -> (i32, i32) {
    %c0_i32 = arith.constant 0 : i32
    %c0_i32_0 = arith.constant 0 : i32
    return %arg0, %c0_i32 : i32, i32
  }
}

</mosaic_0001>

<bundles_post_ra>
// kernel: squeeze.2
= control target key start
LH: loop header
LB: loop body
LE: loop exit
PB: predicated region body
PF: predicated region fallthrough
CT: control target
= control target key end

     0   :  { %s59_s10 = smov 42   ;;  %s60_s11 = smov 28   ;;  %vm3_vm0 = vcmask 56320   ;;  %vm9_vm1 = vcmask 400720   ;;  %vm15_vm2 = vcmask 343320   ;;  %vm21_vm3 = vcmask 285920   ;;  %s99_s0 = inlined_call_operand.vmem [shape: f32[7,7], index: 0, kind: input, shape index: {}]   ;;  %s100_s1 = inlined_call_operand.vmem [shape: f32[49], index: 1, kind: output, shape index: {}]  }
   0x1   :  { %v47_v0 = vld [vmem:[%s99_s0 + $0x6] sm:$0x1]   ;;  %v49_v1 = vld [vmem:[%s99_s0 + $0x4] sm:$0x1]   ;;  %v51_v2 = vld [vmem:[%s99_s0 + $0x2] sm:$0x1]  }
   0x2   :  { %7 = vrot.lane.b32.xlu0 %v47_v0, %s59_s10  ;;  %19 = vrot.lane.b32.xlu1 %v49_v1, %s60_s11  ;;  %s61_s14 = smov 14   ;;  %v48_v3 = vld [vmem:[%s99_s0 + $0x5] sm:$0x1]   ;;  %v50_v4 = vld [vmem:[%s99_s0 + $0x3] sm:$0x1]   ;;  %s62_s21 = smov 35  }
   0x3   :  { %31 = vrot.lane.b32.xlu2 %v51_v2, %s61_s14  ;;  %v52_v5 = vld [vmem:[%s99_s0 + $0x1] sm:$0x1]   ;;  %s63_s22 = smov 21   ;;  %s64_s23 = smov 7   ;;  %v2_v6 = vld [vmem:[%s99_s0] sm:$0x1]  }
   0x4   :  { %4 = vst.msk [vmem:[#allocation0] sm:$0x1] %vm3_vm0, %v2_v6   ;;  %vm27_vm4 = vcmask 228520   ;;  %vm33_vm5 = vcmask 171120   ;;  %vm39_vm6 = vcmask 113720  }
   0xa   :  { %13 = vrot.lane.b32.xlu0 %v48_v3, %s62_s21  ;;  %25 = vrot.lane.b32.xlu1 %v50_v4, %s63_s22 }
   0xb   :  { %37 = vrot.lane.b32.xlu2 %v52_v5, %s64_s23 }
  0x5d   :  { %v32_v7 = vpop.permute.xlu2 %31  }
  0x65   :  { %v38_v8 = vpop.permute.xlu2 %37  }
  0x74   :  { %v8_v9 = vpop.permute.xlu0 %7   ;;  %v20_v10 = vpop.permute.xlu1 %19  }
  0x75   :  { %10 = vst.msk [vmem:[#allocation0] sm:$0x1] %vm9_vm1, %v8_v9  }
  0x7c   :  { %v14_v11 = vpop.permute.xlu0 %13   ;;  %v26_v12 = vpop.permute.xlu1 %25  }
  0x7d   :  { %16 = vst.msk [vmem:[#allocation0] sm:$0x1] %vm15_vm2, %v14_v11  }
  0x7e   :  { %22 = vst.msk [vmem:[#allocation0] sm:$0x1] %vm21_vm3, %v20_v10  }
  0x7f   :  { %28 = vst.msk [vmem:[#allocation0] sm:$0x1] %vm27_vm4, %v26_v12  }
  0x80   :  { %34 = vst.msk [vmem:[#allocation0] sm:$0x1] %vm33_vm5, %v32_v7  }
  0x81   :  { %40 = vst.msk [vmem:[#allocation0] sm:$0x1] %vm39_vm6, %v38_v8  }
  0x88   :  { %v43_v13 = vld [vmem:[#allocation0] sm:$0x1] }
  0x89   :  { %46 = vst [vmem:[%s100_s1] sm:$0x1] %v43_v13 }

// kernel: fem_forward.1
= control target key start
LH: loop header
LB: loop body
LE: loop exit
PB: predicated region body
PF: predicated region fallthrough
CT: control target
= control target key end

     0   :  { %s9981_s0 = inlined_call_operand.vmem [shape: f32[128,16], index: 0, kind: input, shape index: {}]   ;;  %s9982_s1 = inlined_call_operand.vmem [shape: f32[128,16], index: 1, kind: input, shape index: {}]   ;;  %s9983_s2 = inlined_call_operand.vmem [shape: f32[128,32], index: 2, kind: input, shape index: {}]   ;;  %s9984_s3 = inlined_call_operand.vmem [shape: bf16[64,64], index: 3, kind: input, shape index: {}]   ;;  %s9985_s4 = inlined_call_operand.vmem [shape: bf16[64,64], index: 4, kind: input, shape index: {}]   ;;  %s9986_s5 = inlined_call_operand.vmem [shape: bf16[16,4], index: 5, kind: input, shape index: {}]   ;;  %s9987_s6 = inlined_call_operand.vmem [shape: bf16[4,16], index: 6, kind: input, shape index: {}]   ;;  %s9988_s7 = inlined_call_operand.vmem [shape: f32[64,9], index: 7, kind: input, shape index: {}]   ;;  %s9989_s8 = inlined_call_operand.vmem [shape: bf16[16,144], index: 8, kind: input, shape index: {}]   ;;  %s9990_s9 = inlined_call_operand.vmem [shape: bf16[16,144], index: 9, kind: input, shape index: {}]   ;;  %s9991_s10 = inlined_call_operand.vmem [shape: bf16[16,288], index: 10, kind: input, shape index: {}]   ;;  %s9992_s11 = inlined_call_operand.vmem [shape: bf16[16,288], index: 11, kind: input, shape index: {}]   ;;  %s9993_s12 = inlined_call_operand.vmem [shape: bf16[16,288], index: 12, kind: input, shape index: {}]   ;;  %s9994_s13 = inlined_call_operand.vmem [shape: bf16[32,144], index: 13, kind: input, shape index: {}]   ;;  %s9995_s14 = inlined_call_operand.vmem [shape: bf16[16,144], index: 14, kind: input, shape index: {}]   ;;  %s9996_s15 = inlined_call_operand.vmem [shape: bf16[32,32], index: 15, kind: input, shape index: {}]   ;;  %s9997_s16 = inlined_call_operand.vmem [shape: bf16[16,32], index: 16, kind: input, shape index: {}]   ;;  %s9998_s17 = inlined_call_operand.vmem [shape: bf16[32,32], index: 17, kind: input, shape index: {}]   ;;  %s9999_s18 = inlined_call_operand.vmem [shape: bf16[32,96], index: 18, kind: input, shape index: {}]   ;;  %s10000_s19 = inlined_call_operand.vmem [shape: bf16[32,16], index: 19, kind: input, shape index: {}]   ;;  %s10001_s20 = inlined_call_operand.vmem [shape: bf16[32,32], index: 20, kind: input, shape index: {}]   ;;  %s10002_s21 = inlined_call_operand.vmem [shape: bf16[32,32], index: 21, kind: input, shape index: {}]   ;;  %s10003_s22 = inlined_call_operand.vmem [shape: bf16[32,32], index: 22, kind: input, shape index: {}]   ;;  %s10004_s23 = inlined_call_operand.vmem [shape: f32[18,128], index: 23, kind: input, shape index: {}]   ;;  %s10005_s24 = inlined_call_operand.vmem [shape: f32[128,32], index: 24, kind: output, shape index: {}]  }
   0x1   :  { %10243 = sst [smem:[#allocation76_spill]] %s9981_s0 }
   0x2   :  { %10244 = sst [smem:[#allocation77_spill]] %s9982_s1 }
   0x3   :  { %10245 = sst [smem:[#allocation78_spill]] %s9983_s2 }
   0x4   :  { %10246 = sst [smem:[#allocation79_spill]] %s9984_s3 }
   0x5   :  { %10247 = sst [smem:[#allocation80_spill]] %s9985_s4 }
   0x6   :  { %10248 = sst [smem:[#allocation81_spill]] %s9986_s5  ;;  %s6425_s5 = smov 0  }
   0x7   :  { %10249 = sst [smem:[#allocation82_spill]] %s9987_s6 }
   0x8   :  { %10250 = sst [smem:[#allocation83_spill]] %s9988_s7 }
   0x9   :  { %10251 = sst [smem:[#allocation84_spill]] %s9989_s8 }
   0xa   :  { %10252 = sst [smem:[#allocation85_spill]] %s9990_s9 }
   0xb   :  { %10253 = sst [smem:[#allocation86_spill]] %s9991_s10 }
   0xc   :  { %10254 = sst [smem:[#allocation87_spill]] %s9992_s11 }
   0xd LB: > { %s5646_s26 = sadd.s32 4294967295, %s6280_s5   ;;  %p5650_p0 = scmp.ge.s32.totalorder %s6280_s5, 1  ;;  %s6280_s5 = sphi %s6425_s5, %s34_s5  }
   0xe   : > { %p685_p1 = scmp.lt.s32.totalorder %s6280_s5, 3 }
  0x10   : > { %p686_p2 = pnand %p5650_p0, %p685_p1 }
  0x12   : > { %689 = sbr.rel (%p686_p2) target bundleno = 4206 (0x106e), region = 116 }
  0x17   : > { %s5651_s27 = sshll.u32 %s5646_s26, 3  ;;  %vm821_vm0 = vcmask 130048   ;;  %s10255_s29 = sld [smem:[#allocation76_spill]]  ;;  %v6282_v23 = vmov 64.0   ;;  %vm929_vm3 = vcmask 523264   ;;  %vm1285_vm4 = vcmask 1041408  }
  0x18   : > { %p762_p3 = scmp.lt.s32.totalorder %s5651_s27, 15  ;;  %s10256_s3 = sld [smem:[#allocation77_spill]]  ;;  %6101 = vrcp.f32 %v6282_v23  ;;  %vm1281_vm5 = vcmask 31744  }
  0x19   : > { %s10257_s1 = sld [smem:[#allocation81_spill]]  ;;  %s10035_s7 = smov 112  }
  0x1a   : > { %s10670_s27 = smov (!%p762_p3, %s5651_s27), 15  ;;  %s10258_s6 = sld [smem:[#allocation80_spill]] }
  0x1b   : > { %s6433_s28 = sshll.u32 %s10670_s27, 3  ;;  %s10259_s4 = sld [smem:[#allocation79_spill]] }
  0x1c   : > { %s10260_s30 = sld [smem:[#allocation82_spill]]  ;;  %s10033_s8 = smov 32  }
  0x1d   : > { %s6439_s0 = scalar_lea.vmem %s10255_s29, %s6433_s28  ;;  %s10261_s29 = sld [smem:[#allocation83_spill]] }
  0x1e   : > { %v6442_v0 = vld [vmem:[%s6439_s0 + $0x30] sm:$0xff]  ;;  %v6445_v1 = vld [vmem:[%s6439_s0 + $0x20] sm:$0xff]  ;;  %v6457_v6 = vld [vmem:[%s6439_s0 + $0x38] sm:$0xff]  ;;  %s6469_s25 = scalar_lea.vmem %s10256_s3, %s6433_s28  ;;  %v6102_v47 = vpop.eup %6101  ;;  %s10264_s27 = sld [smem:[#allocation84_spill]] }
  0x1f   : > { %v6448_v2 = vld [vmem:[%s6439_s0 + $0x10] sm:$0xff]  ;;  %v879_v3 = vsel %vm821_vm0, %v6442_v0, -inf  ;;  %v873_v4 = vsel %vm821_vm0, %v6445_v1, -inf  ;;  %v6460_v7 = vld [vmem:[%s6439_s0 + $0x28] sm:$0xff]  ;;  %v6463_v8 = vld [vmem:[%s6439_s0 + $0x18] sm:$0xff]  ;;  %v882_v9 = vsel %vm821_vm0, %v6457_v6, -inf  ;;  %vm1210_vm1 = vweird.f32 %v6102_v47 }
  0x20   : > { %v867_v5 = vsel %vm821_vm0, %v6448_v2, -inf  ;;  %880 = vmax.xlane.f32.xlu0 %v879_v3  ;;  %874 = vmax.xlane.f32.xlu1 %v873_v4  ;;  %v876_v10 = vsel %vm821_vm0, %v6460_v7, -inf  ;;  %v870_v11 = vsel %vm821_vm0, %v6463_v8, -inf  ;;  %v6478_v12 = vld [vmem:[%s6439_s0 + $0x8] sm:$0xff]  ;;  %v6481_v13 = vld [vmem:[%s6439_s0] sm:$0xff]  ;;  %v840_v17 = vsel %vm821_vm0, %v6442_v0, 0.0 }
  0x21   : > { %868 = vmax.xlane.f32.xlu2 %v867_v5  ;;  %v5971_v14 = vld [vmem:[%s10257_s1] sm:$0xff]  ;;  %v795_v16 = vld [vmem:[%s6469_s25 + $0x8] sm:$0xff]  ;;  %v796_v18 = vld [vmem:[%s6469_s25 + $0x10] sm:$0xff]  ;;  %v864_v24 = vsel %vm821_vm0, %v6478_v12, -inf  ;;  %v861_v30 = vsel %vm821_vm0, %v6481_v13, -inf  ;;  %v1206_v52 = vmul.f32 64.0, %v6102_v47 }
  0x22   : > { %v794_v15 = vld [vmem:[%s6469_s25] sm:$0xff]  ;;  %v797_v19 = vld [vmem:[%s6469_s25 + $0x18] sm:$0xff]  ;;  %v1185_v22 = vsel %vm821_vm0, %v795_v16, 0.0  ;;  %1254 = vmatpush.bf16.msra.mxu2 %v5971_v14  ;;  %1273 = vmatpush.bf16.msra.mxu3 %v5971_v14  ;;  %v800_v25 = vld [vmem:[%s6469_s25 + $0x30] sm:$0xff]  ;;  %v1187_v28 = vsel %vm821_vm0, %v796_v18, 0.0  ;;  %v1214_v33 = vsel %vm821_vm0, %v795_v16, -inf }
  0x23   : > { %v798_v20 = vld [vmem:[%s6469_s25 + $0x20] sm:$0xff]  ;;  %v1184_v21 = vsel %vm821_vm0, %v794_v15, 0.0  ;;  %v801_v26 = vld [vmem:[%s6469_s25 + $0x38] sm:$0xff]  ;;  %v1213_v29 = vsel %vm821_vm0, %v794_v15, -inf  ;;  %v1189_v31 = vsel %vm821_vm0, %v797_v19, 0.0  ;;  %v799_v34 = vld [vmem:[%s6469_s25 + $0x28] sm:$0xff] }
  0x24   : > { %v1186_v27 = vadd.f32 %v1185_v22, %v1184_v21  ;;  %v1191_v32 = vsel %vm821_vm0, %v798_v20, 0.0  ;;  %v1215_v36 = vsel %vm821_vm0, %v796_v18, -inf  ;;  %v1216_v37 = vsel %vm821_vm0, %v797_v19, -inf  ;;  %s10272_s9 = sld [smem:[#allocation85_spill]]  ;;  %s10048_s3 = smov 48  }
  0x25   : > { %v1217_v38 = vsel %vm821_vm0, %v798_v20, -inf  ;;  %v1219_v40 = vsel %vm821_vm0, %v799_v34, -inf  ;;  %v1221_v41 = vsel %vm821_vm0, %v800_v25, -inf  ;;  %v1223_v42 = vsel %vm821_vm0, %v801_v26, -inf  ;;  %s10084_s1 = smov 16   ;;  %s10325_s11 = sld [smem:[#allocation87_spill]] }
  0x26   : > { %v1188_v35 = vadd.f32 %v1187_v28, %v1186_v27  ;;  %v1218_v39 = vmax.f32 %v1213_v29, %v1217_v38  ;;  %v1220_v44 = vmax.f32 %v1214_v33, %v1219_v40  ;;  %v1222_v45 = vmax.f32 %v1215_v36, %v1221_v41  ;;  %s10344_s10 = sld [smem:[#allocation86_spill]]  ;;  %s10535_s26 = smov 80  }
  0x27   : > { %v1224_v46 = vmax.f32 %v1216_v37, %v1223_v42  ;;  %v1193_v48 = vsel %vm821_vm0, %v799_v34, 0.0  ;;  %v1195_v51 = vsel %vm821_vm0, %v800_v25, 0.0  ;;  %v1197_v55 = vsel %vm821_vm0, %v801_v26, 0.0 }
  0x28   : > { %883 = vmax.xlane.f32.xlu0 %v882_v9  ;;  %877 = vmax.xlane.f32.xlu1 %v876_v10  ;;  %v1190_v43 = vadd.f32 %v1189_v31, %v1188_v35  ;;  %v1225_v50 = vmax.f32 %v1218_v39, %v1220_v44  ;;  %v834_v58 = vsel %vm821_vm0, %v6445_v1, 0.0  ;;  %v843_v59 = vsel %vm821_vm0, %v6457_v6, 0.0 }
  0x29   : > { %871 = vmax.xlane.f32.xlu2 %v870_v11  ;;  %v1226_v53 = vmax.f32 %v1222_v45, %v1224_v46  ;;  %v1207_v60 = vsub.f32 1.0, %v1206_v52  ;;  %v837_v62 = vsel %vm821_vm0, %v6460_v7, 0.0  ;;  %v831_v15 = vsel %vm821_vm0, %v6463_v8, 0.0 }
  0x2a   : > { %v1192_v49 = vadd.f32 %v1191_v32, %v1190_v43  ;;  %v828_v16 = vsel %vm821_vm0, %v6448_v2, 0.0  ;;  %v822_v19 = vsel %vm821_vm0, %v6481_v13, 0.0  ;;  %v825_v27 = vsel %vm821_vm0, %v6478_v12, 0.0 }
  0x2b   : > { %v1227_v56 = vmax.f32 %v1225_v50, %v1226_v53  ;;  %v1208_v5 = vmul.f32 %v6102_v47, %v1207_v60  ;;  %v6283_v29 = vmov 16.0   ;;  %v5967_v50 = vld [vmem:[%s10258_s6] sm:$0xff] }
  0x2c   : > { %v1194_v54 = vadd.f32 %v1193_v48, %v1192_v49  ;;  %6103 = vrcp.f32 %v6283_v29  ;;  %v5969_v49 = vld [vmem:[%s10258_s6 + $0x10] sm:$0xff]  ;;  %v5966_v29 = vld [vmem:[%s10259_s4 + $0x18] sm:$0xff] }
  0x2d   : > { %v1228_v61 = vrot.slane %v1227_v56, 4 }
  0x2e   : > { %v1196_v57 = vadd.f32 %v1195_v51, %v1194_v54 }
  0x2f   : > { %v1229_v3 = vmax.f32 %v1227_v56, %v1228_v61 }
  0x30   : > { %865 = vmax.xlane.f32.xlu1 %v864_v24  ;;  %862 = vmax.xlane.f32.xlu0 %v861_v30  ;;  %v1198_v63 = vadd.f32 %v1197_v55, %v1196_v57 }
  0x31   : > { %841 = vadd.xlane.f32.xlu2 %v840_v17  ;;  %v1230_v9 = vrot.slane %v1229_v3, 2  ;;  %v1209_v17 = vadd.f32 %v6102_v47, %v1208_v5  ;;  %v5970_v5 = vld [vmem:[%s10258_s6 + $0x18] sm:$0xff] }
  0x32   : > { %v1199_v4 = vrot.slane %v1198_v63, 4  ;;  %v6104_v32 = vpop.eup %6103 }
  0x33   : > { %v1231_v11 = vmax.f32 %v1229_v3, %v1230_v9  ;;  %v1211_v23 = vsel %vm1210_vm1, %v6102_v47, %v1209_v17  ;;  %v847_v34 = vmul.f32 16.0, %v6104_v32  ;;  %vm851_vm2 = vweird.f32 %v6104_v32 }
  0x34   : > { %v1200_v10 = vadd.f32 %v1199_v4, %v1198_v63 }
  0x35   : > { %v1232_v18 = vrot.slane %v1231_v11, 1  ;;  %v848_v37 = vsub.f32 1.0, %v847_v34 }
  0x36   : > { %v1201_v14 = vrot.slane %v1200_v10, 2 }
  0x37   : > { %v1233_v21 = vmax.f32 %v1231_v11, %v1232_v18  ;;  %v849_v40 = vmul.f32 %v6104_v32, %v848_v37 }
  0x38   : > { %835 = vadd.xlane.f32.xlu1 %v834_v58  ;;  %844 = vadd.xlane.f32.xlu0 %v843_v59  ;;  %v1202_v20 = vadd.f32 %v1201_v14, %v1200_v10 }
  0x39   : > { %838 = vadd.xlane.f32.xlu2 %v837_v62  ;;  %v1262_v24 = vpack.c.bf16 %v1233_v21, %v1233_v21  ;;  %v850_v44 = vadd.f32 %v6104_v32, %v849_v40  ;;  %v5964_v21 = vld [vmem:[%s10259_s4 + $0x8] sm:$0xff]  ;;  %v10020_v40 = vmov 7  }
  0x3a   : > { %v1203_v22 = vrot.slane %v1202_v20, 1 }
  0x3b   : > { %5712 = vmatmul.msk.bf16.vlgmr.msra.gmra.mxu3 %vm821_vm0, %v1262_v24  ;;  %v852_v48 = vsel %vm851_vm2, %v6104_v32, %v850_v44  ;;  %v1236_v24 = vld [vmem:[%s10260_s30] sm:$0x3]  ;;  %v6284_v32 = vmov 1   ;;  %s10055_s30 = smov 80  }
  0x3c   : > { %v1204_v25 = vadd.f32 %v1203_v22, %v1202_v20  ;;  %6038 = vset.pattern.permute.xlu2 %v6284_v32 }
  0x3e   : > { %v1212_v26 = vmul.f32 %v1211_v23, %v1204_v25 }
  0x40   : > { %832 = vadd.xlane.f32.xlu1 %v831_v15  ;;  %829 = vadd.xlane.f32.xlu0 %v828_v16  ;;  %v1237_v28 = vpack.c.bf16 %v1212_v26, %v1212_v26  ;;  %v5963_v15 = vld [vmem:[%s10259_s4] sm:$0xff]  ;;  %v5968_v16 = vld [vmem:[%s10258_s6 + $0x8] sm:$0xff] }
  0x41   : > { %823 = vadd.xlane.f32.xlu2 %v822_v19 }
  0x42   : > { %5711 = vmatmul.msk.bf16.vlgmr.msra.gmra.mxu2 %vm821_vm0, %v1237_v28  ;;  %v5965_v28 = vld [vmem:[%s10259_s4 + $0x10] sm:$0xff]  ;;  %s10050_s4 = smov 64  }
  0x48   : > { %826 = vadd.xlane.f32.xlu0 %v825_v27  ;;  %v1287_v27 = vsel %vm1285_vm4, %v1236_v24, 0 }
  0x49   : > { %1296 = vmatpush.bf16.msrb.mxu2 %v1287_v27  ;;  %1312 = vmatpush.bf16.msrb.mxu3 %v1287_v27 }
  0x93   : > { %v881_v30 = vpop.xlane.xlu0 %880  ;;  %v875_v31 = vpop.xlane.xlu1 %874 }
  0x94   : > { %v869_v33 = vpop.xlane.xlu2 %868 }
  0x9b   : > { %v884_v35 = vpop.xlane.xlu0 %883  ;;  %v878_v36 = vpop.xlane.xlu1 %877 }
  0x9c   : > { %v872_v38 = vpop.xlane.xlu2 %871  ;;  %v908_v39 = vpack.c.bf16 %v884_v35, %v881_v30  ;;  %v907_v41 = vpack.c.bf16 %v878_v36, %v875_v31  ;;  %v6570_v30 = vld [vmem:[%s10261_s29 + $0x8] sm:$0xff]  ;;  %v6575_v31 = vld [vmem:[%s10261_s29] sm:$0xff]  ;;  %v10016_v35 = vmov 2   ;;  %v10011_v36 = vmov 3  }
  0x9d   : > { %v906_v45 = vpack.c.bf16 %v872_v38, %v869_v33  ;;  %v6285_v33 = vmov 0   ;;  %1670 = vperm.xlu2 %6038, %v6570_v30   ;;  %v10013_v38 = vmov 5  }
  0x9e   : > { %946 = vmatpush.bf16.msra.mxu0 %v908_v39  ;;  %6006 = vmatpush.bf16.msra.mxu1 %v908_v39 }
  0x9f   : > { %6037 = vset.pattern.permute.xlu1 %v6285_v33 }
  0xa0   : > { %1587 = vperm.xlu1 %6037, %v6575_v31  }
  0xa2   : > { %947 = vmatpush.bf16.msra.mxu0 %v907_v41  ;;  %6007 = vmatpush.bf16.msra.mxu1 %v907_v41 }
  0xa3   : > { %v866_v42 = vpop.xlane.xlu1 %865  ;;  %v863_v43 = vpop.xlane.xlu0 %862 }
  0xa4   : > { %v842_v46 = vpop.xlane.xlu2 %841  ;;  %v905_v47 = vpack.c.bf16 %v866_v42, %v863_v43  ;;  %v10022_v42 = vmov 6  }
  0xa5   : > { %v859_v51 = vmul.f32 %v852_v48, %v842_v46  ;;  %6039 = vset.pattern.permute.xlu2 %v10016_v35  ;;  %6044 = vset.pattern.permute.xlu0 %v10022_v42 }
  0xa6   : > { %948 = vmatpush.bf16.msra.mxu0 %v906_v45  ;;  %6008 = vmatpush.bf16.msra.mxu1 %v906_v45 }
  0xa7   : > { %1759 = vperm.xlu2 %6039, %v6570_v30   ;;  %2051 = vperm.xlu0 %6044, %v6575_v31  }
  0xa8   : > { %6040 = vset.pattern.permute.xlu1 %v10011_v36 }
  0xa9   : > { %1843 = vperm.xlu1 %6040, %v6575_v31  }
  0xaa   : > { %949 = vmatpush.bf16.msra.mxu0 %v905_v47  ;;  %6009 = vmatpush.bf16.msra.mxu1 %v905_v47 }
  0xab   : > { %v836_v52 = vpop.xlane.xlu1 %835  ;;  %v845_v53 = vpop.xlane.xlu0 %844 }
  0xac   : > { %v857_v54 = vmul.f32 %v852_v48, %v836_v52  ;;  %v860_v55 = vmul.f32 %v852_v48, %v845_v53  ;;  %v839_v56 = vpop.xlane.xlu2 %838 }
  0xad   : > { %5677 = vmatmul.msk.bf16.vlgmr.msra.gmra.mxu1 %vm929_vm3, %v5969_v49  ;;  %v858_v57 = vmul.f32 %v852_v48, %v839_v56  ;;  %5675 = vmatmul.msk.bf16.vlgmr.msra.gmra.mxu0 %vm929_vm3, %v5967_v50 }
  0xae   : > { %v896_v58 = vpack.c.bf16 %v860_v55, %v859_v51 }
  0xaf   : > { %v895_v59 = vpack.c.bf16 %v858_v57, %v857_v54  ;;  %6041 = vset.pattern.permute.xlu2 %v10011_v36  ;;  %6047 = vset.pattern.permute.xlu0 %v10020_v40 }
  0xb0   : > { %1007 = vmatpush.bf16.msrb.mxu1 %v896_v58  ;;  %1847 = vperm.xlu2 %6041, %v6570_v30  }
  0xb1   : > { %6043 = vset.pattern.permute.xlu1 %v10013_v38  ;;  %2127 = vperm.xlu0 %6047, %v6570_v30  }
  0xb2   : > { %1967 = vperm.xlu1 %6043, %v6570_v30  }
  0xb3   : > { %v833_v60 = vpop.xlane.xlu1 %832  ;;  %v830_v61 = vpop.xlane.xlu0 %829 }
  0xb4   : > { %v856_v62 = vmul.f32 %v852_v48, %v833_v60  ;;  %v855_v63 = vmul.f32 %v852_v48, %v830_v61  ;;  %1008 = vmatpush.bf16.msrb.mxu1 %v895_v59  ;;  %v824_v4 = vpop.xlane.xlu2 %823 }
  0xb5   : > { %v853_v9 = vmul.f32 %v852_v48, %v824_v4 }
  0xb6   : > { %v894_v3 = vpack.c.bf16 %v856_v62, %v855_v63 }
  0xb8   : > { %1009 = vmatpush.bf16.msrb.mxu1 %v894_v3  ;;  %6042 = vset.pattern.permute.xlu2 %v10013_v38 }
  0xb9   : > { %1963 = vperm.xlu2 %6042, %v6575_v31   ;;  %6050 = vset.pattern.permute.xlu0 %v6285_v33 }
  0xba   : > { %6046 = vset.pattern.permute.xlu1 %v10020_v40 }
  0xbb   : > { %v827_v10 = vpop.xlane.xlu0 %826  ;;  %2123 = vperm.xlu1 %6046, %v6575_v31  }
  0xbc   : > { %v854_v11 = vmul.f32 %v852_v48, %v827_v10 }
  0xbd   : > { %5678 = vmatmul.msk.bf16.gmra.mxu1 %vm929_vm3, %v5970_v5  ;;  %5676 = vmatmul.msk.bf16.gmra.mxu0 %vm929_vm3, %v5968_v16 }
  0xbe   : > { %v893_v14 = vpack.c.bf16 %v854_v11, %v853_v9  ;;  %v1275_v18 = vpop.f32.mrf.mxu3 }
  0xbf   : > { %v1279_v23 = vmax.f32 %v1275_v18, 0.0 }
  0xc0   : > { %1010 = vmatpush.bf16.msrb.mxu1 %v893_v14 }
  0xc1   : > { %v1280_v26 = vpack.c.bf16 %v1279_v23, %v1279_v23  ;;  %6045 = vset.pattern.permute.xlu2 %v10022_v42 }
  0xc2   : > { %2055 = vperm.xlu2 %6045, %v6570_v30  }
  0xc3   : > { %5713 = vmatmul.msk.bf16.vlgmr.msrb.gmra.mxu2 %vm1281_vm5, %v1280_v26  ;;  %6048 = vset.pattern.permute.xlu1 %v6285_v33 }
  0xc5   : > { %v1256_v17 = vpop.f32.mrf.mxu2 }
  0xc6   : > { %v1277_v20 = vpop.f32.mrf.mxu3  ;;  %v1260_v22 = vmax.f32 %v1256_v17, 0.0 }
  0xc8   : > { %v1261_v25 = vpack.c.bf16 %v1260_v22, %v1260_v22 }
  0xca   : > { %5714 = vmatmul.msk.bf16.vlgmr.msrb.gmra.mxu3 %vm1281_vm5, %v1261_v25  ;;  %6049 = vset.pattern.permute.xlu2 %v6285_v33 }
  0xcd   : > { %5695 = vmatmul.msk.bf16.vlgmr.msrb.gmra.mxu1 %vm929_vm3, %v5963_v15  ;;  %v1258_v19 = vpop.f32.mrf.mxu2 }
  0xdd   : > { %5696 = vmatmul.msk.bf16.gmra.mxu1 %vm929_vm3, %v5964_v21 }
  0xed   : > { %5697 = vmatmul.msk.bf16.gmra.mxu1 %vm929_vm3, %v5965_v28 }
  0xfd   : > { %5698 = vmatmul.msk.bf16.gmra.mxu1 %vm929_vm3, %v5966_v29 }
 0x12a   : > { %v6581_v34 = vpop.f32.mrf.mxu1  ;;  %v951_v43 = vpop.f32.mrf.mxu0 }
 0x132   : > { %v6587_v37 = vpop.f32.mrf.mxu1  ;;  %v953_v47 = vpop.f32.mrf.mxu0 }
 0x13a   : > { %v6593_v39 = vpop.f32.mrf.mxu1  ;;  %v956_v54 = vpop.f32.mrf.mxu0 }
 0x142   : > { %v6599_v41 = vpop.f32.mrf.mxu1 }
 0x146   : > { %v1298_v9 = vpop.f32.mrf.mxu2 }
 0x14a   : > { %v1012_v44 = vpop.f32.mrf.mxu1 }
 0x14b   : > { %v1013_v45 = vadd.f32 %v1012_v44, %v951_v43 }
 0x14d   : > { %v5699_v46 = vmul.f32 -1.442695, %v1013_v45  ;;  %v1314_v10 = vpop.f32.mrf.mxu3 }
 0x14e   : > { %v1315_v16 = vadd.f32 %v1314_v10, %v1298_v9  ;;  %v1300_v27 = vpop.f32.mrf.mxu2 }
 0x14f   : > { %6105 = vpow2.f32 %v5699_v46 }
 0x150   : > { %v5715_v21 = vmul.f32 -1.442695, %v1315_v16 }
 0x152   : > { %v1014_v48 = vpop.f32.mrf.mxu1 }
 0x153   : > { %v1015_v49 = vadd.f32 %v1014_v48, %v953_v47  ;;  %v10018_v48 = vmov 8  }
 0x155   : > { %v6106_v50 = vpop.eup %6105  ;;  %v5700_v51 = vmul.f32 -1.442695, %v1015_v49  ;;  %v1316_v28 = vpop.f32.mrf.mxu3 }
 0x156   : > { %v1056_v52 = vadd.f32 1.0, %v6106_v50 }
 0x157   : > { %6107 = vpow2.f32 %v5700_v51 }
 0x158   : > { %6109 = vrcp.f32 %v1056_v52  ;;  %v1075_v62 = vand.u32 2147483648, %v1056_v52  ;;  %v1073_v3 = vand.u32 2147483647, %v1056_v52  ;;  %vm1069_vm7 = vweird.f32 %v1056_v52 }
 0x15a   : > { %v1017_v53 = vpop.f32.mrf.mxu1  ;;  %v1076_v14 = vor.u32 1.1754944e-38, %v1075_v62  ;;  %vm1074_vm9 = vcmp.eq.f32.partialorder %v1073_v3, 8.507059e+37 }
 0x15b   : > { %v1018_v55 = vadd.f32 %v1017_v53, %v956_v54 }
 0x15d   : > { %v6108_v56 = vpop.eup %6107  ;;  %v5701_v57 = vmul.f32 -1.442695, %v1018_v55 }
 0x15e   : > { %v6110_v58 = vpop.eup %6109  ;;  %v1057_v59 = vadd.f32 1.0, %v6108_v56 }
 0x15f   : > { %v1065_v60 = vmul.f32 %v6110_v58, %v1056_v52  ;;  %6111 = vpow2.f32 %v5701_v57  ;;  %vm1070_vm6 = vweird.f32 %v6110_v58 }
 0x160   : > { %6113 = vrcp.f32 %v1057_v59  ;;  %vm1071_vm8 = vmor %vm1069_vm7, %vm1070_vm6  ;;  %v1090_v23 = vand.u32 2147483648, %v1057_v59  ;;  %v1088_v25 = vand.u32 2147483647, %v1057_v59  ;;  %vm1084_vm11 = vweird.f32 %v1057_v59 }
 0x161   : > { %v1066_v61 = vsub.f32 1.0, %v1065_v60 }
 0x162   : > { %v6610_v19 = vpop.f32.mrf.mxu1  ;;  %v1091_v43 = vor.u32 1.1754944e-38, %v1090_v23  ;;  %vm1089_vm13 = vcmp.eq.f32.partialorder %v1088_v25, 8.507059e+37  ;;  %v958_v23 = vpop.f32.mrf.mxu0 }
 0x163   : > { %v1067_v63 = vmul.f32 %v6110_v58, %v1066_v61  ;;  %v1020_v28 = vadd.f32 %v6610_v19, %v958_v23  ;;  %v5972_v19 = vld [vmem:[%s10264_s27 + $0x4] sm:$0xf] }
 0x165   : > { %v6112_v4 = vpop.eup %6111  ;;  %v1068_v5 = vadd.f32 %v6110_v58, %v1067_v63 }
 0x166   : > { %v6114_v11 = vpop.eup %6113  ;;  %v1058_v15 = vadd.f32 1.0, %v6112_v4 }
 0x167   : > { %v1072_v17 = vsel %vm1071_vm8, %v6110_v58, %v1068_v5  ;;  %v1080_v18 = vmul.f32 %v6114_v11, %v1057_v59  ;;  %vm1085_vm10 = vweird.f32 %v6114_v11  ;;  %v6618_v58 = vld [vmem:[%s10261_s29 + $0x10] sm:$0xff] }
 0x168   : > { %v1077_v20 = vsel %vm1074_vm9, %v1076_v14, %v1072_v17  ;;  %6115 = vrcp.f32 %v1058_v15  ;;  %vm1086_vm12 = vmor %vm1084_vm11, %vm1085_vm10  ;;  %v1105_v51 = vand.u32 2147483648, %v1058_v15  ;;  %vm1099_vm14 = vweird.f32 %v1058_v15  ;;  %v5973_v14 = vld [vmem:[%s10264_s27 + $0x4] sm:$0xf0] }
 0x169   : > { %1348 = vperm.xlu1 %6048, %v1077_v20   ;;  %v1081_v22 = vsub.f32 1.0, %v1080_v18  ;;  %6117 = vpow2.f32 %v5715_v21  ;;  %v1103_v53 = vand.u32 2147483647, %v1058_v15 }
 0x16a   : > { %v1022_v52 = vpop.f32.mrf.mxu1  ;;  %v1106_v56 = vor.u32 1.1754944e-38, %v1105_v51 }
 0x16b   : > { %v1082_v24 = vmul.f32 %v6114_v11, %v1081_v22  ;;  %v1023_v55 = vadd.f32 %v1022_v52, %v6581_v34  ;;  %vm1104_vm2 = vcmp.eq.f32.partialorder %v1103_v53, 8.507059e+37 }
 0x16d   : > { %v1083_v26 = vadd.f32 %v6114_v11, %v1082_v24  ;;  %v5703_v61 = vmul.f32 -1.442695, %v1023_v55 }
 0x16e   : > { %v6116_v29 = vpop.eup %6115 }
 0x16f   : > { %v1087_v44 = vsel %vm1086_vm12, %v6114_v11, %v1083_v26  ;;  %v1095_v45 = vmul.f32 %v6116_v29, %v1058_v15  ;;  %v6118_v46 = vpop.eup %6117  ;;  %vm1100_vm15 = vweird.f32 %v6116_v29  ;;  %v5734_v11 = vld [vmem:[%s10264_s27] sm:$0xf]  ;;  %v6637_v15 = vld [vmem:[%s10261_s29 + $0x18] sm:$0xff] }
 0x170   : > { %v1092_v47 = vsel %vm1089_vm13, %v1091_v43, %v1087_v44  ;;  %v1321_v49 = vadd.f32 1.0, %v6118_v46  ;;  %vm1101_vm1 = vmor %vm1099_vm14, %vm1100_vm15  ;;  %v5735_v17 = vor.u32 %v5973_v14, %v5734_v11  ;;  %v5702_v43 = vmul.f32 -1.442695, %v1020_v28 }
 0x171   : > { %1353 = vperm.xlu2 %6049, %v1092_v47   ;;  %6053 = vset.pattern.permute.xlu1 %v10018_v48  ;;  %v1096_v50 = vsub.f32 1.0, %v1095_v45  ;;  %v5736_v45 = vld [vmem:[%s10264_s27 + $0x8] sm:$0xf0] }
 0x172   : > { %2191 = vperm.xlu1 %6053, %v6570_v30   ;;  %6119 = vrcp.f32 %v1321_v49  ;;  %v1333_v63 = vand.u32 2147483648, %v1321_v49  ;;  %vm1327_vm4 = vweird.f32 %v1321_v49  ;;  %v1331_v4 = vand.u32 2147483647, %v1321_v49  ;;  %1515 = vmatpush.bf16.msrb.mxu0 %v5735_v17  ;;  %v1024_v21 = vpop.f32.mrf.mxu1 }
 0x173   : > { %v1097_v54 = vmul.f32 %v6116_v29, %v1096_v50  ;;  %6121 = vpow2.f32 %v5703_v61  ;;  %v6670_v46 = vor.u32 %v5972_v19, %v5736_v45  ;;  %v1025_v55 = vadd.f32 %v1024_v21, %v6587_v37  ;;  %v6730_v21 = vld [vmem:[%s10261_s29 + $0x28] sm:$0xff] }
 0x174   : > { %v1334_v10 = vor.u32 1.1754944e-38, %v1333_v63  ;;  %vm1332_vm7 = vcmp.eq.f32.partialorder %v1331_v4, 8.507059e+37 }
 0x175   : > { %v1098_v57 = vadd.f32 %v6116_v29, %v1097_v54  ;;  %1544 = vmatpush.bf16.msra.mxu1 %v6670_v46 }
 0x177   : > { %v1102_v59 = vsel %vm1101_vm1, %v6116_v29, %v1098_v57  ;;  %v5704_v57 = vmul.f32 -1.442695, %v1025_v55  ;;  %v5718_v55 = vld [vmem:[%s10272_s9] sm:$0xf] }
 0x178   : > { %v6120_v60 = vpop.eup %6119  ;;  %v1107_v62 = vsel %vm1104_vm2, %v1106_v56, %v1102_v59  ;;  %v6688_v56 = vpop.permute.xlu2 %1670 }
 0x179   : > { %6052 = vset.pattern.permute.xlu2 %v10018_v48  ;;  %v1323_v34 = vmul.f32 %v6120_v60, %v1321_v49  ;;  %1358 = vperm.xlu0 %6050, %v1107_v62   ;;  %vm1328_vm5 = vweird.f32 %v6120_v60  ;;  %v6122_v20 = vpop.eup %6121  ;;  %10265 = vst [vmem:[#allocation2_spill] sm:$0xff] %v6688_v56 }
 0x17a   : > { %2187 = vperm.xlu2 %6052, %v6575_v31   ;;  %6055 = vset.pattern.permute.xlu1 %v6284_v32  ;;  %vm6624_vm6 = vmor %vm1327_vm4, %vm1328_vm5  ;;  %v6649_v25 = vadd.f32 1.0, %v6122_v20  ;;  %v1027_v44 = vpop.f32.mrf.mxu1 }
 0x17b   : > { %1674 = vperm.xlu1 %6055, %v6618_v58   ;;  %v1324_v3 = vsub.f32 1.0, %v1323_v34 }
 0x17c   : > { %6123 = vrcp.f32 %v6649_v25  ;;  %vm1129_vm9 = vweird.f32 %v6649_v25  ;;  %v1133_v62 = vand.u32 2147483647, %v6649_v25 }
 0x17d   : > { %v1325_v5 = vmul.f32 %v6120_v60, %v1324_v3  ;;  %6125 = vpow2.f32 %v5702_v43  ;;  %v6749_v43 = vpop.permute.xlu1 %1587 }
 0x17e   : > { %vm1134_vm11 = vcmp.eq.f32.partialorder %v1133_v62, 8.507059e+37  ;;  %10270 = vst [vmem:[#allocation5_spill] sm:$0xff] %v6749_v43 }
 0x17f   : > { %v1326_v16 = vadd.f32 %v6120_v60, %v1325_v5 }
 0x180   : > { %v6712_v5 = vpop.permute.xlu2 %1759 }
 0x181   : > { %v1330_v18 = vsel %vm6624_vm6, %v6120_v60, %v1326_v16  ;;  %6051 = vset.pattern.permute.xlu0 %v6284_v32  ;;  %v1135_v60 = vand.u32 2147483648, %v6649_v25  ;;  %10266 = vst [vmem:[#allocation3_spill] sm:$0xff] %v6712_v5 }
 0x182   : > { %6054 = vset.pattern.permute.xlu2 %v6285_v33  ;;  %v1335_v22 = vsel %vm1332_vm7, %v1334_v10, %v1330_v18  ;;  %1666 = vperm.xlu0 %6051, %v6575_v31  }
 0x183   : > { %1602 = vperm.xlu2 %6054, %v6637_v15   ;;  %6057 = vset.pattern.permute.xlu1 %v10016_v35  ;;  %v6644_v24 = vperm.slane %v1335_v22, 0  ;;  %v1136_v9 = vor.u32 1.1754944e-38, %v1135_v60  ;;  %v5720_v60 = vld [vmem:[%s10272_s9 + $0x8] sm:$0xf0] }
 0x184   : > { %1767 = vperm.xlu1 %6057, %v6637_v15  }
 0x185   : > { %v1338_v26 = vmul.f32 %v6644_v24, %v6481_v13  ;;  %v1339_v27 = vmul.f32 %v6644_v24, %v6478_v12  ;;  %v6124_v12 = vpop.eup %6123  ;;  %v1028_v13 = vadd.f32 %v1027_v44, %v6593_v39  ;;  %v1340_v39 = vmul.f32 %v6644_v24, %v6448_v2 }
 0x186   : > { %v1125_v47 = vmul.f32 %v6124_v12, %v6649_v25  ;;  %v6126_v50 = vpop.eup %6125  ;;  %v1341_v51 = vmul.f32 %v6644_v24, %v6463_v8  ;;  %v6695_v8 = vld [vmem:[%s10261_s29 + $0x20] sm:$0xff]  ;;  %vm1130_vm8 = vweird.f32 %v6124_v12  ;;  %v1342_v63 = vmul.f32 %v6644_v24, %v6445_v1  ;;  %v1029_v1 = vpop.f32.mrf.mxu1 }
 0x187   : > { %v1396_v29 = vpack.c.bf16 %v1339_v27, %v1338_v26  ;;  %v5705_v49 = vmul.f32 -1.442695, %v1028_v13  ;;  %v6684_v53 = vadd.f32 1.0, %v6126_v50  ;;  %vm1131_vm10 = vmor %vm1129_vm9, %vm1130_vm8  ;;  %v1343_v3 = vmul.f32 %v6644_v24, %v6460_v7 }
 0x188   : > { %v1126_v52 = vsub.f32 1.0, %v1125_v47  ;;  %v1397_v54 = vpack.c.bf16 %v1341_v51, %v1340_v39  ;;  %v1030_v18 = vadd.f32 %v1029_v1, %v6599_v41  ;;  %v6732_v22 = vpop.permute.xlu2 %1847  ;;  %v1344_v13 = vmul.f32 %v6644_v24, %v6442_v0 }
 0x189   : > { %5740 = vmatmul.msk.bf16.vlgmr.msrb.gmra.mxu0 %vm821_vm0, %v1396_v29  ;;  %5744 = vmatmul.msk.bf16.vlgmr.msra.gmra.mxu1 %vm821_vm0, %v1396_v29  ;;  %6127 = vpow2.f32 %v5705_v49  ;;  %v1398_v14 = vpack.c.bf16 %v1343_v3, %v1342_v63  ;;  %10267 = vst [vmem:[#allocation4_spill] sm:$0xff] %v6732_v22  ;;  %vm1114_vm12 = vweird.f32 %v6684_v53  ;;  %v1118_v27 = vand.u32 2147483647, %v6684_v53 }
 0x18a   : > { %1678 = vperm.xlu0 %6051, %v6637_v15   ;;  %v1127_v2 = vmul.f32 %v6124_v12, %v1126_v52  ;;  %6129 = vrcp.f32 %v6684_v53  ;;  %v5706_v25 = vmul.f32 -1.442695, %v1030_v18  ;;  %v1345_v19 = vmul.f32 %v6644_v24, %v6457_v6 }
 0x18b   : > { %6056 = vset.pattern.permute.xlu2 %v10016_v35  ;;  %6131 = vpow2.f32 %v5704_v57  ;;  %vm1119_vm15 = vcmp.eq.f32.partialorder %v1118_v27, 8.507059e+37  ;;  %v5974_v57 = vld [vmem:[%s10272_s9 + $0x4] sm:$0xf] }
 0x18c   : > { %1763 = vperm.xlu2 %6056, %v6618_v58   ;;  %6061 = vset.pattern.permute.xlu1 %v10022_v42  ;;  %v1128_v37 = vadd.f32 %v6124_v12, %v1127_v2  ;;  %v6760_v49 = vpack.c.bf16 %v1345_v19, %v1344_v13  ;;  %v5975_v2 = vld [vmem:[%s10272_s9 + $0x4] sm:$0xf0]  ;;  %v5723_v62 = vor.u32 %v5974_v57, %v5720_v60  ;;  %v6840_v13 = vld [vmem:[%s6469_s25] sm:$0xff]  ;;  %s10358_s9 = smov 16  }
 0x18d   : > { %2059 = vperm.xlu1 %6061, %v6618_v58  }
 0x18e   : > { %v1132_v4 = vsel %vm1131_vm10, %v6124_v12, %v1128_v37  ;;  %v6794_v37 = vpop.permute.xlu1 %1843  ;;  %1464 = vmatpush.bf16.msra.mxu3 %v5723_v62  ;;  %v6889_v62 = vld [vmem:[%s6469_s25 + $0x10] sm:$0xff] }
 0x18f   : > { %v6128_v59 = vpop.eup %6127  ;;  %v1137_v11 = vsel %vm1134_vm11, %v1136_v9, %v1132_v4  ;;  %10275 = vst [vmem:[#allocation7_spill] sm:$0xff] %v6794_v37 }
 0x190   : > { %v6703_v61 = vadd.f32 1.0, %v6128_v59  ;;  %v6130_v34 = vpop.eup %6129  ;;  %v6763_v50 = vpop.permute.xlu2 %1963 }
 0x191   : > { %v1110_v10 = vmul.f32 %v6130_v34, %v6684_v53  ;;  %v6132_v16 = vpop.eup %6131  ;;  %vm1115_vm13 = vweird.f32 %v6130_v34  ;;  %10271 = vst [vmem:[#allocation6_spill] sm:$0xff] %v6763_v50 }
 0x192   : > { %6059 = vset.pattern.permute.xlu0 %v10013_v38  ;;  %6133 = vrcp.f32 %v6703_v61  ;;  %v6720_v17 = vadd.f32 1.0, %v6132_v16  ;;  %vm6744_vm14 = vmor %vm1114_vm12, %vm1115_vm13  ;;  %v1163_v52 = vand.u32 2147483647, %v6703_v61  ;;  %vm1159_vm2 = vweird.f32 %v6703_v61 }
 0x193   : > { %1971 = vperm.xlu0 %6059, %v6618_v58   ;;  %v1111_v7 = vsub.f32 1.0, %v1110_v10 }
 0x194   : > { %6058 = vset.pattern.permute.xlu2 %v10011_v36  ;;  %6135 = vrcp.f32 %v6720_v17  ;;  %vm1164_vm5 = vcmp.eq.f32.partialorder %v1163_v52, 8.507059e+37  ;;  %v1150_v10 = vand.u32 2147483648, %v6720_v17  ;;  %vm1144_vm7 = vweird.f32 %v6720_v17 }
 0x195   : > { %1855 = vperm.xlu2 %6058, %v6637_v15   ;;  %6064 = vset.pattern.permute.xlu1 %v10020_v40  ;;  %v1112_v23 = vmul.f32 %v6130_v34, %v1111_v7  ;;  %6137 = vpow2.f32 %v5706_v25 }
 0x196   : > { %2135 = vperm.xlu1 %6064, %v6637_v15  }
 0x197   : > { %v1113_v26 = vadd.f32 %v6130_v34, %v1112_v23 }
 0x198   : > { %v6725_v20 = vpop.eup %6133  ;;  %v6807_v4 = vpop.permute.xlu2 %2055 }
 0x199   : > { %5741 = vmatmul.msk.bf16.gmra.mxu0 %vm821_vm0, %v1397_v54  ;;  %5745 = vmatmul.msk.bf16.gmra.mxu1 %vm821_vm0, %v1397_v54  ;;  %v1155_v41 = vmul.f32 %v6725_v20, %v6703_v61  ;;  %v1117_v45 = vsel %vm6744_vm14, %v6130_v34, %v1113_v26  ;;  %vm1160_vm1 = vweird.f32 %v6725_v20  ;;  %10276 = vst [vmem:[#allocation8_spill] sm:$0xff] %v6807_v4  ;;  %v5752_v4 = vld [vmem:[%s10325_s11 + $0xc] sm:$0xf0] }
 0x19a   : > { %v6751_v44 = vpop.eup %6135  ;;  %vm6790_vm4 = vmor %vm1159_vm2, %vm1160_vm1  ;;  %vm3091_vm1 = vcmask 261120  }
 0x19b   : > { %6065 = vset.pattern.permute.xlu0 %v10018_v48  ;;  %v1156_v29 = vsub.f32 1.0, %v1155_v41  ;;  %v1140_v39 = vmul.f32 %v6751_v44, %v6720_v17  ;;  %v6138_v51 = vpop.eup %6137  ;;  %vm1145_vm6 = vweird.f32 %v6751_v44 }
 0x19c   : > { %2195 = vperm.xlu0 %6065, %v6618_v58   ;;  %v6775_v24 = vadd.f32 1.0, %v6138_v51  ;;  %vm1146_vm8 = vmor %vm1144_vm7, %vm1145_vm6 }
 0x19d   : > { %6060 = vset.pattern.permute.xlu2 %v10013_v38  ;;  %v1157_v47 = vmul.f32 %v6725_v20, %v1156_v29  ;;  %v1141_v54 = vsub.f32 1.0, %v1140_v39 }
 0x19e   : > { %1975 = vperm.xlu2 %6060, %v6637_v15   ;;  %6069 = vset.pattern.permute.xlu1 %v6285_v33  ;;  %6139 = vrcp.f32 %v6775_v24  ;;  %vm1174_vm11 = vweird.f32 %v6775_v24  ;;  %v1178_v26 = vand.u32 2147483647, %v6775_v24 }
 0x19f   : > { %1607 = vperm.xlu1 %6069, %v6695_v8   ;;  %v1158_v6 = vadd.f32 %v6725_v20, %v1157_v47  ;;  %v1142_v63 = vmul.f32 %v6751_v44, %v1141_v54  ;;  %v6871_v54 = vpop.permute.xlu0 %2051 }
 0x1a0   : > { %vm1179_vm13 = vcmp.eq.f32.partialorder %v1178_v26, 8.507059e+37  ;;  %10287 = vst [vmem:[#allocation19_spill] sm:$0xff] %v6871_v54 }
 0x1a1   : > { %v1143_v9 = vadd.f32 %v6751_v44, %v1142_v63  ;;  %v6893_v63 = vld [vmem:[%s6469_s25 + $0x18] sm:$0xff] }
 0x1a2   : > { %v2273_v22 = vpack.c.bf16 %v6893_v63, %v6889_v62 }
 0x1a3   : > { %v1147_v16 = vsel %vm1146_vm8, %v6751_v44, %v1143_v9  ;;  %v6836_v44 = vld [vmem:[%s6469_s25 + $0x8] sm:$0xff] }
 0x1a4   : > { %6066 = vset.pattern.permute.xlu0 %v10016_v35 }
 0x1a5   : > { %1755 = vperm.xlu0 %6066, %v6575_v31   ;;  %v1120_v31 = vand.u32 2147483648, %v6684_v53  ;;  %v1165_v53 = vand.u32 2147483648, %v6703_v61  ;;  %v1162_v61 = vsel %vm6790_vm4, %v6725_v20, %v1158_v6 }
 0x1a6   : > { %6062 = vset.pattern.permute.xlu2 %v10022_v42 }
 0x1a7   : > { %2063 = vperm.xlu2 %6062, %v6637_v15   ;;  %1368 = vperm.xlu1 %6069, %v1137_v11   ;;  %v1121_v12 = vor.u32 1.1754944e-38, %v1120_v31  ;;  %v1166_v34 = vor.u32 1.1754944e-38, %v1165_v53  ;;  %v6140_v11 = vpop.eup %6139  ;;  %v1180_v31 = vand.u32 2147483648, %v6775_v24 }
 0x1a8   : > { %v1170_v1 = vmul.f32 %v6140_v11, %v6775_v24  ;;  %vm1175_vm10 = vweird.f32 %v6140_v11 }
 0x1a9   : > { %5742 = vmatmul.msk.bf16.gmra.mxu0 %vm821_vm0, %v1398_v14  ;;  %5746 = vmatmul.msk.bf16.gmra.mxu1 %vm821_vm0, %v1398_v14  ;;  %v1122_v0 = vsel %vm1119_vm15, %v1121_v12, %v1117_v45  ;;  %v1167_v3 = vsel %vm1164_vm5, %v1166_v34, %v1162_v61  ;;  %v6816_v14 = vpop.permute.xlu1 %1967  ;;  %vm1176_vm12 = vmor %vm1174_vm11, %vm1175_vm10  ;;  %v1181_v28 = vor.u32 1.1754944e-38, %v1180_v31 }
 0x1aa   : > { %10277 = vst [vmem:[#allocation9_spill] sm:$0xff] %v6816_v14  ;;  %v2272_v14 = vpack.c.bf16 %v6836_v44, %v6840_v13 }
 0x1ad   : > { %1775 = vperm.xlu0 %6066, %v6730_v21  }
 0x1af   : > { %6063 = vset.pattern.permute.xlu2 %v10020_v40  ;;  %6072 = vset.pattern.permute.xlu1 %v6284_v32 }
 0x1b0   : > { %2131 = vperm.xlu2 %6063, %v6618_v58   ;;  %1686 = vperm.xlu1 %6072, %v6730_v21  }
 0x1b1   : > { %v6824_v20 = vpop.permute.xlu1 %2123 }
 0x1b2   : > { %10278 = vst [vmem:[#allocation10_spill] sm:$0xff] %v6824_v20 }
 0x1b5   : > { %6074 = vset.pattern.permute.xlu0 %v6285_v33 }
 0x1b6   : > { %1592 = vperm.xlu0 %6074, %v6570_v30   ;;  %v5719_v30 = vor.u32 %v5975_v2, %v5718_v55  ;;  %v6879_v2 = vpop.permute.xlu0 %2127 }
 0x1b7   : > { %10290 = vst [vmem:[#allocation22_spill] sm:$0xff] %v6879_v2  ;;  %v10324_v2 = vmov 6  }
 0x1b8   : > { %6067 = vset.pattern.permute.xlu2 %v6285_v33  ;;  %6073 = vset.pattern.permute.xlu1 %v10016_v35 }
 0x1b9   : > { %1363 = vperm.xlu2 %6067, %v1122_v0   ;;  %1771 = vperm.xlu1 %6073, %v6695_v8  }
 0x1ba   : > { %5743 = vmatmul.msk.bf16.gmra.mxu0 %vm821_vm0, %v6760_v49  ;;  %1435 = vmatpush.bf16.msra.mxu2 %v5719_v30 }
 0x1be   : > { %6010 = vmatpush.bf16.msrb.mxu2 %v6670_v46  ;;  %1597 = vperm.xlu0 %6074, %v6618_v58   ;;  %v1148_v46 = vand.u32 2147483647, %v6720_v17  ;;  %v1171_v17 = vsub.f32 1.0, %v1170_v1  ;;  %v6910_v1 = vld [vmem:[%s6469_s25 + $0x20] sm:$0xff] }
 0x1c0   : > { %vm1149_vm9 = vcmp.eq.f32.partialorder %v1148_v46, 8.507059e+37  ;;  %v1172_v23 = vmul.f32 %v6140_v11, %v1171_v17 }
 0x1c1   : > { %6068 = vset.pattern.permute.xlu2 %v10018_v48  ;;  %6075 = vset.pattern.permute.xlu1 %v6285_v33 }
 0x1c2   : > { %2199 = vperm.xlu2 %6068, %v6637_v15   ;;  %1378 = vperm.xlu1 %6075, %v1167_v3   ;;  %v1151_v15 = vor.u32 1.1754944e-38, %v1150_v10  ;;  %v1173_v41 = vadd.f32 %v6140_v11, %v1172_v23 }
 0x1c4   : > { %v1152_v7 = vsel %vm1149_vm9, %v1151_v15, %v1147_v16  ;;  %v1177_v27 = vsel %vm1176_vm12, %v6140_v11, %v1173_v41  ;;  %v6903_v11 = vld [vmem:[%s10261_s29 + $0x30] sm:$0xff] }
 0x1c5   : > { %v1182_v45 = vsel %vm1179_vm13, %v1181_v28, %v1177_v27  ;;  %v6932_v28 = vld [vmem:[%s6469_s25 + $0x30] sm:$0xff] }
 0x1c6   : > { %1612 = vperm.xlu0 %6074, %v6730_v21  }
 0x1ca   : > { %6070 = vset.pattern.permute.xlu2 %v6285_v33  ;;  %6078 = vset.pattern.permute.xlu1 %v10011_v36 }
 0x1cb   : > { %1373 = vperm.xlu2 %6070, %v1152_v7   ;;  %v1354_v18 = vpop.permute.xlu2 %1353  ;;  %1863 = vperm.xlu1 %6078, %v6730_v21  }
 0x1cc   : > { %v1387_v12 = vmul.f32 %v6836_v44, %v1354_v18  ;;  %v6914_v18 = vld [vmem:[%s6469_s25 + $0x28] sm:$0xff] }
 0x1d3   : > { %6071 = vset.pattern.permute.xlu2 %v6284_v32  ;;  %6080 = vset.pattern.permute.xlu1 %v10013_v38 }
 0x1d4   : > { %1682 = vperm.xlu2 %6071, %v6695_v8   ;;  %v6829_v25 = vpop.permute.xlu2 %2187  ;;  %1983 = vperm.xlu1 %6080, %v6730_v21  }
 0x1d5   : > { %10279 = vst [vmem:[#allocation11_spill] sm:$0xff] %v6829_v25 }
 0x1db   : > { %v1349_v29 = vpop.permute.xlu1 %1348 }
 0x1dc   : > { %v1386_v19 = vmul.f32 %v6840_v13, %v1349_v29  ;;  %6076 = vset.pattern.permute.xlu2 %v6285_v33  ;;  %6082 = vset.pattern.permute.xlu1 %v10020_v40 }
 0x1dd   : > { %1383 = vperm.xlu2 %6076, %v1182_v45   ;;  %v6845_v47 = vpop.permute.xlu2 %1602  ;;  %2139 = vperm.xlu1 %6082, %v6695_v8  }
 0x1de   : > { %10280 = vst [vmem:[#allocation12_spill] sm:$0xff] %v6845_v47  ;;  %v1402_v39 = vpack.c.bf16 %v1387_v12, %v1386_v19  ;;  %v6936_v12 = vld [vmem:[%s6469_s25 + $0x38] sm:$0xff]  ;;  %s10082_s25 = smov 96  }
 0x1e0   : > { %5724 = vmatmul.msk.bf16.vlgmr.msra.gmra.mxu2 %vm821_vm0, %v1402_v39  ;;  %5728 = vmatmul.msk.bf16.vlgmr.msra.gmra.mxu3 %vm821_vm0, %v1402_v39 }
 0x1e4   : > { %v6850_v51 = vpop.permute.xlu1 %2191 }
 0x1e5   : > { %10281 = vst [vmem:[#allocation13_spill] sm:$0xff] %v6850_v51  ;;  %6084 = vset.pattern.permute.xlu1 %v10018_v48  ;;  %6077 = vset.pattern.permute.xlu2 %v10011_v36 }
 0x1e6   : > { %v6854_v0 = vpop.permute.xlu2 %1763  ;;  %2207 = vperm.xlu1 %6084, %v6730_v21   ;;  %1859 = vperm.xlu2 %6077, %v6695_v8  }
 0x1e7   : > { %10282 = vst [vmem:[#allocation14_spill] sm:$0xff] %v6854_v0 }
 0x1eb   : > { %v1359_v30 = vpop.permute.xlu0 %1358 }
 0x1ec   : > { %v1388_v34 = vmul.f32 %v6889_v62, %v1359_v30 }
 0x1ed   : > { %v6858_v6 = vpop.permute.xlu1 %1674 }
 0x1ee   : > { %10283 = vst [vmem:[#allocation15_spill] sm:$0xff] %v6858_v6  ;;  %6085 = vset.pattern.permute.xlu1 %v6285_v33  ;;  %6079 = vset.pattern.permute.xlu2 %v10013_v38 }
 0x1ef   : > { %v6862_v24 = vpop.permute.xlu2 %1855  ;;  %1979 = vperm.xlu2 %6079, %v6695_v8   ;;  %1617 = vperm.xlu1 %6085, %v6903_v11  }
 0x1f0   : > { %10284 = vst [vmem:[#allocation16_spill] sm:$0xff] %v6862_v24 }
 0x1f6   : > { %v6865_v52 = vpop.permute.xlu1 %1767 }
 0x1f7   : > { %10285 = vst [vmem:[#allocation17_spill] sm:$0xff] %v6865_v52  ;;  %6081 = vset.pattern.permute.xlu2 %v10022_v42  ;;  %6088 = vset.pattern.permute.xlu1 %v6284_v32 }
 0x1f8   : > { %v6868_v53 = vpop.permute.xlu2 %1975  ;;  %2071 = vperm.xlu2 %6081, %v6730_v21  }
 0x1f9   : > { %10286 = vst [vmem:[#allocation18_spill] sm:$0xff] %v6868_v53 }
 0x1ff   : > { %v6873_v55 = vpop.permute.xlu1 %2059 }
 0x200   : > { %10288 = vst [vmem:[#allocation20_spill] sm:$0xff] %v6873_v55  ;;  %6083 = vset.pattern.permute.xlu2 %v10018_v48 }
 0x201   : > { %v6876_v33 = vpop.permute.xlu2 %2063  ;;  %2203 = vperm.xlu2 %6083, %v6695_v8  }
 0x202   : > { %10289 = vst [vmem:[#allocation21_spill] sm:$0xff] %v6876_v33 }
 0x206   : > { %v1517_v39 = vpop.f32.mrf.mxu0 }
 0x208   : > { %v6881_v57 = vpop.permute.xlu1 %2135 }
 0x209   : > { %10291 = vst [vmem:[#allocation23_spill] sm:$0xff] %v6881_v57  ;;  %6087 = vset.pattern.permute.xlu2 %v6284_v32  ;;  %v6924_v32 = vld [vmem:[%s10261_s29 + $0x38] sm:$0xff] }
 0x20a   : > { %v6884_v59 = vpop.permute.xlu2 %2131  ;;  %1622 = vperm.xlu0 %6074, %v6924_v32  }
 0x20b   : > { %10292 = vst [vmem:[#allocation24_spill] sm:$0xff] %v6884_v59 }
 0x211   : > { %v6886_v60 = vpop.permute.xlu1 %1607 }
 0x212   : > { %10293 = vst [vmem:[#allocation25_spill] sm:$0xff] %v6886_v60  ;;  %6086 = vset.pattern.permute.xlu0 %v10011_v36 }
 0x213   : > { %v1364_v61 = vpop.permute.xlu2 %1363  ;;  %1851 = vperm.xlu0 %6086, %v6618_v58  }
 0x214   : > { %v1389_v3 = vmul.f32 %v6893_v63, %v1364_v61  ;;  %v1519_v61 = vpop.f32.mrf.mxu0 }
 0x216   : > { %v1403_v9 = vpack.c.bf16 %v1389_v3, %v1388_v34 }
 0x218   : > { %5725 = vmatmul.msk.bf16.gmra.mxu2 %vm821_vm0, %v1403_v9  ;;  %5729 = vmatmul.msk.bf16.gmra.mxu3 %vm821_vm0, %v1403_v9  ;;  %v1574_v9 = vlaneseq }
 0x219   : > { %v1369_v10 = vpop.permute.xlu1 %1368 }
 0x21a   : > { %v1390_v7 = vmul.f32 %v6910_v1, %v1369_v10 }
 0x21c   : > { %v6898_v46 = vpop.permute.xlu2 %2199  ;;  %v1522_v10 = vpop.f32.mrf.mxu0 }
 0x21d   : > { %10294 = vst [vmem:[#allocation26_spill] sm:$0xff] %v6898_v46 }
 0x222   : > { %v6906_v16 = vpop.permute.xlu1 %1686 }
 0x223   : > { %10295 = vst [vmem:[#allocation27_spill] sm:$0xff] %v6906_v16 }
 0x225   : > { %v1374_v15 = vpop.permute.xlu2 %1373 }
 0x226   : > { %v1391_v17 = vmul.f32 %v6914_v18, %v1374_v15  ;;  %v6975_v15 = vshrl.u32 %v1574_v9, 7 }
 0x228   : > { %v1404_v23 = vpack.c.bf16 %v1391_v17, %v1390_v7  ;;  %vm1576_vm14 = vcmp.lt.s32.totalorder %v6975_v15, 1  ;;  %vm1745_vm15 = vcmp.lt.s32.totalorder %v6975_v15, 7 }
 0x22a   : > { %5726 = vmatmul.msk.bf16.gmra.mxu2 %vm821_vm0, %v1404_v23  ;;  %5730 = vmatmul.msk.bf16.gmra.mxu3 %vm821_vm0, %v1404_v23 }
 0x22b   : > { %v6919_v41 = vpop.permute.xlu1 %1771 }
 0x22c   : > { %10296 = vst [vmem:[#allocation28_spill] sm:$0xff] %v6919_v41 }
 0x22e   : > { %v6927_v31 = vpop.permute.xlu2 %1682 }
 0x22f   : > { %10297 = vst [vmem:[#allocation29_spill] sm:$0xff] %v6927_v31 }
 0x234   : > { %v1379_v26 = vpop.permute.xlu1 %1378 }
 0x235   : > { %v1392_v29 = vmul.f32 %v6932_v28, %v1379_v26 }
 0x237   : > { %v1384_v27 = vpop.permute.xlu2 %1383 }
 0x238   : > { %v1393_v19 = vmul.f32 %v6936_v12, %v1384_v27 }
 0x23a   : > { %v1405_v45 = vpack.c.bf16 %v1393_v19, %v1392_v29  ;;  %v1524_v19 = vpop.f32.mrf.mxu0 }
 0x23c   : > { %5727 = vmatmul.msk.bf16.gmra.mxu2 %vm821_vm0, %v1405_v45  ;;  %5731 = vmatmul.msk.bf16.gmra.mxu3 %vm821_vm0, %v1405_v45 }
 0x240   : > { %v7023_v38 = vpop.permute.xlu2 %1859 }
 0x241   : > { %10308 = vst [vmem:[#allocation40_spill] sm:$0xff] %v7023_v38 }
 0x249   : > { %v7037_v42 = vpop.permute.xlu2 %1979 }
 0x24a   : > { %10312 = vst [vmem:[#allocation44_spill] sm:$0xff] %v7037_v42 }
 0x24c   : > { %5747 = vmatmul.msk.bf16.vlgmr.msrb.gmra.mxu2 %vm821_vm0, %v6760_v49  ;;  %v6971_v49 = vpop.permute.xlu0 %1666 }
 0x24d   : > { %10298 = vst [vmem:[#allocation30_spill] sm:$0xff] %v6971_v49 }
 0x254   : > { %v6977_v23 = vpop.permute.xlu0 %1678 }
 0x255   : > { %10299 = vst [vmem:[#allocation31_spill] sm:$0xff] %v6977_v23 }
 0x263   : > { %v1437_v30 = vpop.f32.mrf.mxu2  ;;  %v7139_v62 = vpop.f32.mrf.mxu3 }
 0x264   : > { %v6943_v58 = vadd.f32 %v1517_v39, %v1437_v30  ;;  %10335 = vst [vmem:[#allocation63_spill] sm:$0xff] %v7139_v62 }
 0x266   : > { %1641 = vrot.lane.b32.xlu2 %v6943_v58, %s10035_s7  ;;  %1713 = vrot.lane.b32.xlu1 %v6943_v58, %s10082_s25 }
 0x26b   : > { %v1439_v34 = vpop.f32.mrf.mxu2 }
 0x26c   : > { %v6949_v3 = vadd.f32 %v1519_v61, %v1439_v34  ;;  %v6990_v61 = vpop.permute.xlu0 %1971  ;;  %v6992_v34 = vpop.permute.xlu1 %1863 }
 0x26d   : > { %10300 = vst [vmem:[#allocation32_spill] sm:$0xff] %v6990_v61 }
 0x26e   : > { %1802 = vrot.lane.b32.xlu1 %v6943_v58, %s10055_s30  ;;  %1804 = vrot.lane.b32.xlu2 %v6949_v3, %s10055_s30  ;;  %v10012_v26 = vrot.slane %v6949_v3, 7  ;;  %10301 = vst [vmem:[#allocation33_spill] sm:$0xff] %v6992_v34 }
 0x26f   : > { %1715 = vrot.lane.b32.xlu0 %v6949_v3, %s10082_s25 }
 0x276   : > { %1922 = vrot.lane.b32.xlu1 %v6943_v58, %s10048_s3 }
 0x277   : > { %1924 = vrot.lane.b32.xlu0 %v6949_v3, %s10048_s3 }
 0x27e   : > { %2010 = vrot.lane.b32.xlu1 %v6943_v58, %s10033_s8 }
 0x27f   : > { %2012 = vrot.lane.b32.xlu0 %v6949_v3, %s10033_s8 }
 0x286   : > { %1890 = vrot.lane.b32.xlu1 %v6943_v58, %s10050_s4 }
 0x287   : > { %1892 = vrot.lane.b32.xlu0 %v6949_v3, %s10050_s4 }
 0x28e   : > { %2100 = vrot.lane.b32.xlu1 %v6949_v3, %s10084_s1 }
 0x296   : > { %1643 = vrot.lane.b32.xlu1 %v6949_v3, %s10035_s7 }
 0x29b   : > { %v1442_v7 = vpop.f32.mrf.mxu2 }
 0x29c   : > { %v1523_v17 = vadd.f32 %v1522_v10, %v1442_v7  ;;  %v1527_v10 = vpop.f32.mrf.mxu0 }
 0x29e   : > { %1926 = vrot.lane.b32.xlu2 %v1523_v17, %s10048_s3  ;;  %v1568_v27 = vrot.slane %v1523_v17, 7 }
 0x2a0   : > { %v6986_v29 = vsel %vm1576_vm14, %v10012_v26, %v1568_v27  ;;  %v7007_v26 = vpop.permute.xlu1 %1983 }
 0x2a1   : > { %10304 = vst [vmem:[#allocation36_spill] sm:$0xff] %v7007_v26 }
 0x2a3   : > { %v1444_v45 = vpop.f32.mrf.mxu2 }
 0x2a4   : > { %v1525_v39 = vadd.f32 %v1524_v19, %v1444_v45  ;;  %v7005_v45 = vpop.permute.xlu0 %2195 }
 0x2a5   : > { %10303 = vst [vmem:[#allocation35_spill] sm:$0xff] %v7005_v45 }
 0x2a6   : > { %2014 = vrot.lane.b32.xlu2 %v1523_v17, %s10033_s8  ;;  %1719 = vrot.lane.b32.xlu1 %v1525_v39, %s10082_s25  ;;  %v1569_v30 = vrot.slane %v1525_v39, 7 }
 0x2a8   : > { %v6996_v9 = vsel %vm1576_vm14, %v1568_v27, %v1569_v30 }
 0x2ad   : > { %v1447_v7 = vpop.f32.mrf.mxu2 }
 0x2ae   : > { %v6998_v36 = vadd.f32 %v1527_v10, %v1447_v7  ;;  %2102 = vrot.lane.b32.xlu2 %v1523_v17, %s10084_s1  ;;  %1808 = vrot.lane.b32.xlu1 %v1525_v39, %s10055_s30  ;;  %v7019_v10 = vpop.permute.xlu0 %1755  ;;  %v7021_v7 = vpop.permute.xlu1 %2139 }
 0x2af   : > { %10306 = vst [vmem:[#allocation38_spill] sm:$0xff] %v7019_v10  ;;  %v5979_v10 = vld [vmem:[%s10325_s11 + $0x4] sm:$0xf] }
 0x2b0   : > { %10302 = vst [vmem:[#allocation34_spill] sm:$0xff] %v6998_v36  ;;  %2018 = vrot.lane.b32.xlu0 %v6998_v36, %s10033_s8  ;;  %v10015_v19 = vrot.slane %v6998_v36, 7 }
 0x2b1   : > { %10307 = vst [vmem:[#allocation39_spill] sm:$0xff] %v7021_v7 }
 0x2b2   : > { %v7013_v27 = vsel %vm1576_vm14, %v1569_v30, %v10015_v19  ;;  %v1529_v19 = vpop.f32.mrf.mxu0 }
 0x2b3   : > { %10305 = vst [vmem:[#allocation37_spill] sm:$0xff] %v7013_v27 }
 0x2b5   : > { %v1449_v30 = vpop.f32.mrf.mxu2 }
 0x2b6   : > { %1717 = vrot.lane.b32.xlu2 %v1523_v17, %s10082_s25  ;;  %1928 = vrot.lane.b32.xlu1 %v1525_v39, %s10048_s3  ;;  %v7029_v35 = vpop.permute.xlu0 %1775  ;;  %v7031_v48 = vpop.permute.xlu1 %2207  ;;  %v7033_v40 = vadd.f32 %v1529_v19, %v1449_v30 }
 0x2b7   : > { %10309 = vst [vmem:[#allocation41_spill] sm:$0xff] %v7029_v35  ;;  %v7049_v19 = vpop.permute.xlu2 %2071  ;;  %v10067_v35 = vrot.slane %v6943_v58, 7 }
 0x2b8   : > { %2106 = vrot.lane.b32.xlu0 %v6998_v36, %s10084_s1  ;;  %10310 = vst [vmem:[#allocation42_spill] sm:$0xff] %v7031_v48 }
 0x2b9   : > { %10311 = vst [vmem:[#allocation43_spill] sm:$0xff] %v7033_v40 }
 0x2ba   : > { %10315 = vst [vmem:[#allocation47_spill] sm:$0xff] %v7049_v19  ;;  %v1532_v54 = vpop.f32.mrf.mxu0 }
 0x2be   : > { %1645 = vrot.lane.b32.xlu2 %v1523_v17, %s10035_s7  ;;  %2016 = vrot.lane.b32.xlu1 %v1525_v39, %s10033_s8  ;;  %v7043_v25 = vpop.permute.xlu0 %1592  ;;  %v7045_v20 = vpop.permute.xlu1 %1617 }
 0x2bf   : > { %10313 = vst [vmem:[#allocation45_spill] sm:$0xff] %v7043_v25  ;;  %v1452_v30 = vpop.f32.mrf.mxu2  ;;  %v7062_v50 = vpop.permute.xlu2 %2203 }
 0x2c0   : > { %1810 = vrot.lane.b32.xlu0 %v6998_v36, %s10055_s30  ;;  %10314 = vst [vmem:[#allocation46_spill] sm:$0xff] %v7045_v20  ;;  %v7051_v51 = vadd.f32 %v1532_v54, %v1452_v30 }
 0x2c1   : > { %10319 = vst [vmem:[#allocation51_spill] sm:$0xff] %v7062_v50 }
 0x2c2   : > { %10316 = vst [vmem:[#allocation48_spill] sm:$0xff] %v7051_v51 }
 0x2c6   : > { %1806 = vrot.lane.b32.xlu2 %v1523_v17, %s10055_s30  ;;  %1896 = vrot.lane.b32.xlu1 %v1525_v39, %s10050_s4  ;;  %v7060_v20 = vpop.permute.xlu0 %1597 }
 0x2c7   : > { %10318 = vst [vmem:[#allocation50_spill] sm:$0xff] %v7060_v20  ;;  %v7073_v30 = vpop.permute.xlu2 %1641  ;;  %v1454_v5 = vpop.f32.mrf.mxu2 }
 0x2c8   : > { %2020 = vrot.lane.b32.xlu0 %v7033_v40, %s10033_s8  ;;  %10322 = vst [vmem:[#allocation54_spill] sm:$0xff] %v7073_v30  ;;  %s10338_s8 = smov 32   ;;  %v6263_v30 = vld [vmem:[%s6439_s0 + $0x8] sm:$0xff] }
 0x2ce   : > { %1894 = vrot.lane.b32.xlu2 %v1523_v17, %s10050_s4  ;;  %2104 = vrot.lane.b32.xlu1 %v1525_v39, %s10084_s1 }
 0x2d0   : > { %1900 = vrot.lane.b32.xlu0 %v7033_v40, %s10050_s4 }
 0x2d6   : > { %1647 = vrot.lane.b32.xlu2 %v1525_v39, %s10035_s7  ;;  %1721 = vrot.lane.b32.xlu1 %v6998_v36, %s10082_s25  ;;  %v7071_v39 = vpop.permute.xlu0 %1612 }
 0x2d7   : > { %10321 = vst [vmem:[#allocation53_spill] sm:$0xff] %v7071_v39 }
 0x2d8   : > { %v7056_v17 = vpop.permute.xlu1 %1713  ;;  %1814 = vrot.lane.b32.xlu0 %v7051_v51, %s10055_s30 }
 0x2d9   : > { %10317 = vst [vmem:[#allocation49_spill] sm:$0xff] %v7056_v17  ;;  %v5978_v17 = vld [vmem:[%s10344_s10 + $0x10] sm:$0xf0] }
 0x2de   : > { %1649 = vrot.lane.b32.xlu1 %v6998_v36, %s10035_s7  ;;  %1930 = vrot.lane.b32.xlu2 %v6998_v36, %s10048_s3  ;;  %v7088_v43 = vpop.permute.xlu0 %1622  ;;  %s10333_s7 = smov 112  }
 0x2df   : > { %10326 = vst [vmem:[#allocation56_spill] sm:$0xff] %v7088_v43 }
 0x2e0   : > { %v7068_v54 = vpop.permute.xlu1 %1802  ;;  %1867 = vperm.xlu0 %6086, %v6903_v11  }
 0x2e1   : > { %10320 = vst [vmem:[#allocation52_spill] sm:$0xff] %v7068_v54  ;;  %v6264_v54 = vld [vmem:[%s6439_s0] sm:$0xff] }
 0x2e2   : > { %v7193_v25 = vpack.c.bf16 %v6263_v30, %v6264_v54 }
 0x2e6   : > { %1898 = vrot.lane.b32.xlu1 %v6998_v36, %s10050_s4  ;;  %1723 = vrot.lane.b32.xlu2 %v7033_v40, %s10082_s25  ;;  %v5755_v36 = vor.u32 %v5979_v10, %v5752_v4  ;;  %v7100_v49 = vpop.permute.xlu0 %1851  ;;  %v5980_v4 = vld [vmem:[%s10325_s11 + $0x8] sm:$0xf0]  ;;  %v10330_v10 = vmov 7  }
 0x2e7   : > { %10328 = vst [vmem:[#allocation58_spill] sm:$0xff] %v7100_v49 }
 0x2e8   : > { %v7079_v37 = vpop.permute.xlu1 %1922  ;;  %6091 = vset.pattern.permute.xlu0 %v10324_v2  ;;  %2340 = vmatpush.bf16.msrb.mxu3 %v5755_v36  ;;  %v5750_v36 = vld [vmem:[%s10325_s11] sm:$0xf] }
 0x2e9   : > { %10323 = vst [vmem:[#allocation55_spill] sm:$0xff] %v7079_v37  ;;  %2067 = vperm.xlu0 %6091, %v6695_v8   ;;  %v7098_v37 = vpop.permute.xlu2 %1804  ;;  %v5751_v44 = vor.u32 %v5980_v4, %v5750_v36  ;;  %v1534_v36 = vpop.f32.mrf.mxu0 }
 0x2ea   : > { %10327 = vst [vmem:[#allocation57_spill] sm:$0xff] %v7098_v37 }
 0x2eb   : > { %5764 = vmatmul.msk.bf16.vlgmr.msrb.gmra.mxu3 %vm821_vm0, %v2272_v14  ;;  %2311 = vmatpush.bf16.msra.mxu2 %v5751_v44  ;;  %v7137_v44 = vpop.f32.mrf.mxu1 }
 0x2ec   : > { %10334 = vst [vmem:[#allocation62_spill] sm:$0xff] %v7137_v44 }
 0x2ee   : > { %2108 = vrot.lane.b32.xlu1 %v7033_v40, %s10084_s1  ;;  %1812 = vrot.lane.b32.xlu2 %v7033_v40, %s10055_s30  ;;  %v7119_v43 = vpop.permute.xlu0 %1715 }
 0x2ef   : > { %10331 = vst [vmem:[#allocation60_spill] sm:$0xff] %v7119_v43  ;;  %5760 = vmatmul.msk.bf16.vlgmr.msra.gmra.mxu2 %vm821_vm0, %v2272_v14  ;;  %v10068_v42 = vrot.slane %v7119_v43, 1 }
 0x2f0   : > { %v7103_v8 = vpop.permute.xlu1 %2010 }
 0x2f1   : > { %2075 = vperm.xlu0 %6091, %v6903_v11   ;;  %10329 = vst [vmem:[#allocation59_spill] sm:$0xff] %v7103_v8 }
 0x2f6   : > { %1932 = vrot.lane.b32.xlu2 %v7033_v40, %s10048_s3  ;;  %1934 = vrot.lane.b32.xlu1 %v7051_v51, %s10048_s3  ;;  %v7141_v63 = vpop.permute.xlu0 %1924  ;;  %s10349_s3 = smov 64  }
 0x2f7   : > { %10336 = vst [vmem:[#allocation64_spill] sm:$0xff] %v7141_v63 }
 0x2f8   : > { %v7115_v13 = vpop.permute.xlu2 %1926  ;;  %v7121_v8 = vpop.permute.xlu1 %1890 }
 0x2f9   : > { %6095 = vset.pattern.permute.xlu0 %v10330_v10  ;;  %10332 = vst [vmem:[#allocation61_spill] sm:$0xff] %v7121_v8  ;;  %v7162_v8 = vpop.f32.mrf.mxu1 }
 0x2fa   : > { %2143 = vperm.xlu0 %6095, %v6730_v21   ;;  %v7131_v21 = vadd.f32 %v1534_v36, %v1454_v5  ;;  %v5758_v5 = vld [vmem:[%s10325_s11 + $0x8] sm:$0xf]  ;;  %v5981_v36 = vld [vmem:[%s10325_s11 + $0x10] sm:$0xf0]  ;;  %10340 = vst [vmem:[#allocation67_spill] sm:$0xff] %v7162_v8 }
 0x2fb   : > { %5765 = vmatmul.msk.bf16.gmra.mxu3 %vm821_vm0, %v2273_v22  ;;  %v5759_v44 = vor.u32 %v5981_v36, %v5758_v5  ;;  %v7168_v5 = vpop.f32.mrf.mxu3  ;;  %v5977_v8 = vld [vmem:[%s10344_s10 + $0x8] sm:$0xf0] }
 0x2fc   : > { %10341 = vst [vmem:[#allocation68_spill] sm:$0xff] %v7168_v5 }
 0x2fd   : > { %2369 = vmatpush.bf16.msra.mxu0 %v5759_v44 }
 0x2fe   : > { %1651 = vrot.lane.b32.xlu2 %v7033_v40, %s10333_s7  ;;  %1653 = vrot.lane.b32.xlu1 %v7051_v51, %s10333_s7  ;;  %v7170_v44 = vpop.permute.xlu0 %2012 }
 0x2ff   : > { %5761 = vmatmul.msk.bf16.gmra.mxu2 %vm821_vm0, %v2273_v22  ;;  %10342 = vst [vmem:[#allocation69_spill] sm:$0xff] %v7170_v44 }
 0x300   : > { %v7133_v4 = vpop.permute.xlu2 %2014  ;;  %v7143_v40 = vpop.permute.xlu1 %2100  ;;  %5768 = vmatmul.msk.bf16.vlgmr.msra.gmra.mxu0 %vm821_vm0, %v2272_v14  ;;  %v10343_v14 = vmov 8  }
 0x301   : > { %10337 = vst [vmem:[#allocation65_spill] sm:$0xff] %v7143_v40  ;;  %v2274_v40 = vpack.c.bf16 %v6914_v18, %v6910_v1  ;;  %v5774_v18 = vld [vmem:[%s10344_s10] sm:$0xf] }
 0x302   : > { %1904 = vrot.lane.b32.xlu0 %v7131_v21, %s10050_s4  ;;  %v5775_v5 = vor.u32 %v5977_v8, %v5774_v18  ;;  %v7202_v8 = vpack.c.bf16 %v6936_v12, %v6932_v28  ;;  %v10348_v18 = vmov 2  }
 0x303   : > { %v7187_v44 = vpop.f32.mrf.mxu3 }
 0x304   : > { %10346 = vst [vmem:[#allocation71_spill] sm:$0xff] %v7187_v44  ;;  %2426 = vmatpush.bf16.msrb.mxu1 %v5775_v5  ;;  %v5782_v44 = vld [vmem:[%s10344_s10 + $0x8] sm:$0xf] }
 0x305   : > { %v5783_v26 = vor.u32 %v5978_v17, %v5782_v44  ;;  %v10078_v17 = vrot.slane %v7098_v37, 7 }
 0x306   : > { %2022 = vrot.lane.b32.xlu2 %v7051_v51, %s10338_s8  ;;  %1655 = vrot.lane.b32.xlu1 %v7131_v21, %s10333_s7  ;;  %v7195_v48 = vpop.permute.xlu0 %1892 }
 0x307   : > { %10347 = vst [vmem:[#allocation72_spill] sm:$0xff] %v7195_v48  ;;  %5784 = vmatmul.msk.bf16.vlgmr.msrb.gmra.mxu1 %vm821_vm0, %v7193_v25  ;;  %2484 = vmatpush.bf16.msra.mxu3 %v5783_v26 }
 0x308   : > { %v7155_v62 = vpop.permute.xlu2 %2102  ;;  %v1644_v36 = vpop.permute.xlu1 %1643 }
 0x309   : > { %10339 = vst [vmem:[#allocation66_spill] sm:$0xff] %v7155_v62  ;;  %v7185_v62 = vpop.f32.mrf.mxu1 }
 0x30a   : > { %2151 = vperm.xlu0 %6095, %v6924_v32   ;;  %10345 = vst [vmem:[#allocation70_spill] sm:$0xff] %v7185_v62  ;;  %v10350_v62 = vmov 5  }
 0x30b   : > { %5766 = vmatmul.msk.bf16.gmra.mxu3 %vm821_vm0, %v2274_v40  ;;  %v7215_v48 = vpop.f32.mrf.mxu3 }
 0x30e   : > { %2110 = vrot.lane.b32.xlu2 %v7051_v51, %s10084_s1  ;;  %1816 = vrot.lane.b32.xlu1 %v7131_v21, %s10055_s30  ;;  %s10354_s30 = smov 48  }
 0x30f   : > { %5762 = vmatmul.msk.bf16.gmra.mxu2 %vm821_vm0, %v2274_v40 }
 0x310   : > { %v7173_v1 = vpop.permute.xlu2 %1717  ;;  %5769 = vmatmul.msk.bf16.gmra.mxu0 %vm821_vm0, %v2273_v22 }
 0x311   : > { %v7213_v5 = vpop.f32.mrf.mxu1 }
 0x312   : > { %6100 = vset.pattern.permute.xlu0 %v10343_v14 }
 0x313   : > { %v1476_v19 = vpop.f32.mrf.mxu3 }
 0x316   : > { %1725 = vrot.lane.b32.xlu2 %v7051_v51, %s10082_s25  ;;  %1694 = vperm.xlu1 %6088, %v6924_v32  }
 0x318   : > { %v7189_v63 = vpop.permute.xlu1 %1719  ;;  %v1646_v56 = vpop.permute.xlu2 %1645 }
 0x319   : > { %v1556_v7 = vpop.f32.mrf.mxu1  ;;  %v10074_v34 = vrot.slane %v7189_v63, 1 }
 0x31b   : > { %5767 = vmatmul.msk.bf16.gmra.mxu3 %vm821_vm0, %v7202_v8 }
 0x31e   : > { %6090 = vset.pattern.permute.xlu1 %v10348_v18  ;;  %1727 = vrot.lane.b32.xlu2 %v7131_v21, %s10082_s25  ;;  %s10623_s25 = sld [smem:[#allocation78_spill]] }
 0x31f   : > { %1783 = vperm.xlu1 %6090, %v6924_v32   ;;  %5763 = vmatmul.msk.bf16.gmra.mxu2 %vm821_vm0, %v7202_v8 }
 0x320   : > { %v7211_v54 = vpop.permute.xlu1 %1808  ;;  %v1807_v30 = vpop.permute.xlu2 %1806  ;;  %5770 = vmatmul.msk.bf16.gmra.mxu0 %vm821_vm0, %v2274_v40  ;;  %v10351_v40 = vrot.slane %v6949_v3, 7  ;;  %v1699_v3 = vmul.f32 %v6858_v6, %v1644_v36 }
 0x321   : > { %v1828_v39 = vrot.slane %v1807_v30, 7  ;;  %v10352_v6 = vrot.slane %v7211_v54, 7  ;;  %v1558_v37 = vpop.f32.mrf.mxu1 }
 0x322   : > { %v7217_v28 = vpop.permute.xlu0 %2018  ;;  %v1583_v44 = vsel %vm1576_vm14, %v10067_v35, %v10351_v40  ;;  %v1628_v35 = vmul.f32 %v6845_v47, %v6986_v29 }
 0x323   : > { %v1627_v43 = vmul.f32 %v7060_v20, %v1583_v44  ;;  %v10090_v44 = vrot.slane %v7115_v13, 1 }
 0x324   : > { %s9177_s2 = scalar_lea.vmem %s10623_s25, %s6433_s28 }
 0x325   : > { %v1707_v27 = vadd.f32 %v1699_v3, %v1627_v43  ;;  %v10353_v43 = vmov 3  }
 0x326   : > { %1690 = vperm.xlu2 %6087, %v6903_v11  }
 0x327   : > { %1902 = vrot.lane.b32.xlu1 %v7051_v51, %s10349_s3  ;;  %v1739_v51 = vrot.slane %v7173_v1, 1 }
 0x328   : > { %v7222_v22 = vpop.permute.xlu1 %1928  ;;  %v7224_v12 = vpop.permute.xlu2 %1894  ;;  %6094 = vset.pattern.permute.xlu1 %v10350_v62 }
 0x329   : > { %v1751_v1 = vsel %vm1745_vm15, %v10068_v42, %v1739_v51  ;;  %v1750_v40 = vsel %vm1745_vm15, %v1739_v51, %v10074_v34  ;;  %v1838_v51 = vsel %vm1576_vm14, %v1828_v39, %v10352_v6  ;;  %v1949_v47 = vrot.slane %v7222_v22, 1  ;;  %v5976_v6 = vld [vmem:[%s10344_s10 + $0x4] sm:$0xf] }
 0x32a   : > { %v7233_v50 = vpop.permute.xlu0 %2106  ;;  %v1788_v36 = vmul.f32 %v6854_v0, %v1751_v1  ;;  %v1789_v34 = vmul.f32 %v6865_v52, %v1750_v40  ;;  %v1877_v1 = vmul.f32 %v6862_v24, %v1838_v51  ;;  %v10088_v22 = vrot.slane %v7133_v4, 7  ;;  %v10432_v0 = vld [vmem:[#allocation56_spill] sm:$0xff] }
 0x32b   : > { %5792 = vmatmul.msk.bf16.vlgmr.msra.gmra.mxu3 %vm821_vm0, %v7193_v25  ;;  %v2038_v40 = vrot.slane %v7217_v28, 7  ;;  %v10367_v28 = vld [vmem:[#allocation39_spill] sm:$0xff] }
 0x32e   : > { %6089 = vset.pattern.permute.xlu2 %v10348_v18  ;;  %v1700_v18 = vmul.f32 %v6977_v23, %v1646_v56  ;;  %v1839_v56 = vsel %vm1576_vm14, %v10078_v17, %v1828_v39  ;;  %v1478_v23 = vpop.f32.mrf.mxu3  ;;  %v1796_v39 = vadd.f32 %v1788_v36, %v1707_v27 }
 0x32f   : > { %1991 = vperm.xlu1 %6094, %v6924_v32   ;;  %1779 = vperm.xlu2 %6089, %v6903_v11   ;;  %v1876_v17 = vmul.f32 %v7100_v49, %v1839_v56  ;;  %v7285_v38 = vadd.f32 %v1558_v37, %v1478_v23  ;;  %v1557_v23 = vadd.f32 %v1556_v7, %v1476_v19 }
 0x330   : > { %v2017_v30 = vpop.permute.xlu1 %2016  ;;  %v7259_v26 = vpop.permute.xlu2 %1647  ;;  %v1708_v29 = vadd.f32 %v1700_v18, %v1628_v35  ;;  %v5776_v35 = vld [vmem:[%s10344_s10 + $0xc] sm:$0xf0]  ;;  %v1958_v18 = vsel %vm1745_vm15, %v10090_v44, %v1949_v47  ;;  %v7311_v56 = vadd.f32 %v7213_v5, %v7215_v48  ;;  %5771 = vmatmul.msk.bf16.gmra.mxu0 %vm821_vm0, %v7202_v8 }
 0x331   : > { %v2037_v20 = vrot.slane %v2017_v30, 7  ;;  %v5779_v37 = vor.u32 %v5976_v6, %v5776_v35  ;;  %v1884_v7 = vadd.f32 %v1876_v17, %v1796_v39  ;;  %v6265_v5 = vld [vmem:[%s6439_s0 + $0x10] sm:$0xff]  ;;  %v6266_v6 = vld [vmem:[%s6439_s0 + $0x18] sm:$0xff]  ;;  %v2174_v39 = vrot.slane %v1557_v23, 1 }
 0x332   : > { %v7274_v42 = vpop.permute.xlu0 %1810  ;;  %v1797_v3 = vadd.f32 %v1789_v34, %v1708_v29  ;;  %v10091_v34 = vrot.slane %v7285_v38, 1  ;;  %v2265_v35 = vpack.c.bf16 %v6266_v6, %v6265_v5 }
 0x333   : > { %2455 = vmatpush.bf16.msrb.mxu2 %v5779_v37  ;;  %v2046_v36 = vsel %vm1576_vm14, %v10088_v22, %v2037_v20  ;;  %v2045_v17 = vsel %vm1576_vm14, %v2037_v20, %v2038_v40  ;;  %v1916_v20 = vadd.f32 %v7224_v12, %v1884_v7  ;;  %v2157_v12 = vmul.f32 %v6881_v57, %v7233_v50 }
 0x334   : > { %v1885_v51 = vadd.f32 %v1877_v1, %v1797_v3  ;;  %v2084_v37 = vmul.f32 %v6873_v55, %v2046_v36  ;;  %5785 = vmatmul.msk.bf16.gmra.mxu1 %vm821_vm0, %v2265_v35  ;;  %v10406_v55 = vld [vmem:[#allocation68_spill] sm:$0xff] }
 0x336   : > { %5788 = vmatmul.msk.bf16.vlgmr.msrb.gmra.mxu2 %vm821_vm0, %v7193_v25 }
 0x337   : > { %2098 = vrot.lane.b32.xlu1 %v6943_v58, %s10084_s1  ;;  %6092 = vset.pattern.permute.xlu2 %v10353_v43  ;;  %s10448_s1 = smov 96  }
 0x338   : > { %v1897_v30 = vpop.permute.xlu1 %1896  ;;  %1871 = vperm.xlu2 %6092, %v6924_v32   ;;  %v7304_v27 = vpop.permute.xlu2 %1930  ;;  %6097 = vset.pattern.permute.xlu1 %v10330_v10  ;;  %v1996_v10 = vmul.f32 %v6990_v61, %v1958_v18  ;;  %v2085_v18 = vmul.f32 %v6876_v33, %v2045_v17 }
 0x339   : > { %v1950_v19 = vrot.slane %v7304_v27, 1  ;;  %v1917_v43 = vadd.f32 %v1897_v30, %v1885_v51  ;;  %v2180_v30 = vsel %vm1745_vm15, %v2174_v39, %v10091_v34  ;;  %v818_v51 = vld [vmem:[%s10004_s23] sm:$0xff] }
 0x33a   : > { %v7318_v29 = vpop.permute.xlu0 %2020  ;;  %v2004_v25 = vadd.f32 %v1996_v10, %v1916_v20  ;;  %v7368_v20 = vperm.slane %v818_v51, 1 }
 0x33b   : > { %v1957_v48 = vsel %vm1745_vm15, %v1949_v47, %v1950_v19  ;;  %v10087_v47 = vrot.slane %v7311_v56, 1  ;;  %5793 = vmatmul.msk.bf16.gmra.mxu3 %vm821_vm0, %v2265_v35 }
 0x33c   : > { %v1997_v1 = vmul.f32 %v6868_v53, %v1957_v48  ;;  %v2092_v10 = vadd.f32 %v2084_v37, %v2004_v25  ;;  %v2221_v48 = vmul.f32 %v6898_v46, %v2180_v30  ;;  %v10407_v46 = vld [vmem:[#allocation67_spill] sm:$0xff] }
 0x33d   : > { %v2181_v8 = vsel %vm1745_vm15, %v10087_v47, %v2174_v39  ;;  %v7366_v39 = vperm.slane %v818_v51, 0 }
 0x33e   : > { %v2005_v23 = vadd.f32 %v1997_v1, %v1917_v43 }
 0x33f   : > { %1936 = vrot.lane.b32.xlu1 %v7131_v21, %s10354_s30 }
 0x340   : > { %v2093_v3 = vadd.f32 %v2085_v18, %v2005_v23  ;;  %v2105_v7 = vpop.permute.xlu1 %2104  ;;  %6093 = vset.pattern.permute.xlu2 %v10350_v62  ;;  %v7354_v36 = vpop.permute.xlu2 %1723  ;;  %v2220_v62 = vmul.f32 %v7005_v45, %v2181_v8  ;;  %v5798_v8 = vld [vmem:[%s9993_s12] sm:$0xf] }
 0x341   : > { %v2156_v17 = vmul.f32 %v6884_v59, %v2105_v7  ;;  %1987 = vperm.xlu2 %6093, %v6903_v11   ;;  %v10399_v45 = vld [vmem:[#allocation38_spill] sm:$0xff] }
 0x342   : > { %v7363_v50 = vpop.permute.xlu0 %1900  ;;  %v2165_v5 = vadd.f32 %v2157_v12, %v2093_v3  ;;  %v5983_v12 = vld [vmem:[%s9993_s12 + $0x8] sm:$0xf0] }
 0x343   : > { %v2164_v6 = vadd.f32 %v2156_v17, %v2092_v10  ;;  %v5799_v51 = vor.u32 %v5983_v12, %v5798_v8  ;;  %v5982_v10 = vld [vmem:[%s9993_s12 + $0x4] sm:$0xf]  ;;  %v1701_v12 = vmul.f32 %v6927_v31, %v7259_v26 }
 0x344   : > { %v2229_v43 = vadd.f32 %v2221_v48, %v2165_v5  ;;  %v6267_v5 = vld [vmem:[%s6439_s0 + $0x20] sm:$0xff] }
 0x345   : > { %v2228_v1 = vadd.f32 %v2220_v62, %v2164_v6  ;;  %2549 = vmatpush.bf16.msrb.mxu0 %v5799_v51  ;;  %v6268_v62 = vld [vmem:[%s6439_s0 + $0x28] sm:$0xff] }
 0x346   : > { %v2238_v37 = vmul.f32 %v7366_v39, %v2229_v43  ;;  %5789 = vmatmul.msk.bf16.gmra.mxu2 %vm821_vm0, %v2265_v35  ;;  %v2266_v6 = vpack.c.bf16 %v6268_v62, %v6267_v5 }
 0x347   : > { %v2237_v18 = vmul.f32 %v7366_v39, %v2228_v1  ;;  %2147 = vperm.xlu1 %6097, %v6903_v11  }
 0x348   : > { %v1722_v23 = vpop.permute.xlu1 %1721  ;;  %v7373_v30 = vpop.permute.xlu2 %1812  ;;  %v2247_v25 = vadd.f32 %v7368_v20, %v2238_v37  ;;  %5786 = vmatmul.msk.bf16.gmra.mxu1 %vm821_vm0, %v2266_v6 }
 0x349   : > { %6096 = vset.pattern.permute.xlu2 %v10324_v2  ;;  %v2246_v3 = vadd.f32 %v7368_v20, %v2237_v18  ;;  %v5800_v2 = vld [vmem:[%s9993_s12 + $0xc] sm:$0xf0]  ;;  %v1741_v1 = vrot.slane %v1722_v23, 1  ;;  %v10356_v23 = vrot.slane %v7189_v63, 1 }
 0x34a   : > { %v7384_v7 = vpop.permute.xlu0 %1814  ;;  %2079 = vperm.xlu2 %6096, %v6924_v32   ;;  %v2255_v17 = vmax.f32 %v2247_v25, 0.0  ;;  %v5803_v48 = vor.u32 %v5982_v10, %v5800_v2 }
 0x34b   : > { %v2254_v43 = vmax.f32 %v2246_v3, 0.0  ;;  %5794 = vmatmul.msk.bf16.gmra.mxu3 %vm821_vm0, %v2266_v6  ;;  %v1749_v8 = vsel %vm1745_vm15, %v10356_v23, %v1741_v1  ;;  %v1629_v3 = vmul.f32 %v6886_v60, %v6996_v9  ;;  %v1481_v9 = vpop.f32.mrf.mxu3  ;;  %v10398_v60 = vld [vmem:[#allocation8_spill] sm:$0xff] }
 0x34c   : > { %2578 = vmatpush.bf16.msra.mxu1 %v5803_v48  ;;  %v1790_v51 = vmul.f32 %v6919_v41, %v1749_v8  ;;  %v1561_v48 = vpop.f32.mrf.mxu2  ;;  %v6269_v8 = vld [vmem:[%s6439_s0 + $0x30] sm:$0xff]  ;;  %v10396_v41 = vld [vmem:[#allocation70_spill] sm:$0xff] }
 0x34d   : > { %v7398_v37 = vpack.c.bf16 %v2255_v17, %v2254_v43  ;;  %v1709_v10 = vadd.f32 %v1701_v12, %v1629_v3  ;;  %v10357_v17 = vrot.slane %v7211_v54, 7  ;;  %v10360_v43 = vld [vmem:[#allocation40_spill] sm:$0xff]  ;;  %v6270_v12 = vld [vmem:[%s6439_s0 + $0x38] sm:$0xff]  ;;  %v10089_v3 = vrot.slane %v7354_v36, 1 }
 0x34e   : > { %v2267_v54 = vpack.c.bf16 %v6270_v12, %v6269_v8 }
 0x34f   : > { %6099 = vset.pattern.permute.xlu1 %v10343_v14  ;;  %v1798_v26 = vadd.f32 %v1790_v51, %v1709_v10  ;;  %v10361_v51 = vld [vmem:[#allocation37_spill] sm:$0xff] }
 0x350   : > { %v1650_v18 = vpop.permute.xlu1 %1649  ;;  %2215 = vperm.xlu1 %6099, %v6924_v32   ;;  %v7401_v25 = vpop.permute.xlu2 %1932  ;;  %v1830_v32 = vrot.slane %v7274_v42, 7  ;;  %v10362_v10 = vld [vmem:[#allocation53_spill] sm:$0xff] }
 0x351   : > { %v1951_v42 = vrot.slane %v7401_v25, 1  ;;  %v1702_v62 = vmul.f32 %v6906_v16, %v1650_v18  ;;  %v2039_v25 = vrot.slane %v7318_v29, 7  ;;  %v1748_v18 = vsel %vm1745_vm15, %v1741_v1, %v10089_v3  ;;  %v10364_v1 = vld [vmem:[#allocation44_spill] sm:$0xff] }
 0x352   : > { %v7404_v35 = vpop.permute.xlu0 %1867  ;;  %2024 = vrot.lane.b32.xlu2 %v7131_v21, %s10338_s8  ;;  %v1562_v29 = vadd.f32 %v1561_v48, %v1481_v9 }
 0x353   : > { %10355 = vst [vmem:[#allocation73_spill] sm:$0xff] %v7404_v35  ;;  %6098 = vset.pattern.permute.xlu2 %v10343_v14  ;;  %v1837_v14 = vsel %vm1576_vm14, %v10357_v17, %v1830_v32  ;;  %v1630_v17 = vmul.f32 %v10362_v10, %v10361_v51  ;;  %v1956_v8 = vsel %vm1745_vm15, %v1950_v19, %v1951_v42 }
 0x354   : > { %v1878_v23 = vmul.f32 %v10360_v43, %v1837_v14  ;;  %v10092_v14 = vrot.slane %v7373_v30, 7  ;;  %v1998_v3 = vmul.f32 %v10364_v1, %v1956_v8  ;;  %v2044_v27 = vsel %vm1576_vm14, %v2038_v40, %v2039_v25  ;;  %v10393_v43 = vld [vmem:[#allocation9_spill] sm:$0xff] }
 0x356   : > { %5790 = vmatmul.msk.bf16.gmra.mxu2 %vm821_vm0, %v2266_v6  ;;  %v1886_v47 = vadd.f32 %v1878_v23, %v1798_v26  ;;  %v1710_v6 = vadd.f32 %v1702_v62, %v1630_v17  ;;  %v10363_v23 = vld [vmem:[#allocation41_spill] sm:$0xff]  ;;  %v1836_v19 = vsel %vm1576_vm14, %v1830_v32, %v10092_v14  ;;  %v2176_v17 = vrot.slane %v1562_v29, 1 }
 0x357   : > { %v1791_v22 = vmul.f32 %v10363_v23, %v1748_v18  ;;  %v1483_v18 = vpop.f32.mrf.mxu3 }
 0x358   : > { %v1899_v2 = vpop.permute.xlu1 %1898  ;;  %v7419_v63 = vpop.permute.xlu2 %1651  ;;  %5787 = vmatmul.msk.bf16.gmra.mxu1 %vm821_vm0, %v2267_v54 }
 0x359   : > { %v1918_v12 = vadd.f32 %v1899_v2, %v1886_v47  ;;  %v1563_v2 = vpop.f32.mrf.mxu2  ;;  %v1799_v48 = vadd.f32 %v1791_v22, %v1710_v6  ;;  %v10368_v22 = vrot.slane %v7285_v38, 1 }
 0x35a   : > { %2112 = vrot.lane.b32.xlu2 %v7131_v21, %s10358_s9  ;;  %v7468_v34 = vadd.f32 %v1563_v2, %v1483_v18  ;;  %v10372_v18 = vld [vmem:[#allocation47_spill] sm:$0xff] }
 0x35b   : > { %v7428_v5 = vpop.permute.xlu0 %2067  ;;  %5795 = vmatmul.msk.bf16.gmra.mxu3 %vm821_vm0, %v2267_v54  ;;  %v2006_v9 = vadd.f32 %v1998_v3, %v1918_v12  ;;  %v2179_v3 = vsel %vm1745_vm15, %v10368_v22, %v2176_v17 }
 0x35c   : > { %10359 = vst [vmem:[#allocation74_spill] sm:$0xff] %v7428_v5  ;;  %v2086_v62 = vmul.f32 %v7428_v5, %v2044_v27  ;;  %v10093_v29 = vrot.slane %v7468_v34, 1 }
 0x35e   : > { %v2094_v23 = vadd.f32 %v2086_v62, %v2006_v9 }
 0x360   : > { %v2109_v51 = vpop.permute.xlu1 %2108  ;;  %v7449_v26 = vpop.permute.xlu2 %2022 }
 0x361   : > { %v2158_v44 = vmul.f32 %v10367_v28, %v2109_v51  ;;  %v10095_v40 = vrot.slane %v7449_v26, 7 }
 0x362   : > { %2211 = vperm.xlu2 %6098, %v6903_v11   ;;  %v10366_v11 = vld [vmem:[#allocation33_spill] sm:$0xff] }
 0x363   : > { %v7463_v47 = vpop.permute.xlu0 %2075  ;;  %v1879_v8 = vmul.f32 %v10366_v11, %v1836_v19  ;;  %v2166_v12 = vadd.f32 %v2158_v44, %v2094_v23  ;;  %v2043_v51 = vsel %vm1576_vm14, %v2039_v25, %v10095_v40  ;;  %v10369_v19 = vld [vmem:[#allocation51_spill] sm:$0xff]  ;;  %v1573_v44 = vrot.slane %v7131_v21, 7  ;;  %v10373_v21 = vld [vmem:[#allocation49_spill] sm:$0xff]  ;;  %v10379_v40 = vld [vmem:[#allocation52_spill] sm:$0xff] }
 0x364   : > { %10365 = vst [vmem:[#allocation37_spill] sm:$0xff] %v7463_v47  ;;  %v2222_v38 = vmul.f32 %v10369_v19, %v2179_v3  ;;  %v2087_v25 = vmul.f32 %v10372_v18, %v2043_v51  ;;  %v10375_v51 = vld [vmem:[#allocation42_spill] sm:$0xff]  ;;  %v10382_v19 = vld [vmem:[#allocation3_spill] sm:$0xff] }
 0x365   : > { %v1887_v1 = vadd.f32 %v1879_v8, %v1799_v48  ;;  %v10370_v48 = vld [vmem:[#allocation36_spill] sm:$0xff]  ;;  %v10381_v18 = vld [vmem:[#allocation2_spill] sm:$0xff] }
 0x366   : > { %5791 = vmatmul.msk.bf16.gmra.mxu2 %vm821_vm0, %v2267_v54  ;;  %v2230_v62 = vadd.f32 %v2222_v38, %v2166_v12  ;;  %v10374_v54 = vrot.slane %v6943_v58, 7  ;;  %v1826_v58 = vrot.slane %v10379_v40, 7 }
 0x367   : > { %v1919_v2 = vadd.f32 %v7363_v50, %v1887_v1 }
 0x368   : > { %v7471_v32 = vpop.permute.xlu1 %1934  ;;  %v2111_v14 = vpop.permute.xlu2 %2110  ;;  %v1584_v12 = vsel %vm1576_vm14, %v1573_v44, %v10374_v54 }
 0x369   : > { %v10094_v6 = vrot.slane %v7471_v32, 1 }
 0x36b   : > { %v1955_v27 = vsel %vm1745_vm15, %v1951_v42, %v10094_v6  ;;  %v2178_v42 = vsel %vm1745_vm15, %v2176_v17, %v10093_v29  ;;  %v10378_v29 = vld [vmem:[#allocation45_spill] sm:$0xff] }
 0x36c   : > { %v1999_v9 = vmul.f32 %v10370_v48, %v1955_v27  ;;  %v7491_v23 = vpop.permute.xlu0 %2143  ;;  %v1737_v27 = vrot.slane %v10373_v21, 1  ;;  %v2223_v38 = vmul.f32 %v10375_v51, %v2178_v42  ;;  %v1626_v6 = vmul.f32 %v10378_v29, %v1584_v12  ;;  %v10386_v48 = vld [vmem:[#allocation64_spill] sm:$0xff] }
 0x36d   : > { %10371 = vst [vmem:[#allocation75_spill] sm:$0xff] %v7491_v23  ;;  %v2159_v50 = vmul.f32 %v7491_v23, %v2111_v14  ;;  %v10380_v23 = vld [vmem:[#allocation54_spill] sm:$0xff]  ;;  %v1947_v5 = vrot.slane %v10386_v48, 1 }
 0x36e   : > { %v2007_v8 = vadd.f32 %v1999_v9, %v1919_v2  ;;  %v2239_v2 = vmul.f32 %v7366_v39, %v2230_v62  ;;  %v7511_v17 = vpop.f32.mrf.mxu3  ;;  %v1698_v54 = vmul.f32 %v10381_v18, %v10380_v23 }
 0x370   : > { %v2095_v22 = vadd.f32 %v2087_v25, %v2007_v8  ;;  %v7500_v1 = vpop.permute.xlu1 %1653  ;;  %v7502_v3 = vpop.permute.xlu2 %1725  ;;  %v10376_v25 = vld [vmem:[#allocation60_spill] sm:$0xff]  ;;  %v2248_v62 = vadd.f32 %v7368_v20, %v2239_v2  ;;  %v10384_v2 = vld [vmem:[#allocation57_spill] sm:$0xff] }
 0x371   : > { %v10377_v14 = vrot.slane %v10376_v25, 1  ;;  %v10385_v51 = vrot.slane %v10384_v2, 7 }
 0x372   : > { %v2167_v9 = vadd.f32 %v2159_v50, %v2095_v22  ;;  %v5806_v22 = vld [vmem:[%s9993_s12 + $0x8] sm:$0xf]  ;;  %v5984_v50 = vld [vmem:[%s9993_s12 + $0x10] sm:$0xf0] }
 0x373   : > { %v1752_v8 = vsel %vm1745_vm15, %v1737_v27, %v10377_v14  ;;  %v10383_v14 = vld [vmem:[#allocation48_spill] sm:$0xff]  ;;  %v1840_v28 = vsel %vm1576_vm14, %v1826_v58, %v10385_v51 }
 0x374   : > { %v2231_v21 = vadd.f32 %v2223_v38, %v2167_v9  ;;  %v1787_v42 = vmul.f32 %v10382_v19, %v1752_v8  ;;  %v5807_v38 = vor.u32 %v5984_v50, %v5806_v22  ;;  %v1706_v9 = vadd.f32 %v1698_v54, %v1626_v6  ;;  %v10387_v50 = vld [vmem:[#allocation69_spill] sm:$0xff]  ;;  %v10389_v51 = vld [vmem:[#allocation4_spill] sm:$0xff] }
 0x375   : > { %v10102_v8 = vrot.slane %v10383_v14, 7  ;;  %v2256_v6 = vmax.f32 %v2248_v62, 0.0  ;;  %v2035_v10 = vrot.slane %v10387_v50, 7  ;;  %v1875_v11 = vmul.f32 %v10389_v51, %v1840_v28  ;;  %v10395_v28 = vld [vmem:[#allocation71_spill] sm:$0xff] }
 0x376   : > { %v2240_v12 = vmul.f32 %v7366_v39, %v2231_v21  ;;  %2607 = vmatpush.bf16.msra.mxu2 %v5807_v38  ;;  %v1795_v21 = vadd.f32 %v1787_v42, %v1706_v9  ;;  %v7540_v22 = vpop.f32.mrf.mxu3  ;;  %v10390_v38 = vld [vmem:[#allocation30_spill] sm:$0xff]  ;;  %v10391_v62 = vrot.slane %v7133_v4, 7 }
 0x377   : > { %v1577_v48 = vsel %vm1576_vm14, %v10102_v8, %v1573_v44  ;;  %v10394_v44 = vld [vmem:[#allocation5_spill] sm:$0xff] }
 0x378   : > { %v1656_v40 = vpop.permute.xlu1 %1655  ;;  %v7530_v25 = vpop.permute.xlu2 %1727  ;;  %v2249_v23 = vadd.f32 %v7368_v20, %v2240_v12  ;;  %v10388_v12 = vrot.slane %v7115_v13, 1  ;;  %v1625_v8 = vmul.f32 %v10394_v44, %v1577_v48 }
 0x379   : > { %v1697_v42 = vmul.f32 %v10390_v38, %v1656_v40  ;;  %v10392_v13 = vrot.slane %v7530_v25, 1  ;;  %v1552_v40 = vadd.f32 %v10396_v41, %v10395_v28  ;;  %v10403_v41 = vld [vmem:[#allocation22_spill] sm:$0xff] }
 0x37a   : > { %v2257_v54 = vmax.f32 %v2249_v23, 0.0  ;;  %v1959_v2 = vsel %vm1745_vm15, %v1947_v5, %v10388_v12  ;;  %v2047_v23 = vsel %vm1576_vm14, %v2035_v10, %v10391_v62  ;;  %v1883_v12 = vadd.f32 %v1875_v11, %v1795_v21  ;;  %v10401_v11 = vld [vmem:[#allocation55_spill] sm:$0xff] }
 0x37b   : > { %v1753_v50 = vsel %vm1745_vm15, %v10392_v13, %v1737_v27  ;;  %v1995_v16 = vmul.f32 %v10393_v43, %v1959_v2  ;;  %v2083_v31 = vmul.f32 %v10398_v60, %v2047_v23  ;;  %v1705_v62 = vadd.f32 %v1697_v42, %v1625_v8  ;;  %v10402_v13 = vld [vmem:[#allocation66_spill] sm:$0xff] }
 0x37c   : > { %v7553_v9 = vpack.c.bf16 %v2257_v54, %v2256_v6  ;;  %v7567_v6 = vpop.f32.mrf.mxu2  ;;  %v10397_v54 = vld [vmem:[#allocation72_spill] sm:$0xff]  ;;  %v1786_v59 = vmul.f32 %v10399_v45, %v1753_v50  ;;  %v2155_v28 = vmul.f32 %v10403_v41, %v10402_v13  ;;  %v10405_v45 = vld [vmem:[#allocation7_spill] sm:$0xff]  ;;  %v10409_v13 = vrot.slane %v10401_v11, 1 }
 0x37d   : > { %v1915_v4 = vadd.f32 %v10397_v54, %v1883_v12  ;;  %v2172_v12 = vrot.slane %v1552_v40, 1  ;;  %v10404_v54 = vld [vmem:[#allocation59_spill] sm:$0xff] }
 0x37e   : > { %v7580_v44 = vpop.f32.mrf.mxu3  ;;  %v1794_v50 = vadd.f32 %v1786_v59, %v1705_v62  ;;  %v1960_v23 = vsel %vm1745_vm15, %v10409_v13, %v1947_v5  ;;  %v10410_v59 = vrot.slane %v10404_v54, 7  ;;  %v10411_v62 = vld [vmem:[#allocation6_spill] sm:$0xff] }
 0x37f   : > { %v2003_v48 = vadd.f32 %v1995_v16, %v1915_v4  ;;  %v7590_v16 = vadd.f32 %v10407_v46, %v10406_v55  ;;  %v10408_v4 = vrot.slane %v7311_v56, 1  ;;  %v1994_v55 = vmul.f32 %v10411_v62, %v1960_v23  ;;  %v10412_v46 = vld [vmem:[#allocation13_spill] sm:$0xff] }
 0x380   : > { %v7572_v38 = vpop.permute.xlu1 %1816  ;;  %v7574_v27 = vpop.permute.xlu2 %1690  ;;  %v10413_v56 = vld [vmem:[#allocation61_spill] sm:$0xff] }
 0x381   : > { %10400 = vst [vmem:[#allocation49_spill] sm:$0xff] %v7574_v27  ;;  %v10119_v2 = vrot.slane %v7572_v38, 7  ;;  %v2091_v42 = vadd.f32 %v2083_v31, %v2003_v48  ;;  %v2182_v40 = vsel %vm1745_vm15, %v2172_v12, %v10408_v4  ;;  %v2048_v31 = vsel %vm1576_vm14, %v10410_v59, %v2035_v10  ;;  %v10417_v23 = vld [vmem:[#allocation65_spill] sm:$0xff] }
 0x382   : > { %v2219_v48 = vmul.f32 %v10412_v46, %v2182_v40  ;;  %v10418_v40 = vld [vmem:[#allocation10_spill] sm:$0xff] }
 0x383   : > { %v1841_v8 = vsel %vm1576_vm14, %v10119_v2, %v1826_v58  ;;  %v2163_v57 = vadd.f32 %v2155_v28, %v2091_v42 }
 0x384   : > { %v1874_v21 = vmul.f32 %v10405_v45, %v1841_v8  ;;  %v7609_v4 = vpop.f32.mrf.mxu2  ;;  %v10126_v45 = vrot.slane %v7590_v16, 1 }
 0x385   : > { %v2227_v42 = vadd.f32 %v2219_v48, %v2163_v57 }
 0x386   : > { %v1882_v58 = vadd.f32 %v1874_v21, %v1794_v50  ;;  %v10416_v21 = vld [vmem:[#allocation19_spill] sm:$0xff]  ;;  %v7615_v13 = vpop.f32.mrf.mxu3  ;;  %v2183_v10 = vsel %vm1745_vm15, %v10126_v45, %v2172_v12  ;;  %v10426_v45 = vld [vmem:[#allocation34_spill] sm:$0xff] }
 0x387   : > { %v2082_v28 = vmul.f32 %v10416_v21, %v2048_v31  ;;  %v2236_v61 = vmul.f32 %v7366_v39, %v2227_v42 }
 0x388   : > { %v1914_v8 = vadd.f32 %v10413_v56, %v1882_v58  ;;  %v7607_v2 = vpop.permute.xlu1 %1694  ;;  %v2154_v58 = vmul.f32 %v10418_v40, %v10417_v23  ;;  %v10419_v56 = vld [vmem:[#allocation11_spill] sm:$0xff]  ;;  %v1703_v40 = vmul.f32 %v7574_v27, %v7419_v63  ;;  %v10430_v63 = vld [vmem:[#allocation46_spill] sm:$0xff] }
 0x389   : > { %10414 = vst [vmem:[#allocation60_spill] sm:$0xff] %v7607_v2  ;;  %v7612_v5 = vpop.permute.xlu2 %1779  ;;  %v2218_v62 = vmul.f32 %v10419_v56, %v2183_v10  ;;  %v2245_v57 = vadd.f32 %v7368_v20, %v2236_v61 }
 0x38a   : > { %10415 = vst [vmem:[#allocation52_spill] sm:$0xff] %v7612_v5  ;;  %v2002_v50 = vadd.f32 %v1994_v55, %v1914_v8 }
 0x38c   : > { %v2090_v59 = vadd.f32 %v2082_v28, %v2002_v50  ;;  %v7629_v48 = vpop.f32.mrf.mxu2  ;;  %v2253_v50 = vmax.f32 %v2245_v57, 0.0 }
 0x38e   : > { %v2162_v33 = vadd.f32 %v2154_v58, %v2090_v59  ;;  %v7631_v8 = vpop.f32.mrf.mxu3  ;;  %v10424_v59 = vld [vmem:[#allocation43_spill] sm:$0xff] }
 0x38f   : > { %v1571_v57 = vrot.slane %v10424_v59, 7  ;;  %v10428_v59 = vrot.slane %v10383_v14, 7  ;;  %v1704_v14 = vmul.f32 %v7607_v2, %v7500_v1 }
 0x390   : > { %v2226_v49 = vadd.f32 %v2218_v62, %v2162_v33 }
 0x391   : > { %v7625_v31 = vpop.permute.xlu1 %1783  ;;  %v1578_v53 = vsel %vm1576_vm14, %v1571_v57, %v10428_v59  ;;  %v10431_v59 = vrot.slane %v7530_v25, 1 }
 0x392   : > { %10420 = vst [vmem:[#allocation54_spill] sm:$0xff] %v7625_v31  ;;  %v2235_v55 = vmul.f32 %v7366_v39, %v2226_v49  ;;  %v7633_v12 = vpop.permute.xlu2 %1871  ;;  %v1632_v52 = vmul.f32 %v10432_v0, %v1578_v53 }
 0x393   : > { %10421 = vst [vmem:[#allocation48_spill] sm:$0xff] %v7633_v12 }
 0x394   : > { %v2244_v28 = vadd.f32 %v7368_v20, %v2235_v55  ;;  %v7643_v61 = vpop.f32.mrf.mxu2  ;;  %v1712_v46 = vadd.f32 %v1704_v14, %v1632_v52  ;;  %v2371_v14 = vpop.f32.mrf.mxu0 }
 0x396   : > { %v2252_v10 = vmax.f32 %v2244_v28, 0.0  ;;  %v7638_v33 = vpop.f32.mrf.mxu3  ;;  %v1743_v28 = vrot.slane %v7502_v3, 1  ;;  %v10429_v3 = vrot.slane %v7354_v36, 1  ;;  %v1832_v36 = vrot.slane %v7384_v7, 7 }
 0x397   : > { %v10434_v7 = vrot.slane %v7572_v38, 7  ;;  %v10435_v38 = vrot.slane %v7449_v26, 7 }
 0x398   : > { %v2510_v23 = vpack.c.bf16 %v2253_v50, %v2252_v10  ;;  %v7655_v10 = vpop.f32.mrf.mxu1  ;;  %v1747_v24 = vsel %vm1745_vm15, %v10429_v3, %v1743_v28  ;;  %v1746_v3 = vsel %vm1745_vm15, %v1743_v28, %v10431_v59 }
 0x399   : > { %v1903_v42 = vpop.permute.xlu1 %1902  ;;  %v1834_v25 = vsel %vm1576_vm14, %v1832_v36, %v10434_v7 }
 0x39a   : > { %5808 = vmatmul.msk.bf16.vlgmr.msrb.gmra.mxu0 %vm821_vm0, %v2510_v23  ;;  %5812 = vmatmul.msk.bf16.vlgmr.msra.gmra.mxu1 %vm821_vm0, %v2510_v23 }
 0x39b   : > { %5816 = vmatmul.msk.bf16.vlgmr.msra.gmra.mxu2 %vm821_vm0, %v2510_v23  ;;  %v7641_v49 = vpop.permute.xlu2 %1987  ;;  %v10427_v23 = vrot.slane %v10426_v45, 7 }
 0x39c   : > { %10422 = vst [vmem:[#allocation57_spill] sm:$0xff] %v7641_v49  ;;  %v7653_v50 = vpop.f32.mrf.mxu2 }
 0x39d   : > { %v1579_v56 = vsel %vm1576_vm14, %v10427_v23, %v1571_v57  ;;  %v1792_v57 = vmul.f32 %v7612_v5, %v1747_v24  ;;  %v10433_v24 = vrot.slane %v7373_v30, 7 }
 0x39e   : > { %v7647_v58 = vpop.f32.mrf.mxu3  ;;  %v1631_v23 = vmul.f32 %v10430_v63, %v1579_v56  ;;  %v1793_v56 = vmul.f32 %v7625_v31, %v1746_v3 }
 0x3a0   : > { %v1711_v63 = vadd.f32 %v1703_v40, %v1631_v23  ;;  %v7702_v59 = vpop.f32.mrf.mxu1  ;;  %v1801_v53 = vadd.f32 %v1793_v56, %v1712_v46  ;;  %v1881_v40 = vmul.f32 %v7633_v12, %v1834_v25  ;;  %v10437_v46 = vrot.slane %v10401_v11, 1  ;;  %v10438_v25 = vld [vmem:[#allocation63_spill] sm:$0xff] }
 0x3a1   : > { %v7645_v62 = vpop.permute.xlu1 %1991 }
 0x3a2   : > { %10423 = vst [vmem:[#allocation64_spill] sm:$0xff] %v7645_v62  ;;  %v1800_v1 = vadd.f32 %v1792_v57, %v1711_v63 }
 0x3a4   : > { %v7650_v55 = vpop.permute.xlu2 %2079  ;;  %v7700_v28 = vpop.f32.mrf.mxu2 }
 0x3a5   : > { %10425 = vst [vmem:[#allocation69_spill] sm:$0xff] %v7650_v55 }
 0x3a6   : > { %v7677_v45 = vpop.f32.mrf.mxu3 }
 0x3a9   : > { %v7663_v21 = vpop.permute.xlu1 %2098 }
 0x3aa   : > { %5809 = vmatmul.msk.bf16.gmra.mxu0 %vm821_vm0, %v7398_v37  ;;  %5813 = vmatmul.msk.bf16.gmra.mxu1 %vm821_vm0, %v7398_v37 }
 0x3ab   : > { %5817 = vmatmul.msk.bf16.gmra.mxu2 %vm821_vm0, %v7398_v37  ;;  %v1835_v37 = vsel %vm1576_vm14, %v10433_v24, %v1832_v36 }
 0x3ac   : > { %v2025_v27 = vpop.permute.xlu2 %2024  ;;  %v1880_v52 = vmul.f32 %v7404_v35, %v1835_v37 }
 0x3ad   : > { %v2041_v5 = vrot.slane %v2025_v27, 7  ;;  %v10436_v27 = vrot.slane %v7471_v32, 1 }
 0x3ae   : > { %v1888_v23 = vadd.f32 %v1880_v52, %v1800_v1  ;;  %v2486_v57 = vpop.f32.mrf.mxu3  ;;  %v1889_v1 = vadd.f32 %v1881_v40, %v1801_v53  ;;  %v10439_v52 = vld [vmem:[#allocation62_spill] sm:$0xff]  ;;  %v2328_v40 = vpop.f32.mrf.mxu2 }
 0x3af   : > { %v2042_v36 = vsel %vm1576_vm14, %v10435_v38, %v2041_v5  ;;  %v7718_v37 = vadd.f32 %v2486_v57, %v2371_v14  ;;  %v1905_v38 = vpop.permute.xlu0 %1904  ;;  %v10441_v14 = vrot.slane %v10404_v54, 7  ;;  %v10442_v54 = vrot.slane %v7468_v34, 1 }
 0x3b0   : > { %v1920_v7 = vadd.f32 %v1903_v42, %v1888_v23  ;;  %v2088_v32 = vmul.f32 %v7463_v47, %v2042_v36  ;;  %v1921_v11 = vadd.f32 %v1905_v38, %v1889_v1 }
 0x3b1   : > { %v1937_v63 = vpop.permute.xlu1 %1936  ;;  %v2049_v42 = vsel %vm1576_vm14, %v2041_v5, %v10441_v14  ;;  %v2433_v23 = vpop.f32.mrf.mxu1 }
 0x3b2   : > { %v1953_v30 = vrot.slane %v1937_v63, 1  ;;  %v1547_v63 = vadd.f32 %v10439_v52, %v10438_v25 }
 0x3b4   : > { %v1954_v3 = vsel %vm1745_vm15, %v10436_v27, %v1953_v30  ;;  %v1961_v56 = vsel %vm1745_vm15, %v1953_v30, %v10437_v46  ;;  %v2113_v24 = vpop.permute.xlu2 %2112  ;;  %v2170_v30 = vrot.slane %v1547_v63, 1  ;;  %v2089_v46 = vmul.f32 %v7650_v55, %v2049_v42 }
 0x3b5   : > { %v2000_v26 = vmul.f32 %v7641_v49, %v1954_v3  ;;  %v2001_v27 = vmul.f32 %v7645_v62, %v1961_v56 }
 0x3b6   : > { %v2185_v5 = vsel %vm1745_vm15, %v10442_v54, %v2170_v30  ;;  %v7763_v38 = vpop.f32.mrf.mxu2 }
 0x3b7   : > { %v2008_v12 = vadd.f32 %v2000_v26, %v1920_v7  ;;  %v2009_v57 = vadd.f32 %v2001_v27, %v1921_v11 }
 0x3b9   : > { %v2096_v35 = vadd.f32 %v2088_v32, %v2008_v12  ;;  %v7725_v31 = vpop.permute.xlu1 %2147  ;;  %v7739_v12 = vadd.f32 %v2433_v23, %v7629_v48  ;;  %v2097_v1 = vadd.f32 %v2089_v46, %v2009_v57  ;;  %v10445_v48 = vrot.slane %v7590_v16, 1  ;;  %v7774_v57 = vpop.f32.mrf.mxu0 }
 0x3ba   : > { %10440 = vst [vmem:[#allocation71_spill] sm:$0xff] %v7725_v31  ;;  %v2160_v53 = vmul.f32 %v7725_v31, %v2113_v24  ;;  %5810 = vmatmul.msk.bf16.gmra.mxu0 %vm821_vm0, %v7553_v9  ;;  %5814 = vmatmul.msk.bf16.gmra.mxu1 %vm821_vm0, %v7553_v9  ;;  %v7749_v24 = vpop.permute.xlu0 %2151 }
 0x3bb   : > { %5818 = vmatmul.msk.bf16.gmra.mxu2 %vm821_vm0, %v7553_v9  ;;  %10444 = vst [vmem:[#allocation72_spill] sm:$0xff] %v7749_v24  ;;  %v2161_v9 = vmul.f32 %v7749_v24, %v7663_v21  ;;  %v2184_v34 = vsel %vm1745_vm15, %v2170_v30, %v10445_v48 }
 0x3bc   : > { %v2168_v36 = vadd.f32 %v2160_v53, %v2096_v35  ;;  %v7745_v3 = vpop.permute.xlu2 %2211  ;;  %v7759_v35 = vpop.f32.mrf.mxu1 }
 0x3bd   : > { %10443 = vst [vmem:[#allocation70_spill] sm:$0xff] %v7745_v3  ;;  %v2224_v56 = vmul.f32 %v7745_v3, %v2185_v5  ;;  %v2169_v25 = vadd.f32 %v2161_v9, %v2097_v1 }
 0x3be   : > { %v2457_v23 = vpop.f32.mrf.mxu2 }
 0x3bf   : > { %v2232_v7 = vadd.f32 %v2224_v56, %v2168_v36 }
 0x3c1   : > { %v2241_v63 = vmul.f32 %v7366_v39, %v2232_v7  ;;  %v7778_v5 = vpop.f32.mrf.mxu0 }
 0x3c2   : > { %v7757_v26 = vpop.permute.xlu1 %2215 }
 0x3c3   : > { %10446 = vst [vmem:[#allocation55_spill] sm:$0xff] %v7757_v26  ;;  %v2225_v52 = vmul.f32 %v7757_v26, %v2184_v34  ;;  %v2250_v21 = vadd.f32 %v7368_v20, %v2241_v63 }
 0x3c5   : > { %v2233_v32 = vadd.f32 %v2225_v52, %v2169_v25  ;;  %v2258_v11 = vmax.f32 %v2250_v21, 0.0  ;;  %v2438_v14 = vpop.f32.mrf.mxu1 }
 0x3c6   : > { %v7769_v53 = vadd.f32 %v2438_v14, %v7653_v50  ;;  %v2459_v54 = vpop.f32.mrf.mxu2 }
 0x3c7   : > { %v2242_v27 = vmul.f32 %v7366_v39, %v2233_v32  ;;  %v2429_v32 = vadd.f32 %v7655_v10, %v7567_v6 }
 0x3c9   : > { %v2251_v16 = vadd.f32 %v7368_v20, %v2242_v27  ;;  %v7782_v50 = vpop.f32.mrf.mxu0 }
 0x3cb   : > { %v2259_v30 = vmax.f32 %v2251_v16, 0.0 }
 0x3cd   : > { %v2513_v42 = vpack.c.bf16 %v2259_v30, %v2258_v11  ;;  %v7776_v39 = vpop.f32.mrf.mxu1  ;;  %v2458_v11 = vadd.f32 %v2457_v23, %v7511_v17  ;;  %v2431_v30 = vadd.f32 %v7702_v59, %v7609_v4 }
 0x3ce   : > { %v2462_v46 = vpop.f32.mrf.mxu2 }
 0x3cf   : > { %5811 = vmatmul.msk.bf16.gmra.mxu0 %vm821_vm0, %v2513_v42  ;;  %5815 = vmatmul.msk.bf16.gmra.mxu1 %vm821_vm0, %v2513_v42  ;;  %v2463_v17 = vadd.f32 %v2462_v46, %v7580_v44  ;;  %v2436_v46 = vadd.f32 %v7759_v35, %v7643_v61 }
 0x3d0   : > { %5819 = vmatmul.msk.bf16.gmra.mxu2 %vm821_vm0, %v2513_v42 }
 0x3d1   : > { %v7786_v1 = vpop.f32.mrf.mxu0 }
 0x3d5   : > { %v2443_v20 = vpop.f32.mrf.mxu1 }
 0x3d6   : > { %v7780_v36 = vadd.f32 %v2443_v20, %v2328_v40  ;;  %v7784_v56 = vpop.f32.mrf.mxu2 }
 0x3d9   : > { %v7788_v9 = vpop.f32.mrf.mxu0 }
 0x3dd   : > { %v7796_v52 = vpop.f32.mrf.mxu1 }
 0x3de   : > { %v2467_v7 = vpop.f32.mrf.mxu2 }
 0x3e1   : > { %v7792_v34 = vpop.f32.mrf.mxu0 }
 0x3e6   : > { %v7790_v48 = vpop.f32.mrf.mxu2 }
 0x3e9   : > { %v7798_v40 = vpop.f32.mrf.mxu0 }
 0x3ee   : > { %v7794_v25 = vpop.f32.mrf.mxu2 }
 0x3f6   : > { %v7800_v63 = vpop.f32.mrf.mxu2 }
 0x417   : > { %v2551_v27 = vpop.f32.mrf.mxu0  ;;  %v2580_v21 = vpop.f32.mrf.mxu1 }
 0x418   : > { %v7804_v16 = vadd.f32 %v2551_v27, %v2429_v32  ;;  %v7816_v20 = vadd.f32 %v2580_v21, %v2458_v11 }
 0x41a   : > { %2781 = vrot.lane.b32.xlu0 %v7804_v16, %s10338_s8  ;;  %2725 = vrot.lane.b32.xlu2 %v7804_v16, %s10349_s3  ;;  %v2653_v27 = vrot.slane %v7804_v16, 7 }
 0x41e   : > { %v2609_v14 = vpop.f32.mrf.mxu2 }
 0x41f   : > { %v7814_v42 = vadd.f32 %v2609_v14, %v7718_v37  ;;  %v2553_v6 = vpop.f32.mrf.mxu0  ;;  %v2582_v10 = vpop.f32.mrf.mxu1 }
 0x420   : > { %v2632_v32 = vadd.f32 %v2553_v6, %v2431_v30 }
 0x421   : > { %10447 = vst [vmem:[#allocation66_spill] sm:$0xff] %v7814_v42 }
 0x422   : > { %v2654_v26 = vrot.slane %v2632_v32, 7  ;;  %2853 = vrot.lane.b32.xlu0 %v7816_v20, %s10448_s1  ;;  %2685 = vrot.lane.b32.xlu2 %v7804_v16, %s10448_s1 }
 0x423   : > { %2727 = vrot.lane.b32.xlu1 %v2632_v32, %s10349_s3 }
 0x424   : > { %v7827_v4 = vsel %vm1576_vm14, %v2653_v27, %v2654_v26 }
 0x427   : > { %v2556_v59 = vpop.f32.mrf.mxu0  ;;  %v2585_v37 = vpop.f32.mrf.mxu1 }
 0x428   : > { %v2635_v23 = vadd.f32 %v2556_v59, %v7739_v12  ;;  %v7830_v21 = vadd.f32 %v2585_v37, %v2463_v17  ;;  %v2460_v12 = vadd.f32 %v2459_v54, %v7540_v22  ;;  %v2465_v37 = vadd.f32 %v7784_v56, %v7615_v13 }
 0x42a   : > { %v2655_v11 = vrot.slane %v2635_v23, 7  ;;  %2909 = vrot.lane.b32.xlu0 %v7816_v20, %s10349_s3  ;;  %2783 = vrot.lane.b32.xlu2 %v2632_v32, %s10338_s8  ;;  %v7844_v30 = vadd.f32 %v2582_v10, %v2460_v12  ;;  %v2470_v12 = vadd.f32 %v7790_v48, %v7638_v33 }
 0x42b   : > { %2857 = vrot.lane.b32.xlu1 %v7830_v21, %s10448_s1 }
 0x42c   : > { %v7839_v44 = vsel %vm1576_vm14, %v2654_v26, %v2655_v11 }
 0x42f   : > { %v2558_v16 = vpop.f32.mrf.mxu0  ;;  %v2587_v54 = vpop.f32.mrf.mxu1 }
 0x430   : > { %v2638_v14 = vadd.f32 %v2558_v16, %v2436_v46  ;;  %v7878_v46 = vadd.f32 %v2587_v54, %v2465_v37 }
 0x432   : > { %v2656_v6 = vrot.slane %v2638_v14, 7  ;;  %2967 = vrot.lane.b32.xlu0 %v7844_v30, %s10338_s8  ;;  %2855 = vrot.lane.b32.xlu2 %v7844_v30, %s10448_s1 }
 0x433   : > { %2913 = vrot.lane.b32.xlu1 %v7830_v21, %s10349_s3 }
 0x434   : > { %v7854_v26 = vsel %vm1576_vm14, %v2655_v11, %v2656_v6 }
 0x437   : > { %v2561_v61 = vpop.f32.mrf.mxu0  ;;  %v2590_v59 = vpop.f32.mrf.mxu1 }
 0x438   : > { %v7857_v22 = vadd.f32 %v2561_v61, %v7769_v53  ;;  %v2468_v53 = vadd.f32 %v2467_v7, %v7631_v8  ;;  %v2446_v8 = vadd.f32 %v7796_v52, %v7763_v38  ;;  %v2441_v38 = vadd.f32 %v7776_v39, %v7700_v28 }
 0x439   : > { %v2473_v28 = vadd.f32 %v7794_v25, %v7647_v58  ;;  %v7954_v25 = vpop.f32.mrf.mxu3  ;;  %v2475_v61 = vadd.f32 %v7800_v63, %v7677_v45 }
 0x43a   : > { %v10147_v35 = vrot.slane %v7857_v22, 7  ;;  %2911 = vrot.lane.b32.xlu2 %v7844_v30, %s10349_s3  ;;  %2785 = vrot.lane.b32.xlu0 %v2635_v23, %s10338_s8  ;;  %v7876_v11 = vadd.f32 %v2590_v59, %v2468_v53  ;;  %v7960_v53 = vpop.f32.mrf.mxu2 }
 0x43b   : > { %2729 = vrot.lane.b32.xlu1 %v2635_v23, %s10349_s3 }
 0x43c   : > { %v7868_v10 = vsel %vm1576_vm14, %v2656_v6, %v10147_v35 }
 0x43f   : > { %v2563_v17 = vpop.f32.mrf.mxu0 }
 0x440   : > { %v7912_v52 = vadd.f32 %v2563_v17, %v2441_v38 }
 0x441   : > { %v2491_v45 = vpop.f32.mrf.mxu3 }
 0x442   : > { %2687 = vrot.lane.b32.xlu2 %v2632_v32, %s10448_s1  ;;  %2731 = vrot.lane.b32.xlu0 %v2638_v14, %s10349_s3 }
 0x443   : > { %2689 = vrot.lane.b32.xlu1 %v2635_v23, %s10448_s1 }
 0x44a   : > { %2969 = vrot.lane.b32.xlu2 %v7830_v21, %s10338_s8  ;;  %2861 = vrot.lane.b32.xlu0 %v7876_v11, %s10448_s1 }
 0x44b   : > { %2859 = vrot.lane.b32.xlu1 %v7878_v46, %s10448_s1 }
 0x44c   : > { %v2566_v32 = vpop.f32.mrf.mxu0 }
 0x44d   : > { %v7952_v48 = vadd.f32 %v2566_v32, %v7780_v36  ;;  %v2614_v32 = vpop.f32.mrf.mxu2 }
 0x452   : > { %2787 = vrot.lane.b32.xlu2 %v2638_v14, %s10338_s8 }
 0x453   : > { %2917 = vrot.lane.b32.xlu1 %v7876_v11, %s10349_s3 }
 0x454   : > { %v2568_v13 = vpop.f32.mrf.mxu0 }
 0x455   : > { %v7891_v56 = vadd.f32 %v2568_v13, %v2446_v8  ;;  %v2616_v3 = vpop.f32.mrf.mxu2 }
 0x457   : > { %v10148_v7 = vrot.slane %v7891_v56, 7  ;;  %2739 = vrot.lane.b32.xlu0 %v7891_v56, %s10349_s3 }
 0x459   : > { %v2668_v23 = vsel %vm1576_vm14, %v10148_v7, %v2653_v27  ;;  %v2592_v27 = vpop.f32.mrf.mxu1  ;;  %v5830_v7 = vld [vmem:[%s9994_s13 + $0x10] sm:$0xf] }
 0x45a   : > { %2915 = vrot.lane.b32.xlu2 %v7878_v46, %s10349_s3  ;;  %v7935_v6 = vadd.f32 %v2592_v27, %v2470_v12  ;;  %v2670_v12 = vmul.f32 %v2668_v23, %v10378_v29 }
 0x45b   : > { %2699 = vrot.lane.b32.xlu1 %v7891_v56, %s10448_s1 }
 0x45f   : > { %2971 = vrot.lane.b32.xlu0 %v7878_v46, %s10338_s8 }
 0x461   : > { %v2595_v39 = vpop.f32.mrf.mxu1 }
 0x462   : > { %2973 = vrot.lane.b32.xlu2 %v7876_v11, %s10338_s8 }
 0x463   : > { %2795 = vrot.lane.b32.xlu1 %v7891_v56, %s10338_s8 }
 0x467   : > { %2735 = vrot.lane.b32.xlu0 %v7912_v52, %s10349_s3 }
 0x469   : > { %v2597_v54 = vpop.f32.mrf.mxu1 }
 0x46a   : > { %2691 = vrot.lane.b32.xlu2 %v2638_v14, %s10448_s1  ;;  %v7931_v14 = vadd.f32 %v2595_v39, %v2473_v28  ;;  %v7968_v36 = vadd.f32 %v2597_v54, %v2475_v61 }
 0x46b   : > { %2733 = vrot.lane.b32.xlu1 %v7857_v22, %s10349_s3 }
 0x46c   : > { %10449 = vst [vmem:[#allocation59_spill] sm:$0xff] %v7931_v14 }
 0x46d   : > { %10450 = vst [vmem:[#allocation68_spill] sm:$0xff] %v7968_v36 }
 0x46f   : > { %2789 = vrot.lane.b32.xlu0 %v7857_v22, %s10338_s8 }
 0x472   : > { %2791 = vrot.lane.b32.xlu2 %v7912_v52, %s10338_s8 }
 0x473   : > { %2693 = vrot.lane.b32.xlu1 %v7857_v22, %s10448_s1 }
 0x474   : > { %v7929_v16 = vpop.permute.xlu2 %2725 }
 0x475   : > { %v10149_v13 = vrot.slane %v7929_v16, 1 }
 0x477   : > { %2865 = vrot.lane.b32.xlu0 %v7931_v14, %s10448_s1 }
 0x47a   : > { %2919 = vrot.lane.b32.xlu2 %v7935_v6, %s10349_s3 }
 0x47b   : > { %2863 = vrot.lane.b32.xlu1 %v7935_v6, %s10448_s1 }
 0x47c   : > { %v2686_v58 = vpop.permute.xlu2 %2685 }
 0x47d   : > { %v2710_v28 = vmul.f32 %v2686_v58, %v10381_v18  ;;  %v5988_v58 = vld [vmem:[%s9994_s13 + $0x14] sm:$0xf0] }
 0x47f   : > { %2975 = vrot.lane.b32.xlu0 %v7935_v6, %s10338_s8 }
 0x482   : > { %2977 = vrot.lane.b32.xlu2 %v7931_v14, %s10338_s8 }
 0x483   : > { %2921 = vrot.lane.b32.xlu1 %v7931_v14, %s10349_s3 }
 0x484   : > { %v7947_v33 = vpop.permute.xlu2 %2783 }
 0x485   : > { %v10161_v54 = vrot.slane %v7947_v33, 7 }
 0x487   : > { %2695 = vrot.lane.b32.xlu0 %v7912_v52, %s10448_s1 }
 0x48a   : > { %2697 = vrot.lane.b32.xlu2 %v7952_v48, %s10448_s1 }
 0x48b   : > { %2737 = vrot.lane.b32.xlu1 %v7952_v48, %s10349_s3 }
 0x48c   : > { %v7964_v17 = vpop.permute.xlu0 %2781  ;;  %v7966_v59 = vpop.permute.xlu2 %2855 }
 0x48d   : > { %v10160_v39 = vrot.slane %v7964_v17, 7 }
 0x48f   : > { %2867 = vrot.lane.b32.xlu0 %v7968_v36, %s10448_s1 }
 0x492   : > { %2923 = vrot.lane.b32.xlu2 %v7968_v36, %s10349_s3 }
 0x493   : > { %2793 = vrot.lane.b32.xlu1 %v7952_v48, %s10338_s8 }
 0x494   : > { %v7976_v63 = vpop.permute.xlu0 %2853  ;;  %v7978_v37 = vpop.permute.xlu2 %2911 }
 0x495   : > { %v7980_v8 = vpop.permute.xlu1 %2727 }
 0x496   : > { %v10150_v38 = vrot.slane %v7980_v8, 1 }
 0x497   : > { %2979 = vrot.lane.b32.xlu0 %v7968_v36, %s10338_s8 }
 0x498   : > { %v2763_v27 = vsel %vm1745_vm15, %v10149_v13, %v10150_v38  ;;  %v2493_v13 = vpop.f32.mrf.mxu3  ;;  %v2718_v38 = vadd.f32 %v2710_v28, %v2670_v12  ;;  %v10162_v28 = vrot.slane %v7966_v59, 1 }
 0x499   : > { %v2766_v61 = vmul.f32 %v2763_v27, %v10382_v19  ;;  %v5831_v27 = vor.u32 %v5988_v58, %v5830_v7  ;;  %v2819_v19 = vsel %vm1576_vm14, %v10160_v39, %v10161_v54  ;;  %v2494_v31 = vadd.f32 %v2493_v13, %v7782_v50 }
 0x49a   : > { %v2822_v12 = vmul.f32 %v2819_v19, %v10389_v51  ;;  %v2492_v7 = vadd.f32 %v2491_v45, %v7778_v5 }
 0x49b   : > { %2965 = vrot.lane.b32.xlu1 %v7816_v20, %s10338_s8  ;;  %v2774_v24 = vadd.f32 %v2766_v61, %v2718_v38  ;;  %3110 = vmatpush.bf16.msrb.mxu3 %v5831_v27  ;;  %v8020_v58 = vadd.f32 %v2616_v3, %v2494_v31  ;;  %v10166_v31 = vrot.slane %v7978_v37, 7 }
 0x49c   : > { %v7999_v35 = vpop.permute.xlu0 %2909  ;;  %v2688_v18 = vpop.permute.xlu2 %2687  ;;  %v8028_v38 = vadd.f32 %v2614_v32, %v2492_v7 }
 0x49d   : > { %v8007_v23 = vpop.permute.xlu1 %2857  ;;  %v2830_v54 = vadd.f32 %v2822_v12, %v2774_v24  ;;  %v10172_v19 = vrot.slane %v8020_v58, 1 }
 0x49e   : > { %v10163_v29 = vrot.slane %v8007_v23, 1  ;;  %v10171_v45 = vrot.slane %v8028_v38, 1 }
 0x49f   : > { %v2838_v5 = vadd.f32 %v2830_v54, %v7844_v30 }
 0x4a0   : > { %v2890_v39 = vsel %vm1745_vm15, %v10162_v28, %v10163_v29  ;;  %v3017_v30 = vsel %vm1745_vm15, %v10171_v45, %v10172_v19  ;;  %v10451_v28 = vld [vmem:[#allocation13_spill] sm:$0xff] }
 0x4a1   : > { %v2894_v50 = vmul.f32 %v2890_v39, %v10393_v43  ;;  %v3022_v29 = vmul.f32 %v3017_v30, %v10451_v28  ;;  %v10453_v30 = vld [vmem:[#allocation12_spill] sm:$0xff]  ;;  %v10454_v19 = vld [vmem:[#allocation17_spill] sm:$0xff] }
 0x4a3   : > { %v2902_v27 = vadd.f32 %v2894_v50, %v2838_v5 }
 0x4a4   : > { %v8030_v61 = vpop.permute.xlu0 %2967  ;;  %v2970_v32 = vpop.permute.xlu2 %2969 }
 0x4a5   : > { %v8033_v13 = vpop.permute.xlu1 %2913  ;;  %v2990_v12 = vmul.f32 %v2970_v32, %v10403_v41 }
 0x4a6   : > { %v10167_v3 = vrot.slane %v8033_v13, 7 }
 0x4a8   : > { %v2946_v24 = vsel %vm1576_vm14, %v10166_v31, %v10167_v3  ;;  %v2496_v3 = vpop.f32.mrf.mxu3 }
 0x4a9   : > { %v2950_v39 = vmul.f32 %v2946_v24, %v10398_v60  ;;  %v2619_v24 = vpop.f32.mrf.mxu2  ;;  %v2497_v62 = vadd.f32 %v2496_v3, %v7786_v1  ;;  %v10462_v1 = vld [vmem:[#allocation58_spill] sm:$0xff] }
 0x4ab   : > { %v2958_v54 = vadd.f32 %v2950_v39, %v2902_v27  ;;  %v10452_v39 = vld [vmem:[#allocation31_spill] sm:$0xff] }
 0x4ac   : > { %v2786_v7 = vpop.permute.xlu0 %2785  ;;  %v8057_v50 = vpop.permute.xlu2 %2787 }
 0x4ad   : > { %v2998_v43 = vadd.f32 %v2990_v12, %v2958_v54  ;;  %v2730_v51 = vpop.permute.xlu1 %2729  ;;  %v10186_v54 = vrot.slane %v8057_v50, 7 }
 0x4ae   : > { %v2751_v45 = vrot.slane %v2730_v51, 1  ;;  %v10455_v51 = vrot.slane %v7980_v8, 1  ;;  %v10457_v8 = vld [vmem:[#allocation50_spill] sm:$0xff] }
 0x4af   : > { %v8055_v31 = vadd.f32 %v3022_v29, %v2998_v43  ;;  %v2672_v43 = vmul.f32 %v7839_v44, %v10453_v30  ;;  %v2807_v29 = vrot.slane %v2786_v7, 7  ;;  %v2671_v30 = vmul.f32 %v7827_v4, %v10457_v8 }
 0x4b0   : > { %v2498_v41 = vpop.f32.mrf.mxu3 }
 0x4b1   : > { %v2621_v42 = vpop.f32.mrf.mxu2  ;;  %v2817_v44 = vsel %vm1576_vm14, %v2807_v29, %v10186_v54  ;;  %v10187_v54 = vrot.slane %v7952_v48, 7 }
 0x4b4   : > { %v8059_v5 = vpop.permute.xlu0 %2731  ;;  %v2916_v7 = vpop.permute.xlu2 %2915 }
 0x4b5   : > { %v2690_v60 = vpop.permute.xlu1 %2689  ;;  %v10176_v47 = vrot.slane %v8059_v5, 1  ;;  %v2936_v3 = vrot.slane %v2916_v7, 7 }
 0x4b6   : > { %v2712_v27 = vmul.f32 %v2690_v60, %v10452_v39  ;;  %v2762_v60 = vsel %vm1745_vm15, %v10455_v51, %v2751_v45 }
 0x4b7   : > { %v2761_v32 = vsel %vm1745_vm15, %v2751_v45, %v10176_v47  ;;  %v10456_v47 = vld [vmem:[#allocation15_spill] sm:$0xff]  ;;  %v10458_v45 = vld [vmem:[#allocation14_spill] sm:$0xff] }
 0x4b8   : > { %v2720_v12 = vadd.f32 %v2712_v27, %v2672_v43  ;;  %v2768_v28 = vmul.f32 %v2761_v32, %v10454_v19  ;;  %v2711_v36 = vmul.f32 %v2688_v18, %v10456_v47  ;;  %v2499_v43 = vadd.f32 %v2498_v41, %v7788_v9  ;;  %v10459_v18 = vld [vmem:[#allocation16_spill] sm:$0xff] }
 0x4b9   : > { %v2767_v51 = vmul.f32 %v2762_v60, %v10458_v45  ;;  %v2824_v47 = vmul.f32 %v2817_v44, %v10459_v18  ;;  %v10460_v41 = vrot.slane %v7947_v33, 7  ;;  %v10461_v60 = vld [vmem:[#allocation18_spill] sm:$0xff]  ;;  %v5987_v33 = vld [vmem:[%s9994_s13 + $0x14] sm:$0xf] }
 0x4ba   : > { %v2776_v19 = vadd.f32 %v2768_v28, %v2720_v12  ;;  %v8087_v14 = vadd.f32 %v2621_v42, %v2499_v43  ;;  %v2719_v49 = vadd.f32 %v2711_v36, %v2671_v30  ;;  %v2643_v28 = vadd.f32 %v2619_v24, %v2497_v62  ;;  %v5822_v24 = vld [vmem:[%s9994_s13] sm:$0xf]  ;;  %v10469_v18 = vld [vmem:[#allocation20_spill] sm:$0xff] }
 0x4bb   : > { %v2818_v9 = vsel %vm1576_vm14, %v10460_v41, %v2807_v29  ;;  %v5986_v29 = vld [vmem:[%s9994_s13 + $0x4] sm:$0xf0] }
 0x4bc   : > { %v8071_v55 = vpop.permute.xlu0 %2861  ;;  %v2832_v4 = vadd.f32 %v2824_v47, %v2776_v19  ;;  %v2775_v12 = vadd.f32 %v2767_v51, %v2719_v49  ;;  %v10184_v42 = vrot.slane %v8087_v14, 1  ;;  %v2823_v36 = vmul.f32 %v2818_v9, %v10462_v1  ;;  %v5832_v47 = vld [vmem:[%s9994_s13 + $0x18] sm:$0xf0]  ;;  %v2974_v41 = vpop.permute.xlu2 %2973 }
 0x4bd   : > { %v2860_v39 = vpop.permute.xlu1 %2859  ;;  %v10183_v32 = vrot.slane %v8071_v55, 1  ;;  %v10463_v49 = vrot.slane %v8007_v23, 1  ;;  %v5835_v7 = vor.u32 %v5987_v33, %v5832_v47  ;;  %v3009_v51 = vrot.slane %v2643_v28, 1  ;;  %v10465_v28 = vld [vmem:[#allocation32_spill] sm:$0xff]  ;;  %v10466_v47 = vld [vmem:[#allocation23_spill] sm:$0xff] }
 0x4be   : > { %v2880_v27 = vrot.slane %v2860_v39, 1  ;;  %v2840_v19 = vadd.f32 %v2832_v4, %v7878_v46  ;;  %v10464_v46 = vld [vmem:[#allocation21_spill] sm:$0xff] }
 0x4bf   : > { %3139 = vmatpush.bf16.msra.mxu0 %v5835_v7  ;;  %v3015_v33 = vsel %vm1745_vm15, %v3009_v51, %v10184_v42  ;;  %v10468_v42 = vrot.slane %v8033_v13, 7 }
 0x4c0   : > { %v2888_v39 = vsel %vm1745_vm15, %v2880_v27, %v10183_v32  ;;  %v2889_v62 = vsel %vm1745_vm15, %v10463_v49, %v2880_v27  ;;  %v5823_v27 = vor.u32 %v5986_v29, %v5822_v24 }
 0x4c1   : > { %v2896_v44 = vmul.f32 %v2888_v39, %v10461_v60  ;;  %v2831_v39 = vadd.f32 %v2823_v36, %v2775_v12  ;;  %v2895_v12 = vmul.f32 %v2889_v62, %v10465_v28  ;;  %v5985_v36 = vld [vmem:[%s9994_s13 + $0x4] sm:$0xf]  ;;  %v2945_v62 = vsel %vm1576_vm14, %v10468_v42, %v2936_v3 }
 0x4c2   : > { %3111 = vmatpush.bf16.msrb.mxu3 %v5823_v27  ;;  %v10471_v42 = vrot.slane %v8020_v58, 1 }
 0x4c3   : > { %v2904_v9 = vadd.f32 %v2896_v44, %v2840_v19  ;;  %v5824_v44 = vld [vmem:[%s9994_s13 + $0x8] sm:$0xf0]  ;;  %v2992_v19 = vmul.f32 %v2974_v41, %v10466_v47  ;;  %v2839_v7 = vadd.f32 %v2831_v39, %v7830_v21  ;;  %v2951_v41 = vmul.f32 %v2945_v62, %v10469_v18  ;;  %v10472_v39 = vld [vmem:[#allocation30_spill] sm:$0xff] }
 0x4c4   : > { %v5827_v29 = vor.u32 %v5985_v36, %v5824_v44  ;;  %v10470_v21 = vrot.slane %v7891_v56, 7  ;;  %v10473_v44 = vld [vmem:[#allocation24_spill] sm:$0xff] }
 0x4c5   : > { %v8101_v43 = vpop.permute.xlu1 %2917 }
 0x4c6   : > { %v10185_v30 = vrot.slane %v8101_v43, 7  ;;  %3140 = vmatpush.bf16.msra.mxu0 %v5827_v29  ;;  %v2661_v13 = vsel %vm1576_vm14, %v10187_v54, %v10470_v21  ;;  %v10475_v29 = vld [vmem:[#allocation35_spill] sm:$0xff] }
 0x4c8   : > { %v2944_v23 = vsel %vm1576_vm14, %v2936_v3, %v10185_v30  ;;  %v3016_v3 = vsel %vm1745_vm15, %v10471_v42, %v3009_v51  ;;  %v10476_v51 = vrot.slane %v7929_v16, 1  ;;  %v2489_v16 = vadd.f32 %v7954_v25, %v7774_v57 }
 0x4c9   : > { %v2952_v4 = vmul.f32 %v2944_v23, %v10464_v46  ;;  %v8127_v49 = vpop.permute.xlu0 %2739  ;;  %v10467_v23 = vld [vmem:[#allocation26_spill] sm:$0xff]  ;;  %v2903_v46 = vadd.f32 %v2895_v12, %v2839_v7  ;;  %v2692_v12 = vpop.permute.xlu2 %2691  ;;  %v3023_v7 = vmul.f32 %v3016_v3, %v10475_v29  ;;  %v10480_v25 = vrot.slane %v7966_v59, 1 }
 0x4ca   : > { %v3024_v32 = vmul.f32 %v3015_v33, %v10467_v23  ;;  %v8202_v57 = vadd.f32 %v7960_v53, %v2489_v16  ;;  %v10482_v59 = vld [vmem:[#allocation6_spill] sm:$0xff] }
 0x4cb   : > { %v2960_v24 = vadd.f32 %v2952_v4, %v2904_v9  ;;  %v10188_v9 = vrot.slane %v8127_v49, 1  ;;  %v2959_v36 = vadd.f32 %v2951_v41, %v2903_v46  ;;  %v10190_v46 = vrot.slane %v7976_v63, 1 }
 0x4cd   : > { %v3000_v27 = vadd.f32 %v2992_v19, %v2960_v24  ;;  %v2700_v30 = vpop.permute.xlu1 %2699  ;;  %v10474_v24 = vld [vmem:[#allocation5_spill] sm:$0xff] }
 0x4ce   : > { %v2709_v4 = vmul.f32 %v2700_v30, %v10472_v39  ;;  %v2669_v58 = vmul.f32 %v2661_v13, %v10474_v24  ;;  %v2764_v30 = vsel %vm1745_vm15, %v10188_v9, %v10476_v51  ;;  %v10479_v51 = vld [vmem:[#allocation7_spill] sm:$0xff] }
 0x4cf   : > { %v3032_v60 = vadd.f32 %v3024_v32, %v3000_v27  ;;  %v8164_v32 = vld [vmem:[%s10004_s23] sm:$0xff] }
 0x4d0   : > { %v8167_v56 = vperm.slane %v8164_v32, 2  ;;  %v2717_v21 = vadd.f32 %v2709_v4, %v2669_v58  ;;  %v8183_v41 = vperm.slane %v8164_v32, 3  ;;  %v10478_v4 = vrot.slane %v7964_v17, 7 }
 0x4d1   : > { %v2972_v33 = vpop.permute.xlu0 %2971  ;;  %v2891_v17 = vsel %vm1745_vm15, %v10190_v46, %v10480_v25  ;;  %v10192_v25 = vrot.slane %v8202_v57, 1  ;;  %v10484_v46 = vrot.slane %v8028_v38, 1  ;;  %v10487_v38 = vrot.slane %v8059_v5, 1 }
 0x4d2   : > { %v2991_v19 = vmul.f32 %v2972_v33, %v10473_v44  ;;  %v3041_v27 = vmul.f32 %v8167_v56, %v3032_v60  ;;  %v10477_v33 = vld [vmem:[#allocation38_spill] sm:$0xff] }
 0x4d3   : > { %v2765_v54 = vmul.f32 %v2764_v30, %v10477_v33 }
 0x4d4   : > { %v2999_v62 = vadd.f32 %v2991_v19, %v2959_v36  ;;  %v10191_v36 = vrot.slane %v7999_v35, 7  ;;  %v3050_v58 = vadd.f32 %v8183_v41, %v3041_v27  ;;  %v10481_v27 = vrot.slane %v7978_v37, 7 }
 0x4d5   : > { %v8179_v42 = vpop.permute.xlu1 %2795 }
 0x4d6   : > { %v3031_v13 = vadd.f32 %v3023_v7, %v2999_v62  ;;  %v10189_v3 = vrot.slane %v8179_v42, 7  ;;  %v2773_v7 = vadd.f32 %v2765_v54, %v2717_v21  ;;  %v2947_v54 = vsel %vm1576_vm14, %v10191_v36, %v10481_v27  ;;  %v8217_v21 = vpop.permute.xlu2 %2791  ;;  %v10485_v27 = vld [vmem:[#allocation10_spill] sm:$0xff]  ;;  %v2501_v36 = vpop.f32.mrf.mxu3 }
 0x4d7   : > { %v3058_v16 = vmax.f32 %v3050_v58, 0.0 }
 0x4d8   : > { %v3040_v60 = vmul.f32 %v8167_v56, %v3031_v13  ;;  %v2820_v19 = vsel %vm1576_vm14, %v10189_v3, %v10478_v4  ;;  %v2893_v4 = vmul.f32 %v2891_v17, %v10482_v59  ;;  %v2989_v17 = vmul.f32 %v8030_v61, %v10485_v27 }
 0x4d9   : > { %v2821_v62 = vmul.f32 %v2820_v19, %v10479_v51  ;;  %v8199_v9 = vpop.permute.xlu0 %2735 }
 0x4da   : > { %v3049_v30 = vadd.f32 %v8183_v41, %v3040_v60 }
 0x4db   : > { %v2829_v13 = vadd.f32 %v2821_v62, %v2773_v7  ;;  %v10483_v7 = vld [vmem:[#allocation19_spill] sm:$0xff] }
 0x4dc   : > { %v3057_v53 = vmax.f32 %v3049_v30, 0.0  ;;  %v2949_v37 = vmul.f32 %v2947_v54, %v10483_v7  ;;  %v3018_v30 = vsel %vm1745_vm15, %v10192_v25, %v10484_v46  ;;  %v3039_v54 = vmul.f32 %v8167_v56, %v8055_v31  ;;  %v2624_v46 = vpop.f32.mrf.mxu2 }
 0x4dd   : > { %v2837_v19 = vadd.f32 %v2829_v13, %v7816_v20  ;;  %v2734_v3 = vpop.permute.xlu1 %2733 }
 0x4de   : > { %v8222_v60 = vpack.c.bf16 %v3058_v16, %v3057_v53  ;;  %v2753_v58 = vrot.slane %v2734_v3, 1  ;;  %v10486_v53 = vld [vmem:[#allocation11_spill] sm:$0xff]  ;;  %v10488_v3 = vld [vmem:[#allocation29_spill] sm:$0xff] }
 0x4df   : > { %v2901_v62 = vadd.f32 %v2893_v4, %v2837_v19  ;;  %v3021_v16 = vmul.f32 %v3018_v30, %v10486_v53  ;;  %v2713_v25 = vmul.f32 %v2692_v12, %v10488_v3  ;;  %v10490_v30 = vrot.slane %v8057_v50, 7  ;;  %v10492_v53 = vld [vmem:[#allocation27_spill] sm:$0xff] }
 0x4e0   : > { %v2760_v19 = vsel %vm1745_vm15, %v10487_v38, %v2753_v58  ;;  %v2754_v12 = vrot.slane %v8199_v9, 1 }
 0x4e1   : > { %v2957_v20 = vadd.f32 %v2949_v37, %v2901_v62  ;;  %v2790_v13 = vpop.permute.xlu0 %2789  ;;  %v10489_v37 = vld [vmem:[#allocation25_spill] sm:$0xff] }
 0x4e2   : > { %v2809_v59 = vrot.slane %v2790_v13, 7  ;;  %v2673_v62 = vmul.f32 %v7854_v26, %v10489_v37  ;;  %v2920_v13 = vpop.permute.xlu2 %2919  ;;  %v10494_v26 = vld [vmem:[#allocation53_spill] sm:$0xff] }
 0x4e3   : > { %v2997_v4 = vadd.f32 %v2989_v17, %v2957_v20  ;;  %v3048_v17 = vadd.f32 %v8183_v41, %v3039_v54  ;;  %v10491_v20 = vld [vmem:[#allocation28_spill] sm:$0xff]  ;;  %v2674_v37 = vmul.f32 %v7868_v10, %v10494_v26  ;;  %v2502_v54 = vadd.f32 %v2501_v36, %v7792_v34  ;;  %v10495_v26 = vld [vmem:[#allocation41_spill] sm:$0xff] }
 0x4e4   : > { %v2816_v31 = vsel %vm1576_vm14, %v10490_v30, %v2809_v59  ;;  %v2769_v38 = vmul.f32 %v2760_v19, %v10491_v20  ;;  %v2938_v10 = vrot.slane %v2920_v13, 7  ;;  %v10496_v13 = vrot.slane %v8101_v43, 7 }
 0x4e5   : > { %v3029_v7 = vadd.f32 %v3021_v16, %v2997_v4  ;;  %v2694_v61 = vpop.permute.xlu1 %2693  ;;  %v2721_v16 = vadd.f32 %v2713_v25, %v2673_v62  ;;  %v10493_v4 = vld [vmem:[#allocation40_spill] sm:$0xff]  ;;  %v3056_v19 = vmax.f32 %v3048_v17, 0.0  ;;  %v2503_v62 = vpop.f32.mrf.mxu3 }
 0x4e6   : > { %v2714_v27 = vmul.f32 %v2694_v61, %v10492_v53  ;;  %v2825_v3 = vmul.f32 %v2816_v31, %v10493_v4  ;;  %v2649_v31 = vadd.f32 %v2624_v46, %v2502_v54  ;;  %v10193_v4 = vrot.slane %v8217_v21, 7 }
 0x4e7   : > { %v3038_v5 = vmul.f32 %v8167_v56, %v3029_v7  ;;  %v2759_v7 = vsel %vm1745_vm15, %v2753_v58, %v2754_v12  ;;  %v2777_v61 = vadd.f32 %v2769_v38, %v2721_v16 }
 0x4e8   : > { %v2722_v53 = vadd.f32 %v2714_v27, %v2674_v37  ;;  %v2770_v20 = vmul.f32 %v2759_v7, %v10495_v26  ;;  %v2815_v36 = vsel %vm1576_vm14, %v2809_v59, %v10193_v4  ;;  %v2504_v27 = vadd.f32 %v2503_v62, %v7798_v40  ;;  %v2626_v37 = vpop.f32.mrf.mxu2  ;;  %v10504_v4 = vld [vmem:[#allocation51_spill] sm:$0xff] }
 0x4e9   : > { %v8255_v50 = vpop.permute.xlu0 %2865  ;;  %v3047_v30 = vadd.f32 %v8183_v41, %v3038_v5  ;;  %v2833_v5 = vadd.f32 %v2825_v3, %v2777_v61  ;;  %v3011_v46 = vrot.slane %v2649_v31, 1  ;;  %v2943_v3 = vsel %vm1576_vm14, %v10496_v13, %v2938_v10  ;;  %v10500_v61 = vld [vmem:[#allocation74_spill] sm:$0xff] }
 0x4ea   : > { %v2778_v17 = vadd.f32 %v2770_v20, %v2722_v53  ;;  %v2978_v38 = vpop.permute.xlu2 %2977  ;;  %v10195_v16 = vrot.slane %v8255_v50, 1  ;;  %v10497_v59 = vrot.slane %v8071_v55, 1  ;;  %v10499_v20 = vld [vmem:[#allocation44_spill] sm:$0xff]  ;;  %v10501_v31 = vrot.slane %v8087_v14, 1 }
 0x4eb   : > { %v3055_v25 = vmax.f32 %v3047_v30, 0.0  ;;  %v2841_v7 = vadd.f32 %v2833_v5, %v7876_v11  ;;  %v10503_v11 = vld [vmem:[#allocation39_spill] sm:$0xff] }
 0x4ed   : > { %v2864_v51 = vpop.permute.xlu1 %2863  ;;  %v3067_v34 = vpack.c.bf16 %v3056_v19, %v3055_v25  ;;  %v8284_v19 = vadd.f32 %v2626_v37, %v2504_v27  ;;  %v2953_v25 = vmul.f32 %v2943_v3, %v10500_v61 }
 0x4ee   : > { %v2882_v58 = vrot.slane %v2864_v51, 1  ;;  %v10498_v51 = vld [vmem:[#allocation33_spill] sm:$0xff] }
 0x4ef   : > { %5836 = vmatmul.msk.bf16.vlgmr.msrb.gmra.mxu3 %vm3091_vm1, %v3067_v34  ;;  %5840 = vmatmul.msk.bf16.vlgmr.msra.gmra.mxu0 %vm3091_vm1, %v3067_v34  ;;  %v2826_v53 = vmul.f32 %v2815_v36, %v10498_v51  ;;  %v3014_v34 = vsel %vm1745_vm15, %v10501_v31, %v3011_v46  ;;  %v10502_v36 = vld [vmem:[#allocation36_spill] sm:$0xff]  ;;  %v10194_v37 = vrot.slane %v8284_v19, 1 }
 0x4f0   : > { %v2887_v40 = vsel %vm1745_vm15, %v10497_v59, %v2882_v58  ;;  %v2886_v43 = vsel %vm1745_vm15, %v2882_v58, %v10195_v16  ;;  %v3025_v58 = vmul.f32 %v3014_v34, %v10504_v4 }
 0x4f1   : > { %v2897_v30 = vmul.f32 %v2887_v40, %v10499_v20  ;;  %v2976_v54 = vpop.permute.xlu0 %2975  ;;  %v2834_v55 = vadd.f32 %v2826_v53, %v2778_v17  ;;  %v2898_v13 = vmul.f32 %v2886_v43, %v10502_v36 }
 0x4f2   : > { %v2993_v5 = vmul.f32 %v2976_v54, %v10503_v11  ;;  %v3013_v54 = vsel %vm1745_vm15, %v3011_v46, %v10194_v37  ;;  %v10508_v46 = vrot.slane %v7952_v48, 7 }
 0x4f3   : > { %v2905_v62 = vadd.f32 %v2897_v30, %v2841_v7  ;;  %v2842_v3 = vadd.f32 %v2834_v55, %v7935_v6  ;;  %v10505_v7 = vld [vmem:[#allocation47_spill] sm:$0xff]  ;;  %v2658_v6 = vrot.slane %v7912_v52, 7  ;;  %v10507_v55 = vld [vmem:[#allocation42_spill] sm:$0xff] }
 0x4f5   : > { %v2961_v59 = vadd.f32 %v2953_v25, %v2905_v62  ;;  %v2922_v27 = vpop.permute.xlu1 %2921  ;;  %v2906_v53 = vadd.f32 %v2898_v13, %v2842_v3  ;;  %v2698_v25 = vpop.permute.xlu2 %2697  ;;  %v10506_v62 = vld [vmem:[#allocation75_spill] sm:$0xff] }
 0x4f6   : > { %v2939_v40 = vrot.slane %v2922_v27, 7  ;;  %v2994_v27 = vmul.f32 %v2978_v38, %v10506_v62  ;;  %v2662_v38 = vsel %vm1576_vm14, %v2658_v6, %v10508_v46 }
 0x4f7   : > { %v3001_v17 = vadd.f32 %v2993_v5, %v2961_v59  ;;  %v3026_v59 = vmul.f32 %v3013_v54, %v10507_v55  ;;  %v10511_v54 = vld [vmem:[#allocation49_spill] sm:$0xff] }
 0x4f8   : > { %v2942_v14 = vsel %vm1576_vm14, %v2938_v10, %v2939_v40 }
 0x4f9   : > { %v3033_v30 = vadd.f32 %v3025_v58, %v3001_v17  ;;  %v2954_v31 = vmul.f32 %v2942_v14, %v10505_v7  ;;  %v2696_v43 = vpop.permute.xlu0 %2695  ;;  %v10509_v17 = vrot.slane %v7857_v22, 7 }
 0x4fb   : > { %v2962_v34 = vadd.f32 %v2954_v31, %v2906_v53  ;;  %v3042_v10 = vmul.f32 %v8167_v56, %v3033_v30  ;;  %v2663_v14 = vsel %vm1576_vm14, %v10509_v17, %v2658_v6  ;;  %v10510_v30 = vrot.slane %v8127_v49, 1 }
 0x4fc   : > { %v2676_v6 = vmul.f32 %v2662_v38, %v10432_v0 }
 0x4fd   : > { %v3002_v13 = vadd.f32 %v2994_v27, %v2962_v34  ;;  %v2738_v5 = vpop.permute.xlu1 %2737  ;;  %v3051_v52 = vadd.f32 %v8183_v41, %v3042_v10  ;;  %v2715_v27 = vmul.f32 %v2696_v43, %v10511_v54  ;;  %v10512_v10 = vld [vmem:[#allocation46_spill] sm:$0xff] }
 0x4fe   : > { %v2755_v58 = vrot.slane %v2738_v5, 1  ;;  %v2675_v49 = vmul.f32 %v2663_v14, %v10512_v10  ;;  %v10516_v14 = vrot.slane %v8217_v21, 7  ;;  %v10521_v21 = vrot.slane %v7999_v35, 7 }
 0x4ff   : > { %v3034_v3 = vadd.f32 %v3026_v59, %v3002_v13  ;;  %5837 = vmatmul.msk.bf16.gmra.mxu3 %vm3091_vm1, %v8222_v60  ;;  %5841 = vmatmul.msk.bf16.gmra.mxu0 %vm3091_vm1, %v8222_v60  ;;  %v2716_v60 = vmul.f32 %v2698_v25, %v7607_v2  ;;  %v2924_v59 = vpop.permute.xlu2 %2923  ;;  %v10513_v13 = vld [vmem:[#allocation52_spill] sm:$0xff]  ;;  %v3059_v17 = vmax.f32 %v3051_v52, 0.0  ;;  %v10517_v52 = vld [vmem:[#allocation73_spill] sm:$0xff] }
 0x500   : > { %v2757_v31 = vsel %vm1745_vm15, %v2755_v58, %v10510_v30  ;;  %v2758_v48 = vsel %vm1745_vm15, %v2754_v12, %v2755_v58  ;;  %v2940_v37 = vrot.slane %v2924_v59, 7  ;;  %v2723_v43 = vadd.f32 %v2715_v27, %v2675_v49 }
 0x501   : > { %v3043_v53 = vmul.f32 %v8167_v56, %v3034_v3  ;;  %v2868_v22 = vpop.permute.xlu0 %2867  ;;  %v2771_v5 = vmul.f32 %v2758_v48, %v10513_v13  ;;  %v10514_v3 = vld [vmem:[#allocation54_spill] sm:$0xff]  ;;  %v2724_v25 = vadd.f32 %v2716_v60, %v2676_v6  ;;  %v10519_v60 = vrot.slane %v8255_v50, 1 }
 0x502   : > { %v2772_v46 = vmul.f32 %v2757_v31, %v10514_v3  ;;  %v2884_v12 = vrot.slane %v2868_v22, 1  ;;  %v10518_v22 = vld [vmem:[#allocation48_spill] sm:$0xff]  ;;  %v2948_v59 = vsel %vm1576_vm14, %v2940_v37, %v10521_v21  ;;  %v10531_v21 = vld [vmem:[#allocation71_spill] sm:$0xff] }
 0x503   : > { %v3052_v34 = vadd.f32 %v8183_v41, %v3043_v53  ;;  %v10515_v53 = vrot.slane %v8179_v42, 7  ;;  %v2779_v31 = vadd.f32 %v2771_v5, %v2723_v43  ;;  %v10520_v42 = vrot.slane %v7976_v63, 1  ;;  %v10525_v63 = vld [vmem:[#allocation68_spill] sm:$0xff]  ;;  %v10538_v3 = vld [vmem:[#allocation15_spill] sm:$0xff] }
 0x504   : > { %v2780_v13 = vadd.f32 %v2772_v46, %v2724_v25  ;;  %v2885_v27 = vsel %vm1745_vm15, %v10519_v60, %v2884_v12  ;;  %v2941_v46 = vsel %vm1576_vm14, %v2939_v40, %v2940_v37  ;;  %v10524_v25 = vld [vmem:[#allocation59_spill] sm:$0xff]  ;;  %v10529_v37 = vrot.slane %v8202_v57, 1 }
 0x505   : > { %v2794_v9 = vpop.permute.xlu1 %2793  ;;  %v3060_v30 = vmax.f32 %v3052_v34, 0.0  ;;  %v2892_v6 = vsel %vm1745_vm15, %v2884_v12, %v10520_v42  ;;  %v10528_v42 = vld [vmem:[#allocation37_spill] sm:$0xff] }
 0x506   : > { %v2811_v58 = vrot.slane %v2794_v9, 7 }
 0x507   : > { %v3069_v16 = vpack.c.bf16 %v3060_v30, %v3059_v17  ;;  %v10522_v17 = vld [vmem:[#allocation57_spill] sm:$0xff]  ;;  %v10523_v30 = vld [vmem:[#allocation64_spill] sm:$0xff] }
 0x508   : > { %v2813_v38 = vsel %vm1576_vm14, %v2811_v58, %v10515_v53  ;;  %v2814_v48 = vsel %vm1576_vm14, %v10516_v14, %v2811_v58  ;;  %v2899_v50 = vmul.f32 %v2885_v27, %v10522_v17  ;;  %v2900_v58 = vmul.f32 %v2892_v6, %v10523_v30  ;;  %v10527_v14 = vld [vmem:[#allocation69_spill] sm:$0xff] }
 0x509   : > { %v2827_v34 = vmul.f32 %v2814_v48, %v10517_v52  ;;  %v2828_v9 = vmul.f32 %v2813_v38, %v10518_v22  ;;  %v10526_v38 = vld [vmem:[#allocation66_spill] sm:$0xff]  ;;  %v2956_v35 = vmul.f32 %v2948_v59, %v10527_v14  ;;  %v2980_v48 = vpop.permute.xlu0 %2979 }
 0x50a   : > { %v3005_v12 = vrot.slane %v10526_v38, 1  ;;  %v2995_v59 = vmul.f32 %v2980_v48, %v10531_v21 }
 0x50b   : > { %v2835_v49 = vadd.f32 %v2827_v34, %v2779_v31  ;;  %v2836_v5 = vadd.f32 %v2828_v9, %v2780_v13  ;;  %v2955_v31 = vmul.f32 %v2941_v46, %v10528_v42  ;;  %v10530_v9 = vrot.slane %v8284_v19, 1  ;;  %v5846_v42 = vld [vmem:[%s9995_s14] sm:$0xf] }
 0x50c   : > { %v3019_v40 = vsel %vm1745_vm15, %v3005_v12, %v10529_v37 }
 0x50d   : > { %v2843_v43 = vadd.f32 %v2835_v49, %v10524_v25  ;;  %v2844_v53 = vadd.f32 %v2836_v5, %v10525_v63  ;;  %v2966_v60 = vpop.permute.xlu1 %2965  ;;  %v3020_v27 = vsel %vm1745_vm15, %v10530_v9, %v3005_v12  ;;  %v10532_v5 = vld [vmem:[#allocation72_spill] sm:$0xff] }
 0x50e   : > { %v2996_v46 = vmul.f32 %v2966_v60, %v10532_v5 }
 0x50f   : > { %v2907_v13 = vadd.f32 %v2899_v50, %v2843_v43  ;;  %v2908_v34 = vadd.f32 %v2900_v58, %v2844_v53  ;;  %5838 = vmatmul.msk.bf16.gmra.mxu3 %vm3091_vm1, %v3069_v16  ;;  %5842 = vmatmul.msk.bf16.gmra.mxu0 %vm3091_vm1, %v3069_v16  ;;  %v10533_v50 = vld [vmem:[#allocation70_spill] sm:$0xff]  ;;  %v10534_v16 = vld [vmem:[#allocation55_spill] sm:$0xff] }
 0x510   : > { %v3027_v58 = vmul.f32 %v3020_v27, %v10533_v50  ;;  %v3028_v43 = vmul.f32 %v3019_v40, %v10534_v16  ;;  %v5990_v16 = vld [vmem:[%s9995_s14 + $0x4] sm:$0xf0] }
 0x511   : > { %v2963_v6 = vadd.f32 %v2955_v31, %v2907_v13  ;;  %v2964_v49 = vadd.f32 %v2956_v35, %v2908_v34  ;;  %v5847_v5 = vor.u32 %v5990_v16, %v5846_v42 }
 0x513   : > { %v3003_v25 = vadd.f32 %v2995_v59, %v2963_v6  ;;  %v3004_v57 = vadd.f32 %v2996_v46, %v2964_v49  ;;  %3623 = vmatpush.bf16.msrb.mxu1 %v5847_v5 }
 0x515   : > { %v3035_v63 = vadd.f32 %v3027_v58, %v3003_v25  ;;  %v3036_v53 = vadd.f32 %v3028_v43, %v3004_v57 }
 0x517   : > { %v3044_v38 = vmul.f32 %v8167_v56, %v3035_v63  ;;  %v3045_v19 = vmul.f32 %v8167_v56, %v3036_v53 }
 0x519   : > { %v3053_v12 = vadd.f32 %v8183_v41, %v3044_v38  ;;  %v3054_v31 = vadd.f32 %v8183_v41, %v3045_v19 }
 0x51b   : > { %v3061_v48 = vmax.f32 %v3053_v12, 0.0  ;;  %v3062_v35 = vmax.f32 %v3054_v31, 0.0 }
 0x51d   : > { %v3070_v13 = vpack.c.bf16 %v3062_v35, %v3061_v48 }
 0x51f   : > { %5839 = vmatmul.msk.bf16.gmra.mxu3 %vm3091_vm1, %v3070_v13  ;;  %5843 = vmatmul.msk.bf16.gmra.mxu0 %vm3091_vm1, %v3070_v13 }
 0x56c   : > { %v8521_v63 = vpop.f32.mrf.mxu0 }
 0x56d   : > { %10537 = vst [vmem:[#allocation61_spill] sm:$0xff] %v8521_v63 }
 0x572   : > { %v8391_v60 = vpop.f32.mrf.mxu3 }
 0x573   : > { %3290 = vrot.lane.b32.xlu0 %v8391_v60, %s10535_s26  ;;  %3234 = vrot.lane.b32.xlu2 %v8391_v60, %s10448_s1  ;;  %v10199_v30 = vrot.slane %v8391_v60, 7 }
 0x574   : > { %v8541_v35 = vpop.f32.mrf.mxu0 }
 0x57a   : > { %v8397_v56 = vpop.f32.mrf.mxu3 }
 0x57b   : > { %3378 = vrot.lane.b32.xlu0 %v8391_v60, %s10354_s30  ;;  %3194 = vrot.lane.b32.xlu2 %v8391_v60, %s10333_s7  ;;  %v3163_v14 = vrot.slane %v8397_v56, 7 }
 0x57c   : > { %3236 = vrot.lane.b32.xlu1 %v8397_v56, %s10448_s1  ;;  %v8555_v17 = vpop.f32.mrf.mxu0 }
 0x57d   : > { %v3176_v42 = vsel %vm1576_vm14, %v10199_v30, %v3163_v14 }
 0x57e   : > { %v3180_v2 = vmul.f32 %v3176_v42, %v10457_v8 }
 0x582   : > { %v8411_v41 = vpop.f32.mrf.mxu3 }
 0x583   : > { %3434 = vrot.lane.b32.xlu0 %v8391_v60, %s10338_s8  ;;  %3292 = vrot.lane.b32.xlu2 %v8397_v56, %s10535_s26  ;;  %v10206_v42 = vrot.slane %v8411_v41, 7 }
 0x584   : > { %3492 = vrot.lane.b32.xlu1 %v8397_v56, %s10358_s9  ;;  %v8570_v54 = vpop.f32.mrf.mxu0 }
 0x58a   : > { %v8419_v34 = vpop.f32.mrf.mxu3 }
 0x58b   : > { %3346 = vrot.lane.b32.xlu0 %v8391_v60, %s10349_s3  ;;  %3380 = vrot.lane.b32.xlu2 %v8397_v56, %s10354_s30 }
 0x58c   : > { %3382 = vrot.lane.b32.xlu1 %v8411_v41, %s10354_s30  ;;  %v3152_v7 = vpop.f32.mrf.mxu0 }
 0x58d   : > { %v3534_v36 = vrot.slane %v3152_v7, 1 }
 0x592   : > { %v8431_v37 = vpop.f32.mrf.mxu3 }
 0x593   : > { %3196 = vrot.lane.b32.xlu0 %v8397_v56, %s10333_s7  ;;  %3436 = vrot.lane.b32.xlu2 %v8397_v56, %s10338_s8 }
 0x594   : > { %3438 = vrot.lane.b32.xlu1 %v8411_v41, %s10338_s8 }
 0x59a   : > { %v8441_v40 = vpop.f32.mrf.mxu3 }
 0x59b   : > { %3348 = vrot.lane.b32.xlu2 %v8397_v56, %s10349_s3  ;;  %3494 = vrot.lane.b32.xlu0 %v8411_v41, %s10358_s9  ;;  %10536 = vst [vmem:[#allocation67_spill] sm:$0xff] %v8441_v40 }
 0x59c   : > { %3294 = vrot.lane.b32.xlu1 %v8411_v41, %s10535_s26 }
 0x5a2   : > { %v8449_v9 = vpop.f32.mrf.mxu3 }
 0x5a3   : > { %3238 = vrot.lane.b32.xlu2 %v8411_v41, %s10448_s1  ;;  %3296 = vrot.lane.b32.xlu0 %v8419_v34, %s10535_s26 }
 0x5a4   : > { %3350 = vrot.lane.b32.xlu1 %v8411_v41, %s10349_s3 }
 0x5aa   : > { %v8457_v27 = vpop.f32.mrf.mxu3 }
 0x5ab   : > { %3198 = vrot.lane.b32.xlu2 %v8411_v41, %s10333_s7  ;;  %3440 = vrot.lane.b32.xlu0 %v8419_v34, %s10338_s8 }
 0x5ac   : > { %3240 = vrot.lane.b32.xlu1 %v8419_v34, %s10448_s1 }
 0x5b3   : > { %3384 = vrot.lane.b32.xlu2 %v8419_v34, %s10354_s30  ;;  %3352 = vrot.lane.b32.xlu0 %v8419_v34, %s10349_s3 }
 0x5b4   : > { %3386 = vrot.lane.b32.xlu1 %v8431_v37, %s10354_s30 }
 0x5bb   : > { %3496 = vrot.lane.b32.xlu2 %v8419_v34, %s10358_s9  ;;  %3248 = vrot.lane.b32.xlu0 %v8457_v27, %s10448_s1 }
 0x5bc   : > { %3498 = vrot.lane.b32.xlu1 %v8431_v37, %s10358_s9 }
 0x5c3   : > { %3442 = vrot.lane.b32.xlu2 %v8431_v37, %s10338_s8  ;;  %3242 = vrot.lane.b32.xlu0 %v8431_v37, %s10448_s1 }
 0x5c4   : > { %3208 = vrot.lane.b32.xlu1 %v8457_v27, %s10333_s7 }
 0x5cb   : > { %3244 = vrot.lane.b32.xlu2 %v8441_v40, %s10448_s1  ;;  %3202 = vrot.lane.b32.xlu0 %v8431_v37, %s10333_s7 }
 0x5cc   : > { %3304 = vrot.lane.b32.xlu1 %v8457_v27, %s10535_s26 }
 0x5cd   : > { %v8477_v6 = vpop.permute.xlu2 %3234 }
 0x5d3   : > { %3298 = vrot.lane.b32.xlu2 %v8431_v37, %s10535_s26  ;;  %3388 = vrot.lane.b32.xlu0 %v8441_v40, %s10354_s30 }
 0x5d4   : > { %3200 = vrot.lane.b32.xlu1 %v8419_v34, %s10333_s7 }
 0x5d5   : > { %v8485_v59 = vpop.permute.xlu2 %3194 }
 0x5db   : > { %3390 = vrot.lane.b32.xlu2 %v8449_v9, %s10354_s30  ;;  %3446 = vrot.lane.b32.xlu0 %v8449_v9, %s10338_s8 }
 0x5dc   : > { %3300 = vrot.lane.b32.xlu1 %v8441_v40, %s10535_s26 }
 0x5dd   : > { %v8493_v49 = vpop.permute.xlu2 %3292 }
 0x5de   : > { %v10203_v56 = vrot.slane %v8493_v49, 7 }
 0x5e3   : > { %3354 = vrot.lane.b32.xlu2 %v8431_v37, %s10349_s3  ;;  %3500 = vrot.lane.b32.xlu0 %v8441_v40, %s10358_s9 }
 0x5e4   : > { %3444 = vrot.lane.b32.xlu1 %v8441_v40, %s10338_s8 }
 0x5e5   : > { %v8501_v46 = vpop.permute.xlu0 %3290  ;;  %v8503_v58 = vpop.permute.xlu2 %3380 }
 0x5eb   : > { %3502 = vrot.lane.b32.xlu2 %v8449_v9, %s10358_s9  ;;  %3204 = vrot.lane.b32.xlu0 %v8441_v40, %s10333_s7 }
 0x5ec   : > { %3356 = vrot.lane.b32.xlu1 %v8441_v40, %s10349_s3 }
 0x5ed   : > { %v8511_v25 = vpop.permute.xlu0 %3378  ;;  %v8513_v43 = vpop.permute.xlu2 %3436 }
 0x5ee   : > { %v8515_v57 = vpop.permute.xlu1 %3236 }
 0x5ef   : > { %v10202_v0 = vrot.slane %v8515_v57, 1 }
 0x5f3   : > { %3206 = vrot.lane.b32.xlu2 %v8449_v9, %s10333_s7  ;;  %3392 = vrot.lane.b32.xlu0 %v8457_v27, %s10354_s30 }
 0x5f4   : > { %3246 = vrot.lane.b32.xlu1 %v8449_v9, %s10448_s1 }
 0x5f5   : > { %v8525_v53 = vpop.permute.xlu0 %3434  ;;  %v8527_v38 = vpop.permute.xlu2 %3348 }
 0x5f6   : > { %v8529_v19 = vpop.permute.xlu1 %3492 }
 0x5fb   : > { %3448 = vrot.lane.b32.xlu2 %v8457_v27, %s10338_s8  ;;  %3360 = vrot.lane.b32.xlu0 %v8457_v27, %s10349_s3 }
 0x5fc   : > { %3302 = vrot.lane.b32.xlu1 %v8449_v9, %s10535_s26 }
 0x5fd   : > { %v8537_v12 = vpop.permute.xlu0 %3346  ;;  %v3239_v31 = vpop.permute.xlu2 %3238 }
 0x5fe   : > { %v8539_v48 = vpop.permute.xlu1 %3382  ;;  %v3260_v10 = vrot.slane %v3239_v31, 1 }
 0x600   : > { %v3271_v31 = vsel %vm1745_vm15, %v10202_v0, %v3260_v10  ;;  %v10207_v0 = vrot.slane %v8539_v48, 1 }
 0x601   : > { %v3276_v40 = vmul.f32 %v3271_v31, %v10458_v45  ;;  %v10540_v45 = vld [vmem:[#allocation12_spill] sm:$0xff] }
 0x603   : > { %3490 = vrot.lane.b32.xlu2 %v8391_v60, %s10358_s9 }
 0x604   : > { %3358 = vrot.lane.b32.xlu1 %v8449_v9, %s10349_s3 }
 0x605   : > { %v3197_v13 = vpop.permute.xlu0 %3196  ;;  %v3199_v50 = vpop.permute.xlu2 %3198 }
 0x606   : > { %v8547_v21 = vpop.permute.xlu1 %3438  ;;  %v3220_v5 = vmul.f32 %v3197_v13, %v10538_v3 }
 0x607   : > { %v10208_v31 = vrot.slane %v8547_v21, 7 }
 0x608   : > { %v3228_v30 = vadd.f32 %v3220_v5, %v3180_v2  ;;  %v3175_v2 = vsel %vm1576_vm14, %v3163_v14, %v10206_v42 }
 0x609   : > { %v3181_v14 = vmul.f32 %v3175_v2, %v10540_v45  ;;  %v10541_v2 = vld [vmem:[#allocation17_spill] sm:$0xff] }
 0x60a   : > { %v3284_v8 = vadd.f32 %v3276_v40, %v3228_v30 }
 0x60c   : > { %3504 = vrot.lane.b32.xlu1 %v8457_v27, %s10358_s9 }
 0x60d   : > { %v8560_v63 = vpop.permute.xlu0 %3494  ;;  %v3385_v22 = vpop.permute.xlu2 %3384 }
 0x60e   : > { %v3295_v52 = vpop.permute.xlu1 %3294  ;;  %v3405_v62 = vrot.slane %v3385_v22, 1 }
 0x60f   : > { %v3316_v16 = vrot.slane %v3295_v52, 7 }
 0x611   : > { %v3327_v52 = vsel %vm1576_vm14, %v10203_v56, %v3316_v16 }
 0x612   : > { %v3332_v4 = vmul.f32 %v3327_v52, %v10462_v1  ;;  %v10539_v52 = vld [vmem:[#allocation31_spill] sm:$0xff] }
 0x613   : > { %v3221_v1 = vmul.f32 %v3199_v50, %v10539_v52 }
 0x614   : > { %v3340_v11 = vadd.f32 %v3332_v4, %v3284_v8  ;;  %v3414_v8 = vsel %vm1745_vm15, %v10207_v0, %v3405_v62 }
 0x615   : > { %v8581_v13 = vpop.permute.xlu0 %3296  ;;  %v3497_v55 = vpop.permute.xlu2 %3496  ;;  %v3420_v50 = vmul.f32 %v3414_v8, %v10465_v28  ;;  %v10542_v8 = vld [vmem:[#allocation16_spill] sm:$0xff] }
 0x616   : > { %v3351_v3 = vpop.permute.xlu1 %3350  ;;  %v10210_v5 = vrot.slane %v8581_v13, 7 }
 0x617   : > { %v3372_v30 = vadd.f32 %v3351_v3, %v3340_v11  ;;  %v3229_v3 = vadd.f32 %v3221_v1, %v3181_v14  ;;  %v3516_v1 = vmul.f32 %v3497_v55, %v10473_v44 }
 0x618   : > { %v3326_v0 = vsel %vm1576_vm14, %v3316_v16, %v10210_v5 }
 0x619   : > { %v3333_v28 = vmul.f32 %v3326_v0, %v10542_v8 }
 0x61d   : > { %v3441_v56 = vpop.permute.xlu0 %3440  ;;  %v8617_v45 = vpop.permute.xlu2 %3442 }
 0x61e   : > { %v3461_v4 = vrot.slane %v3441_v56, 7  ;;  %v8598_v22 = vpop.permute.xlu1 %3240  ;;  %v10212_v16 = vrot.slane %v8617_v45, 7 }
 0x61f   : > { %v10215_v40 = vrot.slane %v8598_v22, 1 }
 0x620   : > { %v3470_v42 = vsel %vm1576_vm14, %v10208_v31, %v3461_v4  ;;  %v3428_v31 = vadd.f32 %v3420_v50, %v3372_v30 }
 0x621   : > { %v3476_v56 = vmul.f32 %v3470_v42, %v10469_v18  ;;  %v3270_v11 = vsel %vm1745_vm15, %v3260_v10, %v10215_v40  ;;  %v10216_v42 = vrot.slane %v8570_v54, 1  ;;  %v8624_v10 = vpop.f32.mrf.mxu0 }
 0x622   : > { %v3277_v52 = vmul.f32 %v3270_v11, %v10541_v2  ;;  %v10544_v11 = vld [vmem:[#allocation21_spill] sm:$0xff] }
 0x623   : > { %v3484_v20 = vadd.f32 %v3476_v56, %v3428_v31  ;;  %v3541_v0 = vsel %vm1745_vm15, %v10216_v42, %v3534_v36  ;;  %v3469_v31 = vsel %vm1576_vm14, %v3461_v4, %v10212_v16  ;;  %v3169_v56 = vrot.slane %v8457_v27, 7 }
 0x624   : > { %v3285_v61 = vadd.f32 %v3277_v52, %v3229_v3  ;;  %v10543_v52 = vld [vmem:[#allocation18_spill] sm:$0xff]  ;;  %v3548_v50 = vmul.f32 %v3541_v0, %v10475_v29  ;;  %v3477_v3 = vmul.f32 %v3469_v31, %v10544_v11  ;;  %v10546_v0 = vrot.slane %v8515_v57, 1  ;;  %v10564_v11 = vld [vmem:[#allocation29_spill] sm:$0xff] }
 0x625   : > { %v3353_v5 = vpop.permute.xlu0 %3352  ;;  %v3524_v7 = vadd.f32 %v3516_v1, %v3484_v20  ;;  %v3258_v1 = vrot.slane %v8477_v6, 1  ;;  %v5989_v57 = vld [vmem:[%s9995_s14 + $0x4] sm:$0xf] }
 0x626   : > { %v3341_v18 = vadd.f32 %v3333_v28, %v3285_v61  ;;  %v8622_v51 = vpop.permute.xlu1 %3386  ;;  %v10213_v61 = vrot.slane %v8624_v10, 1 }
 0x627   : > { %v10214_v14 = vrot.slane %v8622_v51, 1  ;;  %v3556_v4 = vadd.f32 %v3548_v50, %v3524_v7  ;;  %v3272_v6 = vsel %vm1745_vm15, %v3258_v1, %v10546_v0  ;;  %v8661_v7 = vperm.slane %v8164_v32, 4  ;;  %v8667_v50 = vpop.permute.xlu2 %3244 }
 0x628   : > { %v3373_v55 = vadd.f32 %v3353_v5, %v3341_v18 }
 0x629   : > { %v3413_v28 = vsel %vm1745_vm15, %v3405_v62, %v10214_v14  ;;  %v3540_v62 = vsel %vm1745_vm15, %v3534_v36, %v10213_v61  ;;  %v8680_v14 = vperm.slane %v8164_v32, 5  ;;  %v3403_v32 = vrot.slane %v8503_v58, 1 }
 0x62a   : > { %v3421_v30 = vmul.f32 %v3413_v28, %v10543_v52  ;;  %v10545_v28 = vrot.slane %v8391_v60, 7  ;;  %v3549_v60 = vmul.f32 %v3540_v62, %v10467_v23 }
 0x62c   : > { %v3429_v20 = vadd.f32 %v3421_v30, %v3373_v55  ;;  %v3177_v27 = vsel %vm1576_vm14, %v3169_v56, %v10545_v28  ;;  %v10547_v55 = vld [vmem:[#allocation2_spill] sm:$0xff]  ;;  %v3314_v30 = vrot.slane %v8501_v46, 7  ;;  %v10548_v28 = vld [vmem:[#allocation45_spill] sm:$0xff] }
 0x62d   : > { %v8646_v16 = vpop.permute.xlu0 %3248  ;;  %v3219_v36 = vmul.f32 %v8485_v59, %v10547_v55  ;;  %v3179_v0 = vmul.f32 %v3177_v27, %v10548_v28  ;;  %v10549_v59 = vld [vmem:[#allocation3_spill] sm:$0xff] }
 0x62e   : > { %v3499_v18 = vpop.permute.xlu1 %3498  ;;  %v3485_v5 = vadd.f32 %v3477_v3, %v3429_v20  ;;  %v5848_v3 = vld [vmem:[%s9995_s14 + $0x8] sm:$0xf0]  ;;  %v3275_v61 = vmul.f32 %v3272_v6, %v10549_v59  ;;  %v10218_v6 = vrot.slane %v8449_v9, 7 }
 0x62f   : > { %v3517_v31 = vmul.f32 %v3499_v18, %v10466_v47  ;;  %v3565_v18 = vmul.f32 %v8661_v7, %v3556_v4  ;;  %v5851_v46 = vor.u32 %v5989_v57, %v5848_v3 }
 0x630   : > { %v3170_v3 = vsel %vm1576_vm14, %v10218_v6, %v3169_v56  ;;  %v10556_v6 = vld [vmem:[#allocation22_spill] sm:$0xff] }
 0x631   : > { %v3525_v20 = vadd.f32 %v3517_v31, %v3485_v5  ;;  %v3227_v5 = vadd.f32 %v3219_v36, %v3179_v0  ;;  %3652 = vmatpush.bf16.msrb.mxu2 %v5851_v46  ;;  %v10550_v31 = vrot.slane %v8493_v49, 7  ;;  %v3574_v4 = vadd.f32 %v8680_v14, %v3565_v18  ;;  %v10551_v49 = vld [vmem:[#allocation4_spill] sm:$0xff] }
 0x632   : > { %v10552_v0 = vrot.slane %v8539_v48, 1  ;;  %v10220_v46 = vrot.slane %v8646_v16, 1  ;;  %v10554_v48 = vld [vmem:[#allocation9_spill] sm:$0xff] }
 0x633   : > { %v3557_v62 = vadd.f32 %v3549_v60, %v3525_v20  ;;  %v3328_v40 = vsel %vm1576_vm14, %v3314_v30, %v10550_v31  ;;  %v3283_v27 = vadd.f32 %v3275_v61, %v3227_v5  ;;  %v3459_v60 = vrot.slane %v8513_v43, 7  ;;  %v8709_v5 = vpop.permute.xlu2 %3298 }
 0x634   : > { %v3331_v20 = vmul.f32 %v3328_v40, %v10551_v49  ;;  %v3415_v61 = vsel %vm1745_vm15, %v3403_v32, %v10552_v0  ;;  %v3582_v58 = vmax.f32 %v3574_v4, 0.0  ;;  %v10553_v43 = vrot.slane %v8547_v21, 7  ;;  %v10555_v21 = vld [vmem:[#allocation8_spill] sm:$0xff] }
 0x635   : > { %v3566_v42 = vmul.f32 %v8661_v7, %v3557_v62  ;;  %v8687_v23 = vpop.permute.xlu0 %3242  ;;  %v3419_v31 = vmul.f32 %v3415_v61, %v10554_v48  ;;  %v3178_v0 = vmul.f32 %v3170_v3, %v10474_v24  ;;  %v3273_v4 = vsel %vm1745_vm15, %v10220_v46, %v3258_v1 }
 0x636   : > { %v3209_v57 = vpop.permute.xlu1 %3208  ;;  %v3339_v62 = vadd.f32 %v3331_v20, %v3283_v27  ;;  %v3471_v40 = vsel %vm1576_vm14, %v3459_v60, %v10553_v43  ;;  %v3515_v3 = vmul.f32 %v8560_v63, %v10556_v6  ;;  %v3274_v47 = vmul.f32 %v3273_v4, %v10477_v33 }
 0x637   : > { %v3575_v36 = vadd.f32 %v8680_v14, %v3566_v42  ;;  %v3218_v42 = vmul.f32 %v3209_v57, %v10472_v39  ;;  %v3532_v1 = vrot.slane %v8555_v17, 1  ;;  %v10223_v46 = vrot.slane %v8525_v53, 7 }
 0x638   : > { %v3371_v57 = vadd.f32 %v8527_v38, %v3339_v62 }
 0x639   : > { %v3583_v18 = vmax.f32 %v3575_v36, 0.0  ;;  %v3475_v36 = vmul.f32 %v3471_v40, %v10555_v21  ;;  %v3226_v20 = vadd.f32 %v3218_v42, %v3178_v0  ;;  %v10557_v40 = vld [vmem:[#allocation7_spill] sm:$0xff] }
 0x63a   : > { %v3427_v61 = vadd.f32 %v3419_v31, %v3371_v57  ;;  %v10558_v31 = vrot.slane %v8570_v54, 1 }
 0x63b   : > { %v8711_v56 = vpack.c.bf16 %v3583_v18, %v3582_v58  ;;  %v10222_v18 = vrot.slane %v8511_v25, 1  ;;  %v3282_v42 = vadd.f32 %v3274_v47, %v3226_v20  ;;  %v8747_v47 = vpop.permute.xlu2 %3390  ;;  %v10559_v20 = vld [vmem:[#allocation13_spill] sm:$0xff] }
 0x63c   : > { %v3483_v62 = vadd.f32 %v3475_v36, %v3427_v61  ;;  %v3542_v63 = vsel %vm1745_vm15, %v3532_v1, %v10558_v31  ;;  %v3165_v36 = vrot.slane %v8419_v34, 7 }
 0x63d   : > { %v3203_v27 = vpop.permute.xlu0 %3202  ;;  %v3416_v17 = vsel %vm1745_vm15, %v10222_v18, %v3403_v32  ;;  %v3547_v61 = vmul.f32 %v3542_v63, %v10559_v20  ;;  %v10562_v63 = vrot.slane %v8411_v41, 7  ;;  %v10567_v41 = vrot.slane %v8598_v22, 1 }
 0x63e   : > { %v8721_v43 = vpop.permute.xlu1 %3304  ;;  %v3523_v4 = vadd.f32 %v3515_v3, %v3483_v62  ;;  %v10224_v3 = vrot.slane %v8541_v35, 1  ;;  %v10561_v62 = vld [vmem:[#allocation19_spill] sm:$0xff]  ;;  %v10569_v22 = vrot.slane %v8581_v13, 7 }
 0x63f   : > { %v10221_v58 = vrot.slane %v8721_v43, 7 }
 0x640   : > { %v3543_v34 = vsel %vm1745_vm15, %v10224_v3, %v3532_v1 }
 0x641   : > { %v3329_v38 = vsel %vm1576_vm14, %v10221_v58, %v3314_v30  ;;  %v3472_v30 = vsel %vm1576_vm14, %v10223_v46, %v3459_v60  ;;  %v3262_v60 = vrot.slane %v8687_v23, 1  ;;  %v3318_v23 = vrot.slane %v8709_v5, 7 }
 0x642   : > { %v3330_v0 = vmul.f32 %v3329_v38, %v10557_v40  ;;  %v10560_v38 = vld [vmem:[#allocation6_spill] sm:$0xff] }
 0x643   : > { %v3418_v31 = vmul.f32 %v3416_v17, %v10560_v38  ;;  %v3174_v17 = vsel %vm1576_vm14, %v10562_v63, %v3165_v36  ;;  %v3269_v63 = vsel %vm1745_vm15, %v10567_v41, %v3262_v60  ;;  %v3325_v41 = vsel %vm1576_vm14, %v10569_v22, %v3318_v23 }
 0x644   : > { %v3338_v57 = vadd.f32 %v3330_v0, %v3282_v42  ;;  %v3474_v42 = vmul.f32 %v3472_v30, %v10561_v62  ;;  %v3555_v0 = vadd.f32 %v3547_v61, %v3523_v4  ;;  %v10565_v4 = vld [vmem:[#allocation11_spill] sm:$0xff]  ;;  %v10566_v62 = vld [vmem:[#allocation25_spill] sm:$0xff] }
 0x645   : > { %v8750_v54 = vpop.permute.xlu0 %3388  ;;  %v3182_v1 = vmul.f32 %v3174_v17, %v10566_v62  ;;  %v10568_v17 = vld [vmem:[#allocation28_spill] sm:$0xff] }
 0x646   : > { %v3370_v58 = vadd.f32 %v8537_v12, %v3338_v57  ;;  %v3201_v32 = vpop.permute.xlu1 %3200  ;;  %v10563_v12 = vld [vmem:[#allocation10_spill] sm:$0xff]  ;;  %v3564_v61 = vmul.f32 %v8661_v7, %v3555_v0  ;;  %v3278_v5 = vmul.f32 %v3269_v63, %v10568_v17  ;;  %v10226_v63 = vrot.slane %v8667_v50, 1  ;;  %v10571_v17 = vld [vmem:[#allocation40_spill] sm:$0xff] }
 0x647   : > { %v3514_v57 = vmul.f32 %v8529_v19, %v10563_v12  ;;  %v3222_v30 = vmul.f32 %v3201_v32, %v10564_v11  ;;  %v3334_v13 = vmul.f32 %v3325_v41, %v10571_v17  ;;  %v3407_v12 = vrot.slane %v8750_v54, 1 }
 0x648   : > { %v3426_v18 = vadd.f32 %v3418_v31, %v3370_v58  ;;  %v3546_v58 = vmul.f32 %v3543_v34, %v10565_v4  ;;  %v3355_v34 = vpop.permute.xlu2 %3354  ;;  %v10572_v4 = vld [vmem:[#allocation53_spill] sm:$0xff]  ;;  %v10573_v54 = vrot.slane %v8622_v51, 1  ;;  %v10576_v51 = vld [vmem:[#allocation44_spill] sm:$0xff] }
 0x649   : > { %v3230_v32 = vadd.f32 %v3222_v30, %v3182_v1  ;;  %v10570_v1 = vld [vmem:[#allocation27_spill] sm:$0xff] }
 0x64a   : > { %v3482_v46 = vadd.f32 %v3474_v42, %v3426_v18  ;;  %v10227_v18 = vrot.slane %v8431_v37, 7 }
 0x64c   : > { %v3522_v31 = vadd.f32 %v3514_v57, %v3482_v46  ;;  %v3573_v46 = vadd.f32 %v8680_v14, %v3564_v61  ;;  %v3157_v57 = vpop.f32.mrf.mxu0  ;;  %v3173_v30 = vsel %vm1576_vm14, %v3165_v36, %v10227_v18  ;;  %v3268_v36 = vsel %vm1745_vm15, %v3262_v60, %v10226_v63  ;;  %v10577_v63 = vld [vmem:[#allocation74_spill] sm:$0xff] }
 0x64d   : > { %v8777_v3 = vpop.permute.xlu0 %3446  ;;  %v3183_v22 = vmul.f32 %v3173_v30, %v10572_v4  ;;  %v3412_v60 = vsel %vm1745_vm15, %v10573_v54, %v3407_v12 }
 0x64e   : > { %v3554_v19 = vadd.f32 %v3546_v58, %v3522_v31  ;;  %v8780_v42 = vpop.permute.xlu1 %3300  ;;  %v3286_v58 = vadd.f32 %v3278_v5, %v3230_v32  ;;  %v3581_v62 = vmax.f32 %v3573_v46, 0.0  ;;  %v10229_v54 = vrot.slane %v8777_v3, 7 }
 0x64f   : > { %v10225_v31 = vrot.slane %v8780_v42, 7 }
 0x650   : > { %v3563_v0 = vmul.f32 %v8661_v7, %v3554_v19  ;;  %v3223_v19 = vmul.f32 %v3203_v27, %v10570_v1  ;;  %v3342_v32 = vadd.f32 %v3334_v13, %v3286_v58  ;;  %v3503_v30 = vpop.permute.xlu2 %3502  ;;  %v10574_v58 = vrot.slane %v8617_v45, 7 }
 0x651   : > { %v3324_v27 = vsel %vm1576_vm14, %v3318_v23, %v10225_v31  ;;  %v10230_v13 = vrot.slane %v8747_v47, 1  ;;  %v3422_v31 = vmul.f32 %v3412_v60, %v10576_v51  ;;  %v3536_v60 = vrot.slane %v3157_v57, 1 }
 0x652   : > { %v3572_v61 = vadd.f32 %v8680_v14, %v3563_v0  ;;  %v3231_v5 = vadd.f32 %v3223_v19, %v3183_v22  ;;  %v3374_v22 = vadd.f32 %v3355_v34, %v3342_v32 }
 0x653   : > { %v3411_v45 = vsel %vm1745_vm15, %v3407_v12, %v10230_v13  ;;  %v10585_v13 = vld [vmem:[#allocation67_spill] sm:$0xff] }
 0x654   : > { %v3580_v11 = vmax.f32 %v3572_v61, 0.0  ;;  %v3430_v32 = vadd.f32 %v3422_v31, %v3374_v22  ;;  %v10582_v31 = vld [vmem:[#allocation75_spill] sm:$0xff] }
 0x655   : > { %v3501_v61 = vpop.permute.xlu0 %3500  ;;  %v3519_v22 = vmul.f32 %v3503_v30, %v10582_v31 }
 0x656   : > { %v3445_v46 = vpop.permute.xlu1 %3444  ;;  %v3590_v0 = vpack.c.bf16 %v3581_v62, %v3580_v11  ;;  %v3279_v11 = vmul.f32 %v3268_v36, %v10495_v26  ;;  %v10575_v62 = vld [vmem:[#allocation33_spill] sm:$0xff] }
 0x657   : > { %v3463_v41 = vrot.slane %v3445_v46, 7  ;;  %v3335_v19 = vmul.f32 %v3324_v27, %v10575_v62  ;;  %v8821_v46 = vpop.f32.mrf.mxu0 }
 0x658   : > { %5852 = vmatmul.msk.bf16.vlgmr.msrb.gmra.mxu1 %vm821_vm0, %v3590_v0  ;;  %5856 = vmatmul.msk.bf16.vlgmr.msrb.gmra.mxu2 %vm821_vm0, %v3590_v0  ;;  %v3287_v0 = vadd.f32 %v3279_v11, %v3231_v5  ;;  %v10231_v27 = vrot.slane %v8821_v46, 1  ;;  %v10578_v11 = vld [vmem:[#allocation36_spill] sm:$0xff] }
 0x659   : > { %v3468_v23 = vsel %vm1576_vm14, %v10574_v58, %v3463_v41  ;;  %v3467_v34 = vsel %vm1576_vm14, %v3463_v41, %v10229_v54  ;;  %v3423_v51 = vmul.f32 %v3411_v45, %v10578_v11  ;;  %v10581_v41 = vrot.slane %v8624_v10, 1  ;;  %v3207_v45 = vpop.permute.xlu2 %3206 }
 0x65a   : > { %v3478_v18 = vmul.f32 %v3468_v23, %v10577_v63  ;;  %v3343_v36 = vadd.f32 %v3335_v19, %v3287_v0  ;;  %v10579_v63 = vld [vmem:[#allocation47_spill] sm:$0xff]  ;;  %v3538_v12 = vsel %vm1745_vm15, %v3536_v60, %v10231_v27  ;;  %v3167_v27 = vrot.slane %v10585_v13, 7 }
 0x65b   : > { %v3479_v17 = vmul.f32 %v3467_v34, %v10579_v63  ;;  %v10580_v19 = vld [vmem:[#allocation39_spill] sm:$0xff]  ;;  %v3539_v57 = vsel %vm1745_vm15, %v10581_v41, %v3536_v60  ;;  %v10583_v34 = vld [vmem:[#allocation42_spill] sm:$0xff]  ;;  %v10586_v10 = vrot.slane %v8449_v9, 7  ;;  %v10591_v41 = vld [vmem:[#allocation49_spill] sm:$0xff] }
 0x65c   : > { %v3486_v23 = vadd.f32 %v3478_v18, %v3430_v32  ;;  %v3518_v0 = vmul.f32 %v3501_v61, %v10580_v19 }
 0x65d   : > { %v3205_v26 = vpop.permute.xlu0 %3204 }
 0x65e   : > { %v3357_v5 = vpop.permute.xlu1 %3356 }
 0x65f   : > { %v3375_v58 = vadd.f32 %v3357_v5, %v3343_v36  ;;  %v3526_v36 = vadd.f32 %v3518_v0, %v3486_v23  ;;  %v10584_v5 = vld [vmem:[#allocation51_spill] sm:$0xff]  ;;  %v10589_v23 = vrot.slane %v8431_v37, 7 }
 0x661   : > { %v3431_v62 = vadd.f32 %v3423_v51, %v3375_v58  ;;  %v3551_v51 = vmul.f32 %v3538_v12, %v10583_v34  ;;  %v3550_v58 = vmul.f32 %v3539_v57, %v10584_v5  ;;  %v3172_v12 = vsel %vm1576_vm14, %v10589_v23, %v3167_v27  ;;  %v10592_v57 = vld [vmem:[#allocation56_spill] sm:$0xff] }
 0x663   : > { %v3487_v18 = vadd.f32 %v3479_v17, %v3431_v62  ;;  %v3558_v19 = vadd.f32 %v3550_v58, %v3526_v36  ;;  %v3171_v17 = vsel %vm1576_vm14, %v3167_v27, %v10586_v10  ;;  %v10587_v62 = vrot.slane %v8646_v16, 1  ;;  %v10593_v36 = vld [vmem:[#allocation54_spill] sm:$0xff] }
 0x664   : > { %v3224_v16 = vmul.f32 %v3205_v26, %v10591_v41  ;;  %v10596_v26 = vrot.slane %v8721_v43, 7 }
 0x665   : > { %v3527_v32 = vadd.f32 %v3519_v22, %v3487_v18  ;;  %v3393_v0 = vpop.permute.xlu0 %3392  ;;  %v3185_v22 = vmul.f32 %v3171_v17, %v10592_v57  ;;  %v3449_v18 = vpop.permute.xlu2 %3448 }
 0x666   : > { %v3247_v54 = vpop.permute.xlu1 %3246 }
 0x667   : > { %v3559_v63 = vadd.f32 %v3551_v51, %v3527_v32  ;;  %v3264_v61 = vrot.slane %v3247_v54, 1  ;;  %v10588_v54 = vld [vmem:[#allocation60_spill] sm:$0xff]  ;;  %v10594_v51 = vld [vmem:[#allocation46_spill] sm:$0xff] }
 0x668   : > { %5853 = vmatmul.msk.bf16.gmra.mxu1 %vm821_vm0, %v8711_v56  ;;  %5857 = vmatmul.msk.bf16.gmra.mxu2 %vm821_vm0, %v8711_v56  ;;  %v3225_v60 = vmul.f32 %v3207_v45, %v10588_v54  ;;  %v10590_v56 = vrot.slane %v8667_v50, 1  ;;  %v3184_v37 = vmul.f32 %v3172_v12, %v10594_v51  ;;  %v10595_v32 = vld [vmem:[#allocation52_spill] sm:$0xff]  ;;  %v10620_v51 = vld [vmem:[#allocation58_spill] sm:$0xff] }
 0x669   : > { %v3568_v30 = vmul.f32 %v8661_v7, %v3559_v63  ;;  %v3266_v13 = vsel %vm1745_vm15, %v3264_v61, %v10587_v62  ;;  %v3567_v63 = vmul.f32 %v8661_v7, %v3558_v19  ;;  %v3409_v62 = vrot.slane %v3393_v0, 1 }
 0x66a   : > { %v3267_v9 = vsel %vm1745_vm15, %v10590_v56, %v3264_v61  ;;  %v3281_v45 = vmul.f32 %v3266_v13, %v10593_v36  ;;  %v3233_v10 = vadd.f32 %v3225_v60, %v3185_v22  ;;  %v3232_v19 = vadd.f32 %v3224_v16, %v3184_v37  ;;  %v10598_v36 = vld [vmem:[#allocation48_spill] sm:$0xff]  ;;  %v10599_v60 = vld [vmem:[#allocation73_spill] sm:$0xff] }
 0x66b   : > { %v3280_v58 = vmul.f32 %v3267_v9, %v10595_v32  ;;  %v3577_v50 = vadd.f32 %v8680_v14, %v3568_v30  ;;  %v3576_v23 = vadd.f32 %v8680_v14, %v3567_v63  ;;  %v3465_v56 = vrot.slane %v3449_v18, 7 }
 0x66c   : > { %v10597_v13 = vrot.slane %v8780_v42, 7  ;;  %v3289_v9 = vadd.f32 %v3281_v45, %v3233_v10  ;;  %v10600_v63 = vrot.slane %v8511_v25, 1  ;;  %v10601_v42 = vrot.slane %v8525_v53, 7  ;;  %v10602_v10 = vld [vmem:[#allocation64_spill] sm:$0xff] }
 0x66d   : > { %v3288_v22 = vadd.f32 %v3280_v58, %v3232_v19  ;;  %v3584_v37 = vmax.f32 %v3576_v23, 0.0  ;;  %v3361_v45 = vpop.permute.xlu0 %3360  ;;  %v10603_v58 = vrot.slane %v8747_v47, 1  ;;  %v10604_v19 = vld [vmem:[#allocation61_spill] sm:$0xff] }
 0x66e   : > { %v3303_v27 = vpop.permute.xlu1 %3302  ;;  %v3417_v43 = vsel %vm1745_vm15, %v3409_v62, %v10600_v63  ;;  %v10607_v63 = vld [vmem:[#allocation57_spill] sm:$0xff] }
 0x66f   : > { %v3320_v61 = vrot.slane %v3303_v27, 7  ;;  %v3585_v27 = vmax.f32 %v3577_v50, 0.0  ;;  %v3410_v25 = vsel %vm1745_vm15, %v10603_v58, %v3409_v62  ;;  %v10608_v62 = vrot.slane %v8777_v3, 7 }
 0x671   : > { %v3322_v17 = vsel %vm1576_vm14, %v3320_v61, %v10596_v26  ;;  %v3323_v12 = vsel %vm1576_vm14, %v10597_v13, %v3320_v61  ;;  %v3473_v61 = vsel %vm1576_vm14, %v3465_v56, %v10601_v42  ;;  %v3425_v26 = vmul.f32 %v3417_v43, %v10602_v10 }
 0x672   : > { %v3337_v30 = vmul.f32 %v3322_v17, %v10598_v36  ;;  %v3336_v0 = vmul.f32 %v3323_v12, %v10599_v60  ;;  %v3592_v50 = vpack.c.bf16 %v3585_v27, %v3584_v37  ;;  %v3530_v12 = vrot.slane %v10604_v19, 1  ;;  %v10613_v19 = vld [vmem:[#allocation71_spill] sm:$0xff] }
 0x673   : > { %v3424_v43 = vmul.f32 %v3410_v25, %v10607_v63  ;;  %v3466_v27 = vsel %vm1576_vm14, %v10608_v62, %v3465_v56  ;;  %v10616_v60 = vld [vmem:[#allocation15_spill] sm:$0xff] }
 0x674   : > { %v3345_v16 = vadd.f32 %v3337_v30, %v3289_v9  ;;  %v3344_v18 = vadd.f32 %v3336_v0, %v3288_v22  ;;  %v3491_v9 = vpop.permute.xlu2 %3490  ;;  %v10605_v30 = vld [vmem:[#allocation69_spill] sm:$0xff]  ;;  %v10606_v22 = vrot.slane %v8541_v35, 1  ;;  %v10612_v35 = vrot.slane %v8821_v46, 1 }
 0x675   : > { %v3481_v53 = vmul.f32 %v3473_v61, %v10605_v30  ;;  %v10610_v61 = vld [vmem:[#allocation55_spill] sm:$0xff] }
 0x676   : > { %v3377_v17 = vadd.f32 %v3361_v45, %v3345_v16  ;;  %v3359_v13 = vpop.permute.xlu1 %3358  ;;  %v3544_v47 = vsel %vm1745_vm15, %v3530_v12, %v10606_v22  ;;  %v10609_v16 = vld [vmem:[#allocation72_spill] sm:$0xff]  ;;  %v3545_v58 = vsel %vm1745_vm15, %v10612_v35, %v3530_v12 }
 0x677   : > { %v3376_v23 = vadd.f32 %v3359_v13, %v3344_v18  ;;  %v3521_v18 = vmul.f32 %v3491_v9, %v10609_v16  ;;  %v3553_v45 = vmul.f32 %v3544_v47, %v10610_v61  ;;  %v10614_v9 = vld [vmem:[#allocation70_spill] sm:$0xff] }
 0x678   : > { %v3433_v0 = vadd.f32 %v3425_v26, %v3377_v17  ;;  %5854 = vmatmul.msk.bf16.gmra.mxu1 %vm821_vm0, %v3592_v50  ;;  %5858 = vmatmul.msk.bf16.gmra.mxu2 %vm821_vm0, %v3592_v50  ;;  %v10611_v17 = vld [vmem:[#allocation37_spill] sm:$0xff] }
 0x679   : > { %v3432_v42 = vadd.f32 %v3424_v43, %v3376_v23  ;;  %v3480_v13 = vmul.f32 %v3466_v27, %v10611_v17 }
 0x67a   : > { %v3489_v37 = vadd.f32 %v3481_v53, %v3433_v0  ;;  %v3552_v53 = vmul.f32 %v3545_v58, %v10614_v9 }
 0x67b   : > { %v3488_v3 = vadd.f32 %v3480_v13, %v3432_v42 }
 0x67c   : > { %v3529_v26 = vadd.f32 %v3521_v18, %v3489_v37 }
 0x67e   : > { %v3561_v25 = vadd.f32 %v3553_v45, %v3529_v26  ;;  %v3505_v50 = vpop.permute.xlu1 %3504 }
 0x67f   : > { %v3520_v22 = vmul.f32 %v3505_v50, %v10613_v19 }
 0x680   : > { %v3570_v56 = vmul.f32 %v8661_v7, %v3561_v25 }
 0x681   : > { %v3528_v23 = vadd.f32 %v3520_v22, %v3488_v3 }
 0x682   : > { %v3579_v43 = vadd.f32 %v8680_v14, %v3570_v56 }
 0x683   : > { %v3560_v0 = vadd.f32 %v3552_v53, %v3528_v23 }
 0x684   : > { %v3587_v27 = vmax.f32 %v3579_v43, 0.0 }
 0x685   : > { %v3569_v47 = vmul.f32 %v8661_v7, %v3560_v0 }
 0x687   : > { %v3578_v46 = vadd.f32 %v8680_v14, %v3569_v47 }
 0x689   : > { %v3586_v62 = vmax.f32 %v3578_v46, 0.0 }
 0x68b   : > { %v3593_v12 = vpack.c.bf16 %v3587_v27, %v3586_v62 }
 0x68d   : > { %5855 = vmatmul.msk.bf16.gmra.mxu1 %vm821_vm0, %v3593_v12  ;;  %5859 = vmatmul.msk.bf16.gmra.mxu2 %vm821_vm0, %v3593_v12 }
 0x6d5   : > { %v8931_v18 = vpop.f32.mrf.mxu1 }
 0x6d6   : > { %3802 = vrot.lane.b32.xlu1 %v8931_v18, %s10535_s26  ;;  %3746 = vrot.lane.b32.xlu0 %v8931_v18, %s10448_s1  ;;  %v3674_v0 = vrot.slane %v8931_v18, 7 }
 0x6dd   : > { %v8937_v7 = vpop.f32.mrf.mxu1 }
 0x6de   : > { %3890 = vrot.lane.b32.xlu1 %v8931_v18, %s10354_s30  ;;  %3706 = vrot.lane.b32.xlu0 %v8931_v18, %s10333_s7  ;;  %v3675_v10 = vrot.slane %v8937_v7, 7 }
 0x6df   : > { %3748 = vrot.lane.b32.xlu2 %v8937_v7, %s10448_s1 }
 0x6e5   : > { %v8951_v14 = vpop.f32.mrf.mxu1 }
 0x6e6   : > { %3946 = vrot.lane.b32.xlu1 %v8931_v18, %s10338_s8  ;;  %3804 = vrot.lane.b32.xlu0 %v8937_v7, %s10535_s26 }
 0x6e7   : > { %4004 = vrot.lane.b32.xlu2 %v8937_v7, %s10358_s9 }
 0x6ed   : > { %v8963_v37 = vpop.f32.mrf.mxu1 }
 0x6ee   : > { %3858 = vrot.lane.b32.xlu1 %v8931_v18, %s10349_s3  ;;  %3892 = vrot.lane.b32.xlu0 %v8937_v7, %s10354_s30 }
 0x6ef   : > { %3894 = vrot.lane.b32.xlu2 %v8951_v14, %s10354_s30 }
 0x6f5   : > { %v8973_v42 = vpop.f32.mrf.mxu1 }
 0x6f6   : > { %3708 = vrot.lane.b32.xlu1 %v8937_v7, %s10333_s7  ;;  %3948 = vrot.lane.b32.xlu0 %v8937_v7, %s10338_s8 }
 0x6f7   : > { %3950 = vrot.lane.b32.xlu2 %v8951_v14, %s10338_s8 }
 0x6fd   : > { %v8981_v45 = vpop.f32.mrf.mxu1 }
 0x6fe   : > { %3860 = vrot.lane.b32.xlu0 %v8937_v7, %s10349_s3  ;;  %4006 = vrot.lane.b32.xlu1 %v8951_v14, %s10358_s9 }
 0x6ff   : > { %3806 = vrot.lane.b32.xlu2 %v8951_v14, %s10535_s26 }
 0x706   : > { %3750 = vrot.lane.b32.xlu0 %v8951_v14, %s10448_s1  ;;  %3808 = vrot.lane.b32.xlu1 %v8963_v37, %s10535_s26 }
 0x707   : > { %3862 = vrot.lane.b32.xlu2 %v8951_v14, %s10349_s3 }
 0x70a   : > { %v8989_v26 = vpop.f32.mrf.mxu1 }
 0x70e   : > { %3710 = vrot.lane.b32.xlu0 %v8951_v14, %s10333_s7  ;;  %3952 = vrot.lane.b32.xlu1 %v8963_v37, %s10338_s8 }
 0x70f   : > { %3752 = vrot.lane.b32.xlu2 %v8963_v37, %s10448_s1 }
 0x712   : > { %v8997_v13 = vpop.f32.mrf.mxu1 }
 0x713   : > { %v10234_v53 = vrot.slane %v8997_v13, 7 }
 0x715   : > { %v3689_v47 = vsel %vm1576_vm14, %v10234_v53, %v3674_v0 }
 0x716   : > { %3896 = vrot.lane.b32.xlu0 %v8963_v37, %s10354_s30  ;;  %3864 = vrot.lane.b32.xlu1 %v8963_v37, %s10349_s3  ;;  %v3691_v62 = vmul.f32 %v3689_v47, %v10548_v28 }
 0x717   : > { %3898 = vrot.lane.b32.xlu2 %v8973_v42, %s10354_s30 }
 0x71e   : > { %4008 = vrot.lane.b32.xlu0 %v8963_v37, %s10358_s9  ;;  %3760 = vrot.lane.b32.xlu1 %v8997_v13, %s10448_s1 }
 0x71f   : > { %4010 = vrot.lane.b32.xlu2 %v8973_v42, %s10358_s9 }
 0x726   : > { %3954 = vrot.lane.b32.xlu0 %v8973_v42, %s10338_s8  ;;  %3754 = vrot.lane.b32.xlu1 %v8973_v42, %s10448_s1 }
 0x727   : > { %3720 = vrot.lane.b32.xlu2 %v8997_v13, %s10333_s7 }
 0x72e   : > { %3756 = vrot.lane.b32.xlu0 %v8981_v45, %s10448_s1  ;;  %3714 = vrot.lane.b32.xlu1 %v8973_v42, %s10333_s7 }
 0x72f   : > { %3816 = vrot.lane.b32.xlu2 %v8997_v13, %s10535_s26 }
 0x736   : > { %3810 = vrot.lane.b32.xlu0 %v8973_v42, %s10535_s26  ;;  %3900 = vrot.lane.b32.xlu1 %v8981_v45, %s10354_s30 }
 0x737   : > { %3712 = vrot.lane.b32.xlu2 %v8963_v37, %s10333_s7 }
 0x739   : > { %v9023_v35 = vpop.permute.xlu2 %3748 }
 0x73a   : > { %v10233_v3 = vrot.slane %v9023_v35, 1 }
 0x73e   : > { %3902 = vrot.lane.b32.xlu0 %v8989_v26, %s10354_s30  ;;  %3958 = vrot.lane.b32.xlu1 %v8989_v26, %s10338_s8 }
 0x73f   : > { %3812 = vrot.lane.b32.xlu2 %v8981_v45, %s10535_s26 }
 0x741   : > { %v9031_v58 = vpop.permute.xlu2 %4004 }
 0x746   : > { %3866 = vrot.lane.b32.xlu0 %v8973_v42, %s10349_s3  ;;  %4012 = vrot.lane.b32.xlu1 %v8981_v45, %s10358_s9 }
 0x747   : > { %3956 = vrot.lane.b32.xlu2 %v8981_v45, %s10338_s8 }
 0x748   : > { %v9039_v25 = vpop.permute.xlu1 %3802  ;;  %v9041_v50 = vpop.permute.xlu0 %3746 }
 0x749   : > { %v10232_v22 = vrot.slane %v9041_v50, 1  ;;  %v9045_v56 = vpop.permute.xlu2 %3894 }
 0x74a   : > { %v3916_v19 = vrot.slane %v9045_v56, 1 }
 0x74b   : > { %v3784_v23 = vsel %vm1745_vm15, %v10232_v22, %v10233_v3 }
 0x74c   : > { %v3787_v22 = vmul.f32 %v3784_v23, %v10549_v59 }
 0x74e   : > { %4014 = vrot.lane.b32.xlu0 %v8989_v26, %s10358_s9  ;;  %3716 = vrot.lane.b32.xlu1 %v8981_v45, %s10333_s7 }
 0x74f   : > { %3868 = vrot.lane.b32.xlu2 %v8981_v45, %s10349_s3 }
 0x750   : > { %v9065_v43 = vpop.permute.xlu1 %3890  ;;  %v3707_v46 = vpop.permute.xlu0 %3706 }
 0x751   : > { %v3731_v27 = vmul.f32 %v3707_v46, %v10547_v55  ;;  %v9069_v12 = vpop.permute.xlu2 %3950  ;;  %v10235_v55 = vrot.slane %v9039_v25, 7 }
 0x753   : > { %v3739_v3 = vadd.f32 %v3731_v27, %v3691_v62  ;;  %v5993_v27 = vld [vmem:[%s9997_s16] sm:$0xff] }
 0x754   : > { %4139 = vmatpush.bf16.msra.mxu3 %v5993_v27 }
 0x755   : > { %v3795_v61 = vadd.f32 %v3787_v22, %v3739_v3 }
 0x756   : > { %3718 = vrot.lane.b32.xlu0 %v8989_v26, %s10333_s7  ;;  %3904 = vrot.lane.b32.xlu1 %v8997_v13, %s10354_s30 }
 0x757   : > { %3758 = vrot.lane.b32.xlu2 %v8989_v26, %s10448_s1 }
 0x758   : > { %v9078_v53 = vpop.permute.xlu1 %3946  ;;  %v3805_v28 = vpop.permute.xlu0 %3804 }
 0x759   : > { %v3827_v47 = vrot.slane %v3805_v28, 7  ;;  %v3807_v46 = vpop.permute.xlu2 %3806  ;;  %v9102_v28 = vpop.f32.mrf.mxu2 }
 0x75a   : > { %10615 = vst [vmem:[#allocation65_spill] sm:$0xff] %v9102_v28  ;;  %v3828_v36 = vrot.slane %v3807_v46, 7 }
 0x75b   : > { %v3840_v59 = vsel %vm1576_vm14, %v10235_v55, %v3827_v47 }
 0x75c   : > { %v3843_v3 = vmul.f32 %v3840_v59, %v10551_v49  ;;  %v5992_v49 = vld [vmem:[%s9996_s15 + $0x8] sm:$0xff] }
 0x75d   : > { %4191 = vmatpush.bf16.msrb.mxu0 %v5992_v49 }
 0x75e   : > { %3960 = vrot.lane.b32.xlu0 %v8997_v13, %s10338_s8  ;;  %3872 = vrot.lane.b32.xlu1 %v8997_v13, %s10349_s3  ;;  %v3851_v22 = vadd.f32 %v3843_v3, %v3795_v61  ;;  %s783_s8 = scalar_lea.vmem %s10005_s24, %s6433_s28 }
 0x75f   : > { %3814 = vrot.lane.b32.xlu2 %v8989_v26, %s10535_s26 }
 0x760   : > { %v9092_v23 = vpop.permute.xlu1 %3858  ;;  %v9094_v62 = vpop.permute.xlu0 %3892 }
 0x761   : > { %v9104_v59 = vpop.permute.xlu2 %3862  ;;  %v10236_v16 = vrot.slane %v9094_v62, 1  ;;  %v9115_v9 = vpop.f32.mrf.mxu2 }
 0x763   : > { %v3927_v27 = vsel %vm1745_vm15, %v10236_v16, %v3916_v19  ;;  %v3688_v16 = vsel %vm1576_vm14, %v3674_v0, %v3675_v10 }
 0x764   : > { %v3931_v17 = vmul.f32 %v3927_v27, %v10554_v48  ;;  %v10237_v48 = vrot.slane %v8951_v14, 7  ;;  %v10617_v27 = vld [vmem:[#allocation50_spill] sm:$0xff] }
 0x765   : > { %v3692_v7 = vmul.f32 %v3688_v16, %v10617_v27 }
 0x766   : > { %4002 = vrot.lane.b32.xlu0 %v8931_v18, %s10358_s9 }
 0x767   : > { %3870 = vrot.lane.b32.xlu2 %v8989_v26, %s10349_s3 }
 0x768   : > { %v3709_v61 = vpop.permute.xlu1 %3708  ;;  %v9110_v3 = vpop.permute.xlu0 %3948 }
 0x769   : > { %v9112_v55 = vpop.permute.xlu2 %3752  ;;  %v9132_v56 = vpop.f32.mrf.mxu2  ;;  %v3732_v54 = vmul.f32 %v3709_v61, %v10616_v60  ;;  %v10619_v60 = vld [vmem:[#allocation14_spill] sm:$0xff] }
 0x76a   : > { %v10239_v16 = vrot.slane %v9112_v55, 1 }
 0x76b   : > { %v3740_v46 = vadd.f32 %v3732_v54, %v3692_v7 }
 0x76f   : > { %4016 = vrot.lane.b32.xlu2 %v8997_v13, %s10358_s9 }
 0x770   : > { %v3861_v18 = vpop.permute.xlu0 %3860  ;;  %v9124_v49 = vpop.permute.xlu1 %4006 }
 0x771   : > { %v3883_v30 = vadd.f32 %v3861_v18, %v3851_v22  ;;  %v9127_v28 = vpop.permute.xlu2 %3898 }
 0x773   : > { %v9130_v63 = vadd.f32 %v3931_v17, %v3883_v30  ;;  %v3839_v30 = vsel %vm1576_vm14, %v3827_v47, %v3828_v36  ;;  %v10618_v17 = vrot.slane %v9023_v35, 1  ;;  %v3661_v35 = vpop.f32.mrf.mxu2 }
 0x774   : > { %v3844_v34 = vmul.f32 %v3839_v30, %v10620_v51 }
 0x778   : > { %v3751_v57 = vpop.permute.xlu0 %3750  ;;  %v9137_v32 = vpop.permute.xlu1 %3808 }
 0x779   : > { %v3772_v22 = vrot.slane %v3751_v57, 1  ;;  %v9139_v18 = vpop.permute.xlu2 %4010  ;;  %v3687_v57 = vsel %vm1576_vm14, %v3675_v10, %v10237_v48  ;;  %v10238_v47 = vrot.slane %v9137_v32, 7  ;;  %v10622_v48 = vld [vmem:[#allocation31_spill] sm:$0xff] }
 0x77b   : > { %v3783_v0 = vsel %vm1745_vm15, %v10618_v17, %v3772_v22  ;;  %v3782_v54 = vsel %vm1745_vm15, %v3772_v22, %v10239_v16 }
 0x77c   : > { %v3788_v61 = vmul.f32 %v3783_v0, %v10619_v60  ;;  %v10621_v60 = vld [vmem:[#allocation12_spill] sm:$0xff]  ;;  %v3789_v22 = vmul.f32 %v3782_v54, %v10541_v2  ;;  %v3664_v2 = vpop.f32.mrf.mxu2 }
 0x77d   : > { %v3693_v10 = vmul.f32 %v3687_v57, %v10621_v60  ;;  %v802_v60 = vld [vmem:[%s9177_s2] sm:$0xff] }
 0x77e   : > { %v3796_v27 = vadd.f32 %v3788_v61, %v3740_v46  ;;  %v3838_v46 = vsel %vm1576_vm14, %v3828_v36, %v10238_v47  ;;  %v5991_v61 = vld [vmem:[%s9996_s15] sm:$0xff]  ;;  %v803_v47 = vld [vmem:[%s9177_s2 + $0x8] sm:$0xff] }
 0x77f   : > { %4192 = vmatpush.bf16.msrb.mxu0 %v5991_v61  ;;  %v3845_v57 = vmul.f32 %v3838_v46, %v10542_v8  ;;  %v3971_v61 = vrot.slane %v9110_v3, 7  ;;  %v3972_v8 = vrot.slane %v9069_v12, 7  ;;  %v10624_v46 = vld [vmem:[#allocation32_spill] sm:$0xff] }
 0x780   : > { %v3852_v7 = vadd.f32 %v3844_v34, %v3796_v27  ;;  %v3711_v17 = vpop.permute.xlu0 %3710  ;;  %v9161_v0 = vpop.permute.xlu1 %3952 }
 0x781   : > { %v3733_v51 = vmul.f32 %v3711_v17, %v10622_v48  ;;  %v3721_v30 = vpop.permute.xlu2 %3720  ;;  %v10241_v16 = vrot.slane %v9161_v0, 7 }
 0x783   : > { %v3741_v34 = vadd.f32 %v3733_v51, %v3693_v10  ;;  %v4104_v51 = vpack.c.bf16 %v803_v47, %v802_v60  ;;  %v3983_v47 = vsel %vm1576_vm14, %v3971_v61, %v3972_v8  ;;  %v10625_v60 = vrot.slane %v8997_v13, 7 }
 0x785   : > { %v3797_v48 = vadd.f32 %v3789_v22, %v3741_v34  ;;  %5876 = vmatmul.msk.bf16.vlgmr.msrb.gmra.mxu0 %vm3091_vm1, %v4104_v51 }
 0x787   : > { %v9180_v27 = vadd.f32 %v3845_v57, %v3797_v48  ;;  %v3884_v48 = vadd.f32 %v9104_v59, %v3852_v7  ;;  %v10240_v57 = vrot.slane %v8989_v26, 7  ;;  %v3730_v7 = vmul.f32 %v3721_v30, %v10472_v39 }
 0x788   : > { %v3897_v36 = vpop.permute.xlu0 %3896  ;;  %v9182_v17 = vpop.permute.xlu1 %3864  ;;  %v3918_v30 = vrot.slane %v9127_v28, 1 }
 0x789   : > { %v3917_v54 = vrot.slane %v3897_v36, 1  ;;  %v9186_v10 = vpop.permute.xlu2 %3816  ;;  %v4045_v36 = vrot.slane %v3661_v35, 1  ;;  %v3682_v12 = vsel %vm1576_vm14, %v10240_v57, %v10625_v60  ;;  %v4044_v35 = vrot.slane %v9132_v56, 1  ;;  %v10626_v60 = vld [vmem:[#allocation20_spill] sm:$0xff]  ;;  %v9222_v56 = vpop.f32.mrf.mxu2 }
 0x78a   : > { %v3833_v59 = vrot.slane %v9186_v10, 7 }
 0x78b   : > { %v3926_v22 = vsel %vm1745_vm15, %v3916_v19, %v3917_v54  ;;  %v3982_v19 = vsel %vm1576_vm14, %v3972_v8, %v10241_v16  ;;  %v3690_v16 = vmul.f32 %v3682_v12, %v10474_v24 }
 0x78c   : > { %v3932_v34 = vmul.f32 %v3926_v22, %v10624_v46  ;;  %v4046_v46 = vrot.slane %v3664_v2, 1  ;;  %v3988_v57 = vmul.f32 %v3982_v19, %v10626_v60  ;;  %v10627_v2 = vrot.slane %v9039_v25, 7 }
 0x78d   : > { %v3738_v19 = vadd.f32 %v3730_v7, %v3690_v16  ;;  %v3914_v60 = vrot.slane %v9065_v43, 1  ;;  %v4047_v16 = vrot.slane %v9222_v56, 1 }
 0x78e   : > { %v3940_v3 = vadd.f32 %v3932_v34, %v3884_v48  ;;  %v3987_v34 = vmul.f32 %v3983_v47, %v10555_v21  ;;  %v4054_v48 = vsel %vm1745_vm15, %v4044_v35, %v4045_v36  ;;  %v3841_v21 = vsel %vm1576_vm14, %v3833_v59, %v10627_v2 }
 0x78f   : > { %v10628_v47 = vrot.slane %v9041_v50, 1  ;;  %v4053_v25 = vsel %vm1745_vm15, %v4045_v36, %v4046_v46  ;;  %v4027_v2 = vmul.f32 %v9124_v49, %v10556_v6  ;;  %v3925_v50 = vsel %vm1745_vm15, %v3917_v54, %v3918_v30 }
 0x790   : > { %v4009_v51 = vpop.permute.xlu0 %4008  ;;  %v9212_v22 = vpop.permute.xlu1 %3760  ;;  %v3995_v39 = vadd.f32 %v3987_v34, %v9130_v63  ;;  %v3996_v12 = vadd.f32 %v3988_v57, %v3940_v3  ;;  %v3970_v57 = vrot.slane %v9078_v53, 7  ;;  %v10242_v3 = vrot.slane %v9115_v9, 1 }
 0x791   : > { %v3777_v8 = vrot.slane %v9212_v22, 1  ;;  %v9216_v13 = vpop.permute.xlu2 %3712  ;;  %v4028_v63 = vmul.f32 %v4009_v51, %v10473_v44  ;;  %v3842_v44 = vmul.f32 %v3841_v21, %v10557_v40  ;;  %v10629_v36 = vrot.slane %v9094_v62, 1 }
 0x792   : > { %v4035_v49 = vadd.f32 %v4027_v2, %v3995_v39  ;;  %v3984_v54 = vsel %vm1576_vm14, %v3970_v57, %v3971_v61  ;;  %v3933_v7 = vmul.f32 %v3925_v50, %v10543_v52  ;;  %v4055_v62 = vsel %vm1745_vm15, %v10242_v3, %v4044_v35 }
 0x793   : > { %v3785_v24 = vsel %vm1745_vm15, %v3777_v8, %v10628_v47  ;;  %v3928_v6 = vsel %vm1745_vm15, %v3914_v60, %v10629_v36  ;;  %v4036_v51 = vadd.f32 %v4028_v63, %v3996_v12  ;;  %v4059_v39 = vmul.f32 %v4054_v48, %v10559_v20  ;;  %v10634_v36 = vld [vmem:[#allocation23_spill] sm:$0xff] }
 0x794   : > { %v3786_v34 = vmul.f32 %v3785_v24, %v10477_v33  ;;  %v4060_v24 = vmul.f32 %v4053_v25, %v10475_v29  ;;  %v4052_v52 = vsel %vm1745_vm15, %v4046_v46, %v4047_v16  ;;  %v3930_v12 = vmul.f32 %v3928_v6, %v10560_v38  ;;  %v6272_v29 = vld [vmem:[%s10004_s23] sm:$0xff] }
 0x795   : > { %v3885_v63 = vadd.f32 %v9182_v17, %v9180_v27  ;;  %v9289_v48 = vperm.slane %v6272_v29, 6  ;;  %v4067_v25 = vadd.f32 %v4059_v39, %v4035_v49  ;;  %v10631_v46 = vrot.slane %v9161_v0, 7  ;;  %v10632_v17 = vld [vmem:[#allocation21_spill] sm:$0xff]  ;;  %v10636_v39 = vld [vmem:[#allocation26_spill] sm:$0xff] }
 0x796   : > { %v3794_v33 = vadd.f32 %v3786_v34, %v3738_v19  ;;  %v10630_v34 = vld [vmem:[#allocation19_spill] sm:$0xff]  ;;  %v4068_v27 = vadd.f32 %v4060_v24, %v4036_v51  ;;  %v4029_v6 = vmul.f32 %v9139_v18, %v10634_v36  ;;  %v10665_v53 = vrot.slane %v9115_v9, 1 }
 0x797   : > { %v3986_v20 = vmul.f32 %v3984_v54, %v10630_v34  ;;  %v3941_v2 = vadd.f32 %v3933_v7, %v3885_v63  ;;  %v4061_v34 = vmul.f32 %v4052_v52, %v10636_v39  ;;  %v4076_v7 = vmul.f32 %v9289_v48, %v4067_v25 }
 0x798   : > { %v3850_v40 = vadd.f32 %v3842_v44, %v3794_v33  ;;  %v9264_v21 = vpop.permute.xlu0 %3954  ;;  %v9266_v47 = vpop.permute.xlu1 %3754  ;;  %v10633_v44 = vld [vmem:[#allocation10_spill] sm:$0xff]  ;;  %v4077_v51 = vmul.f32 %v9289_v48, %v4068_v27 }
 0x799   : > { %v3974_v19 = vrot.slane %v9264_v21, 7  ;;  %v9275_v61 = vpop.permute.xlu2 %3812  ;;  %v4026_v33 = vmul.f32 %v9031_v58, %v10633_v44 }
 0x79a   : > { %v3882_v35 = vadd.f32 %v9092_v23, %v3850_v40  ;;  %v10635_v40 = vld [vmem:[#allocation11_spill] sm:$0xff] }
 0x79b   : > { %v3981_v38 = vsel %vm1576_vm14, %v10631_v46, %v3974_v19  ;;  %v4058_v0 = vmul.f32 %v4055_v62, %v10635_v40  ;;  %v9304_v46 = vperm.slane %v6272_v29, 7  ;;  %v3677_v40 = vrot.slane %v8963_v37, 7 }
 0x79c   : > { %v3938_v23 = vadd.f32 %v3930_v12, %v3882_v35  ;;  %v3989_v50 = vmul.f32 %v3981_v38, %v10632_v17  ;;  %v804_v35 = vld [vmem:[%s9177_s2 + $0x10] sm:$0xff]  ;;  %v805_v38 = vld [vmem:[%s9177_s2 + $0x18] sm:$0xff] }
 0x79d   : > { %v4085_v52 = vadd.f32 %v9304_v46, %v4076_v7  ;;  %v4086_v29 = vadd.f32 %v9304_v46, %v4077_v51 }
 0x79e   : > { %v3994_v49 = vadd.f32 %v3986_v20, %v3938_v23  ;;  %v3997_v54 = vadd.f32 %v3989_v50, %v3941_v2  ;;  %v4105_v20 = vpack.c.bf16 %v805_v38, %v804_v35  ;;  %v3678_v50 = vrot.slane %v8973_v42, 7 }
 0x79f   : > { %v4093_v44 = vmax.f32 %v4085_v52, 0.0  ;;  %v10637_v38 = vrot.slane %v8951_v14, 7  ;;  %v3669_v52 = vpop.f32.mrf.mxu2 }
 0x7a0   : > { %v4034_v24 = vadd.f32 %v4026_v33, %v3994_v49  ;;  %v4037_v12 = vadd.f32 %v4029_v6, %v3997_v54  ;;  %v9308_v63 = vpop.permute.xlu0 %3756  ;;  %v3715_v58 = vpop.permute.xlu1 %3714  ;;  %5877 = vmatmul.msk.bf16.gmra.mxu0 %vm3091_vm1, %v4105_v20  ;;  %v4094_v33 = vmax.f32 %v4086_v29, 0.0  ;;  %v10639_v29 = vld [vmem:[#allocation29_spill] sm:$0xff] }
 0x7a1   : > { %v9312_v18 = vpop.permute.xlu2 %3956  ;;  %v3775_v39 = vrot.slane %v9308_v63, 1  ;;  %v3735_v35 = vmul.f32 %v3715_v58, %v10570_v1  ;;  %v3686_v37 = vsel %vm1576_vm14, %v10637_v38, %v3677_v40  ;;  %v3734_v1 = vmul.f32 %v9216_v13, %v10639_v29  ;;  %v10642_v13 = vld [vmem:[#allocation28_spill] sm:$0xff]  ;;  %v5995_v63 = vld [vmem:[%s9998_s17 + $0x8] sm:$0xff] }
 0x7a2   : > { %v4066_v2 = vadd.f32 %v4058_v0, %v4034_v24  ;;  %v4069_v62 = vadd.f32 %v4061_v34, %v4037_v12  ;;  %v3774_v0 = vrot.slane %v9266_v47, 1  ;;  %v3685_v24 = vsel %vm1576_vm14, %v3677_v40, %v3678_v50  ;;  %4334 = vmatpush.bf16.msra.mxu1 %v5995_v63 }
 0x7a3   : > { %v10638_v47 = vrot.slane %v9112_v55, 1  ;;  %v3695_v14 = vmul.f32 %v3685_v24, %v10572_v4  ;;  %v10640_v58 = vrot.slane %v9137_v32, 7  ;;  %v10645_v24 = vld [vmem:[#allocation40_spill] sm:$0xff]  ;;  %v3975_v29 = vrot.slane %v9312_v18, 7 }
 0x7a4   : > { %v4075_v25 = vmul.f32 %v9289_v48, %v4066_v2  ;;  %v4078_v27 = vmul.f32 %v9289_v48, %v4069_v62  ;;  %v3831_v2 = vrot.slane %v9275_v61, 7  ;;  %v3780_v62 = vsel %vm1745_vm15, %v3774_v0, %v3775_v39 }
 0x7a5   : > { %v3781_v20 = vsel %vm1745_vm15, %v10638_v47, %v3774_v0  ;;  %v807_v47 = vld [vmem:[%s9177_s2 + $0x28] sm:$0xff]  ;;  %v3980_v18 = vsel %vm1576_vm14, %v3974_v19, %v3975_v29 }
 0x7a6   : > { %v4084_v23 = vadd.f32 %v9304_v46, %v4075_v25  ;;  %v4087_v17 = vadd.f32 %v9304_v46, %v4078_v27 }
 0x7a8   : > { %v3811_v36 = vpop.permute.xlu0 %3810  ;;  %v3901_v6 = vpop.permute.xlu1 %3900  ;;  %v4092_v49 = vmax.f32 %v4084_v23, 0.0  ;;  %v4095_v54 = vmax.f32 %v4087_v17, 0.0  ;;  %v10641_v17 = vld [vmem:[#allocation25_spill] sm:$0xff] }
 0x7a9   : > { %v3869_v51 = vpop.permute.xlu2 %3868  ;;  %v3830_v12 = vrot.slane %v3811_v36, 7  ;;  %v10643_v36 = vld [vmem:[#allocation41_spill] sm:$0xff] }
 0x7aa   : > { %v4110_v34 = vpack.c.bf16 %v4093_v44, %v4092_v49  ;;  %v4111_v7 = vpack.c.bf16 %v4095_v54, %v4094_v33  ;;  %v3694_v44 = vmul.f32 %v3686_v37, %v10641_v17  ;;  %v3790_v33 = vmul.f32 %v3781_v20, %v10642_v13  ;;  %v10646_v13 = vld [vmem:[#allocation44_spill] sm:$0xff] }
 0x7ab   : > { %v3836_v55 = vsel %vm1576_vm14, %v3830_v12, %v3831_v2  ;;  %v3837_v25 = vsel %vm1576_vm14, %v10640_v58, %v3830_v12  ;;  %v3791_v4 = vmul.f32 %v3780_v62, %v10643_v36  ;;  %v3743_v49 = vadd.f32 %v3735_v35, %v3695_v14  ;;  %v806_v12 = vld [vmem:[%s9177_s2 + $0x20] sm:$0xff] }
 0x7ac   : > { %5864 = vmatmul.msk.bf16.vlgmr.msra.gmra.mxu3 %vm821_vm0, %v4110_v34  ;;  %v3919_v54 = vrot.slane %v3901_v6, 1  ;;  %v3742_v0 = vadd.f32 %v3734_v1, %v3694_v44  ;;  %v10644_v34 = vld [vmem:[#allocation33_spill] sm:$0xff]  ;;  %v3846_v38 = vmul.f32 %v3837_v25, %v10645_v24  ;;  %v4106_v17 = vpack.c.bf16 %v807_v47, %v806_v12  ;;  %v10647_v36 = vld [vmem:[#allocation74_spill] sm:$0xff]  ;;  %v10649_v24 = vld [vmem:[#allocation47_spill] sm:$0xff] }
 0x7ad   : > { %v3847_v32 = vmul.f32 %v3836_v55, %v10644_v34  ;;  %v3799_v58 = vadd.f32 %v3791_v4, %v3743_v49  ;;  %v4048_v1 = vrot.slane %v3669_v52, 1  ;;  %v3990_v4 = vmul.f32 %v3980_v18, %v10647_v36  ;;  %v10648_v34 = vld [vmem:[#allocation39_spill] sm:$0xff]  ;;  %v10651_v18 = vld [vmem:[#allocation46_spill] sm:$0xff] }
 0x7ae   : > { %v3798_v37 = vadd.f32 %v3790_v33, %v3742_v0  ;;  %v3924_v6 = vsel %vm1745_vm15, %v3918_v30, %v3919_v54  ;;  %v9382_v30 = vpop.f32.mrf.mxu2 }
 0x7af   : > { %v3855_v20 = vadd.f32 %v3847_v32, %v3799_v58  ;;  %v3934_v33 = vmul.f32 %v3924_v6, %v10646_v13  ;;  %v4051_v21 = vsel %vm1745_vm15, %v4047_v16, %v4048_v1  ;;  %v4049_v19 = vrot.slane %v9382_v30, 1  ;;  %v808_v13 = vld [vmem:[%s9177_s2 + $0x30] sm:$0xff]  ;;  %v10668_v30 = vld [vmem:[#allocation55_spill] sm:$0xff] }
 0x7b0   : > { %v9355_v27 = vpop.permute.xlu0 %3902  ;;  %v9357_v23 = vpop.permute.xlu1 %3958  ;;  %v3854_v62 = vadd.f32 %v3846_v38, %v3798_v37  ;;  %5878 = vmatmul.msk.bf16.gmra.mxu0 %vm3091_vm1, %v4106_v17  ;;  %v4062_v56 = vmul.f32 %v4051_v21, %v10584_v5 }
 0x7b1   : > { %v3920_v40 = vrot.slane %v9355_v27, 1  ;;  %v3759_v3 = vpop.permute.xlu2 %3758  ;;  %v3976_v28 = vrot.slane %v9357_v23, 7  ;;  %v3887_v49 = vadd.f32 %v3869_v51, %v3855_v20  ;;  %v4050_v47 = vsel %vm1745_vm15, %v4048_v1, %v4049_v19  ;;  %v10664_v23 = vld [vmem:[#allocation71_spill] sm:$0xff] }
 0x7b2   : > { %v3776_v58 = vrot.slane %v3759_v3, 1 }
 0x7b3   : > { %v3923_v35 = vsel %vm1745_vm15, %v3919_v54, %v3920_v40  ;;  %v3979_v54 = vsel %vm1576_vm14, %v3975_v29, %v3976_v28 }
 0x7b4   : > { %v3935_v25 = vmul.f32 %v3923_v35, %v10578_v11  ;;  %v3679_v11 = vrot.slane %v8981_v45, 7  ;;  %v3991_v38 = vmul.f32 %v3979_v54, %v10649_v24  ;;  %v10650_v35 = vld [vmem:[#allocation42_spill] sm:$0xff]  ;;  %v3779_v3 = vsel %vm1745_vm15, %v3775_v39, %v3776_v58 }
 0x7b5   : > { %v4063_v20 = vmul.f32 %v4050_v47, %v10650_v35  ;;  %v3778_v39 = vsel %vm1745_vm15, %v3776_v58, %v3777_v8  ;;  %v10656_v24 = vld [vmem:[#allocation54_spill] sm:$0xff] }
 0x7b6   : > { %v3943_v32 = vadd.f32 %v3935_v25, %v3887_v49  ;;  %v3684_v45 = vsel %vm1576_vm14, %v3678_v50, %v3679_v11  ;;  %v10654_v49 = vld [vmem:[#allocation56_spill] sm:$0xff]  ;;  %v3793_v61 = vmul.f32 %v3778_v39, %v10656_v24  ;;  %v10666_v39 = vld [vmem:[#allocation70_spill] sm:$0xff] }
 0x7b7   : > { %v3696_v42 = vmul.f32 %v3684_v45, %v10651_v18 }
 0x7b8   : > { %v3867_v14 = vpop.permute.xlu0 %3866  ;;  %v4013_v55 = vpop.permute.xlu1 %4012  ;;  %v3999_v5 = vadd.f32 %v3991_v38, %v3943_v32 }
 0x7b9   : > { %v3886_v44 = vadd.f32 %v3867_v14, %v3854_v62  ;;  %v4030_v51 = vmul.f32 %v4013_v55, %v10648_v34  ;;  %v3815_v12 = vpop.permute.xlu2 %3814  ;;  %v10652_v55 = vrot.slane %v8989_v26, 7  ;;  %v10653_v26 = vld [vmem:[#allocation52_spill] sm:$0xff] }
 0x7ba   : > { %v3832_v50 = vrot.slane %v3815_v12, 7  ;;  %v3792_v36 = vmul.f32 %v3779_v3, %v10653_v26  ;;  %v10657_v12 = vld [vmem:[#allocation73_spill] sm:$0xff] }
 0x7bb   : > { %v3942_v52 = vadd.f32 %v3934_v33, %v3886_v44  ;;  %v809_v33 = vld [vmem:[%s9177_s2 + $0x38] sm:$0xff] }
 0x7bc   : > { %5865 = vmatmul.msk.bf16.gmra.mxu3 %vm821_vm0, %v4111_v7  ;;  %v4107_v54 = vpack.c.bf16 %v809_v33, %v808_v13  ;;  %v3834_v8 = vsel %vm1576_vm14, %v3832_v50, %v3833_v59 }
 0x7bd   : > { %v3998_v0 = vadd.f32 %v3990_v4, %v3942_v52 }
 0x7bf   : > { %v4038_v16 = vadd.f32 %v4030_v51, %v3998_v0  ;;  %v10655_v51 = vld [vmem:[#allocation60_spill] sm:$0xff] }
 0x7c0   : > { %v4015_v29 = vpop.permute.xlu0 %4014  ;;  %v3717_v7 = vpop.permute.xlu1 %3716  ;;  %5879 = vmatmul.msk.bf16.gmra.mxu0 %vm3091_vm1, %v4107_v54 }
 0x7c1   : > { %v4070_v37 = vadd.f32 %v4062_v56, %v4038_v16  ;;  %v4031_v17 = vmul.f32 %v4015_v29, %v10582_v31  ;;  %v3736_v6 = vmul.f32 %v3717_v7, %v10591_v41  ;;  %v3683_v31 = vsel %vm1576_vm14, %v3679_v11, %v10652_v55  ;;  %v3871_v34 = vpop.permute.xlu2 %3870  ;;  %v10658_v7 = vld [vmem:[#allocation48_spill] sm:$0xff] }
 0x7c2   : > { %v3697_v52 = vmul.f32 %v3683_v31, %v10654_v49  ;;  %v3835_v11 = vsel %vm1576_vm14, %v3831_v2, %v3832_v50  ;;  %v3849_v58 = vmul.f32 %v3834_v8, %v10658_v7  ;;  %v10662_v31 = vld [vmem:[#allocation37_spill] sm:$0xff]  ;;  %v10667_v49 = vld [vmem:[#allocation72_spill] sm:$0xff] }
 0x7c3   : > { %v4079_v62 = vmul.f32 %v9289_v48, %v4070_v37  ;;  %v4039_v1 = vadd.f32 %v4031_v17, %v3999_v5  ;;  %v3744_v41 = vadd.f32 %v3736_v6, %v3696_v42  ;;  %v3848_v47 = vmul.f32 %v3835_v11, %v10657_v12  ;;  %v10659_v17 = vld [vmem:[#allocation57_spill] sm:$0xff] }
 0x7c4   : > { %v10661_v42 = vld [vmem:[#allocation65_spill] sm:$0xff] }
 0x7c5   : > { %v4071_v14 = vadd.f32 %v4063_v20, %v4039_v1  ;;  %v4088_v25 = vadd.f32 %v9304_v46, %v4079_v62  ;;  %v3800_v56 = vadd.f32 %v3792_v36, %v3744_v41  ;;  %v10660_v62 = vld [vmem:[#allocation64_spill] sm:$0xff]  ;;  %v4042_v3 = vrot.slane %v10661_v42, 1 }
 0x7c7   : > { %v4080_v44 = vmul.f32 %v9289_v48, %v4071_v14  ;;  %v4096_v38 = vmax.f32 %v4088_v25, 0.0  ;;  %v3856_v59 = vadd.f32 %v3848_v47, %v3800_v56  ;;  %v10663_v25 = vld [vmem:[#allocation69_spill] sm:$0xff]  ;;  %v4057_v13 = vsel %vm1745_vm15, %v4049_v19, %v4042_v3  ;;  %v9491_v56 = vld [vmem:[%s10004_s23 + $0x8] sm:$0xff] }
 0x7c8   : > { %v3719_v4 = vpop.permute.xlu0 %3718  ;;  %v3905_v21 = vpop.permute.xlu1 %3904  ;;  %v4064_v26 = vmul.f32 %v4057_v13, %v10666_v39  ;;  %v9494_v24 = vperm.slane %v9491_v56, 0 }
 0x7c9   : > { %v4089_v0 = vadd.f32 %v9304_v46, %v4080_v44  ;;  %v3737_v22 = vmul.f32 %v3719_v4, %v10655_v51  ;;  %v3921_v32 = vrot.slane %v3905_v21, 1  ;;  %v3888_v18 = vadd.f32 %v3871_v34, %v3856_v59  ;;  %v4017_v50 = vpop.permute.xlu2 %4016 }
 0x7ca   : > { %v4032_v33 = vmul.f32 %v4017_v50, %v10664_v23 }
 0x7cb   : > { %v4097_v16 = vmax.f32 %v4089_v0, 0.0  ;;  %v3745_v2 = vadd.f32 %v3737_v22, %v3697_v52  ;;  %v3922_v29 = vsel %vm1745_vm15, %v3920_v40, %v3921_v32  ;;  %v3929_v37 = vsel %vm1745_vm15, %v3921_v32, %v3914_v60 }
 0x7cc   : > { %v3936_v6 = vmul.f32 %v3922_v29, %v10659_v17  ;;  %v3937_v40 = vmul.f32 %v3929_v37, %v10660_v62 }
 0x7cd   : > { %v4112_v45 = vpack.c.bf16 %v4097_v16, %v4096_v38  ;;  %v3801_v10 = vadd.f32 %v3793_v61, %v3745_v2 }
 0x7ce   : > { %v3944_v55 = vadd.f32 %v3936_v6, %v3888_v18 }
 0x7cf   : > { %5866 = vmatmul.msk.bf16.gmra.mxu3 %vm821_vm0, %v4112_v45  ;;  %v3857_v5 = vadd.f32 %v3849_v58, %v3801_v10 }
 0x7d0   : > { %v3961_v35 = vpop.permute.xlu0 %3960  ;;  %v3873_v27 = vpop.permute.xlu1 %3872 }
 0x7d1   : > { %v3977_v20 = vrot.slane %v3961_v35, 7  ;;  %v3889_v1 = vadd.f32 %v3873_v27, %v3857_v5 }
 0x7d3   : > { %v3978_v43 = vsel %vm1576_vm14, %v3976_v28, %v3977_v20  ;;  %v3985_v60 = vsel %vm1576_vm14, %v3977_v20, %v3970_v57  ;;  %v3945_v14 = vadd.f32 %v3937_v40, %v3889_v1  ;;  %v4056_v57 = vsel %vm1745_vm15, %v4042_v3, %v10665_v53 }
 0x7d4   : > { %v3992_v41 = vmul.f32 %v3978_v43, %v10662_v31  ;;  %v3993_v44 = vmul.f32 %v3985_v60, %v10663_v25  ;;  %v4065_v54 = vmul.f32 %v4056_v57, %v10668_v30 }
 0x7d6   : > { %v4000_v63 = vadd.f32 %v3992_v41, %v3944_v55  ;;  %v4001_v28 = vadd.f32 %v3993_v44, %v3945_v14 }
 0x7d8   : > { %v4040_v36 = vadd.f32 %v4032_v33, %v4000_v63  ;;  %v4003_v4 = vpop.permute.xlu0 %4002 }
 0x7d9   : > { %v4033_v52 = vmul.f32 %v4003_v4, %v10667_v49 }
 0x7da   : > { %v4072_v21 = vadd.f32 %v4064_v26, %v4040_v36 }
 0x7db   : > { %v4041_v11 = vadd.f32 %v4033_v52, %v4001_v28 }
 0x7dc   : > { %v4081_v19 = vmul.f32 %v9289_v48, %v4072_v21 }
 0x7dd   : > { %v4073_v0 = vadd.f32 %v4065_v54, %v4041_v11 }
 0x7de   : > { %v4090_v9 = vadd.f32 %v9304_v46, %v4081_v19 }
 0x7df   : > { %v4082_v34 = vmul.f32 %v9289_v48, %v4073_v0 }
 0x7e0   : > { %v4098_v22 = vmax.f32 %v4090_v9, 0.0 }
 0x7e1   : > { %v4091_v15 = vadd.f32 %v9304_v46, %v4082_v34  ;;  %v5994_v46 = vld [vmem:[%s9998_s17] sm:$0xff] }
 0x7e2   : > { %4335 = vmatpush.bf16.msra.mxu1 %v5994_v46 }
 0x7e3   : > { %v4099_v51 = vmax.f32 %v4091_v15, 0.0 }
 0x7e5   : > { %v4113_v32 = vpack.c.bf16 %v4099_v51, %v4098_v22 }
 0x7e7   : > { %5867 = vmatmul.msk.bf16.gmra.mxu3 %vm821_vm0, %v4113_v32 }
 0x802   : > { %v4194_v8 = vpop.f32.mrf.mxu0 }
 0x80a   : > { %v4196_v16 = vpop.f32.mrf.mxu0 }
 0x81d   : > { %v4199_v58 = vpop.f32.mrf.mxu0 }
 0x825   : > { %v4201_v1 = vpop.f32.mrf.mxu0 }
 0x82d   : > { %v4204_v33 = vpop.f32.mrf.mxu0 }
 0x82f   : > { %v4141_v61 = vpop.f32.mrf.mxu3 }
 0x830   : > { %v4195_v48 = vadd.f32 %v4194_v8, %v4141_v61 }
 0x832   : > { %v4215_v38 = vadd.f32 %v9494_v24, %v4195_v48 }
 0x834   : > { %v4223_v2 = vmul.f32 %v4215_v38, %v4215_v38 }
 0x835   : > { %v4206_v54 = vpop.f32.mrf.mxu0 }
 0x836   : > { %v4231_v12 = vmul.f32 %v4223_v2, %v4215_v38 }
 0x837   : > { %v4143_v47 = vpop.f32.mrf.mxu3 }
 0x838   : > { %v4239_v29 = vmul.f32 0.044715, %v4231_v12  ;;  %v4197_v45 = vadd.f32 %v4196_v16, %v4143_v47 }
 0x83a   : > { %v4247_v10 = vadd.f32 %v4239_v29, %v4215_v38  ;;  %v4216_v7 = vadd.f32 %v9494_v24, %v4197_v45 }
 0x83c   : > { %v4255_v59 = vmul.f32 0.7978846, %v4247_v10  ;;  %v4224_v37 = vmul.f32 %v4216_v7, %v4216_v7 }
 0x83d   : > { %v4209_v45 = vpop.f32.mrf.mxu0 }
 0x83e   : > { %v4232_v5 = vmul.f32 %v4224_v37, %v4216_v7  ;;  %6141 = vtanh.f32 %v4255_v59 }
 0x83f   : > { %v4146_v17 = vpop.f32.mrf.mxu3 }
 0x840   : > { %v4240_v6 = vmul.f32 0.044715, %v4232_v5  ;;  %v4200_v35 = vadd.f32 %v4199_v58, %v4146_v17 }
 0x842   : > { %v4248_v27 = vadd.f32 %v4240_v6, %v4216_v7  ;;  %v4217_v20 = vadd.f32 %v9494_v24, %v4200_v35 }
 0x844   : > { %v4256_v62 = vmul.f32 0.7978846, %v4248_v27  ;;  %v4225_v40 = vmul.f32 %v4217_v20, %v4217_v20  ;;  %v6142_v18 = vpop.eup %6141 }
 0x845   : > { %v4271_v60 = vadd.f32 1.0, %v6142_v18  ;;  %v4211_v35 = vpop.f32.mrf.mxu0 }
 0x846   : > { %6143 = vtanh.f32 %v4256_v62  ;;  %v4233_v42 = vmul.f32 %v4225_v40, %v4217_v20 }
 0x847   : > { %v4148_v3 = vpop.f32.mrf.mxu3  ;;  %v4279_v44 = vmul.f32 0.5, %v4271_v60 }
 0x848   : > { %v4241_v50 = vmul.f32 0.044715, %v4233_v42  ;;  %v4202_v43 = vadd.f32 %v4201_v1, %v4148_v3 }
 0x849   : > { %v4287_v53 = vmul.f32 %v4279_v44, %v4215_v38 }
 0x84a   : > { %v4249_v14 = vadd.f32 %v4241_v50, %v4217_v20  ;;  %v4218_v55 = vadd.f32 %v9494_v24, %v4202_v43 }
 0x84c   : > { %v6144_v31 = vpop.eup %6143  ;;  %v4257_v41 = vmul.f32 0.7978846, %v4249_v14  ;;  %v4226_v25 = vmul.f32 %v4218_v55, %v4218_v55 }
 0x84d   : > { %v4272_v13 = vadd.f32 1.0, %v6144_v31 }
 0x84e   : > { %v4234_v23 = vmul.f32 %v4226_v25, %v4218_v55  ;;  %6145 = vtanh.f32 %v4257_v41 }
 0x84f   : > { %v4280_v63 = vmul.f32 0.5, %v4272_v13 }
 0x850   : > { %v4242_v28 = vmul.f32 0.044715, %v4234_v23 }
 0x851   : > { %v4288_v57 = vmul.f32 %v4280_v63, %v4216_v7 }
 0x852   : > { %v4250_v39 = vadd.f32 %v4242_v28, %v4218_v55  ;;  %v4151_v26 = vpop.f32.mrf.mxu3 }
 0x853   : > { %v4299_v36 = vpack.c.bf16 %v4288_v57, %v4287_v53  ;;  %v4205_v4 = vadd.f32 %v4204_v33, %v4151_v26 }
 0x854   : > { %v4258_v49 = vmul.f32 0.7978846, %v4250_v39  ;;  %v6146_v21 = vpop.eup %6145 }
 0x855   : > { %v4219_v52 = vadd.f32 %v9494_v24, %v4205_v4  ;;  %5888 = vmatmul.msk.bf16.vlgmr.msra.gmra.mxu1 %vm3091_vm1, %v4299_v36  ;;  %v4273_v19 = vadd.f32 1.0, %v6146_v21  ;;  %v4303_v36 = vperm.slane %v9491_v56, 1 }
 0x856   : > { %6147 = vtanh.f32 %v4258_v49 }
 0x857   : > { %v4227_v30 = vmul.f32 %v4219_v52, %v4219_v52  ;;  %v4281_v8 = vmul.f32 0.5, %v4273_v19 }
 0x859   : > { %v4235_v11 = vmul.f32 %v4227_v30, %v4219_v52  ;;  %v4289_v16 = vmul.f32 %v4281_v8, %v4217_v20 }
 0x85a   : > { %v4153_v0 = vpop.f32.mrf.mxu3 }
 0x85b   : > { %v4243_v34 = vmul.f32 0.044715, %v4235_v11  ;;  %v4207_v9 = vadd.f32 %v4206_v54, %v4153_v0 }
 0x85c   : > { %v6148_v15 = vpop.eup %6147 }
 0x85d   : > { %v4251_v51 = vadd.f32 %v4243_v34, %v4219_v52  ;;  %v4220_v22 = vadd.f32 %v9494_v24, %v4207_v9  ;;  %v4274_v32 = vadd.f32 1.0, %v6148_v15 }
 0x85f   : > { %v4259_v61 = vmul.f32 0.7978846, %v4251_v51  ;;  %v4228_v48 = vmul.f32 %v4220_v22, %v4220_v22  ;;  %v4282_v46 = vmul.f32 0.5, %v4274_v32 }
 0x861   : > { %v4236_v38 = vmul.f32 %v4228_v48, %v4220_v22  ;;  %v4290_v2 = vmul.f32 %v4282_v46, %v4218_v55  ;;  %6149 = vtanh.f32 %v4259_v61 }
 0x863   : > { %v4244_v12 = vmul.f32 0.044715, %v4236_v38  ;;  %v4300_v47 = vpack.c.bf16 %v4290_v2, %v4289_v16  ;;  %v6299_v2 = vmov 32.0  }
 0x865   : > { %v4252_v29 = vadd.f32 %v4244_v12, %v4220_v22  ;;  %5889 = vmatmul.msk.bf16.gmra.mxu1 %vm3091_vm1, %v4300_v47 }
 0x867   : > { %v4260_v10 = vmul.f32 0.7978846, %v4252_v29  ;;  %v6150_v7 = vpop.eup %6149 }
 0x868   : > { %v4275_v37 = vadd.f32 1.0, %v6150_v7 }
 0x869   : > { %6151 = vtanh.f32 %v4260_v10 }
 0x86a   : > { %v4156_v58 = vpop.f32.mrf.mxu3  ;;  %v4283_v20 = vmul.f32 0.5, %v4275_v37 }
 0x86b   : > { %v4210_v59 = vadd.f32 %v4209_v45, %v4156_v58 }
 0x86c   : > { %v4291_v3 = vmul.f32 %v4283_v20, %v4219_v52 }
 0x86d   : > { %v4221_v5 = vadd.f32 %v9494_v24, %v4210_v59 }
 0x86f   : > { %v6152_v17 = vpop.eup %6151  ;;  %v4229_v6 = vmul.f32 %v4221_v5, %v4221_v5 }
 0x870   : > { %v4276_v27 = vadd.f32 1.0, %v6152_v17 }
 0x871   : > { %v4237_v62 = vmul.f32 %v4229_v6, %v4221_v5 }
 0x872   : > { %v4158_v40 = vpop.f32.mrf.mxu3  ;;  %v4284_v1 = vmul.f32 0.5, %v4276_v27 }
 0x873   : > { %v4245_v18 = vmul.f32 0.044715, %v4237_v62  ;;  %v4212_v42 = vadd.f32 %v4211_v35, %v4158_v40 }
 0x874   : > { %v4292_v50 = vmul.f32 %v4284_v1, %v4220_v22 }
 0x875   : > { %v4253_v43 = vadd.f32 %v4245_v18, %v4221_v5  ;;  %v4222_v60 = vadd.f32 %v9494_v24, %v4212_v42 }
 0x876   : > { %v4301_v14 = vpack.c.bf16 %v4292_v50, %v4291_v3 }
 0x877   : > { %v4261_v55 = vmul.f32 0.7978846, %v4253_v43  ;;  %v4230_v31 = vmul.f32 %v4222_v60, %v4222_v60 }
 0x878   : > { %5890 = vmatmul.msk.bf16.gmra.mxu1 %vm3091_vm1, %v4301_v14 }
 0x879   : > { %v4238_v41 = vmul.f32 %v4230_v31, %v4222_v60  ;;  %6153 = vtanh.f32 %v4261_v55 }
 0x87b   : > { %v4246_v25 = vmul.f32 0.044715, %v4238_v41 }
 0x87d   : > { %v4254_v44 = vadd.f32 %v4246_v25, %v4222_v60 }
 0x87f   : > { %v4262_v13 = vmul.f32 0.7978846, %v4254_v44  ;;  %v6154_v23 = vpop.eup %6153 }
 0x880   : > { %v4277_v33 = vadd.f32 1.0, %v6154_v23 }
 0x881   : > { %6155 = vtanh.f32 %v4262_v13 }
 0x882   : > { %v4285_v53 = vmul.f32 0.5, %v4277_v33  ;;  %6157 = vrcp.f32 %v6299_v2 }
 0x884   : > { %v4293_v39 = vmul.f32 %v4285_v53, %v4221_v5 }
 0x887   : > { %v6156_v63 = vpop.eup %6155 }
 0x888   : > { %v4278_v28 = vadd.f32 1.0, %v6156_v63  ;;  %v6158_v12 = vpop.eup %6157 }
 0x889   : > { %v4382_v47 = vmul.f32 32.0, %v6158_v12  ;;  %vm4386_vm2 = vweird.f32 %v6158_v12 }
 0x88a   : > { %v4286_v57 = vmul.f32 0.5, %v4278_v28 }
 0x88b   : > { %v4383_v29 = vsub.f32 1.0, %v4382_v47 }
 0x88c   : > { %v4294_v26 = vmul.f32 %v4286_v57, %v4222_v60 }
 0x88d   : > { %v4384_v45 = vmul.f32 %v6158_v12, %v4383_v29 }
 0x88e   : > { %v4302_v24 = vpack.c.bf16 %v4294_v26, %v4293_v39 }
 0x88f   : > { %v4385_v10 = vadd.f32 %v6158_v12, %v4384_v45 }
 0x890   : > { %5891 = vmatmul.msk.bf16.gmra.mxu1 %vm3091_vm1, %v4302_v24 }
 0x891   : > { %v9540_v7 = vsel %vm4386_vm2, %v6158_v12, %v4385_v10 }
 0x8d2   : > { %v4337_v4 = vpop.f32.mrf.mxu1 }
 0x8d3   : > { %v9512_v49 = vadd.f32 %v4337_v4, %v4303_v36 }
 0x8d5   : > { %v4357_v52 = vsel %vm3091_vm1, %v9512_v49, 0.0 }
 0x8d6   : > { %4358 = vadd.xlane.f32.xlu1 %v4357_v52 }
 0x8da   : > { %v4339_v21 = vpop.f32.mrf.mxu1 }
 0x8db   : > { %v9516_v30 = vadd.f32 %v4339_v21, %v4303_v36 }
 0x8dd   : > { %v4360_v54 = vsel %vm3091_vm1, %v9516_v30, 0.0 }
 0x8de   : > { %4361 = vadd.xlane.f32.xlu0 %v4360_v54  ;;  %v5997_v54 = vld [vmem:[%s9999_s18 + $0x8] sm:$0xff] }
 0x8df   : > { %4597 = vmatpush.bf16.msra.mxu2 %v5997_v54 }
 0x8e2   : > { %v4342_v11 = vpop.f32.mrf.mxu1 }
 0x8e3   : > { %v9520_v19 = vadd.f32 %v4342_v11, %v4303_v36 }
 0x8e5   : > { %v4363_v0 = vsel %vm3091_vm1, %v9520_v19, 0.0 }
 0x8e6   : > { %4364 = vadd.xlane.f32.xlu2 %v4363_v0 }
 0x8ea   : > { %v4344_v34 = vpop.f32.mrf.mxu1 }
 0x8eb   : > { %v9524_v9 = vadd.f32 %v4344_v34, %v4303_v36 }
 0x8ed   : > { %v4366_v15 = vsel %vm3091_vm1, %v9524_v9, 0.0 }
 0x8ee   : > { %4367 = vadd.xlane.f32.xlu1 %v4366_v15  ;;  %v5996_v15 = vld [vmem:[%s9999_s18] sm:$0xff] }
 0x8ef   : > { %4598 = vmatpush.bf16.msra.mxu2 %v5996_v15 }
 0x8f5   : > { %v4347_v51 = vpop.f32.mrf.mxu1 }
 0x8f6   : > { %v9528_v22 = vadd.f32 %v4347_v51, %v4303_v36 }
 0x8f8   : > { %v4369_v32 = vsel %vm3091_vm1, %v9528_v22, 0.0 }
 0x8f9   : > { %4370 = vadd.xlane.f32.xlu2 %v4369_v32 }
 0x8fd   : > { %v4349_v8 = vpop.f32.mrf.mxu1 }
 0x8fe   : > { %v9532_v61 = vadd.f32 %v4349_v8, %v4303_v36 }
 0x900   : > { %v4372_v48 = vsel %vm3091_vm1, %v9532_v61, 0.0 }
 0x901   : > { %4373 = vadd.xlane.f32.xlu0 %v4372_v48 }
 0x90d   : > { %v4352_v46 = vpop.f32.mrf.mxu1 }
 0x90e   : > { %v9536_v38 = vadd.f32 %v4352_v46, %v4303_v36 }
 0x910   : > { %v4375_v16 = vsel %vm3091_vm1, %v9536_v38, 0.0 }
 0x911   : > { %4376 = vadd.xlane.f32.xlu0 %v4375_v16 }
 0x915   : > { %v4354_v6 = vpop.f32.mrf.mxu1 }
 0x916   : > { %v9550_v20 = vadd.f32 %v4354_v6, %v4303_v36 }
 0x918   : > { %v4378_v18 = vsel %vm3091_vm1, %v9550_v20, 0.0 }
 0x949   : > { %v4359_v58 = vpop.xlane.xlu1 %4358 }
 0x94a   : > { %v4388_v59 = vmul.f32 %v9540_v7, %v4359_v58 }
 0x94c   : > { %v9544_v37 = vsub.f32 %v9512_v49, %v4388_v59 }
 0x94e   : > { %v4404_v5 = vmul.f32 %v9544_v37, %v9544_v37 }
 0x950   : > { %v4412_v17 = vsel %vm3091_vm1, %v4404_v5, 0.0 }
 0x951   : > { %v4362_v35 = vpop.xlane.xlu0 %4361  ;;  %4413 = vadd.xlane.f32.xlu1 %v4412_v17 }
 0x952   : > { %v4389_v27 = vmul.f32 %v9540_v7, %v4362_v35 }
 0x954   : > { %v9553_v62 = vsub.f32 %v9516_v30, %v4389_v27 }
 0x956   : > { %v4405_v40 = vmul.f32 %v9553_v62, %v9553_v62 }
 0x958   : > { %v4415_v1 = vsel %vm3091_vm1, %v4405_v40, 0.0 }
 0x959   : > { %4416 = vadd.xlane.f32.xlu2 %v4415_v1  ;;  %4379 = vadd.xlane.f32.xlu1 %v4378_v18  ;;  %v4365_v42 = vpop.xlane.xlu2 %4364 }
 0x95a   : > { %v4390_v3 = vmul.f32 %v9540_v7, %v4365_v42 }
 0x95c   : > { %v9562_v50 = vsub.f32 %v9520_v19, %v4390_v3 }
 0x95e   : > { %v4406_v43 = vmul.f32 %v9562_v50, %v9562_v50 }
 0x960   : > { %v4418_v60 = vsel %vm3091_vm1, %v4406_v43, 0.0 }
 0x961   : > { %v4368_v14 = vpop.xlane.xlu1 %4367  ;;  %4419 = vadd.xlane.f32.xlu2 %v4418_v60 }
 0x962   : > { %v4391_v55 = vmul.f32 %v9540_v7, %v4368_v14  ;;  %v9613_v14 = vperm.slane %v9491_v56, 2 }
 0x964   : > { %v9569_v31 = vsub.f32 %v9524_v9, %v4391_v55 }
 0x966   : > { %v4407_v41 = vmul.f32 %v9569_v31, %v9569_v31 }
 0x968   : > { %v4421_v25 = vsel %vm3091_vm1, %v4407_v41, 0.0 }
 0x969   : > { %4422 = vadd.xlane.f32.xlu0 %v4421_v25 }
 0x96c   : > { %v4371_v44 = vpop.xlane.xlu2 %4370 }
 0x96d   : > { %v4392_v13 = vmul.f32 %v9540_v7, %v4371_v44 }
 0x96f   : > { %v9576_v23 = vsub.f32 %v9528_v22, %v4392_v13 }
 0x971   : > { %v4408_v33 = vmul.f32 %v9576_v23, %v9576_v23 }
 0x973   : > { %v4424_v63 = vsel %vm3091_vm1, %v4408_v33, 0.0 }
 0x974   : > { %v4374_v28 = vpop.xlane.xlu0 %4373  ;;  %4425 = vadd.xlane.f32.xlu1 %v4424_v63  ;;  %v9617_v63 = vperm.slane %v9491_v56, 3 }
 0x975   : > { %v4393_v53 = vmul.f32 %v9540_v7, %v4374_v28 }
 0x977   : > { %v9583_v57 = vsub.f32 %v9532_v61, %v4393_v53 }
 0x979   : > { %v4409_v39 = vmul.f32 %v9583_v57, %v9583_v57 }
 0x97b   : > { %v4427_v26 = vsel %vm3091_vm1, %v4409_v39, 0.0 }
 0x97c   : > { %4428 = vadd.xlane.f32.xlu2 %v4427_v26 }
 0x984   : > { %v4377_v24 = vpop.xlane.xlu0 %4376 }
 0x985   : > { %v4394_v36 = vmul.f32 %v9540_v7, %v4377_v24 }
 0x987   : > { %v9590_v4 = vsub.f32 %v9536_v38, %v4394_v36 }
 0x989   : > { %v4410_v52 = vmul.f32 %v9590_v4, %v9590_v4 }
 0x98b   : > { %v4430_v21 = vsel %vm3091_vm1, %v4410_v52, 0.0 }
 0x98c   : > { %4431 = vadd.xlane.f32.xlu0 %v4430_v21 }
 0x9c4   : > { %v4414_v11 = vpop.xlane.xlu1 %4413 }
 0x9c5   : > { %v4436_v0 = vmul.f32 %v4414_v11, %v9540_v7 }
 0x9c7   : > { %v4444_v34 = vadd.f32 1e-05, %v4436_v0 }
 0x9c9   : > { %6159 = vrsqrt.f32 %v4444_v34  ;;  %vm4458_vm5 = vweird.f32 %v4444_v34 }
 0x9cc   : > { %v4380_v51 = vpop.xlane.xlu1 %4379  ;;  %v4417_v32 = vpop.xlane.xlu2 %4416 }
 0x9cd   : > { %v4395_v8 = vmul.f32 %v9540_v7, %v4380_v51  ;;  %v4437_v48 = vmul.f32 %v4417_v32, %v9540_v7 }
 0x9cf   : > { %v6160_v46 = vpop.eup %6159  ;;  %v9605_v16 = vsub.f32 %v9550_v20, %v4395_v8  ;;  %v4445_v2 = vadd.f32 1e-05, %v4437_v48 }
 0x9d0   : > { %v4453_v12 = vmul.f32 %v6160_v46, %v4444_v34  ;;  %vm4459_vm4 = vweird.f32 %v6160_v46 }
 0x9d1   : > { %6161 = vrsqrt.f32 %v4445_v2  ;;  %v4411_v47 = vmul.f32 %v9605_v16, %v9605_v16  ;;  %vm4460_vm6 = vmor %vm4458_vm5, %vm4459_vm4  ;;  %vm4468_vm8 = vweird.f32 %v4445_v2 }
 0x9d2   : > { %v4454_v29 = vmul.f32 %v6160_v46, %v4453_v12 }
 0x9d3   : > { %v4433_v45 = vsel %vm3091_vm1, %v4411_v47, 0.0 }
 0x9d4   : > { %v4455_v10 = vmul.f32 0.5, %v4454_v29  ;;  %4434 = vadd.xlane.f32.xlu1 %v4433_v45  ;;  %v4420_v58 = vpop.xlane.xlu2 %4419 }
 0x9d5   : > { %v4438_v59 = vmul.f32 %v4420_v58, %v9540_v7 }
 0x9d6   : > { %v4456_v5 = vsub.f32 1.5, %v4455_v10 }
 0x9d7   : > { %v6162_v17 = vpop.eup %6161  ;;  %v4446_v6 = vadd.f32 1e-05, %v4438_v59 }
 0x9d8   : > { %v4457_v35 = vmul.f32 %v6160_v46, %v4456_v5  ;;  %v4463_v27 = vmul.f32 %v6162_v17, %v4445_v2  ;;  %vm4469_vm7 = vweird.f32 %v6162_v17 }
 0x9d9   : > { %6163 = vrsqrt.f32 %v4446_v6  ;;  %vm4470_vm9 = vmor %vm4468_vm8, %vm4469_vm7  ;;  %vm4478_vm11 = vweird.f32 %v4446_v6 }
 0x9da   : > { %v4464_v40 = vmul.f32 %v6162_v17, %v4463_v27  ;;  %v4461_v1 = vsel %vm4460_vm6, %v6160_v46, %v4457_v35 }
 0x9db   : > { %v4532_v55 = vmul.f32 %v4461_v1, %v9544_v37 }
 0x9dc   : > { %v4465_v18 = vmul.f32 0.5, %v4464_v40  ;;  %v4423_v42 = vpop.xlane.xlu0 %4422 }
 0x9dd   : > { %v4439_v3 = vmul.f32 %v4423_v42, %v9540_v7  ;;  %v4541_v28 = vmul.f32 %v9613_v14, %v4532_v55 }
 0x9de   : > { %v4466_v43 = vsub.f32 1.5, %v4465_v18 }
 0x9df   : > { %v6164_v60 = vpop.eup %6163  ;;  %v4447_v41 = vadd.f32 1e-05, %v4439_v3  ;;  %v4550_v36 = vadd.f32 %v9617_v63, %v4541_v28 }
 0x9e0   : > { %v4467_v25 = vmul.f32 %v6162_v17, %v4466_v43  ;;  %v4473_v44 = vmul.f32 %v6164_v60, %v4446_v6  ;;  %vm4479_vm10 = vweird.f32 %v6164_v60 }
 0x9e1   : > { %6165 = vrsqrt.f32 %v4447_v41  ;;  %vm4480_vm12 = vmor %vm4478_vm11, %vm4479_vm10  ;;  %vm4488_vm14 = vweird.f32 %v4447_v41 }
 0x9e2   : > { %v4471_v13 = vsel %vm4470_vm9, %v6162_v17, %v4467_v25  ;;  %v4474_v33 = vmul.f32 %v6164_v60, %v4473_v44 }
 0x9e3   : > { %v4533_v53 = vmul.f32 %v4471_v13, %v9553_v62 }
 0x9e4   : > { %v4475_v39 = vmul.f32 0.5, %v4474_v33 }
 0x9e5   : > { %v4542_v26 = vmul.f32 %v9613_v14, %v4533_v53 }
 0x9e6   : > { %v4476_v24 = vsub.f32 1.5, %v4475_v39 }
 0x9e7   : > { %v6166_v37 = vpop.eup %6165  ;;  %v4551_v52 = vadd.f32 %v9617_v63, %v4542_v26  ;;  %v4426_v21 = vpop.xlane.xlu1 %4425 }
 0x9e8   : > { %v4477_v54 = vmul.f32 %v6164_v60, %v4476_v24  ;;  %v4483_v11 = vmul.f32 %v6166_v37, %v4447_v41  ;;  %v4440_v0 = vmul.f32 %v4426_v21, %v9540_v7  ;;  %vm4489_vm13 = vweird.f32 %v6166_v37 }
 0x9e9   : > { %v4562_v34 = vpack.c.bf16 %v4551_v52, %v4550_v36  ;;  %vm4490_vm15 = vmor %vm4488_vm14, %vm4489_vm13 }
 0x9ea   : > { %v4484_v15 = vmul.f32 %v6166_v37, %v4483_v11  ;;  %v4448_v51 = vadd.f32 1e-05, %v4440_v0  ;;  %v4481_v62 = vsel %vm4480_vm12, %v6164_v60, %v4477_v54 }
 0x9eb   : > { %5900 = vmatmul.msk.bf16.vlgmr.msra.gmra.mxu2 %vm3091_vm1, %v4562_v34  ;;  %v4534_v48 = vmul.f32 %v4481_v62, %v9562_v50  ;;  %v5999_v34 = vld [vmem:[%s10000_s19 + $0x8] sm:$0xff] }
 0x9ec   : > { %v4485_v32 = vmul.f32 0.5, %v4484_v15  ;;  %6167 = vrsqrt.f32 %v4448_v51  ;;  %vm4498_vm4 = vweird.f32 %v4448_v51  ;;  %4698 = vmatpush.bf16.msrb.mxu3 %v5999_v34  ;;  %4847 = vmatpush.bf16.msra.mxu0 %v5999_v34 }
 0x9ed   : > { %v4543_v59 = vmul.f32 %v9613_v14, %v4534_v48 }
 0x9ee   : > { %v4486_v8 = vsub.f32 1.5, %v4485_v32 }
 0x9ef   : > { %v4429_v46 = vpop.xlane.xlu2 %4428  ;;  %v4552_v50 = vadd.f32 %v9617_v63, %v4543_v59 }
 0x9f0   : > { %v4487_v2 = vmul.f32 %v6166_v37, %v4486_v8  ;;  %v4441_v12 = vmul.f32 %v4429_v46, %v9540_v7  ;;  %v5998_v46 = vld [vmem:[%s10000_s19] sm:$0xff] }
 0x9f1   : > { %4699 = vmatpush.bf16.msrb.mxu3 %v5998_v46  ;;  %4848 = vmatpush.bf16.msra.mxu0 %v5998_v46 }
 0x9f2   : > { %v6168_v47 = vpop.eup %6167  ;;  %v4491_v29 = vsel %vm4490_vm15, %v6166_v37, %v4487_v2  ;;  %v4449_v45 = vadd.f32 1e-05, %v4441_v12 }
 0x9f3   : > { %v4535_v10 = vmul.f32 %v4491_v29, %v9569_v31  ;;  %v4493_v58 = vmul.f32 %v6168_v47, %v4448_v51  ;;  %vm4499_vm2 = vweird.f32 %v6168_v47 }
 0x9f4   : > { %6169 = vrsqrt.f32 %v4449_v45  ;;  %vm4500_vm5 = vmor %vm4498_vm4, %vm4499_vm2  ;;  %vm4508_vm7 = vweird.f32 %v4449_v45 }
 0x9f5   : > { %v4494_v5 = vmul.f32 %v6168_v47, %v4493_v58  ;;  %v4544_v17 = vmul.f32 %v9613_v14, %v4535_v10 }
 0x9f7   : > { %v4495_v6 = vmul.f32 0.5, %v4494_v5  ;;  %v4553_v35 = vadd.f32 %v9617_v63, %v4544_v17 }
 0x9f9   : > { %v4496_v27 = vsub.f32 1.5, %v4495_v6  ;;  %v4563_v40 = vpack.c.bf16 %v4553_v35, %v4552_v50  ;;  %v4566_v6 = vperm.slane %v9491_v56, 4 }
 0x9fa   : > { %v6170_v1 = vpop.eup %6169 }
 0x9fb   : > { %v4497_v18 = vmul.f32 %v6168_v47, %v4496_v27  ;;  %v4503_v42 = vmul.f32 %v6170_v1, %v4449_v45  ;;  %5901 = vmatmul.msk.bf16.gmra.mxu2 %vm3091_vm1, %v4563_v40  ;;  %vm4509_vm6 = vweird.f32 %v6170_v1 }
 0x9fc   : > { %vm4510_vm8 = vmor %vm4508_vm7, %vm4509_vm6 }
 0x9fd   : > { %v4504_v31 = vmul.f32 %v6170_v1, %v4503_v42  ;;  %v4501_v3 = vsel %vm4500_vm5, %v6168_v47, %v4497_v18 }
 0x9fe   : > { %v4536_v55 = vmul.f32 %v4501_v3, %v9576_v23 }
 0x9ff   : > { %v4505_v43 = vmul.f32 0.5, %v4504_v31  ;;  %v4432_v26 = vpop.xlane.xlu0 %4431 }
 0xa00   : > { %v4545_v13 = vmul.f32 %v9613_v14, %v4536_v55  ;;  %v4442_v23 = vmul.f32 %v4432_v26, %v9540_v7 }
 0xa01   : > { %v4506_v60 = vsub.f32 1.5, %v4505_v43 }
 0xa02   : > { %v4554_v28 = vadd.f32 %v9617_v63, %v4545_v13  ;;  %v4450_v24 = vadd.f32 1e-05, %v4442_v23 }
 0xa03   : > { %v4507_v41 = vmul.f32 %v6170_v1, %v4506_v60 }
 0xa04   : > { %6171 = vrsqrt.f32 %v4450_v24  ;;  %vm4518_vm10 = vweird.f32 %v4450_v24 }
 0xa05   : > { %v4511_v25 = vsel %vm4510_vm8, %v6170_v1, %v4507_v41 }
 0xa06   : > { %v4537_v44 = vmul.f32 %v4511_v25, %v9583_v57 }
 0xa08   : > { %v4546_v33 = vmul.f32 %v9613_v14, %v4537_v44 }
 0xa0a   : > { %v4555_v53 = vadd.f32 %v9617_v63, %v4546_v33  ;;  %v6172_v37 = vpop.eup %6171 }
 0xa0b   : > { %v4513_v36 = vmul.f32 %v6172_v37, %v4450_v24  ;;  %vm4519_vm9 = vweird.f32 %v6172_v37 }
 0xa0c   : > { %v4564_v39 = vpack.c.bf16 %v4555_v53, %v4554_v28  ;;  %vm4520_vm11 = vmor %vm4518_vm10, %vm4519_vm9 }
 0xa0d   : > { %v4514_v52 = vmul.f32 %v6172_v37, %v4513_v36 }
 0xa0e   : > { %5902 = vmatmul.msk.bf16.gmra.mxu2 %vm3091_vm1, %v4564_v39 }
 0xa0f   : > { %v4515_v11 = vmul.f32 0.5, %v4514_v52 }
 0xa11   : > { %v4516_v0 = vsub.f32 1.5, %v4515_v11 }
 0xa13   : > { %v4517_v51 = vmul.f32 %v6172_v37, %v4516_v0 }
 0xa15   : > { %v4521_v8 = vsel %vm4520_vm11, %v6172_v37, %v4517_v51 }
 0xa16   : > { %v4538_v12 = vmul.f32 %v4521_v8, %v9590_v4 }
 0xa18   : > { %v4547_v10 = vmul.f32 %v9613_v14, %v4538_v12 }
 0xa1a   : > { %v4556_v59 = vadd.f32 %v9617_v63, %v4547_v10 }
 0xa47   : > { %v4435_v57 = vpop.xlane.xlu1 %4434 }
 0xa48   : > { %v4443_v21 = vmul.f32 %v4435_v57, %v9540_v7 }
 0xa4a   : > { %v4451_v54 = vadd.f32 1e-05, %v4443_v21 }
 0xa4c   : > { %6173 = vrsqrt.f32 %v4451_v54  ;;  %vm4528_vm13 = vweird.f32 %v4451_v54 }
 0xa52   : > { %v6174_v15 = vpop.eup %6173 }
 0xa53   : > { %v4523_v62 = vmul.f32 %v6174_v15, %v4451_v54  ;;  %vm4529_vm12 = vweird.f32 %v6174_v15 }
 0xa54   : > { %vm4530_vm14 = vmor %vm4528_vm13, %vm4529_vm12 }
 0xa55   : > { %v4524_v32 = vmul.f32 %v6174_v15, %v4523_v62 }
 0xa57   : > { %v4525_v48 = vmul.f32 0.5, %v4524_v32 }
 0xa59   : > { %v4526_v2 = vsub.f32 1.5, %v4525_v48 }
 0xa5b   : > { %v4527_v47 = vmul.f32 %v6174_v15, %v4526_v2 }
 0xa5d   : > { %v4531_v29 = vsel %vm4530_vm14, %v6174_v15, %v4527_v47 }
 0xa5e   : > { %v4539_v45 = vmul.f32 %v4531_v29, %v9605_v16 }
 0xa60   : > { %v4548_v58 = vmul.f32 %v9613_v14, %v4539_v45 }
 0xa62   : > { %v4557_v5 = vadd.f32 %v9617_v63, %v4548_v58 }
 0xa64   : > { %v4565_v17 = vpack.c.bf16 %v4557_v5, %v4556_v59 }
 0xa66   : > { %5903 = vmatmul.msk.bf16.gmra.mxu2 %vm3091_vm1, %v4565_v17 }
 0xa6e   : > { %v4600_v4 = vpop.f32.mrf.mxu2 }
 0xa6f   : > { %v4601_v50 = vadd.f32 %v4600_v4, %v4566_v6 }
 0xa71   : > { %v9657_v35 = vmul.f32 %v4601_v50, %v4601_v50 }
 0xa73   : > { %v4628_v16 = vsel %vm3091_vm1, %v9657_v35, 0.0 }
 0xa74   : > { %4629 = vadd.xlane.f32.xlu2 %v4628_v16 }
 0xa76   : > { %v4602_v27 = vpop.f32.mrf.mxu2 }
 0xa77   : > { %v4603_v40 = vadd.f32 %v4602_v27, %v4566_v6 }
 0xa79   : > { %v9661_v14 = vmul.f32 %v4603_v40, %v4603_v40  ;;  %v4664_v1 = vpack.c.bf16 %v4603_v40, %v4601_v50 }
 0xa7b   : > { %5912 = vmatmul.msk.bf16.vlgmr.msrb.gmra.mxu3 %vm3091_vm1, %v4664_v1  ;;  %v4631_v63 = vsel %vm3091_vm1, %v9661_v14, 0.0 }
 0xa7c   : > { %4632 = vadd.xlane.f32.xlu0 %v4631_v63 }
 0xa7e   : > { %v4605_v56 = vpop.f32.mrf.mxu2 }
 0xa7f   : > { %v4606_v18 = vadd.f32 %v4605_v56, %v4566_v6 }
 0xa81   : > { %v9666_v42 = vmul.f32 %v4606_v18, %v4606_v18 }
 0xa83   : > { %v4634_v31 = vsel %vm3091_vm1, %v9666_v42, 0.0 }
 0xa84   : > { %4635 = vadd.xlane.f32.xlu1 %v4634_v31 }
 0xa86   : > { %v4607_v3 = vpop.f32.mrf.mxu2 }
 0xa87   : > { %v4608_v43 = vadd.f32 %v4607_v3, %v4566_v6 }
 0xa89   : > { %v9670_v60 = vmul.f32 %v4608_v43, %v4608_v43  ;;  %v4665_v55 = vpack.c.bf16 %v4608_v43, %v4606_v18 }
 0xa8b   : > { %5913 = vmatmul.msk.bf16.gmra.mxu3 %vm3091_vm1, %v4665_v55  ;;  %v4637_v41 = vsel %vm3091_vm1, %v9670_v60, 0.0 }
 0xa8c   : > { %4638 = vadd.xlane.f32.xlu2 %v4637_v41 }
 0xa91   : > { %v4610_v25 = vpop.f32.mrf.mxu2 }
 0xa92   : > { %v4611_v44 = vadd.f32 %v4610_v25, %v4566_v6 }
 0xa94   : > { %v9675_v13 = vmul.f32 %v4611_v44, %v4611_v44 }
 0xa96   : > { %v4640_v33 = vsel %vm3091_vm1, %v9675_v13, 0.0 }
 0xa97   : > { %4641 = vadd.xlane.f32.xlu0 %v4640_v33 }
 0xa99   : > { %v4612_v28 = vpop.f32.mrf.mxu2 }
 0xa9a   : > { %v4613_v53 = vadd.f32 %v4612_v28, %v4566_v6 }
 0xa9c   : > { %v9679_v39 = vmul.f32 %v4613_v53, %v4613_v53  ;;  %v4666_v26 = vpack.c.bf16 %v4613_v53, %v4611_v44 }
 0xa9e   : > { %5914 = vmatmul.msk.bf16.gmra.mxu3 %vm3091_vm1, %v4666_v26  ;;  %v4643_v23 = vsel %vm3091_vm1, %v9679_v39, 0.0 }
 0xa9f   : > { %4644 = vadd.xlane.f32.xlu1 %v4643_v23 }
 0xaab   : > { %4821 = vrot.lane.b32.xlu0 %v4664_v1, %s10448_s1 }
 0xab8   : > { %4977 = vrot.lane.b32.xlu1 %v4665_v55, %s10349_s3 }
 0xae7   : > { %v4630_v34 = vpop.xlane.xlu2 %4629 }
 0xae8   : > { %v4652_v15 = vmul.f32 0.5, %v4630_v34 }
 0xae9   : > { %v4615_v24 = vpop.f32.mrf.mxu2 }
 0xaea   : > { %v4616_v37 = vadd.f32 %v4615_v24, %v4566_v6 }
 0xaec   : > { %v9686_v36 = vmul.f32 %v4616_v37, %v4616_v37 }
 0xaee   : > { %v4646_v52 = vsel %vm3091_vm1, %v9686_v36, 0.0 }
 0xaef   : > { %4647 = vadd.xlane.f32.xlu2 %v4646_v52  ;;  %v4633_v32 = vpop.xlane.xlu0 %4632 }
 0xaf0   : > { %v4653_v48 = vmul.f32 0.5, %v4633_v32 }
 0xaf1   : > { %v4617_v57 = vpop.f32.mrf.mxu2 }
 0xaf2   : > { %v4618_v21 = vadd.f32 %v4617_v57, %v4566_v6 }
 0xaf4   : > { %v9690_v54 = vmul.f32 %v4618_v21, %v4618_v21  ;;  %v4667_v11 = vpack.c.bf16 %v4618_v21, %v4616_v37 }
 0xaf6   : > { %4981 = vrot.lane.b32.xlu1 %v4667_v11, %s10349_s3  ;;  %5915 = vmatmul.msk.bf16.gmra.mxu3 %vm3091_vm1, %v4667_v11  ;;  %v4649_v0 = vsel %vm3091_vm1, %v9690_v54, 0.0 }
 0xaf7   : > { %4650 = vadd.xlane.f32.xlu0 %v4649_v0  ;;  %v4636_v47 = vpop.xlane.xlu1 %4635 }
 0xaf8   : > { %v4654_v45 = vmul.f32 0.5, %v4636_v47 }
 0xafe   : > { %v4701_v51 = vpop.f32.mrf.mxu3 }
 0xaff   : > { %v4721_v62 = vsub.f32 %v4701_v51, %v4652_v15  ;;  %v4639_v6 = vpop.xlane.xlu2 %4638 }
 0xb00   : > { %v4655_v27 = vmul.f32 0.5, %v4639_v6 }
 0xb01   : > { %v4729_v8 = vmul.f32 1.442695, %v4721_v62 }
 0xb03   : > { %6175 = vpow2.f32 %v4729_v8 }
 0xb06   : > { %v4703_v46 = vpop.f32.mrf.mxu3 }
 0xb07   : > { %v4722_v2 = vsub.f32 %v4703_v46, %v4653_v48  ;;  %4979 = vrot.lane.b32.xlu2 %v4666_v26, %s10349_s3 }
 0xb09   : > { %v4731_v12 = vmul.f32 1.442695, %v4722_v2  ;;  %v6176_v29 = vpop.eup %6175 }
 0xb0a   : > { %v4745_v59 = vmul.f32 0.25, %v6176_v29 }
 0xb0b   : > { %6177 = vpow2.f32 %v4731_v12  ;;  %4975 = vrot.lane.b32.xlu0 %v4664_v1, %s10349_s3  ;;  %v4642_v1 = vpop.xlane.xlu0 %4641 }
 0xb0c   : > { %v4902_v50 = vsel %vm821_vm0, %v4745_v59, 0.0  ;;  %v4656_v25 = vmul.f32 0.5, %v4642_v1 }
 0xb0e   : > { %v4706_v10 = vpop.f32.mrf.mxu3 }
 0xb0f   : > { %v4723_v58 = vsub.f32 %v4706_v10, %v4654_v45  ;;  %4823 = vrot.lane.b32.xlu2 %v4665_v55, %s10448_s1 }
 0xb11   : > { %v6178_v5 = vpop.eup %6177  ;;  %v4733_v17 = vmul.f32 1.442695, %v4723_v58 }
 0xb12   : > { %v4746_v4 = vmul.f32 0.25, %v6178_v5  ;;  %v4645_v23 = vpop.xlane.xlu1 %4644 }
 0xb13   : > { %6179 = vpow2.f32 %v4733_v17  ;;  %4825 = vrot.lane.b32.xlu0 %v4666_v26, %s10448_s1  ;;  %v4657_v37 = vmul.f32 0.5, %v4645_v23 }
 0xb14   : > { %v4903_v16 = vsel %vm821_vm0, %v4746_v4, 0.0  ;;  %v4955_v52 = vpack.c.bf16 %v4746_v4, %v4745_v59 }
 0xb15   : > { %v4904_v40 = vadd.f32 %v4903_v16, %v4902_v50 }
 0xb16   : > { %v4708_v63 = vpop.f32.mrf.mxu3 }
 0xb17   : > { %v4724_v56 = vsub.f32 %v4708_v63, %v4655_v27  ;;  %4827 = vrot.lane.b32.xlu2 %v4667_v11, %s10448_s1 }
 0xb19   : > { %v6180_v18 = vpop.eup %6179  ;;  %v4735_v31 = vmul.f32 1.442695, %v4724_v56 }
 0xb1a   : > { %v4747_v3 = vmul.f32 0.25, %v6180_v18 }
 0xb1b   : > { %6181 = vpow2.f32 %v4735_v31  ;;  %4761 = vrot.lane.b32.xlu0 %v9657_v35, %s10448_s1 }
 0xb1c   : > { %v4905_v43 = vsel %vm821_vm0, %v4747_v3, 0.0 }
 0xb1d   : > { %v4906_v55 = vadd.f32 %v4905_v43, %v4904_v40  ;;  %v4822_v41 = vpop.permute.xlu0 %4821 }
 0xb1e   : > { %5916 = vmatmul.msk.bf16.vlgmr.msra.gmra.mxu0 %vm3091_vm1, %v4822_v41 }
 0xb1f   : > { %4763 = vrot.lane.b32.xlu2 %v9661_v14, %s10448_s1 }
 0xb21   : > { %v6182_v44 = vpop.eup %6181  ;;  %v4711_v33 = vpop.f32.mrf.mxu3 }
 0xb22   : > { %v4748_v28 = vmul.f32 0.25, %v6182_v44  ;;  %v4725_v53 = vsub.f32 %v4711_v33, %v4656_v25 }
 0xb23   : > { %4765 = vrot.lane.b32.xlu0 %v9666_v42, %s10448_s1 }
 0xb24   : > { %v4907_v26 = vsel %vm821_vm0, %v4748_v28, 0.0  ;;  %v4737_v35 = vmul.f32 1.442695, %v4725_v53  ;;  %v4956_v32 = vpack.c.bf16 %v4748_v28, %v4747_v3 }
 0xb25   : > { %v4908_v24 = vadd.f32 %v4907_v26, %v4906_v55 }
 0xb26   : > { %6183 = vpow2.f32 %v4737_v35 }
 0xb27   : > { %4767 = vrot.lane.b32.xlu2 %v9670_v60, %s10448_s1 }
 0xb29   : > { %v4713_v14 = vpop.f32.mrf.mxu3 }
 0xb2a   : > { %v4726_v57 = vsub.f32 %v4713_v14, %v4657_v37 }
 0xb2b   : > { %4769 = vrot.lane.b32.xlu0 %v9675_v13, %s10448_s1  ;;  %4959 = vxpose.xlu1.c.b16.start [1/4] (short) (narrow) %v4955_v52, 16  ;;  %v4978_v13 = vpop.permute.xlu1 %4977 }
 0xb2c   : > { %v6184_v21 = vpop.eup %6183  ;;  %v4739_v11 = vmul.f32 1.442695, %v4726_v57 }
 0xb2d   : > { %v4749_v42 = vmul.f32 0.25, %v6184_v21 }
 0xb2e   : > { %6185 = vpow2.f32 %v4739_v11 }
 0xb2f   : > { %v4909_v0 = vsel %vm821_vm0, %v4749_v42, 0.0  ;;  %4771 = vrot.lane.b32.xlu2 %v9679_v39, %s10448_s1 }
 0xb30   : > { %v4910_v34 = vadd.f32 %v4909_v0, %v4908_v24 }
 0xb34   : > { %v6186_v15 = vpop.eup %6185 }
 0xb35   : > { %v4750_v60 = vmul.f32 0.25, %v6186_v15 }
 0xb37   : > { %v4911_v51 = vsel %vm821_vm0, %v4750_v60, 0.0  ;;  %v4957_v8 = vpack.c.bf16 %v4750_v60, %v4749_v42 }
 0xb38   : > { %v4912_v62 = vadd.f32 %v4911_v51, %v4910_v34 }
 0xb3b   : > { %4960 = vxpose.xlu1.c.b16.cont [2/4] (short) (narrow) %v4956_v32, 16 }
 0xb4b   : > { %4961 = vxpose.xlu1.c.b16.cont [3/4] (short) (narrow) %v4957_v8, 16 }
 0xb62   : > { %v4648_v48 = vpop.xlane.xlu2 %4647 }
 0xb63   : > { %v4658_v47 = vmul.f32 0.5, %v4648_v48 }
 0xb68   : > { %v4982_v46 = vpop.permute.xlu1 %4981 }
 0xb69   : > { %4994 = vmatpush.bf16.msrb.mxu1 %v4982_v46 }
 0xb6a   : > { %v4980_v2 = vpop.permute.xlu2 %4979  ;;  %v4651_v39 = vpop.xlane.xlu0 %4650 }
 0xb6b   : > { %v4659_v5 = vmul.f32 0.5, %v4651_v39 }
 0xb6d   : > { %4995 = vmatpush.bf16.msrb.mxu1 %v4980_v2 }
 0xb71   : > { %4996 = vmatpush.bf16.msrb.mxu1 %v4978_v13 }
 0xb72   : > { %v4824_v12 = vpop.permute.xlu2 %4823 }
 0xb73   : > { %5917 = vmatmul.msk.bf16.gmra.mxu0 %vm3091_vm1, %v4824_v12 }
 0xb79   : > { %v4716_v29 = vpop.f32.mrf.mxu3 }
 0xb7a   : > { %v4727_v45 = vsub.f32 %v4716_v29, %v4658_v47  ;;  %v4828_v10 = vpop.permute.xlu2 %4827 }
 0xb7c   : > { %v4741_v58 = vmul.f32 1.442695, %v4727_v45 }
 0xb7d   : > { %v4976_v59 = vpop.permute.xlu0 %4975 }
 0xb7e   : > { %6187 = vpow2.f32 %v4741_v58  ;;  %4997 = vmatpush.bf16.msrb.mxu1 %v4976_v59 }
 0xb81   : > { %v4718_v17 = vpop.f32.mrf.mxu3 }
 0xb82   : > { %v4728_v6 = vsub.f32 %v4718_v17, %v4659_v5  ;;  %v4764_v4 = vpop.permute.xlu2 %4763 }
 0xb83   : > { %v4788_v50 = vsel %vm3091_vm1, %v4764_v4, 0.0 }
 0xb84   : > { %v6188_v16 = vpop.eup %6187  ;;  %v4743_v27 = vmul.f32 1.442695, %v4728_v6  ;;  %4789 = vadd.xlane.f32.xlu2 %v4788_v50 }
 0xb85   : > { %v4751_v40 = vmul.f32 0.25, %v6188_v16  ;;  %v4826_v1 = vpop.permute.xlu0 %4825 }
 0xb86   : > { %6189 = vpow2.f32 %v4743_v27  ;;  %5918 = vmatmul.msk.bf16.gmra.mxu0 %vm3091_vm1, %v4826_v1 }
 0xb87   : > { %v4913_v63 = vsel %vm821_vm0, %v4751_v40, 0.0 }
 0xb88   : > { %v4914_v56 = vadd.f32 %v4913_v63, %v4912_v62 }
 0xb8a   : > { %v4768_v53 = vpop.permute.xlu2 %4767 }
 0xb8b   : > { %v4794_v37 = vsel %vm3091_vm1, %v4768_v53, 0.0 }
 0xb8c   : > { %v6190_v18 = vpop.eup %6189 }
 0xb8d   : > { %v4752_v31 = vmul.f32 0.25, %v6190_v18  ;;  %v4762_v3 = vpop.permute.xlu0 %4761 }
 0xb8e   : > { %v4785_v43 = vsel %vm3091_vm1, %v4762_v3, 0.0 }
 0xb8f   : > { %v4915_v55 = vsel %vm821_vm0, %v4752_v31, 0.0  ;;  %v4958_v41 = vpack.c.bf16 %v4752_v31, %v4751_v40  ;;  %4786 = vadd.xlane.f32.xlu0 %v4785_v43 }
 0xb90   : > { %v4916_v25 = vadd.f32 %v4915_v55, %v4914_v56 }
 0xb91   : > { %4962 = vxpose.xlu1.c.b16.end [4/4] (short) (narrow) %v4958_v41, 16 }
 0xb92   : > { %v4772_v35 = vpop.permute.xlu2 %4771 }
 0xb93   : > { %v4800_v23 = vsel %vm3091_vm1, %v4772_v35, 0.0 }
 0xb95   : > { %v4766_v44 = vpop.permute.xlu0 %4765 }
 0xb96   : > { %5919 = vmatmul.msk.bf16.gmra.mxu0 %vm3091_vm1, %v4828_v10  ;;  %v4791_v26 = vsel %vm3091_vm1, %v4766_v44, 0.0 }
 0xb9b   : > { %v4850_v24 = vpop.f32.mrf.mxu0 }
 0xb9c   : > { %4775 = vrot.lane.b32.xlu2 %v9690_v54, %s10448_s1  ;;  %v4917_v54 = vrot.slane %v4916_v25, 4 }
 0xb9d   : > { %v4770_v33 = vpop.permute.xlu0 %4769 }
 0xb9e   : > { %v4797_v28 = vsel %vm3091_vm1, %v4770_v33, 0.0  ;;  %v4918_v52 = vadd.f32 %v4917_v54, %v4916_v25 }
 0xba0   : > { %v4919_v57 = vrot.slane %v4918_v52, 2 }
 0xba2   : > { %v4920_v0 = vadd.f32 %v4919_v57, %v4918_v52 }
 0xba3   : > { %4773 = vrot.lane.b32.xlu0 %v9686_v36, %s10448_s1  ;;  %v4852_v21 = vpop.f32.mrf.mxu0 }
 0xba4   : > { %v4921_v60 = vrot.slane %v4920_v0, 1 }
 0xba6   : > { %v9736_v8 = vadd.f32 %v4921_v60, %v4920_v0 }
 0xbc5   : > { %4798 = vadd.xlane.f32.xlu2 %v4797_v28 }
 0xbcd   : > { %4792 = vadd.xlane.f32.xlu0 %v4791_v26 }
 0xbd5   : > { %4801 = vadd.xlane.f32.xlu0 %v4800_v23 }
 0xbf0   : > { %v4855_v17 = vpop.f32.mrf.mxu0 }
 0xbf1   : > { %4795 = vadd.xlane.f32.xlu1 %v4794_v37 }
 0xbf7   : > { %v4790_v36 = vpop.xlane.xlu2 %4789 }
 0xbf8   : > { %v4810_v14 = vmul.f32 0.5, %v4790_v36  ;;  %v4857_v6 = vpop.f32.mrf.mxu0 }
 0xbfa   : > { %v4871_v11 = vsub.f32 %v4852_v21, %v4810_v14 }
 0xbfc   : > { %v4880_v42 = vmul.f32 1.442695, %v4871_v11 }
 0xbfe   : > { %6191 = vpow2.f32 %v4880_v42 }
 0xbff   : > { %v4776_v34 = vpop.permute.xlu2 %4775 }
 0xc00   : > { %v4806_v15 = vsel %vm3091_vm1, %v4776_v34, 0.0 }
 0xc01   : > { %4807 = vadd.xlane.f32.xlu0 %v4806_v15 }
 0xc02   : > { %v4787_v51 = vpop.xlane.xlu0 %4786 }
 0xc03   : > { %v4809_v62 = vmul.f32 0.5, %v4787_v51  ;;  %v4860_v16 = vpop.f32.mrf.mxu0 }
 0xc04   : > { %v6192_v32 = vpop.eup %6191 }
 0xc05   : > { %v9738_v13 = vmul.f32 0.25, %v6192_v32  ;;  %v4870_v48 = vsub.f32 %v4850_v24, %v4809_v62 }
 0xc07   : > { %v4878_v46 = vmul.f32 1.442695, %v4870_v48  ;;  %v4924_v2 = vmul.f32 %v9736_v8, %v9738_v13 }
 0xc09   : > { %6193 = vpow2.f32 %v4878_v46  ;;  %v4934_v12 = vsel %vm821_vm0, %v4924_v2, 0.0 }
 0xc0a   : > { %4935 = vadd.xlane.f32.xlu0 %v4934_v12 }
 0xc0b   : > { %v4862_v26 = vpop.f32.mrf.mxu0 }
 0xc0d   : > { %v4967_v39 = vpop.trf.xlu1 }
 0xc0e   : > { %5920 = vmatmul.msk.bf16.vlgmr.msrb.gmra.mxu1 %vm929_vm3, %v4967_v39 }
 0xc0f   : > { %v6194_v47 = vpop.eup %6193 }
 0xc10   : > { %v9744_v29 = vmul.f32 0.25, %v6194_v47 }
 0xc12   : > { %v5004_v45 = vpack.c.bf16 %v9738_v13, %v9744_v29  ;;  %v4923_v59 = vmul.f32 %v9736_v8, %v9744_v29  ;;  %v6001_v13 = vld [vmem:[%s10001_s20 + $0x8] sm:$0xff] }
 0xc13   : > { %v4865_v36 = vpop.f32.mrf.mxu0  ;;  %5112 = vmatpush.bf16.msrb.mxu2 %v6001_v13 }
 0xc14   : > { %v4931_v5 = vsel %vm821_vm0, %v4923_v59, 0.0 }
 0xc15   : > { %v4774_v10 = vpop.permute.xlu0 %4773 }
 0xc16   : > { %v4803_v58 = vsel %vm3091_vm1, %v4774_v10, 0.0 }
 0xc17   : > { %4804 = vadd.xlane.f32.xlu2 %v4803_v58 }
 0xc1b   : > { %v4867_v34 = vpop.f32.mrf.mxu0 }
 0xc1f   : > { %4932 = vadd.xlane.f32.xlu2 %v4931_v5 }
 0xc38   : > { %v4799_v4 = vpop.xlane.xlu2 %4798 }
 0xc39   : > { %v4813_v50 = vmul.f32 0.5, %v4799_v4 }
 0xc3b   : > { %v4874_v40 = vsub.f32 %v4860_v16, %v4813_v50 }
 0xc3d   : > { %v4886_v56 = vmul.f32 1.442695, %v4874_v40 }
 0xc40   : > { %v4793_v27 = vpop.xlane.xlu0 %4792 }
 0xc41   : > { %v4811_v1 = vmul.f32 0.5, %v4793_v27 }
 0xc43   : > { %v4872_v63 = vsub.f32 %v4855_v17, %v4811_v1 }
 0xc45   : > { %v4882_v18 = vmul.f32 1.442695, %v4872_v63 }
 0xc47   : > { %6195 = vpow2.f32 %v4882_v18 }
 0xc48   : > { %6197 = vpow2.f32 %v4886_v56  ;;  %v4802_v28 = vpop.xlane.xlu0 %4801 }
 0xc49   : > { %v4814_v53 = vmul.f32 0.5, %v4802_v28 }
 0xc4b   : > { %v4875_v23 = vsub.f32 %v4862_v26, %v4814_v53 }
 0xc4d   : > { %v6196_v31 = vpop.eup %6195  ;;  %v4888_v54 = vmul.f32 1.442695, %v4875_v23 }
 0xc4e   : > { %v4896_v3 = vmul.f32 0.25, %v6196_v31  ;;  %v6198_v43 = vpop.eup %6197 }
 0xc4f   : > { %v4898_v41 = vmul.f32 0.25, %v6198_v43 }
 0xc50   : > { %v4925_v55 = vmul.f32 %v9736_v8, %v4896_v3 }
 0xc51   : > { %v4927_v44 = vmul.f32 %v9736_v8, %v4898_v41 }
 0xc52   : > { %v4937_v25 = vsel %vm821_vm0, %v4925_v55, 0.0 }
 0xc53   : > { %4938 = vadd.xlane.f32.xlu2 %v4937_v25  ;;  %v4943_v33 = vsel %vm821_vm0, %v4927_v44, 0.0 }
 0xc5b   : > { %4944 = vadd.xlane.f32.xlu2 %v4943_v33 }
 0xc64   : > { %v4796_v35 = vpop.xlane.xlu1 %4795 }
 0xc65   : > { %v4812_v24 = vmul.f32 0.5, %v4796_v35 }
 0xc67   : > { %v4873_v37 = vsub.f32 %v4857_v6, %v4812_v24 }
 0xc69   : > { %v4884_v52 = vmul.f32 1.442695, %v4873_v37 }
 0xc6b   : > { %6199 = vpow2.f32 %v4884_v52 }
 0xc6c   : > { %6201 = vpow2.f32 %v4888_v54 }
 0xc71   : > { %v6200_v14 = vpop.eup %6199 }
 0xc72   : > { %v4897_v57 = vmul.f32 0.25, %v6200_v14  ;;  %v6202_v21 = vpop.eup %6201 }
 0xc73   : > { %v4899_v15 = vmul.f32 0.25, %v6202_v21 }
 0xc74   : > { %v4808_v11 = vpop.xlane.xlu0 %4807  ;;  %v4926_v42 = vmul.f32 %v9736_v8, %v4897_v57  ;;  %v5005_v40 = vpack.c.bf16 %v4897_v57, %v4896_v3 }
 0xc75   : > { %v4816_v0 = vmul.f32 0.5, %v4808_v11  ;;  %v4928_v32 = vmul.f32 %v9736_v8, %v4899_v15  ;;  %v5006_v1 = vpack.c.bf16 %v4899_v15, %v4898_v41 }
 0xc76   : > { %v4940_v60 = vsel %vm821_vm0, %v4926_v42, 0.0 }
 0xc77   : > { %v4877_v51 = vsub.f32 %v4867_v34, %v4816_v0  ;;  %4941 = vadd.xlane.f32.xlu0 %v4940_v60  ;;  %v4946_v48 = vsel %vm821_vm0, %v4928_v32, 0.0 }
 0xc79   : > { %v4892_v62 = vmul.f32 1.442695, %v4877_v51 }
 0xc7b   : > { %6203 = vpow2.f32 %v4892_v62 }
 0xc7d   : > { %v4936_v29 = vpop.xlane.xlu0 %4935 }
 0xc7e   : > { %v5051_v56 = vadd.f32 1e-08, %v4936_v29 }
 0xc7f   : > { %4947 = vadd.xlane.f32.xlu0 %v4946_v48 }
 0xc81   : > { %v6204_v46 = vpop.eup %6203 }
 0xc82   : > { %v4901_v2 = vmul.f32 0.25, %v6204_v46 }
 0xc84   : > { %v4930_v12 = vmul.f32 %v9736_v8, %v4901_v2 }
 0xc86   : > { %v4952_v39 = vsel %vm821_vm0, %v4930_v12, 0.0 }
 0xc87   : > { %4953 = vadd.xlane.f32.xlu0 %v4952_v39 }
 0xc8a   : > { %v4805_v47 = vpop.xlane.xlu2 %4804 }
 0xc8b   : > { %v4815_v10 = vmul.f32 0.5, %v4805_v47  ;;  %v4999_v58 = vpop.f32.mrf.mxu1 }
 0xc8d   : > { %v4876_v59 = vsub.f32 %v4865_v36, %v4815_v10 }
 0xc8f   : > { %v4890_v5 = vmul.f32 1.442695, %v4876_v59 }
 0xc91   : > { %6205 = vpow2.f32 %v4890_v5 }
 0xc92   : > { %6207 = vrcp.f32 %v5051_v56 }
 0xc93   : > { %v5001_v17 = vpop.f32.mrf.mxu1 }
 0xc94   : > { %v5008_v6 = vpack.c.bf16 %v5001_v17, %v4999_v58  ;;  %v9784_v17 = vld [vmem:[%s10004_s23 + $0x8] sm:$0xff] }
 0xc96   : > { %5028 = vmatpush.bf16.msra.mxu1 %v5008_v6  ;;  %v5143_v6 = vperm.slane %v9784_v17, 5 }
 0xc97   : > { %v6206_v4 = vpop.eup %6205 }
 0xc98   : > { %v4900_v50 = vmul.f32 0.25, %v6206_v4  ;;  %v6208_v3 = vpop.eup %6207 }
 0xc99   : > { %5921 = vmatmul.msk.bf16.vlgmr.msra.gmra.mxu1 %vm821_vm0, %v5004_v45  ;;  %v4933_v45 = vpop.xlane.xlu2 %4932 }
 0xc9a   : > { %v4929_v16 = vmul.f32 %v9736_v8, %v4900_v50  ;;  %v5007_v63 = vpack.c.bf16 %v4901_v2, %v4900_v50  ;;  %v6000_v8 = vld [vmem:[%s10001_s20] sm:$0xff]  ;;  %v5050_v18 = vadd.f32 1e-08, %v4933_v45 }
 0xc9b   : > { %5113 = vmatpush.bf16.msrb.mxu2 %v6000_v8 }
 0xc9c   : > { %v4949_v27 = vsel %vm821_vm0, %v4929_v16, 0.0  ;;  %6209 = vrcp.f32 %v5050_v18 }
 0xc9d   : > { %4950 = vadd.xlane.f32.xlu2 %v4949_v27 }
 0xca2   : > { %v6210_v43 = vpop.eup %6209 }
 0xca9   : > { %5922 = vmatmul.msk.bf16.gmra.mxu1 %vm821_vm0, %v5005_v40 }
 0xcb9   : > { %5923 = vmatmul.msk.bf16.gmra.mxu1 %vm821_vm0, %v5006_v1 }
 0xcc6   : > { %v4939_v44 = vpop.xlane.xlu2 %4938 }
 0xcc7   : > { %v5052_v53 = vadd.f32 1e-08, %v4939_v44 }
 0xcc9   : > { %5924 = vmatmul.msk.bf16.gmra.mxu1 %vm821_vm0, %v5007_v63  ;;  %6211 = vrcp.f32 %v5052_v53 }
 0xcce   : > { %v4945_v36 = vpop.xlane.xlu2 %4944 }
 0xccf   : > { %v6212_v23 = vpop.eup %6211  ;;  %v5054_v21 = vadd.f32 1e-08, %v4945_v36 }
 0xcea   : > { %v4942_v33 = vpop.xlane.xlu0 %4941 }
 0xceb   : > { %v5053_v26 = vadd.f32 1e-08, %v4942_v33 }
 0xced   : > { %6213 = vrcp.f32 %v5053_v26 }
 0xcee   : > { %6215 = vrcp.f32 %v5054_v21 }
 0xcf2   : > { %v4948_v14 = vpop.xlane.xlu0 %4947 }
 0xcf3   : > { %v6214_v24 = vpop.eup %6213  ;;  %v5055_v11 = vadd.f32 1e-08, %v4948_v14 }
 0xcf4   : > { %v6216_v0 = vpop.eup %6215 }
 0xcf5   : > { %6217 = vrcp.f32 %v5055_v11 }
 0xcfa   : > { %v4954_v62 = vpop.xlane.xlu0 %4953 }
 0xcfb   : > { %v6218_v34 = vpop.eup %6217  ;;  %v5057_v46 = vadd.f32 1e-08, %v4954_v62 }
 0xcfd   : > { %6219 = vrcp.f32 %v5057_v46 }
 0xd03   : > { %v6220_v39 = vpop.eup %6219 }
 0xd10   : > { %v4951_v32 = vpop.xlane.xlu2 %4950 }
 0xd11   : > { %v5056_v2 = vadd.f32 1e-08, %v4951_v32 }
 0xd13   : > { %6221 = vrcp.f32 %v5056_v2 }
 0xd16   : > { %v5030_v31 = vpop.f32.mrf.mxu1 }
 0xd17   : > { %v5066_v41 = vmul.f32 %v6210_v43, %v5030_v31 }
 0xd19   : > { %v6222_v47 = vpop.eup %6221 }
 0xd1e   : > { %v5032_v55 = vpop.f32.mrf.mxu1 }
 0xd1f   : > { %v5067_v25 = vmul.f32 %v6208_v3, %v5032_v55 }
 0xd21   : > { %v5078_v28 = vpack.c.bf16 %v5067_v25, %v5066_v41 }
 0xd23   : > { %5933 = vmatmul.msk.bf16.vlgmr.msrb.gmra.mxu2 %vm3091_vm1, %v5078_v28 }
 0xd26   : > { %v5035_v35 = vpop.f32.mrf.mxu1 }
 0xd27   : > { %v5068_v54 = vmul.f32 %v6212_v23, %v5035_v35 }
 0xd2e   : > { %v5037_v37 = vpop.f32.mrf.mxu1 }
 0xd2f   : > { %v5069_v52 = vmul.f32 %v6214_v24, %v5037_v37 }
 0xd31   : > { %v5079_v57 = vpack.c.bf16 %v5069_v52, %v5068_v54 }
 0xd33   : > { %5934 = vmatmul.msk.bf16.gmra.mxu2 %vm3091_vm1, %v5079_v57 }
 0xd36   : > { %v5040_v42 = vpop.f32.mrf.mxu1 }
 0xd37   : > { %v5070_v60 = vmul.f32 %v6216_v0, %v5040_v42 }
 0xd3e   : > { %v5042_v15 = vpop.f32.mrf.mxu1 }
 0xd3f   : > { %v5071_v51 = vmul.f32 %v6218_v34, %v5042_v15 }
 0xd41   : > { %v5080_v48 = vpack.c.bf16 %v5071_v51, %v5070_v60 }
 0xd43   : > { %5935 = vmatmul.msk.bf16.gmra.mxu2 %vm3091_vm1, %v5080_v48 }
 0xd46   : > { %v5045_v12 = vpop.f32.mrf.mxu1 }
 0xd47   : > { %v5072_v58 = vmul.f32 %v6222_v47, %v5045_v12 }
 0xd4e   : > { %v5047_v10 = vpop.f32.mrf.mxu1 }
 0xd4f   : > { %v5073_v59 = vmul.f32 %v6220_v39, %v5047_v10 }
 0xd51   : > { %v5081_v5 = vpack.c.bf16 %v5073_v59, %v5072_v58 }
 0xd53   : > { %5936 = vmatmul.msk.bf16.gmra.mxu2 %vm3091_vm1, %v5081_v5 }
 0xda6   : > { %v5115_v4 = vpop.f32.mrf.mxu2 }
 0xda7   : > { %v5135_v50 = vadd.f32 %v5115_v4, %v9512_v49 }
 0xda9   : > { %v9788_v16 = vadd.f32 %v5143_v6, %v5135_v50 }
 0xdab   : > { %v5152_v27 = vsel %vm3091_vm1, %v9788_v16, 0.0 }
 0xdac   : > { %5153 = vadd.xlane.f32.xlu2 %v5152_v27 }
 0xdae   : > { %v5117_v40 = vpop.f32.mrf.mxu2 }
 0xdaf   : > { %v5136_v1 = vadd.f32 %v5117_v40, %v9516_v30 }
 0xdb1   : > { %v9793_v63 = vadd.f32 %v5143_v6, %v5136_v1 }
 0xdb3   : > { %v5155_v13 = vsel %vm3091_vm1, %v9793_v63, 0.0 }
 0xdb4   : > { %5156 = vadd.xlane.f32.xlu0 %v5155_v13  ;;  %v6003_v13 = vld [vmem:[%s10002_s21 + $0x8] sm:$0xff] }
 0xdb5   : > { %5385 = vmatpush.bf16.msra.mxu3 %v6003_v13 }
 0xdb6   : > { %v5120_v8 = vpop.f32.mrf.mxu2 }
 0xdb7   : > { %v5137_v29 = vadd.f32 %v5120_v8, %v9520_v19 }
 0xdb9   : > { %v9798_v45 = vadd.f32 %v5143_v6, %v5137_v29 }
 0xdbb   : > { %v5158_v49 = vsel %vm3091_vm1, %v9798_v45, 0.0 }
 0xdbc   : > { %5159 = vadd.xlane.f32.xlu2 %v5158_v49 }
 0xdbe   : > { %v5122_v56 = vpop.f32.mrf.mxu2 }
 0xdbf   : > { %v5138_v18 = vadd.f32 %v5122_v56, %v9524_v9  ;;  %v6002_v56 = vld [vmem:[%s10002_s21] sm:$0xff] }
 0xdc0   : > { %5386 = vmatpush.bf16.msra.mxu3 %v6002_v56 }
 0xdc1   : > { %v9803_v31 = vadd.f32 %v5143_v6, %v5138_v18 }
 0xdc3   : > { %v5161_v30 = vsel %vm3091_vm1, %v9803_v31, 0.0 }
 0xdc4   : > { %5162 = vadd.xlane.f32.xlu0 %v5161_v30 }
 0xdc6   : > { %v5125_v3 = vpop.f32.mrf.mxu2 }
 0xdc7   : > { %v5139_v43 = vadd.f32 %v5125_v3, %v9528_v22 }
 0xdc9   : > { %v9808_v55 = vadd.f32 %v5143_v6, %v5139_v43 }
 0xdcb   : > { %v5164_v19 = vsel %vm3091_vm1, %v9808_v55, 0.0 }
 0xdcc   : > { %5165 = vadd.xlane.f32.xlu1 %v5164_v19 }
 0xdce   : > { %v5127_v41 = vpop.f32.mrf.mxu2 }
 0xdcf   : > { %v5140_v25 = vadd.f32 %v5127_v41, %v9532_v61 }
 0xdd1   : > { %v9813_v44 = vadd.f32 %v5143_v6, %v5140_v25 }
 0xdd3   : > { %v5167_v9 = vsel %vm3091_vm1, %v9813_v44, 0.0 }
 0xdd4   : > { %5168 = vadd.xlane.f32.xlu2 %v5167_v9 }
 0xdd6   : > { %v5130_v33 = vpop.f32.mrf.mxu2 }
 0xdd7   : > { %v5141_v28 = vadd.f32 %v5130_v33, %v9536_v38 }
 0xdd9   : > { %v9818_v53 = vadd.f32 %v5143_v6, %v5141_v28 }
 0xddb   : > { %v5170_v22 = vsel %vm3091_vm1, %v9818_v53, 0.0 }
 0xddc   : > { %5171 = vadd.xlane.f32.xlu2 %v5170_v22 }
 0xdde   : > { %v5132_v23 = vpop.f32.mrf.mxu2 }
 0xddf   : > { %v5142_v37 = vadd.f32 %v5132_v23, %v9550_v20 }
 0xde1   : > { %v9831_v36 = vadd.f32 %v5143_v6, %v5142_v37 }
 0xde3   : > { %v5173_v11 = vsel %vm3091_vm1, %v9831_v36, 0.0 }
 0xe1f   : > { %v5154_v26 = vpop.xlane.xlu2 %5153 }
 0xe20   : > { %v5176_v35 = vmul.f32 %v5154_v26, %v9540_v7 }
 0xe22   : > { %v9824_v61 = vsub.f32 %v9788_v16, %v5176_v35 }
 0xe24   : > { %v5192_v24 = vmul.f32 %v9824_v61, %v9824_v61 }
 0xe26   : > { %v5200_v38 = vsel %vm3091_vm1, %v5192_v24, 0.0 }
 0xe27   : > { %v5157_v54 = vpop.xlane.xlu0 %5156  ;;  %5201 = vadd.xlane.f32.xlu0 %v5200_v38 }
 0xe28   : > { %v5177_v52 = vmul.f32 %v5157_v54, %v9540_v7 }
 0xe2a   : > { %v9834_v14 = vsub.f32 %v9793_v63, %v5177_v52 }
 0xe2c   : > { %v5193_v57 = vmul.f32 %v9834_v14, %v9834_v14 }
 0xe2e   : > { %v5203_v21 = vsel %vm3091_vm1, %v5193_v57, 0.0 }
 0xe2f   : > { %5204 = vadd.xlane.f32.xlu1 %v5203_v21  ;;  %5174 = vadd.xlane.f32.xlu0 %v5173_v11  ;;  %v5160_v20 = vpop.xlane.xlu2 %5159 }
 0xe30   : > { %v5178_v42 = vmul.f32 %v5160_v20, %v9540_v7 }
 0xe32   : > { %v9843_v0 = vsub.f32 %v9798_v45, %v5178_v42 }
 0xe34   : > { %v5194_v34 = vmul.f32 %v9843_v0, %v9843_v0 }
 0xe36   : > { %v5206_v15 = vsel %vm3091_vm1, %v5194_v34, 0.0 }
 0xe37   : > { %v5163_v60 = vpop.xlane.xlu0 %5162  ;;  %5207 = vadd.xlane.f32.xlu1 %v5206_v15 }
 0xe38   : > { %v5179_v51 = vmul.f32 %v5163_v60, %v9540_v7  ;;  %v9894_v60 = vperm.slane %v9784_v17, 6 }
 0xe3a   : > { %v9850_v62 = vsub.f32 %v9803_v31, %v5179_v51 }
 0xe3c   : > { %v5195_v32 = vmul.f32 %v9850_v62, %v9850_v62 }
 0xe3e   : > { %v5209_v48 = vsel %vm3091_vm1, %v5195_v32, 0.0 }
 0xe3f   : > { %v5166_v46 = vpop.xlane.xlu1 %5165  ;;  %5210 = vadd.xlane.f32.xlu2 %v5209_v48 }
 0xe40   : > { %v5180_v2 = vmul.f32 %v5166_v46, %v9540_v7 }
 0xe42   : > { %v9857_v12 = vsub.f32 %v9808_v55, %v5180_v2 }
 0xe44   : > { %v5196_v39 = vmul.f32 %v9857_v12, %v9857_v12 }
 0xe46   : > { %v5212_v47 = vsel %vm3091_vm1, %v5196_v39, 0.0 }
 0xe47   : > { %5213 = vadd.xlane.f32.xlu0 %v5212_v47  ;;  %v5169_v10 = vpop.xlane.xlu2 %5168  ;;  %v9898_v47 = vperm.slane %v9784_v17, 7 }
 0xe48   : > { %v5181_v58 = vmul.f32 %v5169_v10, %v9540_v7 }
 0xe4a   : > { %v9864_v59 = vsub.f32 %v9813_v44, %v5181_v58 }
 0xe4c   : > { %v5197_v5 = vmul.f32 %v9864_v59, %v9864_v59 }
 0xe4e   : > { %v5215_v6 = vsel %vm3091_vm1, %v5197_v5, 0.0 }
 0xe4f   : > { %5216 = vadd.xlane.f32.xlu1 %v5215_v6  ;;  %v5172_v4 = vpop.xlane.xlu2 %5171 }
 0xe50   : > { %v5182_v50 = vmul.f32 %v5172_v4, %v9540_v7 }
 0xe52   : > { %v9871_v27 = vsub.f32 %v9818_v53, %v5182_v50 }
 0xe54   : > { %v5198_v40 = vmul.f32 %v9871_v27, %v9871_v27 }
 0xe56   : > { %v5218_v1 = vsel %vm3091_vm1, %v5198_v40, 0.0 }
 0xe57   : > { %5219 = vadd.xlane.f32.xlu2 %v5218_v1 }
 0xe9a   : > { %v5202_v8 = vpop.xlane.xlu0 %5201 }
 0xe9b   : > { %v5224_v29 = vmul.f32 %v5202_v8, %v9540_v7 }
 0xe9d   : > { %v5232_v49 = vadd.f32 1e-05, %v5224_v29 }
 0xe9f   : > { %6223 = vrsqrt.f32 %v5232_v49  ;;  %vm5246_vm3 = vweird.f32 %v5232_v49 }
 0xea2   : > { %v5205_v18 = vpop.xlane.xlu1 %5204  ;;  %v5175_v30 = vpop.xlane.xlu0 %5174 }
 0xea3   : > { %v5225_v3 = vmul.f32 %v5205_v18, %v9540_v7  ;;  %v5183_v43 = vmul.f32 %v5175_v30, %v9540_v7 }
 0xea5   : > { %v6224_v19 = vpop.eup %6223  ;;  %v5233_v41 = vadd.f32 1e-05, %v5225_v3  ;;  %v9886_v25 = vsub.f32 %v9831_v36, %v5183_v43 }
 0xea6   : > { %v5241_v9 = vmul.f32 %v6224_v19, %v5232_v49  ;;  %vm5247_vm0 = vweird.f32 %v6224_v19 }
 0xea7   : > { %6225 = vrsqrt.f32 %v5233_v41  ;;  %v5199_v33 = vmul.f32 %v9886_v25, %v9886_v25  ;;  %vm5248_vm15 = vmor %vm5246_vm3, %vm5247_vm0  ;;  %vm5256_vm4 = vweird.f32 %v5233_v41 }
 0xea8   : > { %v5242_v28 = vmul.f32 %v6224_v19, %v5241_v9 }
 0xea9   : > { %v5221_v22 = vsel %vm3091_vm1, %v5199_v33, 0.0 }
 0xeaa   : > { %v5243_v26 = vmul.f32 0.5, %v5242_v28  ;;  %5222 = vadd.xlane.f32.xlu0 %v5221_v22  ;;  %v5208_v35 = vpop.xlane.xlu1 %5207 }
 0xeab   : > { %v5226_v23 = vmul.f32 %v5208_v35, %v9540_v7 }
 0xeac   : > { %v5244_v24 = vsub.f32 1.5, %v5243_v26 }
 0xead   : > { %v6226_v37 = vpop.eup %6225  ;;  %v5234_v38 = vadd.f32 1e-05, %v5226_v23 }
 0xeae   : > { %v5245_v54 = vmul.f32 %v6224_v19, %v5244_v24  ;;  %v5251_v52 = vmul.f32 %v6226_v37, %v5233_v41  ;;  %vm5257_vm2 = vweird.f32 %v6226_v37 }
 0xeaf   : > { %6227 = vrsqrt.f32 %v5234_v38  ;;  %vm5258_vm5 = vmor %vm5256_vm4, %vm5257_vm2  ;;  %vm5266_vm7 = vweird.f32 %v5234_v38 }
 0xeb0   : > { %v5252_v57 = vmul.f32 %v6226_v37, %v5251_v52  ;;  %v5249_v21 = vsel %vm5248_vm15, %v6224_v19, %v5245_v54 }
 0xeb1   : > { %v5320_v51 = vmul.f32 %v5249_v21, %v9824_v61 }
 0xeb2   : > { %v5253_v11 = vmul.f32 0.5, %v5252_v57  ;;  %v5211_v20 = vpop.xlane.xlu2 %5210 }
 0xeb3   : > { %v5227_v42 = vmul.f32 %v5211_v20, %v9540_v7  ;;  %v5329_v10 = vmul.f32 %v9894_v60, %v5320_v51 }
 0xeb4   : > { %v5254_v34 = vsub.f32 1.5, %v5253_v11 }
 0xeb5   : > { %v6228_v15 = vpop.eup %6227  ;;  %v5235_v32 = vadd.f32 1e-05, %v5227_v42  ;;  %v5338_v1 = vadd.f32 %v9898_v47, %v5329_v10 }
 0xeb6   : > { %v5255_v48 = vmul.f32 %v6226_v37, %v5254_v34  ;;  %v5261_v46 = vmul.f32 %v6228_v15, %v5234_v38  ;;  %vm5267_vm6 = vweird.f32 %v6228_v15 }
 0xeb7   : > { %6229 = vrsqrt.f32 %v5235_v32  ;;  %vm5268_vm8 = vmor %vm5266_vm7, %vm5267_vm6  ;;  %vm5276_vm10 = vweird.f32 %v5235_v32 }
 0xeb8   : > { %v5259_v2 = vsel %vm5258_vm5, %v6226_v37, %v5255_v48  ;;  %v5262_v39 = vmul.f32 %v6228_v15, %v5261_v46 }
 0xeb9   : > { %v5321_v58 = vmul.f32 %v5259_v2, %v9834_v14 }
 0xeba   : > { %v5263_v5 = vmul.f32 0.5, %v5262_v39  ;;  %v5214_v6 = vpop.xlane.xlu0 %5213 }
 0xebb   : > { %v5330_v4 = vmul.f32 %v9894_v60, %v5321_v58  ;;  %v5228_v61 = vmul.f32 %v5214_v6, %v9540_v7 }
 0xebc   : > { %v5264_v50 = vsub.f32 1.5, %v5263_v5 }
 0xebd   : > { %v6230_v40 = vpop.eup %6229  ;;  %v5339_v13 = vadd.f32 %v9898_v47, %v5330_v4  ;;  %v5236_v8 = vadd.f32 1e-05, %v5228_v61 }
 0xebe   : > { %v5265_v29 = vmul.f32 %v6228_v15, %v5264_v50  ;;  %v5271_v17 = vmul.f32 %v6230_v40, %v5235_v32  ;;  %vm5277_vm9 = vweird.f32 %v6230_v40 }
 0xebf   : > { %v5350_v49 = vpack.c.bf16 %v5339_v13, %v5338_v1  ;;  %6231 = vrsqrt.f32 %v5236_v8  ;;  %vm5278_vm11 = vmor %vm5276_vm10, %vm5277_vm9  ;;  %vm5286_vm13 = vweird.f32 %v5236_v8 }
 0xec0   : > { %v5272_v14 = vmul.f32 %v6230_v40, %v5271_v17  ;;  %v5269_v56 = vsel %vm5268_vm8, %v6228_v15, %v5265_v29 }
 0xec1   : > { %5945 = vmatmul.msk.bf16.vlgmr.msra.gmra.mxu3 %vm3091_vm1, %v5350_v49  ;;  %v5322_v41 = vmul.f32 %v5269_v56, %v9843_v0 }
 0xec2   : > { %v5273_v18 = vmul.f32 0.5, %v5272_v14  ;;  %v5217_v30 = vpop.xlane.xlu1 %5216 }
 0xec3   : > { %v5229_v3 = vmul.f32 %v5217_v30, %v9540_v7  ;;  %v5331_v23 = vmul.f32 %v9894_v60, %v5322_v41 }
 0xec4   : > { %v5274_v43 = vsub.f32 1.5, %v5273_v18 }
 0xec5   : > { %v6232_v19 = vpop.eup %6231  ;;  %v5237_v9 = vadd.f32 1e-05, %v5229_v3  ;;  %v5340_v52 = vadd.f32 %v9898_v47, %v5331_v23 }
 0xec6   : > { %v5275_v33 = vmul.f32 %v6230_v40, %v5274_v43  ;;  %v5281_v28 = vmul.f32 %v6232_v19, %v5236_v8  ;;  %vm5287_vm12 = vweird.f32 %v6232_v19 }
 0xec7   : > { %6233 = vrsqrt.f32 %v5237_v9  ;;  %vm5288_vm14 = vmor %vm5286_vm13, %vm5287_vm12  ;;  %vm5296_vm3 = vweird.f32 %v5237_v9 }
 0xec8   : > { %v5279_v22 = vsel %vm5278_vm11, %v6230_v40, %v5275_v33  ;;  %v5282_v26 = vmul.f32 %v6232_v19, %v5281_v28 }
 0xec9   : > { %v5323_v35 = vmul.f32 %v5279_v22, %v9850_v62 }
 0xeca   : > { %v5283_v24 = vmul.f32 0.5, %v5282_v26  ;;  %v5220_v5 = vpop.xlane.xlu2 %5219 }
 0xecb   : > { %v5332_v37 = vmul.f32 %v9894_v60, %v5323_v35 }
 0xecc   : > { %v5284_v38 = vsub.f32 1.5, %v5283_v24 }
 0xecd   : > { %v6234_v54 = vpop.eup %6233  ;;  %v5341_v0 = vadd.f32 %v9898_v47, %v5332_v37 }
 0xece   : > { %v5285_v57 = vmul.f32 %v6232_v19, %v5284_v38  ;;  %v5291_v21 = vmul.f32 %v6234_v54, %v5237_v9  ;;  %vm5297_vm0 = vweird.f32 %v6234_v54 }
 0xecf   : > { %v5351_v11 = vpack.c.bf16 %v5341_v0, %v5340_v52  ;;  %vm5298_vm15 = vmor %vm5296_vm3, %vm5297_vm0 }
 0xed0   : > { %v5292_v20 = vmul.f32 %v6234_v54, %v5291_v21  ;;  %v5289_v62 = vsel %vm5288_vm14, %v6232_v19, %v5285_v57 }
 0xed1   : > { %5946 = vmatmul.msk.bf16.gmra.mxu3 %vm3091_vm1, %v5351_v11  ;;  %v5324_v15 = vmul.f32 %v5289_v62, %v9857_v12  ;;  %v5230_v12 = vmul.f32 %v5220_v5, %v9540_v7 }
 0xed2   : > { %v5293_v42 = vmul.f32 0.5, %v5292_v20 }
 0xed3   : > { %v5333_v46 = vmul.f32 %v9894_v60, %v5324_v15  ;;  %v5238_v6 = vadd.f32 1e-05, %v5230_v12 }
 0xed4   : > { %v5294_v34 = vsub.f32 1.5, %v5293_v42 }
 0xed5   : > { %v5342_v39 = vadd.f32 %v9898_v47, %v5333_v46  ;;  %6235 = vrsqrt.f32 %v5238_v6  ;;  %vm5306_vm4 = vweird.f32 %v5238_v6 }
 0xed6   : > { %v5295_v51 = vmul.f32 %v6234_v54, %v5294_v34 }
 0xed8   : > { %v5299_v32 = vsel %vm5298_vm15, %v6234_v54, %v5295_v51 }
 0xed9   : > { %v5325_v48 = vmul.f32 %v5299_v32, %v9864_v59 }
 0xedb   : > { %v5334_v2 = vmul.f32 %v9894_v60, %v5325_v48  ;;  %v6236_v4 = vpop.eup %6235 }
 0xedc   : > { %v5301_v61 = vmul.f32 %v6236_v4, %v5238_v6  ;;  %vm5307_vm2 = vweird.f32 %v6236_v4 }
 0xedd   : > { %v5343_v10 = vadd.f32 %v9898_v47, %v5334_v2  ;;  %vm5308_vm5 = vmor %vm5306_vm4, %vm5307_vm2 }
 0xede   : > { %v5302_v50 = vmul.f32 %v6236_v4, %v5301_v61 }
 0xedf   : > { %v5352_v58 = vpack.c.bf16 %v5343_v10, %v5342_v39 }
 0xee0   : > { %v5303_v13 = vmul.f32 0.5, %v5302_v50 }
 0xee1   : > { %5947 = vmatmul.msk.bf16.gmra.mxu3 %vm3091_vm1, %v5352_v58 }
 0xee2   : > { %v5304_v8 = vsub.f32 1.5, %v5303_v13 }
 0xee4   : > { %v5305_v17 = vmul.f32 %v6236_v4, %v5304_v8 }
 0xee6   : > { %v5309_v56 = vsel %vm5308_vm5, %v6236_v4, %v5305_v17 }
 0xee7   : > { %v5326_v3 = vmul.f32 %v5309_v56, %v9871_v27  ;;  %v9934_v27 = vld [vmem:[%s10004_s23 + $0x10] sm:$0x3] }
 0xee8   : > { %v9940_v26 = vperm.slane %v9934_v27, 0 }
 0xee9   : > { %v5335_v41 = vmul.f32 %v9894_v60, %v5326_v3 }
 0xeeb   : > { %v5344_v33 = vadd.f32 %v9898_v47, %v5335_v41 }
 0xf1d   : > { %v5223_v59 = vpop.xlane.xlu0 %5222 }
 0xf1e   : > { %v5231_v40 = vmul.f32 %v5223_v59, %v9540_v7 }
 0xf20   : > { %v5239_v1 = vadd.f32 1e-05, %v5231_v40 }
 0xf22   : > { %6237 = vrsqrt.f32 %v5239_v1  ;;  %vm5316_vm7 = vweird.f32 %v5239_v1 }
 0xf28   : > { %v6238_v29 = vpop.eup %6237 }
 0xf29   : > { %v5311_v49 = vmul.f32 %v6238_v29, %v5239_v1  ;;  %vm5317_vm6 = vweird.f32 %v6238_v29 }
 0xf2a   : > { %vm5318_vm8 = vmor %vm5316_vm7, %vm5317_vm6 }
 0xf2b   : > { %v5312_v14 = vmul.f32 %v6238_v29, %v5311_v49 }
 0xf2d   : > { %v5313_v18 = vmul.f32 0.5, %v5312_v14 }
 0xf2f   : > { %v5314_v30 = vsub.f32 1.5, %v5313_v18 }
 0xf31   : > { %v5315_v43 = vmul.f32 %v6238_v29, %v5314_v30 }
 0xf33   : > { %v5319_v7 = vsel %vm5318_vm8, %v6238_v29, %v5315_v43 }
 0xf34   : > { %v5327_v19 = vmul.f32 %v5319_v7, %v9886_v25  ;;  %v6005_v25 = vld [vmem:[%s10003_s22 + $0x8] sm:$0xff] }
 0xf35   : > { %5518 = vmatpush.bf16.msrb.mxu0 %v6005_v25 }
 0xf36   : > { %v5336_v9 = vmul.f32 %v9894_v60, %v5327_v19 }
 0xf38   : > { %v5345_v28 = vadd.f32 %v9898_v47, %v5336_v9  ;;  %v6004_v47 = vld [vmem:[%s10003_s22] sm:$0xff] }
 0xf39   : > { %5519 = vmatpush.bf16.msrb.mxu0 %v6004_v47 }
 0xf3a   : > { %v5353_v22 = vpack.c.bf16 %v5345_v28, %v5344_v33 }
 0xf3c   : > { %5948 = vmatmul.msk.bf16.gmra.mxu3 %vm3091_vm1, %v5353_v22 }
 0xf44   : > { %v5388_v60 = vpop.f32.mrf.mxu3 }
 0xf45   : > { %v5389_v35 = vadd.f32 %v5388_v60, %v9940_v26 }
 0xf47   : > { %v5408_v23 = vmul.f32 %v5389_v35, %v5389_v35 }
 0xf49   : > { %v5416_v24 = vmul.f32 %v5408_v23, %v5389_v35 }
 0xf4b   : > { %v5424_v37 = vmul.f32 0.044715, %v5416_v24 }
 0xf4c   : > { %v5390_v38 = vpop.f32.mrf.mxu3 }
 0xf4d   : > { %v5432_v54 = vadd.f32 %v5424_v37, %v5389_v35  ;;  %v5391_v52 = vadd.f32 %v5390_v38, %v9940_v26 }
 0xf4f   : > { %v5440_v0 = vmul.f32 0.7978846, %v5432_v54  ;;  %v5409_v57 = vmul.f32 %v5391_v52, %v5391_v52 }
 0xf51   : > { %v5417_v21 = vmul.f32 %v5409_v57, %v5391_v52  ;;  %6239 = vtanh.f32 %v5440_v0 }
 0xf53   : > { %v5425_v11 = vmul.f32 0.044715, %v5417_v21 }
 0xf54   : > { %v5393_v20 = vpop.f32.mrf.mxu3 }
 0xf55   : > { %v5433_v62 = vadd.f32 %v5425_v11, %v5391_v52  ;;  %v5394_v42 = vadd.f32 %v5393_v20, %v9940_v26 }
 0xf57   : > { %v5441_v34 = vmul.f32 0.7978846, %v5433_v62  ;;  %v5410_v15 = vmul.f32 %v5394_v42, %v5394_v42  ;;  %v6240_v51 = vpop.eup %6239 }
 0xf58   : > { %v5456_v46 = vadd.f32 1.0, %v6240_v51 }
 0xf59   : > { %6241 = vtanh.f32 %v5441_v34  ;;  %v5418_v32 = vmul.f32 %v5410_v15, %v5394_v42 }
 0xf5a   : > { %v5464_v6 = vmul.f32 0.5, %v5456_v46 }
 0xf5b   : > { %v5426_v48 = vmul.f32 0.044715, %v5418_v32 }
 0xf5c   : > { %v5395_v2 = vpop.f32.mrf.mxu3  ;;  %v5472_v40 = vmul.f32 %v5464_v6, %v5389_v35 }
 0xf5d   : > { %v5434_v39 = vadd.f32 %v5426_v48, %v5394_v42  ;;  %v5396_v10 = vadd.f32 %v5395_v2, %v9940_v26 }
 0xf5f   : > { %v6242_v58 = vpop.eup %6241  ;;  %v5442_v5 = vmul.f32 0.7978846, %v5434_v39  ;;  %v5411_v12 = vmul.f32 %v5396_v10, %v5396_v10 }
 0xf60   : > { %v5457_v4 = vadd.f32 1.0, %v6242_v58 }
 0xf61   : > { %v5419_v61 = vmul.f32 %v5411_v12, %v5396_v10  ;;  %6243 = vtanh.f32 %v5442_v5 }
 0xf62   : > { %v5465_v50 = vmul.f32 0.5, %v5457_v4 }
 0xf63   : > { %v5427_v59 = vmul.f32 0.044715, %v5419_v61 }
 0xf64   : > { %v5473_v1 = vmul.f32 %v5465_v50, %v5391_v52  ;;  %v5398_v13 = vpop.f32.mrf.mxu3 }
 0xf65   : > { %v5435_v8 = vadd.f32 %v5427_v59, %v5396_v10  ;;  %v5399_v29 = vadd.f32 %v5398_v13, %v9940_v26 }
 0xf66   : > { %v5484_v17 = vpack.c.bf16 %v5473_v1, %v5472_v40 }
 0xf67   : > { %v5443_v49 = vmul.f32 0.7978846, %v5435_v8  ;;  %v5412_v14 = vmul.f32 %v5399_v29, %v5399_v29  ;;  %v6244_v56 = vpop.eup %6243 }
 0xf68   : > { %5957 = vmatmul.msk.bf16.vlgmr.msrb.gmra.mxu0 %vm3091_vm1, %v5484_v17  ;;  %v5458_v3 = vadd.f32 1.0, %v6244_v56 }
 0xf69   : > { %6245 = vtanh.f32 %v5443_v49  ;;  %v5420_v18 = vmul.f32 %v5412_v14, %v5399_v29 }
 0xf6a   : > { %v5466_v28 = vmul.f32 0.5, %v5458_v3 }
 0xf6b   : > { %v5428_v30 = vmul.f32 0.044715, %v5420_v18 }
 0xf6c   : > { %v5400_v43 = vpop.f32.mrf.mxu3  ;;  %v5474_v35 = vmul.f32 %v5466_v28, %v5394_v42 }
 0xf6d   : > { %v5436_v7 = vadd.f32 %v5428_v30, %v5399_v29  ;;  %v5401_v19 = vadd.f32 %v5400_v43, %v9940_v26 }
 0xf6f   : > { %v6246_v41 = vpop.eup %6245  ;;  %v5444_v9 = vmul.f32 0.7978846, %v5436_v7  ;;  %v5413_v33 = vmul.f32 %v5401_v19, %v5401_v19 }
 0xf70   : > { %v5459_v22 = vadd.f32 1.0, %v6246_v41 }
 0xf71   : > { %v5421_v25 = vmul.f32 %v5413_v33, %v5401_v19  ;;  %6247 = vtanh.f32 %v5444_v9 }
 0xf72   : > { %v5467_v60 = vmul.f32 0.5, %v5459_v22 }
 0xf73   : > { %v5429_v47 = vmul.f32 0.044715, %v5421_v25 }
 0xf74   : > { %v5475_v23 = vmul.f32 %v5467_v60, %v5396_v10 }
 0xf75   : > { %v5437_v24 = vadd.f32 %v5429_v47, %v5401_v19 }
 0xf76   : > { %v5485_v37 = vpack.c.bf16 %v5475_v23, %v5474_v35 }
 0xf77   : > { %v5445_v38 = vmul.f32 0.7978846, %v5437_v24  ;;  %v6248_v54 = vpop.eup %6247 }
 0xf78   : > { %5958 = vmatmul.msk.bf16.gmra.mxu0 %vm3091_vm1, %v5485_v37  ;;  %v5460_v52 = vadd.f32 1.0, %v6248_v54 }
 0xf79   : > { %6249 = vtanh.f32 %v5445_v38 }
 0xf7a   : > { %v5468_v57 = vmul.f32 0.5, %v5460_v52 }
 0xf7c   : > { %v5476_v20 = vmul.f32 %v5468_v57, %v5399_v29 }
 0xf7f   : > { %v6250_v0 = vpop.eup %6249 }
 0xf80   : > { %v5461_v21 = vadd.f32 1.0, %v6250_v0 }
 0xf82   : > { %v5469_v11 = vmul.f32 0.5, %v5461_v21 }
 0xf84   : > { %v5477_v62 = vmul.f32 %v5469_v11, %v5401_v19 }
 0xf86   : > { %v5486_v34 = vpack.c.bf16 %v5477_v62, %v5476_v20 }
 0xf88   : > { %5959 = vmatmul.msk.bf16.gmra.mxu0 %vm3091_vm1, %v5486_v34 }
 0xfbf   : > { %v5403_v15 = vpop.f32.mrf.mxu3 }
 0xfc0   : > { %v5404_v42 = vadd.f32 %v5403_v15, %v9940_v26 }
 0xfc2   : > { %v5414_v51 = vmul.f32 %v5404_v42, %v5404_v42 }
 0xfc4   : > { %v5422_v32 = vmul.f32 %v5414_v51, %v5404_v42 }
 0xfc6   : > { %v5430_v48 = vmul.f32 0.044715, %v5422_v32 }
 0xfc7   : > { %v5405_v46 = vpop.f32.mrf.mxu3 }
 0xfc8   : > { %v5438_v2 = vadd.f32 %v5430_v48, %v5404_v42  ;;  %v5406_v39 = vadd.f32 %v5405_v46, %v9940_v26  ;;  %v5549_v26 = vperm.slane %v9934_v27, 1 }
 0xfca   : > { %v5446_v10 = vmul.f32 0.7978846, %v5438_v2  ;;  %v5415_v58 = vmul.f32 %v5406_v39, %v5406_v39 }
 0xfcc   : > { %v5423_v5 = vmul.f32 %v5415_v58, %v5406_v39  ;;  %6251 = vtanh.f32 %v5446_v10 }
 0xfce   : > { %v5431_v12 = vmul.f32 0.044715, %v5423_v5 }
 0xfd0   : > { %v5439_v6 = vadd.f32 %v5431_v12, %v5406_v39 }
 0xfd2   : > { %v5447_v4 = vmul.f32 0.7978846, %v5439_v6  ;;  %v6252_v61 = vpop.eup %6251 }
 0xfd3   : > { %v5462_v50 = vadd.f32 1.0, %v6252_v61 }
 0xfd4   : > { %6253 = vtanh.f32 %v5447_v4 }
 0xfd5   : > { %v5470_v40 = vmul.f32 0.5, %v5462_v50 }
 0xfd7   : > { %v5478_v8 = vmul.f32 %v5470_v40, %v5404_v42 }
 0xfda   : > { %v6254_v59 = vpop.eup %6253 }
 0xfdb   : > { %v5463_v1 = vadd.f32 1.0, %v6254_v59 }
 0xfdd   : > { %v5471_v13 = vmul.f32 0.5, %v5463_v1 }
 0xfdf   : > { %v5479_v29 = vmul.f32 %v5471_v13, %v5406_v39 }
 0xfe1   : > { %v5487_v17 = vpack.c.bf16 %v5479_v29, %v5478_v8 }
 0xfe3   : > { %5960 = vmatmul.msk.bf16.gmra.mxu0 %vm3091_vm1, %v5487_v17 }
 0xfe5   : > { %v5521_v49 = vpop.f32.mrf.mxu0 }
 0xfe6   : > { %v5541_v14 = vadd.f32 %v5521_v49, %v9788_v16 }
 0xfe8   : > { %v5550_v56 = vadd.f32 %v5549_v26, %v5541_v14 }
 0xfea   : > { %5558 = vst.msk [vmem:[%s783_s8] sm:$0xff] %vm3091_vm1, %v5550_v56 }
 0xfed   : > { %v5523_v18 = vpop.f32.mrf.mxu0 }
 0xfee   : > { %v5542_v30 = vadd.f32 %v5523_v18, %v9793_v63 }
 0xff0   : > { %v5551_v3 = vadd.f32 %v5549_v26, %v5542_v30 }
 0xff2   : > { %5559 = vst.msk [vmem:[%s783_s8 + $0x8] sm:$0xff] %vm3091_vm1, %v5551_v3 }
 0xff5   : > { %v5526_v43 = vpop.f32.mrf.mxu0 }
 0xff6   : > { %v5543_v7 = vadd.f32 %v5526_v43, %v9798_v45 }
 0xff8   : > { %v5552_v27 = vadd.f32 %v5549_v26, %v5543_v7 }
 0xffa   : > { %5560 = vst.msk [vmem:[%s783_s8 + $0x10] sm:$0xff] %vm3091_vm1, %v5552_v27 }
 0xffd   : > { %v5528_v16 = vpop.f32.mrf.mxu0 }
 0xffe   : > { %v5544_v19 = vadd.f32 %v5528_v16, %v9803_v31 }
0x1000   : > { %v5553_v41 = vadd.f32 %v5549_v26, %v5544_v19 }
0x1002   : > { %5561 = vst.msk [vmem:[%s783_s8 + $0x18] sm:$0xff] %vm3091_vm1, %v5553_v41 }
0x1005   : > { %v5531_v9 = vpop.f32.mrf.mxu0 }
0x1006   : > { %v5545_v33 = vadd.f32 %v5531_v9, %v9808_v55 }
0x1008   : > { %v5554_v28 = vadd.f32 %v5549_v26, %v5545_v33 }
0x100a   : > { %5562 = vst.msk [vmem:[%s783_s8 + $0x20] sm:$0xff] %vm3091_vm1, %v5554_v28 }
0x100d   : > { %v5533_v63 = vpop.f32.mrf.mxu0 }
0x100e   : > { %v5546_v22 = vadd.f32 %v5533_v63, %v9813_v44 }
0x1010   : > { %v5555_v25 = vadd.f32 %v5549_v26, %v5546_v22 }
0x1012   : > { %5563 = vst.msk [vmem:[%s783_s8 + $0x28] sm:$0xff] %vm3091_vm1, %v5555_v25 }
0x1060   : > { %v5536_v45 = vpop.f32.mrf.mxu0 }
0x1061   : > { %v5547_v60 = vadd.f32 %v5536_v45, %v9818_v53 }
0x1063   : > { %v5556_v47 = vadd.f32 %v5549_v26, %v5547_v60 }
0x1065   : > { %5564 = vst.msk [vmem:[%s783_s8 + $0x30] sm:$0xff] %vm3091_vm1, %v5556_v47 }
0x1068   : > { %v5538_v31 = vpop.f32.mrf.mxu0 }
0x1069   : > { %v5548_v35 = vadd.f32 %v5538_v31, %v9831_v36 }
0x106b   : > { %v5557_v23 = vadd.f32 %v5549_v26, %v5548_v35 }
0x106d   : > { %5565 = vst.msk [vmem:[%s783_s8 + $0x38] sm:$0xff] %vm3091_vm1, %v5557_v23 }
0x106e PF: > { %s34_s5 = sadd.s32 1, %s6280_s5  }
0x106f   : > { %p31_p4 = scmp.ge.s32.totalorder %s34_s5, 4  }
0x1071   :  { %33 = sbr.rel (!%p31_p4) target bundleno = 13 (0xd), region = 152 }

</bundles_post_ra>
